<compile_context>
chip_gen: v5e
topology: v5e:2x2
jax: 0.10.0
libtpu: 0.0.40
codegen_flags: <defaults>
</compile_context>

<pallas_src>
import functools

import jax
import jax.numpy as jnp
from jax.experimental import pallas as pl
from jax.experimental.pallas import tpu as pltpu

MARGIN = 1.0
ALPHA1 = 1.0
ALPHA2 = 0.5
EPS = 1e-6  # matches F.pairwise_distance / TripletMarginLoss default eps


def _pdist(x1, x2):
    # F.pairwise_distance semantics: (sum_j |x1 - x2 + eps|^p)^(1/p), p=2
    d = jnp.abs(x1 - x2 + EPS)
    return jnp.sqrt(jnp.sum(d * d, axis=1, keepdims=True))  # (rows, 1)


def _mm(x, w_bf16):
    # bf16 x bf16 on the MXU, f32 accumulation.  astype is a no-op when the
    # activations were already cast to bf16 once per tile.
    return jnp.dot(x.astype(jnp.bfloat16), w_bf16,
                   preferred_element_type=jnp.float32)


def _rownorm(y):
    # per-row (x - min) / (max - min); divide via EUP approx reciprocal.
    mn = jnp.min(y, axis=1, keepdims=True)
    mx = jnp.max(y, axis=1, keepdims=True)
    inv = pl.reciprocal(mx - mn, approx=True)
    return (y - mn) * inv


def tmqnet_kernel(
    tb,                                  # static batch-tile size
    # data tile: (4, tb, F) f32 = [anchor; positive; negative; nanom]
    x_ref,
    # self.linear (no bias): (F, L) bf16
    w_lin_ref,
    # global seq-len-1 MHA: v_proj / out_proj (4L, 4L) bf16, biases (1, 4L) f32
    wv_g_ref, bv_g_ref, wo_g_ref, bo_g_ref,
    # local MHA v-projections: branches 0,1 stacked (2, 3L, 3L); branches 2,3
    # (identical input) pre-merged along the output dim (3L, 6L)
    wv_l01_ref, bv_l01_ref, wv_l23_ref, bv_l23_ref,
    # local MHA out-projections, stacked (4, 3L, 3L) / (4, 1, 3L)
    wo_l_ref, bo_l_ref,
    # AttentionNetplus "out" layers (global / local), (4L, L) / (3L, L)
    w_pg_ref, b_pg_ref, w_pl_ref, b_pl_ref,
    # outputs
    attn_ref,                            # (tb, L) f32
    dis_ref,                             # (tb, 1) f32
    part_ref,                            # (1, 8, 128) f32 per-tile loss partials
):
    f_in = x_ref.shape[2]

    # ---- x = self.linear(x): one fused (4*tb, F) @ (F, L) matmul ------------
    x2d = x_ref[...].reshape(4 * tb, f_in)        # layout-preserving (tb % 8 == 0)
    h = _mm(x2d, w_lin_ref[...])                  # (4*tb, L) f32
    L = h.shape[1]
    d_l = 3 * L

    a = h[0 * tb:1 * tb]
    p = h[1 * tb:2 * tb]
    n = h[2 * tb:3 * tb]
    m = h[3 * tb:4 * tb]

    # single bf16 cast for all downstream projection inputs
    hb = h.astype(jnp.bfloat16)
    ab = hb[0 * tb:1 * tb]
    pb = hb[1 * tb:2 * tb]
    nb = hb[2 * tb:3 * tb]
    mb = hb[3 * tb:4 * tb]

    # ---- global branch ------------------------------------------------------
    query = jnp.concatenate([nb, ab, pb, mb], axis=1)                 # (tb, 4L) bf16
    vg = _mm(query, wv_g_ref[...]) + bv_g_ref[...]
    yg = _mm(vg, wo_g_ref[...]) + bo_g_ref[...]
    attn_global = _rownorm(_mm(yg, w_pg_ref[...]) + b_pg_ref[...])    # (tb, L)

    # ---- four local branches --------------------------------------------------
    k_local = jnp.concatenate([nb, mb, ab], axis=1)   # (tb, 3L) bf16
    v_local = jnp.concatenate([nb, mb, pb], axis=1)   # (tb, 3L) bf16
    o_local = jnp.concatenate([ab, pb, nb], axis=1)   # (tb, 3L) bf16 (o2 == o)

    v0 = _mm(k_local, wv_l01_ref[0]) + bv_l01_ref[0]
    v1 = _mm(v_local, wv_l01_ref[1]) + bv_l01_ref[1]
    v23 = _mm(o_local, wv_l23_ref[...]) + bv_l23_ref[...]             # (tb, 6L)
    v2 = v23[:, :d_l]
    v3 = v23[:, d_l:]

    y0 = _mm(v0, wo_l_ref[0]) + bo_l_ref[0]
    y1 = _mm(v1, wo_l_ref[1]) + bo_l_ref[1]
    y2 = _mm(v2, wo_l_ref[2]) + bo_l_ref[2]
    y3 = _mm(v3, wo_l_ref[3]) + bo_l_ref[3]

    # shared attnplus_net_local.out applied once on the stacked (4*tb, 3L) block;
    # per-row min/max normalization is row-independent, so this is exact.
    y_all = jnp.concatenate([y0, y1, y2, y3], axis=0)                 # (4*tb, 3L)
    z_all = _rownorm(_mm(y_all, w_pl_ref[...]) + b_pl_ref[...])       # (4*tb, L)
    attn_local = (z_all[0 * tb:1 * tb] + z_all[1 * tb:2 * tb]
                  + z_all[2 * tb:3 * tb] + z_all[3 * tb:4 * tb])

    attn = _rownorm(attn_global + attn_local)                         # (tb, L)
    attn_ref[...] = attn

    # ---- embeddings, dis, per-tile loss partials -----------------------------
    emb_n = n * attn
    emb_a = a * attn
    emb_p = p * attn
    emb_m = m * attn

    one_minus = 1.0 - attn
    d_n = one_minus * n
    d_a = one_minus * a
    d_p = one_minus * p
    d_m = one_minus * m

    dis1 = _pdist(d_n, d_a)
    dis2 = _pdist(d_p, d_a)
    dis3 = _pdist(d_n, d_m)
    dis = jnp.abs(dis1 - dis2) + jnp.abs(dis1 - dis3) + jnp.abs(dis3 - dis2)
    dis_ref[...] = dis                                                # (tb, 1)

    d_ap = _pdist(emb_a, emb_p)
    d_an = _pdist(emb_a, emb_n)
    d_am = _pdist(emb_a, emb_m)
    d_nm = _pdist(emb_n, emb_m)

    # Per-tile SUMS (means over the whole batch are taken in the wrapper).
    quad_s = jnp.sum(jnp.maximum(MARGIN + d_ap - d_nm, 0.0))   # Quadrupletloss
    tml1_s = jnp.sum(jnp.maximum(d_ap - d_an + MARGIN, 0.0))   # triplet(a, p, n)
    tml2_s = jnp.sum(jnp.maximum(d_ap - d_am + MARGIN, 0.0))   # triplet(a, p, nn)
    dis_s = jnp.sum(dis)

    # Lane-dense (8, 128) partials block: lanes 0..3 hold the four sums.
    lane = jax.lax.broadcasted_iota(jnp.int32, (8, 128), 1)
    part = jnp.where(lane == 0, quad_s,
           jnp.where(lane == 1, tml1_s,
           jnp.where(lane == 2, tml2_s,
           jnp.where(lane == 3, dis_s, 0.0))))
    part_ref[0] = part


def prepare_tmqnet_params(params):
    """One-time parameter prep (call ONCE, reuse across forward calls).

    * transposes PyTorch (out, in) weights to (in, out)
    * casts matmul weights to bfloat16 (biases / sigma stay f32)
    * pre-merges the v-projections of attn_negative / attn_namon (same input)
      along the output dim so the kernel issues a single matmul for them.
    """
    bf16 = jnp.bfloat16
    f32 = jnp.float32
    wv_l_t = jnp.transpose(params["wv_l"], (0, 2, 1)).astype(bf16)   # (4, 3L, 3L)
    bv_l = params["bv_l"].astype(f32)                                # (4, 3L)
    return {
        "w_lin": params["w_lin"].T.astype(bf16),
        "wv_g": params["wv_g"].T.astype(bf16),
        "bv_g": params["bv_g"].reshape(1, -1).astype(f32),
        "wo_g": params["wo_g"].T.astype(bf16),
        "bo_g": params["bo_g"].reshape(1, -1).astype(f32),
        "wv_l01": wv_l_t[:2],                                        # (2, 3L, 3L)
        "bv_l01": bv_l[:2][:, None, :],                              # (2, 1, 3L)
        "wv_l23": jnp.concatenate([wv_l_t[2], wv_l_t[3]], axis=1),   # (3L, 6L)
        "bv_l23": jnp.concatenate([bv_l[2], bv_l[3]], axis=0).reshape(1, -1),
        "wo_l": jnp.transpose(params["wo_l"], (0, 2, 1)).astype(bf16),
        "bo_l": params["bo_l"].astype(f32)[:, None, :],
        "w_pg": params["w_pg"].T.astype(bf16),
        "b_pg": params["b_pg"].reshape(1, -1).astype(f32),
        "w_pl": params["w_pl"].T.astype(bf16),
        "b_pl": params["b_pl"].reshape(1, -1).astype(f32),
        "sigma": params["sigma"].astype(f32),
    }


def _pick_tile(batch):
    for tb in (256, 128, 64, 32, 16, 8):
        if batch % tb == 0:
            return tb
    raise ValueError("batch size must be a multiple of 8")


@functools.partial(jax.jit, static_argnames=("tb",))
def tmqnet_forward(anchor, positive, negative, nanom, prepped, tb=None):
    B, f_in = anchor.shape
    L = prepped["w_lin"].shape[1]
    if tb is None:
        tb = _pick_tile(B)
    assert B % tb == 0 and tb % 8 == 0, "batch / tile must be multiples of 8"
    num_tiles = B // tb

    # stacked data block -> per-tile (4, tb, F) fetch, one fused linear matmul
    x = jnp.stack([anchor, positive, negative, nanom], axis=0)   # (4, B, F)

    weights = [
        prepped["w_lin"],
        prepped["wv_g"], prepped["bv_g"], prepped["wo_g"], prepped["bo_g"],
        prepped["wv_l01"], prepped["bv_l01"],
        prepped["wv_l23"], prepped["bv_l23"],
        prepped["wo_l"], prepped["bo_l"],
        prepped["w_pg"], prepped["b_pg"], prepped["w_pl"], prepped["b_pl"],
    ]

    # Weights: full block, constant index_map -> fetched once, VMEM-resident
    # across all grid steps (the Pallas pipeline skips re-copies of an
    # unchanged block index).
    def _resident(arr):
        nd = arr.ndim
        return pl.BlockSpec(arr.shape, lambda i, _nd=nd: (0,) * _nd)

    in_specs = ([pl.BlockSpec((4, tb, f_in), lambda i: (0, i, 0))]
                + [_resident(w) for w in weights])

    out_shape = (
        jax.ShapeDtypeStruct((B, L), jnp.float32),             # attn
        jax.ShapeDtypeStruct((B, 1), jnp.float32),             # dis
        jax.ShapeDtypeStruct((num_tiles, 8, 128), jnp.float32),  # loss partials
    )
    out_specs = (
        pl.BlockSpec((tb, L), lambda i: (i, 0)),
        pl.BlockSpec((tb, 1), lambda i: (i, 0)),
        pl.BlockSpec((1, 8, 128), lambda i: (i, 0, 0)),
    )

    # ---- VMEM scaling guard + cost estimate ---------------------------------
    weight_bytes = sum(int(w.size) * w.dtype.itemsize for w in weights)
    act_bytes = (4 * B * f_in * 4            # x
                 + B * L * 4 + B * 4         # attn, dis
                 + num_tiles * 8 * 128 * 4)  # partials
    # resident weights (x2 buffer slack) + double-buffered data/output tiles
    vmem_need = (2 * weight_bytes
                 + 2 * (4 * tb * f_in * 4)
                 + 2 * (tb * L * 4 + tb * 4 + 8 * 128 * 4))
    vmem_limit = None
    if vmem_need > (24 << 20):
        # The square (4L,4L)/(3L,3L) weights grow quadratically with n_linear
        # and hit v7x's 64 MiB physical VMEM first.
        # TODO(synk): if this trips on v7x, tile wv_g/wo_g/wo_l over their
        # output dim on an extra 'arbitrary' grid axis instead of raising it.
        vmem_limit = int(min(vmem_need + (8 << 20), 60 << 20))

    flops = 2 * B * (
        4 * f_in * L                    # fused self.linear
        + 2 * (4 * L) * (4 * L)         # global v_proj + out_proj
        + (4 * L) * L                   # attnplus_net.out
        + 2 * (3 * L) * (3 * L)         # local v0, v1
        + (3 * L) * (6 * L)             # merged v2/v3
        + 4 * (3 * L) * (3 * L)         # local out projections
        + 4 * (3 * L) * L               # shared attnplus_net_local.out
    )
    cost = pl.CostEstimate(flops=flops, transcendentals=0,
                           bytes_accessed=int(weight_bytes + act_bytes))

    attn, dis, partials = pl.pallas_call(
        functools.partial(tmqnet_kernel, tb),
        out_shape=out_shape,
        grid=(num_tiles,),
        in_specs=in_specs,
        out_specs=out_specs,
        compiler_params=pltpu.CompilerParams(
            dimension_semantics=("parallel",),
            vmem_limit_bytes=vmem_limit),
        cost_estimate=cost,
    )(x, *weights)

    # ---- tiny scalar epilogue: combine per-tile partial sums (MyLoss) -------
    totals = jnp.sum(partials[:, 0, :], axis=0)       # (128,)
    quad = totals[0] / B
    tml1 = totals[1] / B
    tml2 = totals[2] / B
    dis_mean = totals[3] / B
    s0 = prepped["sigma"][0, 0]
    s1 = prepped["sigma"][1, 0]
    loss_tml = (quad + tml1) / (2.0 * s0 * s0) + tml2 / (2.0 * s1 * s1)
    loss = ALPHA1 * loss_tml + ALPHA2 * dis_mean

    # match PyTorch return shapes: loss (1,), attn (B, n_linear), dis (B,)
    return loss.reshape(1), attn, dis[:, 0]


if __name__ == "__main__":
    B = 16            # multiple of 8; with tb=8 the kernel runs a 2-step grid
    n_feature = 128
    n_linear = 128
    D_g = 4 * n_linear
    D_l = 3 * n_linear

    key = jax.random.PRNGKey(0)
    ks = jax.random.split(key, 24)

    def rnd(k, shape, scale=0.05):
        return scale * jax.random.normal(k, shape, dtype=jnp.float32)

    anchor = rnd(ks[0], (B, n_feature), 1.0)
    positive = rnd(ks[1], (B, n_feature), 1.0)
    negative = rnd(ks[2], (B, n_feature), 1.0)
    nanom = rnd(ks[3], (B, n_feature), 1.0)

    params = {
        # self.linear: Linear(n_feature, n_linear, bias=False)
        "w_lin": rnd(ks[4], (n_linear, n_feature)),
        # attn_net (global, embed_dim = 4*n_linear): v_proj / out_proj
        "wv_g": rnd(ks[5], (D_g, D_g)),
        "bv_g": rnd(ks[6], (D_g,)),
        "wo_g": rnd(ks[7], (D_g, D_g)),
        "bo_g": rnd(ks[8], (D_g,)),
        # attn_net_local / attn_positive / attn_negative / attn_namon (embed_dim = 3*n_linear)
        "wv_l": rnd(ks[9], (4, D_l, D_l)),
        "bv_l": rnd(ks[10], (4, D_l)),
        "wo_l": rnd(ks[11], (4, D_l, D_l)),
        "bo_l": rnd(ks[12], (4, D_l)),
        # attnplus_net.out: Linear(4*n_linear, n_linear)
        "w_pg": rnd(ks[13], (n_linear, D_g)),
        "b_pg": rnd(ks[14], (n_linear,)),
        # attnplus_net_local.out: Linear(3*n_linear, n_linear)
        "w_pl": rnd(ks[15], (n_linear, D_l)),
        "b_pl": rnd(ks[16], (n_linear,)),
        # MyLoss.sigma_weight (deterministic stand-in for xavier_uniform init)
        "sigma": jnp.array([[0.6], [0.9]], dtype=jnp.float32),
    }

    # one-time prep: transpose / bf16-cast / merge — NOT on the per-call path
    prepped = jax.block_until_ready(prepare_tmqnet_params(params))

    loss, attn, dis = jax.block_until_ready(
        tmqnet_forward(anchor, positive, negative, nanom, prepped, tb=8)
    )
    assert loss.shape == (1,) and attn.shape == (B, n_linear) and dis.shape == (B,)
    assert bool(jnp.all(jnp.isfinite(loss)))
    print("KERNEL_OK")
</pallas_src>

<mosaic_0001>
module attributes {stable_mosaic.version = 11 : i64} {
  func.func @tmqnet_kernel(%arg0: i32, %arg1: memref<4x8x128xf32, #tpu.memory_space<vmem>>, %arg2: memref<128x128xbf16, #tpu.memory_space<vmem>>, %arg3: memref<512x512xbf16, #tpu.memory_space<vmem>>, %arg4: memref<1x512xf32, #tpu.memory_space<vmem>>, %arg5: memref<512x512xbf16, #tpu.memory_space<vmem>>, %arg6: memref<1x512xf32, #tpu.memory_space<vmem>>, %arg7: memref<2x384x384xbf16, #tpu.memory_space<vmem>>, %arg8: memref<2x1x384xf32, #tpu.memory_space<vmem>>, %arg9: memref<384x768xbf16, #tpu.memory_space<vmem>>, %arg10: memref<1x768xf32, #tpu.memory_space<vmem>>, %arg11: memref<4x384x384xbf16, #tpu.memory_space<vmem>>, %arg12: memref<4x1x384xf32, #tpu.memory_space<vmem>>, %arg13: memref<512x128xbf16, #tpu.memory_space<vmem>>, %arg14: memref<1x128xf32, #tpu.memory_space<vmem>>, %arg15: memref<384x128xbf16, #tpu.memory_space<vmem>>, %arg16: memref<1x128xf32, #tpu.memory_space<vmem>>, %arg17: memref<8x128xf32, #tpu.memory_space<vmem>>, %arg18: memref<8x1xf32, #tpu.memory_space<vmem>>, %arg19: memref<1x8x128xf32, #tpu.memory_space<vmem>>) attributes {dimension_semantics = [#tpu.dimension_semantics<parallel>], iteration_bounds = array<i64: 2>, scalar_prefetch = 0 : i64, scratch_operands = 0 : i64, tpu.core_type = #tpu.core_type<tc>, window_params = [{transform_indices = @transform_0, window_bounds = array<i64: 4, 8, 128>}, {pipeline_mode = #tpu.pipeline_mode<synchronous>, transform_indices = @transform_1, window_bounds = array<i64: 128, 128>}, {pipeline_mode = #tpu.pipeline_mode<synchronous>, transform_indices = @transform_2, window_bounds = array<i64: 512, 512>}, {pipeline_mode = #tpu.pipeline_mode<synchronous>, transform_indices = @transform_3, window_bounds = array<i64: 1, 512>}, {pipeline_mode = #tpu.pipeline_mode<synchronous>, transform_indices = @transform_4, window_bounds = array<i64: 512, 512>}, {pipeline_mode = #tpu.pipeline_mode<synchronous>, transform_indices = @transform_5, window_bounds = array<i64: 1, 512>}, {pipeline_mode = #tpu.pipeline_mode<synchronous>, transform_indices = @transform_6, window_bounds = array<i64: 2, 384, 384>}, {pipeline_mode = #tpu.pipeline_mode<synchronous>, transform_indices = @transform_7, window_bounds = array<i64: 2, 1, 384>}, {pipeline_mode = #tpu.pipeline_mode<synchronous>, transform_indices = @transform_8, window_bounds = array<i64: 384, 768>}, {pipeline_mode = #tpu.pipeline_mode<synchronous>, transform_indices = @transform_9, window_bounds = array<i64: 1, 768>}, {pipeline_mode = #tpu.pipeline_mode<synchronous>, transform_indices = @transform_10, window_bounds = array<i64: 4, 384, 384>}, {pipeline_mode = #tpu.pipeline_mode<synchronous>, transform_indices = @transform_11, window_bounds = array<i64: 4, 1, 384>}, {pipeline_mode = #tpu.pipeline_mode<synchronous>, transform_indices = @transform_12, window_bounds = array<i64: 512, 128>}, {pipeline_mode = #tpu.pipeline_mode<synchronous>, transform_indices = @transform_13, window_bounds = array<i64: 1, 128>}, {pipeline_mode = #tpu.pipeline_mode<synchronous>, transform_indices = @transform_14, window_bounds = array<i64: 384, 128>}, {pipeline_mode = #tpu.pipeline_mode<synchronous>, transform_indices = @transform_15, window_bounds = array<i64: 1, 128>}, {transform_indices = @transform_16, window_bounds = array<i64: 8, 128>}, {transform_indices = @transform_17, window_bounds = array<i64: 8, 1>}, {transform_indices = @transform_18, window_bounds = array<i64: 1, 8, 128>}]} {
    %c0 = arith.constant 0 : index
    %c0_0 = arith.constant 0 : index
    %c0_1 = arith.constant 0 : index
    %0 = vector.load %arg1[%c0, %c0_0, %c0_1] : memref<4x8x128xf32, #tpu.memory_space<vmem>>, vector<4x8x128xf32>
    %1 = vector.shape_cast %0 : vector<4x8x128xf32> to vector<32x128xf32>
    %c0_2 = arith.constant 0 : index
    %c0_3 = arith.constant 0 : index
    %2 = vector.load %arg2[%c0_2, %c0_3] : memref<128x128xbf16, #tpu.memory_space<vmem>>, vector<128x128xbf16>
    %3 = arith.truncf %1 : vector<32x128xf32> to vector<32x128xbf16>
    %cst = arith.constant dense<0.000000e+00> : vector<32x128xf32>
    %4 = tpu.matmul %3, %2, %cst {dimension_numbers = #tpu.dot_dimension_numbers<[1], [0], [0], [1], [0, 0, 1, 1], [], []>} : vector<32x128xbf16>, vector<128x128xbf16>, vector<32x128xf32> -> vector<32x128xf32>
    %5 = vector.extract_strided_slice %4 {offsets = [0, 0], sizes = [8, 128], strides = [1, 1]} : vector<32x128xf32> to vector<8x128xf32>
    %6 = vector.extract_strided_slice %4 {offsets = [8, 0], sizes = [8, 128], strides = [1, 1]} : vector<32x128xf32> to vector<8x128xf32>
    %7 = vector.extract_strided_slice %4 {offsets = [16, 0], sizes = [8, 128], strides = [1, 1]} : vector<32x128xf32> to vector<8x128xf32>
    %8 = vector.extract_strided_slice %4 {offsets = [24, 0], sizes = [8, 128], strides = [1, 1]} : vector<32x128xf32> to vector<8x128xf32>
    %9 = arith.truncf %4 : vector<32x128xf32> to vector<32x128xbf16>
    %10 = vector.extract_strided_slice %9 {offsets = [0, 0], sizes = [8, 128], strides = [1, 1]} : vector<32x128xbf16> to vector<8x128xbf16>
    %11 = vector.extract_strided_slice %9 {offsets = [8, 0], sizes = [8, 128], strides = [1, 1]} : vector<32x128xbf16> to vector<8x128xbf16>
    %12 = vector.extract_strided_slice %9 {offsets = [16, 0], sizes = [8, 128], strides = [1, 1]} : vector<32x128xbf16> to vector<8x128xbf16>
    %13 = vector.extract_strided_slice %9 {offsets = [24, 0], sizes = [8, 128], strides = [1, 1]} : vector<32x128xbf16> to vector<8x128xbf16>
    %14 = tpu.concatenate %12, %10, %11, %13 in 1 : vector<8x128xbf16>, vector<8x128xbf16>, vector<8x128xbf16>, vector<8x128xbf16> -> vector<8x512xbf16>
    %c0_4 = arith.constant 0 : index
    %c0_5 = arith.constant 0 : index
    %15 = vector.load %arg3[%c0_4, %c0_5] : memref<512x512xbf16, #tpu.memory_space<vmem>>, vector<512x512xbf16>
    %cst_6 = arith.constant dense<0.000000e+00> : vector<8x512xf32>
    %16 = tpu.matmul %14, %15, %cst_6 {dimension_numbers = #tpu.dot_dimension_numbers<[1], [0], [0], [1], [0, 0, 1, 1], [], []>} : vector<8x512xbf16>, vector<512x512xbf16>, vector<8x512xf32> -> vector<8x512xf32>
    %c0_7 = arith.constant 0 : index
    %c0_8 = arith.constant 0 : index
    %17 = vector.load %arg4[%c0_7, %c0_8] : memref<1x512xf32, #tpu.memory_space<vmem>>, vector<1x512xf32>
    %18 = vector.broadcast %17 : vector<1x512xf32> to vector<8x512xf32>
    %19 = arith.addf %16, %18 : vector<8x512xf32>
    %c0_9 = arith.constant 0 : index
    %c0_10 = arith.constant 0 : index
    %20 = vector.load %arg5[%c0_9, %c0_10] : memref<512x512xbf16, #tpu.memory_space<vmem>>, vector<512x512xbf16>
    %21 = arith.truncf %19 : vector<8x512xf32> to vector<8x512xbf16>
    %cst_11 = arith.constant dense<0.000000e+00> : vector<8x512xf32>
    %22 = tpu.matmul %21, %20, %cst_11 {dimension_numbers = #tpu.dot_dimension_numbers<[1], [0], [0], [1], [0, 0, 1, 1], [], []>} : vector<8x512xbf16>, vector<512x512xbf16>, vector<8x512xf32> -> vector<8x512xf32>
    %c0_12 = arith.constant 0 : index
    %c0_13 = arith.constant 0 : index
    %23 = vector.load %arg6[%c0_12, %c0_13] : memref<1x512xf32, #tpu.memory_space<vmem>>, vector<1x512xf32>
    %24 = vector.broadcast %23 : vector<1x512xf32> to vector<8x512xf32>
    %25 = arith.addf %22, %24 : vector<8x512xf32>
    %c0_14 = arith.constant 0 : index
    %c0_15 = arith.constant 0 : index
    %26 = vector.load %arg13[%c0_14, %c0_15] : memref<512x128xbf16, #tpu.memory_space<vmem>>, vector<512x128xbf16>
    %27 = arith.truncf %25 : vector<8x512xf32> to vector<8x512xbf16>
    %cst_16 = arith.constant dense<0.000000e+00> : vector<8x128xf32>
    %28 = tpu.matmul %27, %26, %cst_16 {dimension_numbers = #tpu.dot_dimension_numbers<[1], [0], [0], [1], [0, 0, 1, 1], [], []>} : vector<8x512xbf16>, vector<512x128xbf16>, vector<8x128xf32> -> vector<8x128xf32>
    %c0_17 = arith.constant 0 : index
    %c0_18 = arith.constant 0 : index
    %29 = vector.load %arg14[%c0_17, %c0_18] : memref<1x128xf32, #tpu.memory_space<vmem>>, vector<1x128xf32>
    %30 = vector.broadcast %29 : vector<1x128xf32> to vector<8x128xf32>
    %31 = arith.addf %28, %30 : vector<8x128xf32>
    %cst_19 = arith.constant dense<0x7F800000> : vector<8xf32>
    %32 = vector.multi_reduction <minimumf>, %31, %cst_19 [1] : vector<8x128xf32> to vector<8xf32>
    %33 = vector.shape_cast %32 : vector<8xf32> to vector<8x1xf32>
    %cst_20 = arith.constant dense<0xFF800000> : vector<8xf32>
    %34 = vector.multi_reduction <maximumf>, %31, %cst_20 [1] : vector<8x128xf32> to vector<8xf32>
    %35 = vector.shape_cast %34 : vector<8xf32> to vector<8x1xf32>
    %36 = arith.subf %35, %33 : vector<8x1xf32>
    %37 = tpu.reciprocal %36 {approx = true} : vector<8x1xf32> -> vector<8x1xf32>
    %38 = vector.broadcast %33 : vector<8x1xf32> to vector<8x128xf32>
    %39 = arith.subf %31, %38 : vector<8x128xf32>
    %40 = vector.broadcast %37 : vector<8x1xf32> to vector<8x128xf32>
    %41 = arith.mulf %39, %40 : vector<8x128xf32>
    %42 = tpu.concatenate %12, %13, %10 in 1 : vector<8x128xbf16>, vector<8x128xbf16>, vector<8x128xbf16> -> vector<8x384xbf16>
    %43 = tpu.concatenate %12, %13, %11 in 1 : vector<8x128xbf16>, vector<8x128xbf16>, vector<8x128xbf16> -> vector<8x384xbf16>
    %44 = tpu.concatenate %10, %11, %12 in 1 : vector<8x128xbf16>, vector<8x128xbf16>, vector<8x128xbf16> -> vector<8x384xbf16>
    %c0_21 = arith.constant 0 : index
    %c0_22 = arith.constant 0 : index
    %c0_23 = arith.constant 0 : index
    %45 = vector.load %arg7[%c0_21, %c0_22, %c0_23] : memref<2x384x384xbf16, #tpu.memory_space<vmem>>, vector<1x384x384xbf16>
    %46 = vector.shape_cast %45 : vector<1x384x384xbf16> to vector<384x384xbf16>
    %cst_24 = arith.constant dense<0.000000e+00> : vector<8x384xf32>
    %47 = tpu.matmul %42, %46, %cst_24 {dimension_numbers = #tpu.dot_dimension_numbers<[1], [0], [0], [1], [0, 0, 1, 1], [], []>} : vector<8x384xbf16>, vector<384x384xbf16>, vector<8x384xf32> -> vector<8x384xf32>
    %c0_25 = arith.constant 0 : index
    %c0_26 = arith.constant 0 : index
    %c0_27 = arith.constant 0 : index
    %48 = vector.load %arg8[%c0_25, %c0_26, %c0_27] : memref<2x1x384xf32, #tpu.memory_space<vmem>>, vector<1x1x384xf32>
    %49 = vector.shape_cast %48 : vector<1x1x384xf32> to vector<1x384xf32>
    %50 = vector.broadcast %49 : vector<1x384xf32> to vector<8x384xf32>
    %51 = arith.addf %47, %50 : vector<8x384xf32>
    %c1 = arith.constant 1 : index
    %c0_28 = arith.constant 0 : index
    %c0_29 = arith.constant 0 : index
    %52 = vector.load %arg7[%c1, %c0_28, %c0_29] : memref<2x384x384xbf16, #tpu.memory_space<vmem>>, vector<1x384x384xbf16>
    %53 = vector.shape_cast %52 : vector<1x384x384xbf16> to vector<384x384xbf16>
    %cst_30 = arith.constant dense<0.000000e+00> : vector<8x384xf32>
    %54 = tpu.matmul %43, %53, %cst_30 {dimension_numbers = #tpu.dot_dimension_numbers<[1], [0], [0], [1], [0, 0, 1, 1], [], []>} : vector<8x384xbf16>, vector<384x384xbf16>, vector<8x384xf32> -> vector<8x384xf32>
    %c1_31 = arith.constant 1 : index
    %c0_32 = arith.constant 0 : index
    %c0_33 = arith.constant 0 : index
    %55 = vector.load %arg8[%c1_31, %c0_32, %c0_33] : memref<2x1x384xf32, #tpu.memory_space<vmem>>, vector<1x1x384xf32>
    %56 = vector.shape_cast %55 : vector<1x1x384xf32> to vector<1x384xf32>
    %57 = vector.broadcast %56 : vector<1x384xf32> to vector<8x384xf32>
    %58 = arith.addf %54, %57 : vector<8x384xf32>
    %c0_34 = arith.constant 0 : index
    %c0_35 = arith.constant 0 : index
    %59 = vector.load %arg9[%c0_34, %c0_35] : memref<384x768xbf16, #tpu.memory_space<vmem>>, vector<384x768xbf16>
    %cst_36 = arith.constant dense<0.000000e+00> : vector<8x768xf32>
    %60 = tpu.matmul %44, %59, %cst_36 {dimension_numbers = #tpu.dot_dimension_numbers<[1], [0], [0], [1], [0, 0, 1, 1], [], []>} : vector<8x384xbf16>, vector<384x768xbf16>, vector<8x768xf32> -> vector<8x768xf32>
    %c0_37 = arith.constant 0 : index
    %c0_38 = arith.constant 0 : index
    %61 = vector.load %arg10[%c0_37, %c0_38] : memref<1x768xf32, #tpu.memory_space<vmem>>, vector<1x768xf32>
    %62 = vector.broadcast %61 : vector<1x768xf32> to vector<8x768xf32>
    %63 = arith.addf %60, %62 : vector<8x768xf32>
    %64 = vector.extract_strided_slice %63 {offsets = [0, 0], sizes = [8, 384], strides = [1, 1]} : vector<8x768xf32> to vector<8x384xf32>
    %65 = vector.extract_strided_slice %63 {offsets = [0, 384], sizes = [8, 384], strides = [1, 1]} : vector<8x768xf32> to vector<8x384xf32>
    %c0_39 = arith.constant 0 : index
    %c0_40 = arith.constant 0 : index
    %c0_41 = arith.constant 0 : index
    %66 = vector.load %arg11[%c0_39, %c0_40, %c0_41] : memref<4x384x384xbf16, #tpu.memory_space<vmem>>, vector<1x384x384xbf16>
    %67 = vector.shape_cast %66 : vector<1x384x384xbf16> to vector<384x384xbf16>
    %68 = arith.truncf %51 : vector<8x384xf32> to vector<8x384xbf16>
    %cst_42 = arith.constant dense<0.000000e+00> : vector<8x384xf32>
    %69 = tpu.matmul %68, %67, %cst_42 {dimension_numbers = #tpu.dot_dimension_numbers<[1], [0], [0], [1], [0, 0, 1, 1], [], []>} : vector<8x384xbf16>, vector<384x384xbf16>, vector<8x384xf32> -> vector<8x384xf32>
    %c0_43 = arith.constant 0 : index
    %c0_44 = arith.constant 0 : index
    %c0_45 = arith.constant 0 : index
    %70 = vector.load %arg12[%c0_43, %c0_44, %c0_45] : memref<4x1x384xf32, #tpu.memory_space<vmem>>, vector<1x1x384xf32>
    %71 = vector.shape_cast %70 : vector<1x1x384xf32> to vector<1x384xf32>
    %72 = vector.broadcast %71 : vector<1x384xf32> to vector<8x384xf32>
    %73 = arith.addf %69, %72 : vector<8x384xf32>
    %c1_46 = arith.constant 1 : index
    %c0_47 = arith.constant 0 : index
    %c0_48 = arith.constant 0 : index
    %74 = vector.load %arg11[%c1_46, %c0_47, %c0_48] : memref<4x384x384xbf16, #tpu.memory_space<vmem>>, vector<1x384x384xbf16>
    %75 = vector.shape_cast %74 : vector<1x384x384xbf16> to vector<384x384xbf16>
    %76 = arith.truncf %58 : vector<8x384xf32> to vector<8x384xbf16>
    %cst_49 = arith.constant dense<0.000000e+00> : vector<8x384xf32>
    %77 = tpu.matmul %76, %75, %cst_49 {dimension_numbers = #tpu.dot_dimension_numbers<[1], [0], [0], [1], [0, 0, 1, 1], [], []>} : vector<8x384xbf16>, vector<384x384xbf16>, vector<8x384xf32> -> vector<8x384xf32>
    %c1_50 = arith.constant 1 : index
    %c0_51 = arith.constant 0 : index
    %c0_52 = arith.constant 0 : index
    %78 = vector.load %arg12[%c1_50, %c0_51, %c0_52] : memref<4x1x384xf32, #tpu.memory_space<vmem>>, vector<1x1x384xf32>
    %79 = vector.shape_cast %78 : vector<1x1x384xf32> to vector<1x384xf32>
    %80 = vector.broadcast %79 : vector<1x384xf32> to vector<8x384xf32>
    %81 = arith.addf %77, %80 : vector<8x384xf32>
    %c2 = arith.constant 2 : index
    %c0_53 = arith.constant 0 : index
    %c0_54 = arith.constant 0 : index
    %82 = vector.load %arg11[%c2, %c0_53, %c0_54] : memref<4x384x384xbf16, #tpu.memory_space<vmem>>, vector<1x384x384xbf16>
    %83 = vector.shape_cast %82 : vector<1x384x384xbf16> to vector<384x384xbf16>
    %84 = arith.truncf %64 : vector<8x384xf32> to vector<8x384xbf16>
    %cst_55 = arith.constant dense<0.000000e+00> : vector<8x384xf32>
    %85 = tpu.matmul %84, %83, %cst_55 {dimension_numbers = #tpu.dot_dimension_numbers<[1], [0], [0], [1], [0, 0, 1, 1], [], []>} : vector<8x384xbf16>, vector<384x384xbf16>, vector<8x384xf32> -> vector<8x384xf32>
    %c2_56 = arith.constant 2 : index
    %c0_57 = arith.constant 0 : index
    %c0_58 = arith.constant 0 : index
    %86 = vector.load %arg12[%c2_56, %c0_57, %c0_58] : memref<4x1x384xf32, #tpu.memory_space<vmem>>, vector<1x1x384xf32>
    %87 = vector.shape_cast %86 : vector<1x1x384xf32> to vector<1x384xf32>
    %88 = vector.broadcast %87 : vector<1x384xf32> to vector<8x384xf32>
    %89 = arith.addf %85, %88 : vector<8x384xf32>
    %c3 = arith.constant 3 : index
    %c0_59 = arith.constant 0 : index
    %c0_60 = arith.constant 0 : index
    %90 = vector.load %arg11[%c3, %c0_59, %c0_60] : memref<4x384x384xbf16, #tpu.memory_space<vmem>>, vector<1x384x384xbf16>
    %91 = vector.shape_cast %90 : vector<1x384x384xbf16> to vector<384x384xbf16>
    %92 = arith.truncf %65 : vector<8x384xf32> to vector<8x384xbf16>
    %cst_61 = arith.constant dense<0.000000e+00> : vector<8x384xf32>
    %93 = tpu.matmul %92, %91, %cst_61 {dimension_numbers = #tpu.dot_dimension_numbers<[1], [0], [0], [1], [0, 0, 1, 1], [], []>} : vector<8x384xbf16>, vector<384x384xbf16>, vector<8x384xf32> -> vector<8x384xf32>
    %c3_62 = arith.constant 3 : index
    %c0_63 = arith.constant 0 : index
    %c0_64 = arith.constant 0 : index
    %94 = vector.load %arg12[%c3_62, %c0_63, %c0_64] : memref<4x1x384xf32, #tpu.memory_space<vmem>>, vector<1x1x384xf32>
    %95 = vector.shape_cast %94 : vector<1x1x384xf32> to vector<1x384xf32>
    %96 = vector.broadcast %95 : vector<1x384xf32> to vector<8x384xf32>
    %97 = arith.addf %93, %96 : vector<8x384xf32>
    %98 = tpu.concatenate %73, %81, %89, %97 in 0 : vector<8x384xf32>, vector<8x384xf32>, vector<8x384xf32>, vector<8x384xf32> -> vector<32x384xf32>
    %c0_65 = arith.constant 0 : index
    %c0_66 = arith.constant 0 : index
    %99 = vector.load %arg15[%c0_65, %c0_66] : memref<384x128xbf16, #tpu.memory_space<vmem>>, vector<384x128xbf16>
    %100 = arith.truncf %98 : vector<32x384xf32> to vector<32x384xbf16>
    %cst_67 = arith.constant dense<0.000000e+00> : vector<32x128xf32>
    %101 = tpu.matmul %100, %99, %cst_67 {dimension_numbers = #tpu.dot_dimension_numbers<[1], [0], [0], [1], [0, 0, 1, 1], [], []>} : vector<32x384xbf16>, vector<384x128xbf16>, vector<32x128xf32> -> vector<32x128xf32>
    %c0_68 = arith.constant 0 : index
    %c0_69 = arith.constant 0 : index
    %102 = vector.load %arg16[%c0_68, %c0_69] : memref<1x128xf32, #tpu.memory_space<vmem>>, vector<1x128xf32>
    %103 = vector.broadcast %102 : vector<1x128xf32> to vector<32x128xf32>
    %104 = arith.addf %101, %103 : vector<32x128xf32>
    %cst_70 = arith.constant dense<0x7F800000> : vector<32xf32>
    %105 = vector.multi_reduction <minimumf>, %104, %cst_70 [1] : vector<32x128xf32> to vector<32xf32>
    %106 = vector.shape_cast %105 : vector<32xf32> to vector<32x1xf32>
    %cst_71 = arith.constant dense<0xFF800000> : vector<32xf32>
    %107 = vector.multi_reduction <maximumf>, %104, %cst_71 [1] : vector<32x128xf32> to vector<32xf32>
    %108 = vector.shape_cast %107 : vector<32xf32> to vector<32x1xf32>
    %109 = arith.subf %108, %106 : vector<32x1xf32>
    %110 = tpu.reciprocal %109 {approx = true} : vector<32x1xf32> -> vector<32x1xf32>
    %111 = vector.broadcast %106 : vector<32x1xf32> to vector<32x128xf32>
    %112 = arith.subf %104, %111 : vector<32x128xf32>
    %113 = vector.broadcast %110 : vector<32x1xf32> to vector<32x128xf32>
    %114 = arith.mulf %112, %113 : vector<32x128xf32>
    %115 = vector.extract_strided_slice %114 {offsets = [0, 0], sizes = [8, 128], strides = [1, 1]} : vector<32x128xf32> to vector<8x128xf32>
    %116 = vector.extract_strided_slice %114 {offsets = [8, 0], sizes = [8, 128], strides = [1, 1]} : vector<32x128xf32> to vector<8x128xf32>
    %117 = arith.addf %115, %116 : vector<8x128xf32>
    %118 = vector.extract_strided_slice %114 {offsets = [16, 0], sizes = [8, 128], strides = [1, 1]} : vector<32x128xf32> to vector<8x128xf32>
    %119 = arith.addf %117, %118 : vector<8x128xf32>
    %120 = vector.extract_strided_slice %114 {offsets = [24, 0], sizes = [8, 128], strides = [1, 1]} : vector<32x128xf32> to vector<8x128xf32>
    %121 = arith.addf %119, %120 : vector<8x128xf32>
    %122 = arith.addf %41, %121 : vector<8x128xf32>
    %cst_72 = arith.constant dense<0x7F800000> : vector<8xf32>
    %123 = vector.multi_reduction <minimumf>, %122, %cst_72 [1] : vector<8x128xf32> to vector<8xf32>
    %124 = vector.shape_cast %123 : vector<8xf32> to vector<8x1xf32>
    %cst_73 = arith.constant dense<0xFF800000> : vector<8xf32>
    %125 = vector.multi_reduction <maximumf>, %122, %cst_73 [1] : vector<8x128xf32> to vector<8xf32>
    %126 = vector.shape_cast %125 : vector<8xf32> to vector<8x1xf32>
    %127 = arith.subf %126, %124 : vector<8x1xf32>
    %128 = tpu.reciprocal %127 {approx = true} : vector<8x1xf32> -> vector<8x1xf32>
    %129 = vector.broadcast %124 : vector<8x1xf32> to vector<8x128xf32>
    %130 = arith.subf %122, %129 : vector<8x128xf32>
    %131 = vector.broadcast %128 : vector<8x1xf32> to vector<8x128xf32>
    %132 = arith.mulf %130, %131 : vector<8x128xf32>
    %c0_74 = arith.constant 0 : index
    %c0_75 = arith.constant 0 : index
    %133 = vector.load %arg17[%c0_74, %c0_75] : memref<8x128xf32, #tpu.memory_space<vmem>>, vector<8x128xf32>
    tpu.vector_store %arg17[%c0_74, %c0_75], %132 {strides = array<i32>} : memref<8x128xf32, #tpu.memory_space<vmem>>, vector<8x128xf32>,
    %134 = arith.mulf %7, %132 : vector<8x128xf32>
    %135 = arith.mulf %5, %132 : vector<8x128xf32>
    %136 = arith.mulf %6, %132 : vector<8x128xf32>
    %137 = arith.mulf %8, %132 : vector<8x128xf32>
    %cst_76 = arith.constant 1.000000e+00 : f32
    %138 = vector.broadcast %cst_76 : f32 to vector<8x128xf32>
    %139 = arith.subf %138, %132 : vector<8x128xf32>
    %140 = arith.mulf %139, %7 : vector<8x128xf32>
    %141 = arith.mulf %139, %5 : vector<8x128xf32>
    %142 = arith.mulf %139, %6 : vector<8x128xf32>
    %143 = arith.mulf %139, %8 : vector<8x128xf32>
    %144 = arith.subf %140, %141 : vector<8x128xf32>
    %cst_77 = arith.constant 9.99999997E-7 : f32
    %145 = vector.broadcast %cst_77 : f32 to vector<8x128xf32>
    %146 = arith.addf %144, %145 : vector<8x128xf32>
    %147 = math.absf %146 : vector<8x128xf32>
    %148 = arith.mulf %147, %147 : vector<8x128xf32>
    %cst_78 = arith.constant dense<0.000000e+00> : vector<8xf32>
    %149 = vector.multi_reduction <add>, %148, %cst_78 [1] : vector<8x128xf32> to vector<8xf32>
    %150 = vector.shape_cast %149 : vector<8xf32> to vector<8x1xf32>
    %151 = math.sqrt %150 : vector<8x1xf32>
    %152 = arith.subf %142, %141 : vector<8x128xf32>
    %cst_79 = arith.constant 9.99999997E-7 : f32
    %153 = vector.broadcast %cst_79 : f32 to vector<8x128xf32>
    %154 = arith.addf %152, %153 : vector<8x128xf32>
    %155 = math.absf %154 : vector<8x128xf32>
    %156 = arith.mulf %155, %155 : vector<8x128xf32>
    %cst_80 = arith.constant dense<0.000000e+00> : vector<8xf32>
    %157 = vector.multi_reduction <add>, %156, %cst_80 [1] : vector<8x128xf32> to vector<8xf32>
    %158 = vector.shape_cast %157 : vector<8xf32> to vector<8x1xf32>
    %159 = math.sqrt %158 : vector<8x1xf32>
    %160 = arith.subf %140, %143 : vector<8x128xf32>
    %cst_81 = arith.constant 9.99999997E-7 : f32
    %161 = vector.broadcast %cst_81 : f32 to vector<8x128xf32>
    %162 = arith.addf %160, %161 : vector<8x128xf32>
    %163 = math.absf %162 : vector<8x128xf32>
    %164 = arith.mulf %163, %163 : vector<8x128xf32>
    %cst_82 = arith.constant dense<0.000000e+00> : vector<8xf32>
    %165 = vector.multi_reduction <add>, %164, %cst_82 [1] : vector<8x128xf32> to vector<8xf32>
    %166 = vector.shape_cast %165 : vector<8xf32> to vector<8x1xf32>
    %167 = math.sqrt %166 : vector<8x1xf32>
    %168 = arith.subf %151, %159 : vector<8x1xf32>
    %169 = math.absf %168 : vector<8x1xf32>
    %170 = arith.subf %151, %167 : vector<8x1xf32>
    %171 = math.absf %170 : vector<8x1xf32>
    %172 = arith.addf %169, %171 : vector<8x1xf32>
    %173 = arith.subf %167, %159 : vector<8x1xf32>
    %174 = math.absf %173 : vector<8x1xf32>
    %175 = arith.addf %172, %174 : vector<8x1xf32>
    %c0_83 = arith.constant 0 : index
    %c0_84 = arith.constant 0 : index
    %176 = vector.load %arg18[%c0_83, %c0_84] : memref<8x1xf32, #tpu.memory_space<vmem>>, vector<8x1xf32>
    tpu.vector_store %arg18[%c0_83, %c0_84], %175 {strides = array<i32>} : memref<8x1xf32, #tpu.memory_space<vmem>>, vector<8x1xf32>,
    %177 = arith.subf %135, %136 : vector<8x128xf32>
    %cst_85 = arith.constant 9.99999997E-7 : f32
    %178 = vector.broadcast %cst_85 : f32 to vector<8x128xf32>
    %179 = arith.addf %177, %178 : vector<8x128xf32>
    %180 = math.absf %179 : vector<8x128xf32>
    %181 = arith.mulf %180, %180 : vector<8x128xf32>
    %cst_86 = arith.constant dense<0.000000e+00> : vector<8xf32>
    %182 = vector.multi_reduction <add>, %181, %cst_86 [1] : vector<8x128xf32> to vector<8xf32>
    %183 = vector.shape_cast %182 : vector<8xf32> to vector<8x1xf32>
    %184 = math.sqrt %183 : vector<8x1xf32>
    %185 = arith.subf %135, %134 : vector<8x128xf32>
    %cst_87 = arith.constant 9.99999997E-7 : f32
    %186 = vector.broadcast %cst_87 : f32 to vector<8x128xf32>
    %187 = arith.addf %185, %186 : vector<8x128xf32>
    %188 = math.absf %187 : vector<8x128xf32>
    %189 = arith.mulf %188, %188 : vector<8x128xf32>
    %cst_88 = arith.constant dense<0.000000e+00> : vector<8xf32>
    %190 = vector.multi_reduction <add>, %189, %cst_88 [1] : vector<8x128xf32> to vector<8xf32>
    %191 = vector.shape_cast %190 : vector<8xf32> to vector<8x1xf32>
    %192 = math.sqrt %191 : vector<8x1xf32>
    %193 = arith.subf %135, %137 : vector<8x128xf32>
    %cst_89 = arith.constant 9.99999997E-7 : f32
    %194 = vector.broadcast %cst_89 : f32 to vector<8x128xf32>
    %195 = arith.addf %193, %194 : vector<8x128xf32>
    %196 = math.absf %195 : vector<8x128xf32>
    %197 = arith.mulf %196, %196 : vector<8x128xf32>
    %cst_90 = arith.constant dense<0.000000e+00> : vector<8xf32>
    %198 = vector.multi_reduction <add>, %197, %cst_90 [1] : vector<8x128xf32> to vector<8xf32>
    %199 = vector.shape_cast %198 : vector<8xf32> to vector<8x1xf32>
    %200 = math.sqrt %199 : vector<8x1xf32>
    %201 = arith.subf %134, %137 : vector<8x128xf32>
    %cst_91 = arith.constant 9.99999997E-7 : f32
    %202 = vector.broadcast %cst_91 : f32 to vector<8x128xf32>
    %203 = arith.addf %201, %202 : vector<8x128xf32>
    %204 = math.absf %203 : vector<8x128xf32>
    %205 = arith.mulf %204, %204 : vector<8x128xf32>
    %cst_92 = arith.constant dense<0.000000e+00> : vector<8xf32>
    %206 = vector.multi_reduction <add>, %205, %cst_92 [1] : vector<8x128xf32> to vector<8xf32>
    %207 = vector.shape_cast %206 : vector<8xf32> to vector<8x1xf32>
    %208 = math.sqrt %207 : vector<8x1xf32>
    %cst_93 = arith.constant 1.000000e+00 : f32
    %209 = vector.broadcast %cst_93 : f32 to vector<8x1xf32>
    %210 = arith.addf %209, %184 : vector<8x1xf32>
    %211 = arith.subf %210, %208 : vector<8x1xf32>
    %cst_94 = arith.constant 0.000000e+00 : f32
    %212 = vector.broadcast %cst_94 : f32 to vector<8x1xf32>
    %213 = arith.maximumf %211, %212 : vector<8x1xf32>
    %214 = vector.shape_cast %213 : vector<8x1xf32> to vector<1x8x1xf32>
    %cst_95 = arith.constant dense<0.000000e+00> : vector<1xf32>
    %215 = vector.multi_reduction <add>, %214, %cst_95 [1, 2] : vector<1x8x1xf32> to vector<1xf32>
    %216 = vector.shape_cast %215 : vector<1xf32> to vector<1x1x1xf32>
    %217 = vector.extract %216[0, 0, 0] : f32 from vector<1x1x1xf32>
    %218 = arith.subf %184, %192 : vector<8x1xf32>
    %cst_96 = arith.constant 1.000000e+00 : f32
    %219 = vector.broadcast %cst_96 : f32 to vector<8x1xf32>
    %220 = arith.addf %218, %219 : vector<8x1xf32>
    %cst_97 = arith.constant 0.000000e+00 : f32
    %221 = vector.broadcast %cst_97 : f32 to vector<8x1xf32>
    %222 = arith.maximumf %220, %221 : vector<8x1xf32>
    %223 = vector.shape_cast %222 : vector<8x1xf32> to vector<1x8x1xf32>
    %cst_98 = arith.constant dense<0.000000e+00> : vector<1xf32>
    %224 = vector.multi_reduction <add>, %223, %cst_98 [1, 2] : vector<1x8x1xf32> to vector<1xf32>
    %225 = vector.shape_cast %224 : vector<1xf32> to vector<1x1x1xf32>
    %226 = vector.extract %225[0, 0, 0] : f32 from vector<1x1x1xf32>
    %227 = arith.subf %184, %200 : vector<8x1xf32>
    %cst_99 = arith.constant 1.000000e+00 : f32
    %228 = vector.broadcast %cst_99 : f32 to vector<8x1xf32>
    %229 = arith.addf %227, %228 : vector<8x1xf32>
    %cst_100 = arith.constant 0.000000e+00 : f32
    %230 = vector.broadcast %cst_100 : f32 to vector<8x1xf32>
    %231 = arith.maximumf %229, %230 : vector<8x1xf32>
    %232 = vector.shape_cast %231 : vector<8x1xf32> to vector<1x8x1xf32>
    %cst_101 = arith.constant dense<0.000000e+00> : vector<1xf32>
    %233 = vector.multi_reduction <add>, %232, %cst_101 [1, 2] : vector<1x8x1xf32> to vector<1xf32>
    %234 = vector.shape_cast %233 : vector<1xf32> to vector<1x1x1xf32>
    %235 = vector.extract %234[0, 0, 0] : f32 from vector<1x1x1xf32>
    %236 = vector.shape_cast %175 : vector<8x1xf32> to vector<1x8x1xf32>
    %cst_102 = arith.constant dense<0.000000e+00> : vector<1xf32>
    %237 = vector.multi_reduction <add>, %236, %cst_102 [1, 2] : vector<1x8x1xf32> to vector<1xf32>
    %238 = vector.shape_cast %237 : vector<1xf32> to vector<1x1x1xf32>
    %239 = vector.extract %238[0, 0, 0] : f32 from vector<1x1x1xf32>
    %240 = tpu.iota {dimensions = array<i32: 1>} : vector<8x128xi32>
    %c0_i32 = arith.constant 0 : i32
    %241 = vector.broadcast %c0_i32 : i32 to vector<8x128xi32>
    %242 = arith.cmpi eq, %240, %241 : vector<8x128xi32>
    %c1_i32 = arith.constant 1 : i32
    %243 = vector.broadcast %c1_i32 : i32 to vector<8x128xi32>
    %244 = arith.cmpi eq, %240, %243 : vector<8x128xi32>
    %c2_i32 = arith.constant 2 : i32
    %245 = vector.broadcast %c2_i32 : i32 to vector<8x128xi32>
    %246 = arith.cmpi eq, %240, %245 : vector<8x128xi32>
    %c3_i32 = arith.constant 3 : i32
    %247 = vector.broadcast %c3_i32 : i32 to vector<8x128xi32>
    %248 = arith.cmpi eq, %240, %247 : vector<8x128xi32>
    %cst_103 = arith.constant 0.000000e+00 : f32
    %249 = vector.broadcast %239 : f32 to vector<8x128xf32>
    %250 = vector.broadcast %cst_103 : f32 to vector<8x128xf32>
    %251 = arith.select %248, %249, %250 : vector<8x128xi1>, vector<8x128xf32>
    %252 = vector.broadcast %235 : f32 to vector<8x128xf32>
    %253 = arith.select %246, %252, %251 : vector<8x128xi1>, vector<8x128xf32>
    %254 = vector.broadcast %226 : f32 to vector<8x128xf32>
    %255 = arith.select %244, %254, %253 : vector<8x128xi1>, vector<8x128xf32>
    %256 = vector.broadcast %217 : f32 to vector<8x128xf32>
    %257 = arith.select %242, %256, %255 : vector<8x128xi1>, vector<8x128xf32>
    %c0_104 = arith.constant 0 : index
    %c0_105 = arith.constant 0 : index
    %c0_106 = arith.constant 0 : index
    %258 = vector.load %arg19[%c0_104, %c0_105, %c0_106] : memref<1x8x128xf32, #tpu.memory_space<vmem>>, vector<1x8x128xf32>
    %259 = vector.shape_cast %258 : vector<1x8x128xf32> to vector<8x128xf32>
    %260 = vector.shape_cast %257 : vector<8x128xf32> to vector<1x8x128xf32>
    tpu.vector_store %arg19[%c0_104, %c0_105, %c0_106], %260 {strides = array<i32>} : memref<1x8x128xf32, #tpu.memory_space<vmem>>, vector<1x8x128xf32>,
    return
  }
  func.func @transform_0(%arg0: i32) -> (i32, i32, i32) {
    %c0_i32 = arith.constant 0 : i32
    %c0_i32_0 = arith.constant 0 : i32
    %c0_i32_1 = arith.constant 0 : i32
    return %c0_i32, %arg0, %c0_i32_0 : i32, i32, i32
  }
  func.func @transform_1(%arg0: i32) -> (i32, i32) {
    %c0_i32 = arith.constant 0 : i32
    %c0_i32_0 = arith.constant 0 : i32
    %c0_i32_1 = arith.constant 0 : i32
    return %c0_i32, %c0_i32_0 : i32, i32
  }
  func.func @transform_2(%arg0: i32) -> (i32, i32) {
    %c0_i32 = arith.constant 0 : i32
    %c0_i32_0 = arith.constant 0 : i32
    %c0_i32_1 = arith.constant 0 : i32
    return %c0_i32, %c0_i32_0 : i32, i32
  }
  func.func @transform_3(%arg0: i32) -> (i32, i32) {
    %c0_i32 = arith.constant 0 : i32
    %c0_i32_0 = arith.constant 0 : i32
    %c0_i32_1 = arith.constant 0 : i32
    return %c0_i32, %c0_i32_0 : i32, i32
  }
  func.func @transform_4(%arg0: i32) -> (i32, i32) {
    %c0_i32 = arith.constant 0 : i32
    %c0_i32_0 = arith.constant 0 : i32
    %c0_i32_1 = arith.constant 0 : i32
    return %c0_i32, %c0_i32_0 : i32, i32
  }
  func.func @transform_5(%arg0: i32) -> (i32, i32) {
    %c0_i32 = arith.constant 0 : i32
    %c0_i32_0 = arith.constant 0 : i32
    %c0_i32_1 = arith.constant 0 : i32
    return %c0_i32, %c0_i32_0 : i32, i32
  }
  func.func @transform_6(%arg0: i32) -> (i32, i32, i32) {
    %c0_i32 = arith.constant 0 : i32
    %c0_i32_0 = arith.constant 0 : i32
    %c0_i32_1 = arith.constant 0 : i32
    %c0_i32_2 = arith.constant 0 : i32
    return %c0_i32, %c0_i32_0, %c0_i32_1 : i32, i32, i32
  }
  func.func @transform_7(%arg0: i32) -> (i32, i32, i32) {
    %c0_i32 = arith.constant 0 : i32
    %c0_i32_0 = arith.constant 0 : i32
    %c0_i32_1 = arith.constant 0 : i32
    %c0_i32_2 = arith.constant 0 : i32
    return %c0_i32, %c0_i32_0, %c0_i32_1 : i32, i32, i32
  }
  func.func @transform_8(%arg0: i32) -> (i32, i32) {
    %c0_i32 = arith.constant 0 : i32
    %c0_i32_0 = arith.constant 0 : i32
    %c0_i32_1 = arith.constant 0 : i32
    return %c0_i32, %c0_i32_0 : i32, i32
  }
  func.func @transform_9(%arg0: i32) -> (i32, i32) {
    %c0_i32 = arith.constant 0 : i32
    %c0_i32_0 = arith.constant 0 : i32
    %c0_i32_1 = arith.constant 0 : i32
    return %c0_i32, %c0_i32_0 : i32, i32
  }
  func.func @transform_10(%arg0: i32) -> (i32, i32, i32) {
    %c0_i32 = arith.constant 0 : i32
    %c0_i32_0 = arith.constant 0 : i32
    %c0_i32_1 = arith.constant 0 : i32
    %c0_i32_2 = arith.constant 0 : i32
    return %c0_i32, %c0_i32_0, %c0_i32_1 : i32, i32, i32
  }
  func.func @transform_11(%arg0: i32) -> (i32, i32, i32) {
    %c0_i32 = arith.constant 0 : i32
    %c0_i32_0 = arith.constant 0 : i32
    %c0_i32_1 = arith.constant 0 : i32
    %c0_i32_2 = arith.constant 0 : i32
    return %c0_i32, %c0_i32_0, %c0_i32_1 : i32, i32, i32
  }
  func.func @transform_12(%arg0: i32) -> (i32, i32) {
    %c0_i32 = arith.constant 0 : i32
    %c0_i32_0 = arith.constant 0 : i32
    %c0_i32_1 = arith.constant 0 : i32
    return %c0_i32, %c0_i32_0 : i32, i32
  }
  func.func @transform_13(%arg0: i32) -> (i32, i32) {
    %c0_i32 = arith.constant 0 : i32
    %c0_i32_0 = arith.constant 0 : i32
    %c0_i32_1 = arith.constant 0 : i32
    return %c0_i32, %c0_i32_0 : i32, i32
  }
  func.func @transform_14(%arg0: i32) -> (i32, i32) {
    %c0_i32 = arith.constant 0 : i32
    %c0_i32_0 = arith.constant 0 : i32
    %c0_i32_1 = arith.constant 0 : i32
    return %c0_i32, %c0_i32_0 : i32, i32
  }
  func.func @transform_15(%arg0: i32) -> (i32, i32) {
    %c0_i32 = arith.constant 0 : i32
    %c0_i32_0 = arith.constant 0 : i32
    %c0_i32_1 = arith.constant 0 : i32
    return %c0_i32, %c0_i32_0 : i32, i32
  }
  func.func @transform_16(%arg0: i32) -> (i32, i32) {
    %c0_i32 = arith.constant 0 : i32
    %c0_i32_0 = arith.constant 0 : i32
    return %arg0, %c0_i32 : i32, i32
  }
  func.func @transform_17(%arg0: i32) -> (i32, i32) {
    %c0_i32 = arith.constant 0 : i32
    %c0_i32_0 = arith.constant 0 : i32
    return %arg0, %c0_i32 : i32, i32
  }
  func.func @transform_18(%arg0: i32) -> (i32, i32, i32) {
    %c0_i32 = arith.constant 0 : i32
    %c0_i32_0 = arith.constant 0 : i32
    %c0_i32_1 = arith.constant 0 : i32
    return %arg0, %c0_i32, %c0_i32_0 : i32, i32, i32
  }
}

</mosaic_0001>

<bundles_post_ra>
// kernel: tmqnet_forward.1
= control target key start
LH: loop header
LB: loop body
LE: loop exit
PB: predicated region body
PF: predicated region fallthrough
CT: control target
= control target key end

     0   :  { %s15023_s0 = inlined_call_operand.vmem [shape: f32[4,16,128], index: 0, kind: input, shape index: {}]   ;;  %s15024_s1 = inlined_call_operand.hbm [shape: bf16[128,128], index: 1, kind: input, shape index: {}]   ;;  %s15025_s2 = inlined_call_operand.hbm [shape: bf16[512,512], index: 2, kind: input, shape index: {}]   ;;  %s15026_s3 = inlined_call_operand.hbm [shape: f32[1,512], index: 3, kind: input, shape index: {}]   ;;  %s15027_s4 = inlined_call_operand.hbm [shape: bf16[512,512], index: 4, kind: input, shape index: {}]   ;;  %s15028_s5 = inlined_call_operand.hbm [shape: f32[1,512], index: 5, kind: input, shape index: {}]   ;;  %s15029_s6 = inlined_call_operand.hbm [shape: bf16[2,384,384], index: 6, kind: input, shape index: {}]   ;;  %s15030_s7 = inlined_call_operand.hbm [shape: f32[2,1,384], index: 7, kind: input, shape index: {}]   ;;  %s15031_s8 = inlined_call_operand.hbm [shape: bf16[384,768], index: 8, kind: input, shape index: {}]   ;;  %s15032_s9 = inlined_call_operand.hbm [shape: f32[1,768], index: 9, kind: input, shape index: {}]   ;;  %s15033_s10 = inlined_call_operand.hbm [shape: bf16[4,384,384], index: 10, kind: input, shape index: {}]   ;;  %s15034_s11 = inlined_call_operand.hbm [shape: f32[4,1,384], index: 11, kind: input, shape index: {}]   ;;  %s15035_s12 = inlined_call_operand.hbm [shape: bf16[512,128], index: 12, kind: input, shape index: {}]   ;;  %s15036_s13 = inlined_call_operand.hbm [shape: f32[1,128], index: 13, kind: input, shape index: {}]   ;;  %s15037_s14 = inlined_call_operand.hbm [shape: bf16[384,128], index: 14, kind: input, shape index: {}]   ;;  %s15038_s15 = inlined_call_operand.hbm [shape: f32[1,128], index: 15, kind: input, shape index: {}]   ;;  %s15039_s16 = inlined_call_operand.hbm [shape: f32[16,128], index: 16, kind: output, shape index: {0}]   ;;  %s15040_s17 = inlined_call_operand.vmem [shape: f32[16,1], index: 17, kind: output, shape index: {1}]   ;;  %s15041_s18 = inlined_call_operand.vmem [shape: f32[2,8,128], index: 18, kind: output, shape index: {2}]  }
   0x1   :  { %15054 = sst [smem:[#allocation45_spill]] %s15023_s0 }
   0x2   :  { %15055 = sst [smem:[#allocation46_spill]] %s15024_s1 }
   0x3   :  { %15056 = sst [smem:[#allocation47_spill]] %s15025_s2 }
   0x4   :  { %15057 = sst [smem:[#allocation48_spill]] %s15026_s3 }
   0x5   :  { %15058 = sst [smem:[#allocation49_spill]] %s15027_s4 }
   0x6   :  { %15059 = sst [smem:[#allocation50_spill]] %s15029_s6 }
   0x7   :  { %15060 = sst [smem:[#allocation51_spill]] %s15039_s16 }
   0x8   :  { %15061 = sst [smem:[#allocation52_spill]] %s15040_s17 }
   0x9   :  { %15062 = sst [smem:[#allocation53_spill]] %s15041_s18 }
   0xa   :  { %24 = vsyncpa [#allocation4], 0 }
   0xb   :  { %25 = vsyncpa [#allocation7], 0 }
   0xc   :  { %26 = vsyncpa [#allocation10], 0 }
   0xd   :  { %27 = vsyncpa [#allocation13], 0 }
   0xe   :  { %28 = vsyncpa [#allocation16], 0 }
   0xf   :  { %29 = vsyncpa [#allocation19], 0 }
  0x10   :  { %30 = vsyncpa [#allocation22], 0 }
  0x11   :  { %31 = vsyncpa [#allocation25], 0 }
  0x12   :  { %32 = vsyncpa [#allocation5], 0 }
  0x13   :  { %34 = vsyncpa [#allocation5 + $0x1], 0  ;;  %s14262_s27 = smov 0   ;;  %s14264_s28 = smov 0  }
  0x14   :  { %s14266_s29 = smov 0   ;;  %s14268_s30 = smov 0  }
  0x15 LB: > { %15063 = sst [smem:[#allocation37_spill]] %s14128_s27  ;;  %s14283_s0 = sadd.s32 4294967295, %s14140_s30   ;;  %s14140_s30 = sphi %s14268_s30, %s15092_s30   ;;  %s14136_s29 = sphi %s14266_s29, %s15096_s29   ;;  %s14132_s28 = sphi %s14264_s28, %s15095_s28   ;;  %s14128_s27 = sphi %s14262_s27, %s15093_s27  }
  0x16   : > { %15064 = sst [smem:[#allocation38_spill]] %s14132_s28  ;;  %s8836_s19 = sadd.s32 4294967294, %s14140_s30  }
  0x17   : > { %15065 = sst [smem:[#allocation39_spill]] %s14283_s0  ;;  %s14287_s1 = sadd.s32 1, %s14140_s30  }
  0x18   : > { %15066 = sst [smem:[#allocation40_spill]] %s14287_s1  ;;  %s47_s20 = sadd.s32 1, %s14136_s29 }
  0x19   : > { %s44_s21 = ssub.s32 %s14140_s30, %s14287_s1  ;;  %p54_p0 = scmp.ne.s32.totalorder %s14136_s29, %s14132_s28 }
  0x1a   : > { %p45_p1 = scmp.eq.s32.totalorder %s44_s21, 0  ;;  %p55_p2 = scmp.eq.s32.totalorder %s14140_s30, 0 }
  0x1b   : > { %p399_p3 = scmp.eq.s32.totalorder %s14283_s0, 1  ;;  %p404_p4 = scmp.ne.s32.totalorder %s14132_s28, %s14128_s27 }
  0x1c   : > { %s14299_s22 = scalar_select %p45_p1, %s14136_s29, %s47_s20  }
  0x1d   : > { %p14301_p5 = por %p55_p2, %p54_p0  ;;  %p14305_p6 = por %p399_p3, %p54_p0 }
  0x1e   : > { %15067 = sst [smem:[#allocation41_spill]] %s14299_s22  ;;  %p405_p7 = scmp.eq.s32.totalorder %s8836_s19, 1 }
  0x1f   : > { %s15069_s23 = scalar_select %p14305_p6, 1, 0 }
  0x20   : > { %p8837_p8 = scmp.ge.s32.totalorder %s14140_s30, 1  ;;  %p464_p9 = scmp.lt.s32.totalorder %s14140_s30, 3 }
  0x21   : > { %15070 = sst [smem:[#allocation42_spill]] %s15069_s23  ;;  %p14311_p10 = por %p405_p7, %p404_p4 }
  0x22   : > { %p13480_p11 = scmp.eq.s32.totalorder %s14283_s0, 0  ;;  %p14316_p12 = pnand %p8837_p8, %p464_p9 }
  0x23   : > { %s15071_s24 = scalar_select %p14311_p10, 1, 0 }
  0x24   : > { %s15073_s25 = scalar_select %p14316_p12, 1, 0 }
  0x25   : > { %15072 = sst [smem:[#allocation43_spill]] %s15071_s24  ;;  %p13430_p13 = pneg %p14316_p12 }
  0x26   : > { %15074 = sst [smem:[#allocation44_spill]] %s15073_s25  ;;  %s14142_s19 = smov [#allocation6]  }
  0x27   : > { %s15075_s21 = sld [smem:[#allocation47_spill]]  ;;  %s491_s1 = sshll.u32 %s14142_s19, 4  ;;  %s492_s1 = int_to_ptr.vmem [resolvable:$true] %s491_s1 }
  0x28   : > { %p14327_p0 = pnand %p13480_p11, %p13430_p13  ;;  %s15077_s4 = sld [smem:[#allocation49_spill]] }
  0x29   : > { %s14143_s26 = smov 256   ;;  %s14144_s20 = smov 16  }
  0x2a   : > { %s15078_s6 = sld [smem:[#allocation50_spill]]  ;;  %s14146_s18 = smov [#allocation12]  }
  0x2b   : > { %s543_s24 = sshll.u32 %s14146_s18, 4  ;;  %s569_s25 = sshll.u32 %s15031_s8, 4  ;;  %s544_s24 = int_to_ptr.vmem [resolvable:$true] %s543_s24  ;;  %s570_s25 = int_to_ptr.hbm [resolvable:$true] %s569_s25 }
  0x2c   : > { %s14149_s17 = smov [#allocation15]   ;;  %s623_s18 = sshll.u32 %s15035_s12, 4  ;;  %s624_s18 = int_to_ptr.hbm [resolvable:$true] %s623_s18 }
  0x2d   : > { %s489_s22 = sshll.u32 %s15075_s21, 4  ;;  %s14145_s21 = smov [#allocation9]   ;;  %s490_s22 = int_to_ptr.hbm [resolvable:$true] %s489_s22 }
  0x2e   : > { %s515_s16 = sshll.u32 %s15077_s4, 4  ;;  %s517_s19 = sshll.u32 %s14145_s21, 4  ;;  %s516_s16 = int_to_ptr.hbm [resolvable:$true] %s515_s16  ;;  %s518_s19 = int_to_ptr.vmem [resolvable:$true] %s517_s19 }
  0x2f   : > { %13436 = dma.hbm_to_vmem [thread:$0]  (!%p14327_p0), %s490_s22, 16384, %s492_s1, [#allocation7], %s14143_s26, %s14143_s26, %s14144_s20  }
  0x30   : > { %s541_s0 = sshll.u32 %s15078_s6, 4  ;;  %s14147_s1 = smov 192   ;;  %s542_s0 = int_to_ptr.hbm [resolvable:$true] %s541_s0 }
  0x31   : > { %13442 = dma.hbm_to_vmem [thread:$0]  (!%p14327_p0), %s516_s16, 16384, %s518_s19, [#allocation10], %s14143_s26, %s14143_s26, %s14144_s20  }
  0x32   : > { %s14148_s22 = smov 12   ;;  %s571_s23 = sshll.u32 %s14149_s17, 4  ;;  %s572_s23 = int_to_ptr.vmem [resolvable:$true] %s571_s23 }
  0x33   : > { %13448 = dma.hbm_to_vmem [thread:$0]  (!%p14327_p0), %s542_s0, 18432, %s544_s24, [#allocation13], %s14147_s1, %s14147_s1, %s14148_s22  }
  0x34   : > { %s14150_s21 = smov 384   ;;  %s14151_s6 = smov 24  }
  0x35   : > { %13454 = dma.hbm_to_vmem [thread:$0]  (!%p14327_p0), %s570_s25, 18432, %s572_s23, [#allocation16], %s14150_s21, %s14150_s21, %s14151_s6  }
  0x36   : > { %s595_s20 = sshll.u32 %s15033_s10, 4  ;;  %s14152_s4 = smov [#allocation18]   ;;  %s596_s20 = int_to_ptr.hbm [resolvable:$true] %s595_s20 }
  0x37   : > { %s597_s28 = sshll.u32 %s14152_s4, 4  ;;  %s14153_s24 = smov [#allocation21]   ;;  %s598_s28 = int_to_ptr.vmem [resolvable:$true] %s597_s28 }
  0x38   : > { %13460 = dma.hbm_to_vmem [thread:$0]  (!%p14327_p0), %s596_s20, 36864, %s598_s28, [#allocation19], %s14147_s1, %s14147_s1, %s14148_s22  }
  0x39   : > { %s625_s17 = sshll.u32 %s14153_s24, 4  ;;  %s649_s23 = sshll.u32 %s15037_s14, 4  ;;  %s626_s17 = int_to_ptr.vmem [resolvable:$true] %s625_s17  ;;  %s650_s23 = int_to_ptr.hbm [resolvable:$true] %s649_s23 }
  0x3a   : > { %s14154_s21 = smov 64   ;;  %s14155_s16 = smov 4  }
  0x3b   : > { %13466 = dma.hbm_to_vmem [thread:$0]  (!%p14327_p0), %s624_s18, 4096, %s626_s17, [#allocation22], %s14154_s21, %s14154_s21, %s14155_s16  }
  0x3c   : > { %s15079_s26 = sld [smem:[#allocation46_spill]]  ;;  %s14156_s4 = smov [#allocation24]  }
  0x3d   : > { %s651_s28 = sshll.u32 %s14156_s4, 4  ;;  %s14157_s0 = smov [#allocation3]   ;;  %s652_s28 = int_to_ptr.vmem [resolvable:$true] %s651_s28 }
  0x3e   : > { %13472 = dma.hbm_to_vmem [thread:$0]  (!%p14327_p0), %s650_s23, 3072, %s652_s28, [#allocation25], %s14154_s21, %s14154_s21, %s14155_s16  }
  0x3f   : > { %s477_s19 = sshll.u32 %s14157_s0, 4  ;;  %s15080_s3 = sld [smem:[#allocation48_spill]]  ;;  %s478_s19 = int_to_ptr.vmem [resolvable:$true] %s477_s19 }
  0x40   : > { %s530_s1 = sshll.u32 %s15028_s5, 4  ;;  %s14158_s22 = smov [#allocation8]   ;;  %s531_s1 = int_to_ptr.hbm [resolvable:$true] %s530_s1 }
  0x41   : > { %s14159_s23 = smov [#allocation11]   ;;  %s555_s24 = sshll.u32 %s15030_s7, 4  ;;  %s556_s24 = int_to_ptr.hbm [resolvable:$true] %s555_s24 }
  0x42   : > { %s475_s20 = sshll.u32 %s15079_s26, 4  ;;  %s506_s26 = sshll.u32 %s14158_s22, 4  ;;  %s476_s20 = int_to_ptr.hbm [resolvable:$true] %s475_s20  ;;  %s507_s26 = int_to_ptr.vmem [resolvable:$true] %s506_s26 }
  0x43   : > { %13433 = dma.hbm_to_vmem [thread:$0]  (!%p14327_p0), %s476_s20, 1024, %s478_s19, [#allocation4], %s14154_s21, %s14154_s21, %s14155_s16  }
  0x44   : > { %s532_s4 = sshll.u32 %s14159_s23, 4  ;;  %s14160_s21 = smov [#allocation14]   ;;  %s533_s4 = int_to_ptr.vmem [resolvable:$true] %s532_s4 }
  0x45   : > { %s504_s25 = sshll.u32 %s15080_s3, 4  ;;  %s557_s16 = sshll.u32 %s14160_s21, 4  ;;  %s505_s25 = int_to_ptr.hbm [resolvable:$true] %s504_s25  ;;  %s558_s16 = int_to_ptr.vmem [resolvable:$true] %s557_s16 }
  0x46   : > { %13439 = dma.hbm_to_vmem [thread:$0]  (!%p14327_p0), %s505_s25, 64, %s507_s26, [#allocation7]  }
  0x47   : > { %13445 = dma.hbm_to_vmem [thread:$0]  (!%p14327_p0), %s531_s1, 64, %s533_s4, [#allocation10]  }
  0x48   : > { %s584_s6 = sshll.u32 %s15032_s9, 4  ;;  %s14161_s25 = smov 48   ;;  %s585_s6 = int_to_ptr.hbm [resolvable:$true] %s584_s6 }
  0x49   : > { %s14162_s18 = smov 3   ;;  %s14163_s17 = smov [#allocation17]  }
  0x4a   : > { %13451 = dma.hbm_to_vmem [thread:$0]  (!%p14327_p0), %s556_s24, 96, %s558_s16, [#allocation13], %s14161_s25, %s14161_s25, %s14162_s18  }
  0x4b   : > { %s586_s22 = sshll.u32 %s14163_s17, 4  ;;  %s609_s1 = sshll.u32 %s15034_s11, 4  ;;  %s587_s22 = int_to_ptr.vmem [resolvable:$true] %s586_s22  ;;  %s610_s1 = int_to_ptr.hbm [resolvable:$true] %s609_s1 }
  0x4c   : > { %13457 = dma.hbm_to_vmem [thread:$0]  (!%p14327_p0), %s585_s6, 96, %s587_s22, [#allocation16]  }
  0x4d   : > { %s638_s0 = sshll.u32 %s15036_s13, 4  ;;  %s14164_s21 = smov [#allocation20]   ;;  %s639_s0 = int_to_ptr.hbm [resolvable:$true] %s638_s0 }
  0x4e   : > { %s611_s20 = sshll.u32 %s14164_s21, 4  ;;  %s14165_s24 = smov [#allocation23]   ;;  %s612_s20 = int_to_ptr.vmem [resolvable:$true] %s611_s20 }
  0x4f   : > { %13463 = dma.hbm_to_vmem [thread:$0]  (!%p14327_p0), %s610_s1, 192, %s612_s20, [#allocation19], %s14161_s25, %s14161_s25, %s14162_s18  }
  0x50   : > { %s640_s16 = sshll.u32 %s14165_s24, 4  ;;  %s664_s26 = sshll.u32 %s15038_s15, 4  ;;  %s641_s16 = int_to_ptr.vmem [resolvable:$true] %s640_s16  ;;  %s665_s26 = int_to_ptr.hbm [resolvable:$true] %s664_s26 }
  0x51   : > { %13469 = dma.hbm_to_vmem [thread:$0]  (!%p14327_p0), %s639_s0, 16, %s641_s16, [#allocation22]  }
  0x52   : > { %s14166_s6 = smov [#allocation26]   ;;  %p8853_p1 = scmp.ge.s32.totalorder %s14140_s30, 2 }
  0x53   : > { %s666_s22 = sshll.u32 %s14166_s6, 4  ;;  %s667_s22 = int_to_ptr.vmem [resolvable:$true] %s666_s22 }
  0x54   : > { %13475 = dma.hbm_to_vmem [thread:$0]  (!%p14327_p0), %s665_s26, 16, %s667_s22, [#allocation25]  }
  0x55   : > { %673 = sbr.rel (%p8853_p1) target bundleno = 104 (0x68), region = 76 }
  0x5a   : > { %676 = sbr.rel (!%p14301_p5) target bundleno = 104 (0x68), region = 80  ;;  %s678_s25 = sand.u32 (%p14301_p5), 1, %s14136_s29  }
  0x5b   : > { %s8855_s18 = sshll.u32 (%p14301_p5), %s14140_s30, 3  ;;  %s8854_s23 = sshll.u32 (%p14301_p5), %s678_s25, 5 }
  0x5c   : > { %s15081_s28 = sld [smem:[#allocation45_spill]] (%p14301_p5)  ;;  %s680_s27 = scalar_lea.vmem (%p14301_p5), [#allocation2], %s8854_s23 }
  0x62   : > { %s682_s0 = scalar_lea.vmem %s15081_s28, %s8855_s18 }
  0x63   : > { %v717_v0 = vld [vmem:[%s682_s0] sm:$0xff]  ;;  %v719_v1 = vld [vmem:[%s682_s0 + $0x10] sm:$0xff] }
  0x64   : > { %v721_v2 = vld [vmem:[%s682_s0 + $0x20] sm:$0xff]  ;;  %718 = vst [vmem:[%s680_s27] sm:$0xff] %v717_v0  ;;  %v723_v3 = vld [vmem:[%s682_s0 + $0x30] sm:$0xff] }
  0x65   : > { %720 = vst [vmem:[%s680_s27 + $0x8] sm:$0xff] %v719_v1 }
  0x66   : > { %722 = vst [vmem:[%s680_s27 + $0x10] sm:$0xff] %v721_v2 }
  0x67   : > { %724 = vst [vmem:[%s680_s27 + $0x18] sm:$0xff] %v723_v3 }
  0x68 PF: > { %733 = sbr.rel (%p14316_p12) target bundleno = 2142 (0x85e), region = 118  ;;  %s15083_s21 = sld [smem:[#allocation38_spill]] (!%p14316_p12) }
  0x69   : > { %s15084_s20 = sld [smem:[#allocation39_spill]] (!%p14316_p12) }
  0x6e   : > { %s14416_s24 = sand.u32 1, %s15083_s21  }
  0x6f   : > { %s8857_s16 = sshll.u32 %s14416_s24, 5 }
  0x70   : > { %s14419_s19 = scalar_lea.vmem [#allocation2], %s8857_s16 }
  0x71   : > { %14091 = dma.done.wait (%p13480_p11), [#allocation4], 1024  }
  0x72   : > { %14093 = vsyncadd (%p13480_p11), [#allocation4], 4294966272 }
  0x73   : > { %14095 = dma.done.wait (%p13480_p11), [#allocation7], 16448  }
  0x74   : > { %14097 = vsyncadd (%p13480_p11), [#allocation7], 4294950848 }
  0x75   : > { %14099 = dma.done.wait (%p13480_p11), [#allocation10], 16448  }
  0x76   : > { %14101 = vsyncadd (%p13480_p11), [#allocation10], 4294950848 }
  0x77   : > { %14103 = dma.done.wait (%p13480_p11), [#allocation13], 18528  }
  0x78   : > { %14105 = vsyncadd (%p13480_p11), [#allocation13], 4294948768 }
  0x79   : > { %14107 = dma.done.wait (%p13480_p11), [#allocation16], 18528  }
  0x7a   : > { %14109 = vsyncadd (%p13480_p11), [#allocation16], 4294948768 }
  0x7b   : > { %14111 = dma.done.wait (%p13480_p11), [#allocation19], 37056  }
  0x7c   : > { %14113 = vsyncadd (%p13480_p11), [#allocation19], 4294930240 }
  0x7d   : > { %14115 = dma.done.wait (%p13480_p11), [#allocation22], 4112  }
  0x7e   : > { %14117 = vsyncadd (%p13480_p11), [#allocation22], 4294963184 }
  0x7f   : > { %14119 = dma.done.wait (%p13480_p11), [#allocation25], 3088  }
  0x80   : > { %14121 = vsyncadd (%p13480_p11), [#allocation25], 4294964208  ;;  %v12471_v4 = vld [vmem:[#allocation3 + $0x38] sm:$0xff]  ;;  %v12470_v5 = vld [vmem:[#allocation3 + $0x30] sm:$0xff]  ;;  %s8873_s17 = sshll.u32 %s14416_s24, 3  ;;  %p872_p2 = scmp.lt.s32.totalorder %s15084_s20, 1 }
  0x81   : > { %950 = vmatpush.bf16.msra.mxu0 %v12471_v4  ;;  %v12469_v6 = vld [vmem:[#allocation3 + $0x28] sm:$0xff]  ;;  %v12468_v7 = vld [vmem:[#allocation3 + $0x20] sm:$0xff]  ;;  %v12467_v8 = vld [vmem:[#allocation3 + $0x18] sm:$0xff]  ;;  %s14871_s26 = scalar_lea.vmem [#allocation27], %s8873_s17  ;;  %vm8410_vm12 = vcmask 7168   ;;  %s15085_s23 = sld [smem:[#allocation52_spill]] }
  0x82   : > { %v9150_v9 = vld [vmem:[#allocation6 + $0x1e0] sm:$0xf]  ;;  %v12534_v10 = vld [vmem:[#allocation6 + $0x1ec] sm:$0xf0]  ;;  %v12465_v25 = vld [vmem:[#allocation3 + $0x8] sm:$0xff]  ;;  %s14952_s6 = scalar_select %p872_p2, %s15084_s20, 1 }
  0x83   : > { %v9134_v11 = vld [vmem:[#allocation6 + $0x1c0] sm:$0xf]  ;;  %v12466_v12 = vld [vmem:[#allocation3 + $0x10] sm:$0xff]  ;;  %v9151_v13 = vor.u32 %v12534_v10, %v9150_v9  ;;  %v881_v40 = vld [vmem:[%s14419_s19 + $0x8] sm:$0xff]  ;;  %s12461_s28 = sshll.u32 %s15084_s20, 3  ;;  %s15087_s2 = sld [smem:[#allocation51_spill]] }
  0x84   : > { %v12530_v14 = vld [vmem:[#allocation6 + $0x1cc] sm:$0xf0]  ;;  %v9278_v15 = vld [vmem:[#allocation6 + $0x2e0] sm:$0xf]  ;;  %s15053_s22 = sshll.u32 %s14952_s6, 3  ;;  %s8569_s16 = sshll.u32 %s14871_s26, 4  ;;  %s8570_s16 = int_to_ptr.vmem [resolvable:$true] %s8569_s16 }
  0x85   : > { %951 = vmatpush.bf16.msra.mxu0 %v12470_v5  ;;  %v12566_v16 = vld [vmem:[#allocation6 + $0x2ec] sm:$0xf0]  ;;  %1764 = vmatpush.bf16.msra.mxu2 %v9151_v13  ;;  %v9135_v17 = vor.u32 %v12530_v14, %v9134_v11  ;;  %v9118_v18 = vld [vmem:[#allocation6 + $0x1a0] sm:$0xf]  ;;  %s8549_s17 = scalar_lea.sflag [#allocation5], %s14416_s24 }
  0x86   : > { %v9279_v19 = vor.u32 %v12566_v16, %v9278_v15  ;;  %v9262_v20 = vld [vmem:[#allocation6 + $0x2c0] sm:$0xf]  ;;  %v12562_v21 = vld [vmem:[#allocation6 + $0x2cc] sm:$0xf0] }
  0x87   : > { %v12526_v22 = vld [vmem:[#allocation6 + $0x1ac] sm:$0xf0]  ;;  %v9022_v23 = vld [vmem:[#allocation6 + $0xe0] sm:$0xf]  ;;  %v9263_v26 = vor.u32 %v12562_v21, %v9262_v20  ;;  %s875_s1 = scalar_lea.vmem %s15085_s23, %s15053_s22 }
  0x88   : > { %v12502_v24 = vld [vmem:[#allocation6 + $0xec] sm:$0xf0]  ;;  %1777 = vmatpush.bf16.msra.mxu3 %v9279_v19  ;;  %v9246_v28 = vld [vmem:[#allocation6 + $0x2a0] sm:$0xf]  ;;  %v9119_v33 = vor.u32 %v12526_v22, %v9118_v18 }
  0x89   : > { %952 = vmatpush.bf16.msra.mxu0 %v12469_v6  ;;  %v9023_v27 = vor.u32 %v12502_v24, %v9022_v23  ;;  %v12558_v29 = vld [vmem:[#allocation6 + $0x2ac] sm:$0xf0]  ;;  %v9006_v30 = vld [vmem:[#allocation6 + $0xc0] sm:$0xf]  ;;  %1765 = vmatpush.bf16.msra.mxu2 %v9135_v17  ;;  %s8567_s21 = scalar_lea.hbm %s15087_s2, %s12461_s28  ;;  %s14066_s20 = scalar_lea.hbm %s15087_s2, 16 }
  0x8a   : > { %v12498_v31 = vld [vmem:[#allocation6 + $0xcc] sm:$0xf0]  ;;  %v12464_v32 = vld [vmem:[#allocation3] sm:$0xff]  ;;  %v9247_v41 = vor.u32 %v12558_v29, %v9246_v28  ;;  %v883_v29 = vld [vmem:[%s14419_s19 + $0x18] sm:$0xff] }
  0x8b   : > { %v9102_v34 = vld [vmem:[#allocation6 + $0x180] sm:$0xf]  ;;  %1751 = vmatpush.bf16.msra.mxu1 %v9023_v27  ;;  %v9007_v35 = vor.u32 %v12498_v31, %v9006_v30  ;;  %v12522_v36 = vld [vmem:[#allocation6 + $0x18c] sm:$0xf0]  ;;  %v12532_v30 = vld [vmem:[#allocation6 + $0x1e4] sm:$0xf] }
  0x8c   : > { %v8990_v37 = vld [vmem:[#allocation6 + $0xa0] sm:$0xf]  ;;  %v12494_v38 = vld [vmem:[#allocation6 + $0xac] sm:$0xf0]  ;;  %1778 = vmatpush.bf16.msra.mxu3 %v9263_v26  ;;  %v9103_v46 = vor.u32 %v12522_v36, %v9102_v34  ;;  %v9152_v31 = vld [vmem:[#allocation6 + $0x1f0] sm:$0xf0] }
  0x8d   : > { %953 = vmatpush.bf16.msra.mxu0 %v12468_v7  ;;  %v880_v39 = vld [vmem:[%s14419_s19] sm:$0xff]  ;;  %v12554_v43 = vld [vmem:[#allocation6 + $0x28c] sm:$0xf0]  ;;  %1766 = vmatpush.bf16.msra.mxu2 %v9119_v33  ;;  %v8991_v49 = vor.u32 %v12494_v38, %v8990_v37  ;;  %v9280_v38 = vld [vmem:[#allocation6 + $0x2f0] sm:$0xf0] }
  0x8e   : > { %v9230_v42 = vld [vmem:[#allocation6 + $0x280] sm:$0xf]  ;;  %v12598_v45 = vld [vmem:[#allocation6 + $0x3ec] sm:$0xf0]  ;;  %v900_v51 = vpack.c.bf16 %v881_v40, %v880_v39 }
  0x8f   : > { %v9406_v44 = vld [vmem:[#allocation6 + $0x3e0] sm:$0xf]  ;;  %v12518_v48 = vld [vmem:[#allocation6 + $0x16c] sm:$0xf0]  ;;  %1752 = vmatpush.bf16.msra.mxu1 %v9007_v35  ;;  %v9231_v55 = vor.u32 %v12554_v43, %v9230_v42  ;;  %v12564_v35 = vld [vmem:[#allocation6 + $0x2e4] sm:$0xf]  ;;  %v9155_v43 = vor.u32 %v12532_v30, %v9152_v31 }
  0x90   : > { %v9086_v47 = vld [vmem:[#allocation6 + $0x160] sm:$0xf]  ;;  %v9407_v50 = vor.u32 %v12598_v45, %v9406_v44  ;;  %v12490_v53 = vld [vmem:[#allocation6 + $0x8c] sm:$0xf0]  ;;  %1779 = vmatpush.bf16.msra.mxu3 %v9247_v41  ;;  %v12528_v44 = vld [vmem:[#allocation6 + $0x1c4] sm:$0xf] }
  0x91   : > { %954 = vmatpush.bf16.msra.mxu0 %v12467_v8  ;;  %v8974_v52 = vld [vmem:[#allocation6 + $0x80] sm:$0xf]  ;;  %v12594_v56 = vld [vmem:[#allocation6 + $0x3cc] sm:$0xf0]  ;;  %1767 = vmatpush.bf16.msra.mxu2 %v9103_v46  ;;  %v9087_v60 = vor.u32 %v12518_v48, %v9086_v47  ;;  %v9136_v47 = vld [vmem:[#allocation6 + $0x1d0] sm:$0xf0] }
  0x92   : > { %v9390_v54 = vld [vmem:[#allocation6 + $0x3c0] sm:$0xf]  ;;  %v12550_v58 = vld [vmem:[#allocation6 + $0x26c] sm:$0xf0]  ;;  %v8975_v62 = vor.u32 %v12490_v53, %v8974_v52  ;;  %v12560_v52 = vld [vmem:[#allocation6 + $0x2c4] sm:$0xf] }
  0x93   : > { %v9214_v57 = vld [vmem:[#allocation6 + $0x260] sm:$0xf]  ;;  %v9391_v59 = vor.u32 %v12594_v56, %v9390_v54  ;;  %1753 = vmatpush.bf16.msra.mxu1 %v8991_v49  ;;  %v12590_v0 = vld [vmem:[#allocation6 + $0x3ac] sm:$0xf0]  ;;  %v12500_v49 = vld [vmem:[#allocation6 + $0xe4] sm:$0xf] }
  0x94   : > { %v9070_v61 = vld [vmem:[#allocation6 + $0x140] sm:$0xf]  ;;  %v12514_v1 = vld [vmem:[#allocation6 + $0x14c] sm:$0xf0]  ;;  %1780 = vmatpush.bf16.msra.mxu3 %v9231_v55  ;;  %v9215_v4 = vor.u32 %v12550_v58, %v9214_v57  ;;  %v9264_v54 = vld [vmem:[#allocation6 + $0x2d0] sm:$0xf0]  ;;  %v9139_v58 = vor.u32 %v12528_v44, %v9136_v47 }
  0x95   : > { %955 = vmatpush.bf16.msra.mxu0 %v12466_v12  ;;  %v9374_v63 = vld [vmem:[#allocation6 + $0x3a0] sm:$0xf]  ;;  %v12486_v3 = vld [vmem:[#allocation6 + $0x6c] sm:$0xf0]  ;;  %1768 = vmatpush.bf16.msra.mxu2 %v9087_v60  ;;  %v9071_v8 = vor.u32 %v12514_v1, %v9070_v61  ;;  %v9120_v61 = vld [vmem:[#allocation6 + $0x1b0] sm:$0xf0] }
  0x96   : > { %v8958_v2 = vld [vmem:[#allocation6 + $0x60] sm:$0xf]  ;;  %v12546_v6 = vld [vmem:[#allocation6 + $0x24c] sm:$0xf0]  ;;  %v9375_v7 = vor.u32 %v12590_v0, %v9374_v63  ;;  %v9008_v63 = vld [vmem:[#allocation6 + $0xd0] sm:$0xf0]  ;;  %v9267_v0 = vor.u32 %v12560_v52, %v9264_v54 }
  0x97   : > { %v9198_v5 = vld [vmem:[#allocation6 + $0x240] sm:$0xf]  ;;  %1754 = vmatpush.bf16.msra.mxu1 %v8975_v62  ;;  %v8959_v10 = vor.u32 %v12486_v3, %v8958_v2  ;;  %v12586_v12 = vld [vmem:[#allocation6 + $0x38c] sm:$0xf0]  ;;  %v12496_v62 = vld [vmem:[#allocation6 + $0xc4] sm:$0xf] }
  0x98   : > { %v9054_v9 = vld [vmem:[#allocation6 + $0x120] sm:$0xf]  ;;  %v12510_v13 = vld [vmem:[#allocation6 + $0x12c] sm:$0xf0]  ;;  %1781 = vmatpush.bf16.msra.mxu3 %v9215_v4  ;;  %v9199_v16 = vor.u32 %v12546_v6, %v9198_v5  ;;  %v12556_v1 = vld [vmem:[#allocation6 + $0x2a4] sm:$0xf] }
  0x99   : > { %956 = vmatpush.bf16.msra.mxu0 %v12465_v25  ;;  %v9358_v11 = vld [vmem:[#allocation6 + $0x380] sm:$0xf]  ;;  %v12482_v15 = vld [vmem:[#allocation6 + $0x4c] sm:$0xf0]  ;;  %1769 = vmatpush.bf16.msra.mxu2 %v9071_v8  ;;  %v9055_v21 = vor.u32 %v12510_v13, %v9054_v9  ;;  %v9248_v3 = vld [vmem:[#allocation6 + $0x2b0] sm:$0xf0]  ;;  %v9011_v8 = vor.u32 %v12496_v62, %v9008_v63 }
  0x9a   : > { %v8942_v14 = vld [vmem:[#allocation6 + $0x40] sm:$0xf]  ;;  %v12542_v18 = vld [vmem:[#allocation6 + $0x22c] sm:$0xf0]  ;;  %v9359_v19 = vor.u32 %v12586_v12, %v9358_v11  ;;  %v12596_v9 = vld [vmem:[#allocation6 + $0x3e4] sm:$0xf] }
  0x9b   : > { %v9182_v17 = vld [vmem:[#allocation6 + $0x220] sm:$0xf]  ;;  %v882_v20 = vld [vmem:[%s14419_s19 + $0x10] sm:$0xff]  ;;  %1755 = vmatpush.bf16.msra.mxu1 %v8959_v10  ;;  %v8943_v23 = vor.u32 %v12482_v15, %v8942_v14  ;;  %v12492_v12 = vld [vmem:[#allocation6 + $0xa4] sm:$0xf]  ;;  %v9251_v14 = vor.u32 %v12556_v1, %v9248_v3  ;;  %s8571_s19 = sshll.u32 %s8567_s21, 4  ;;  %s8572_s19 = int_to_ptr.hbm [resolvable:$true] %s8571_s19 }
  0x9c   : > { %v9038_v22 = vld [vmem:[#allocation6 + $0x100] sm:$0xf]  ;;  %v12582_v25 = vld [vmem:[#allocation6 + $0x36c] sm:$0xf0]  ;;  %1782 = vmatpush.bf16.msra.mxu3 %v9199_v16  ;;  %v901_v42 = vpack.c.bf16 %v883_v29, %v882_v20  ;;  %v9408_v10 = vld [vmem:[#allocation6 + $0x3f0] sm:$0xf0] }
  0x9d   : > { %957 = vmatpush.bf16.msra.mxu0 %v12464_v32  ;;  %v9342_v24 = vld [vmem:[#allocation6 + $0x360] sm:$0xf]  ;;  %v12506_v26 = vld [vmem:[#allocation6 + $0x10c] sm:$0xf0]  ;;  %v9183_v32 = vor.u32 %v12542_v18, %v9182_v17  ;;  %1770 = vmatpush.bf16.msra.mxu2 %v9055_v21  ;;  %v9104_v11 = vld [vmem:[#allocation6 + $0x190] sm:$0xf0]  ;;  %v9411_v18 = vor.u32 %v12596_v9, %v9408_v10 }
  0x9e   : > { %v8926_v27 = vld [vmem:[#allocation6 + $0x20] sm:$0xf]  ;;  %v12478_v28 = vld [vmem:[#allocation6 + $0x2c] sm:$0xf0]  ;;  %v9343_v36 = vor.u32 %v12582_v25, %v9342_v24  ;;  %v9039_v37 = vor.u32 %v12506_v26, %v9038_v22  ;;  %v8992_v13 = vld [vmem:[#allocation6 + $0xb0] sm:$0xf0] }
  0x9f   : > { %v9166_v33 = vld [vmem:[#allocation6 + $0x200] sm:$0xf]  ;;  %v12538_v34 = vld [vmem:[#allocation6 + $0x20c] sm:$0xf0]  ;;  %1756 = vmatpush.bf16.msra.mxu1 %v8943_v23  ;;  %v8927_v39 = vor.u32 %v12478_v28, %v8926_v27  ;;  %v12552_v16 = vld [vmem:[#allocation6 + $0x284] sm:$0xf]  ;;  %v8995_v20 = vor.u32 %v12492_v12, %v8992_v13 }
  0xa0   : > { %958 = vmatmul.bf16.vlgmr.msra.gmra.mxu0 %v900_v51  ;;  %v9326_v40 = vld [vmem:[#allocation6 + $0x340] sm:$0xf]  ;;  %v12578_v41 = vld [vmem:[#allocation6 + $0x34c] sm:$0xf0]  ;;  %1783 = vmatpush.bf16.msra.mxu3 %v9183_v32  ;;  %v9167_v48 = vor.u32 %v12538_v34, %v9166_v33  ;;  %v9283_v51 = vor.u32 %v12564_v35, %v9280_v38  ;;  %v9232_v17 = vld [vmem:[#allocation6 + $0x290] sm:$0xf0] }
  0xa1   : > { %1790 = vmatpush.bf16.msrb.mxu0 %v9407_v50  ;;  %v8910_v45 = vld [vmem:[#allocation6] sm:$0xf]  ;;  %v12474_v46 = vld [vmem:[#allocation6 + $0xc] sm:$0xf0]  ;;  %v9024_v50 = vld [vmem:[#allocation6 + $0xf0] sm:$0xf0]  ;;  %v9327_v53 = vor.u32 %v12578_v41, %v9326_v40  ;;  %1771 = vmatpush.bf16.msra.mxu2 %v9039_v37  ;;  %v9235_v23 = vor.u32 %v12552_v16, %v9232_v17 }
  0xa2   : > { %v8911_v55 = vor.u32 %v12474_v46, %v8910_v45  ;;  %v9310_v56 = vld [vmem:[#allocation6 + $0x320] sm:$0xf]  ;;  %v12574_v57 = vld [vmem:[#allocation6 + $0x32c] sm:$0xf0]  ;;  %v9027_v60 = vor.u32 %v12500_v49, %v9024_v50  ;;  %v12516_v21 = vld [vmem:[#allocation6 + $0x164] sm:$0xf] }
  0xa3   : > { %1757 = vmatpush.bf16.msra.mxu1 %v8927_v39  ;;  %v9311_v2 = vor.u32 %v12574_v57, %v9310_v56  ;;  %v9294_v4 = vld [vmem:[#allocation6 + $0x300] sm:$0xf]  ;;  %v12570_v5 = vld [vmem:[#allocation6 + $0x30c] sm:$0xf0]  ;;  %v9088_v22 = vld [vmem:[#allocation6 + $0x170] sm:$0xf0] }
  0xa4   : > { %1784 = vmatpush.bf16.msra.mxu3 %v9167_v48  ;;  %v9295_v15 = vor.u32 %v12570_v5, %v9294_v4  ;;  %v12548_v24 = vld [vmem:[#allocation6 + $0x264] sm:$0xf]  ;;  %v9216_v25 = vld [vmem:[#allocation6 + $0x270] sm:$0xf0]  ;;  %v9091_v26 = vor.u32 %v12516_v21, %v9088_v22  ;;  %s14060_s25 = sshra.s32 %s8572_s19, 4  ;;  %s14061_s25 = int_to_ptr.hbm [resolvable:$true] %s14060_s25 }
  0xa5   : > { %1791 = vmatpush.bf16.msrb.mxu0 %v9391_v59  ;;  %1816 = vmatpush.bf16.msrb.mxu2 %v9155_v43  ;;  %v12524_v59 = vld [vmem:[#allocation6 + $0x1a4] sm:$0xf]  ;;  %v9072_v28 = vld [vmem:[#allocation6 + $0x150] sm:$0xf0]  ;;  %v9219_v29 = vor.u32 %v12548_v24, %v9216_v25  ;;  %v12531_v24 = vld [vmem:[#allocation6 + $0x1d4] sm:$0xf0]  ;;  %p14067_p7 = scmp.lt.s32.totalorder %s14061_s25, %s15087_s2 }
  0xa6   : > { %v9123_v6 = vor.u32 %v12524_v59, %v9120_v61  ;;  %v12512_v27 = vld [vmem:[#allocation6 + $0x144] sm:$0xf]  ;;  %v9056_v32 = vld [vmem:[#allocation6 + $0x130] sm:$0xf0]  ;;  %s14062_s18 = scalar_lea.hbm %s14061_s25, 8 }
  0xa7   : > { %1758 = vmatpush.bf16.msra.mxu1 %v8911_v55  ;;  %v9075_v30 = vor.u32 %v12512_v27, %v9072_v28  ;;  %v12508_v31 = vld [vmem:[#allocation6 + $0x124] sm:$0xf]  ;;  %v8976_v35 = vld [vmem:[#allocation6 + $0x90] sm:$0xf0]  ;;  %v12527_v27 = vld [vmem:[#allocation6 + $0x1b4] sm:$0xf0]  ;;  %p14063_p3 = scmp.ne.s32.totalorder %s14061_s25, %s14062_s18  ;;  %p14068_p8 = scmp.lt.s32.totalorder %s14066_s20, %s14062_s18 }
  0xa8   : > { %1829 = vmatpush.bf16.msrb.mxu3 %v9283_v51  ;;  %v9059_v33 = vor.u32 %v12508_v31, %v9056_v32  ;;  %v12488_v34 = vld [vmem:[#allocation6 + $0x84] sm:$0xf]  ;;  %v9040_v38 = vld [vmem:[#allocation6 + $0x110] sm:$0xf0]  ;;  %v9286_v28 = vld [vmem:[#allocation6 + $0x2e8] sm:$0xf] }
  0xa9   : > { %1792 = vmatpush.bf16.msrb.mxu0 %v9375_v7  ;;  %1817 = vmatpush.bf16.msrb.mxu2 %v9139_v58  ;;  %v12520_v7 = vld [vmem:[#allocation6 + $0x184] sm:$0xf]  ;;  %v8979_v37 = vor.u32 %v12488_v34, %v8976_v35  ;;  %v9200_v40 = vld [vmem:[#allocation6 + $0x250] sm:$0xf0]  ;;  %v12523_v35 = vld [vmem:[#allocation6 + $0x194] sm:$0xf0]  ;;  %p14064_p4 = pnand %p14063_p3, %p14305_p6  ;;  %p14069_p9 = por %p14068_p8, %p14067_p7 }
  0xaa   : > { %v12544_v39 = vld [vmem:[#allocation6 + $0x244] sm:$0xf]  ;;  %v9392_v44 = vld [vmem:[#allocation6 + $0x3d0] sm:$0xf0] }
  0xab   : > { %1803 = vmatpush.bf16.msrb.mxu1 %v9027_v60  ;;  %v12592_v43 = vld [vmem:[#allocation6 + $0x3c4] sm:$0xf]  ;;  %v8960_v47 = vld [vmem:[#allocation6 + $0x70] sm:$0xf0]  ;;  %p14065_p5 = pneg %p14064_p4 }
  0xac   : > { %1830 = vmatpush.bf16.msrb.mxu3 %v9267_v0  ;;  %v9395_v45 = vor.u32 %v12592_v43, %v9392_v44  ;;  %v12484_v46 = vld [vmem:[#allocation6 + $0x64] sm:$0xf]  ;;  %v9184_v50 = vld [vmem:[#allocation6 + $0x230] sm:$0xf0]  ;;  %v12519_v43 = vld [vmem:[#allocation6 + $0x174] sm:$0xf0] }
  0xad   : > { %1793 = vmatpush.bf16.msrb.mxu0 %v9359_v19  ;;  %1818 = vmatpush.bf16.msrb.mxu2 %v9123_v6  ;;  %v9107_v19 = vor.u32 %v12520_v7, %v9104_v11  ;;  %v12540_v48 = vld [vmem:[#allocation6 + $0x224] sm:$0xf]  ;;  %v8963_v49 = vor.u32 %v12484_v46, %v8960_v47  ;;  %v9376_v52 = vld [vmem:[#allocation6 + $0x3b0] sm:$0xf0]  ;;  %v9254_v44 = vld [vmem:[#allocation6 + $0x2a8] sm:$0xf]  ;;  %p14070_p11 = pnand %p14069_p9, %p14065_p5 }
  0xae   : > { %v12588_v51 = vld [vmem:[#allocation6 + $0x3a4] sm:$0xf]  ;;  %v8944_v56 = vld [vmem:[#allocation6 + $0x50] sm:$0xf0] }
  0xaf   : > { %1804 = vmatpush.bf16.msrb.mxu1 %v9011_v8  ;;  %v9379_v54 = vor.u32 %v12588_v51, %v9376_v52  ;;  %v12480_v55 = vld [vmem:[#allocation6 + $0x44] sm:$0xf]  ;;  %v9168_v59 = vld [vmem:[#allocation6 + $0x210] sm:$0xf0]  ;;  %v12499_v52 = vld [vmem:[#allocation6 + $0xd4] sm:$0xf0] }
  0xb0   : > { %963 = vmatmul.bf16.gmra.mxu0 %v901_v42  ;;  %1831 = vmatpush.bf16.msrb.mxu3 %v9251_v14  ;;  %v9203_v42 = vor.u32 %v12544_v39, %v9200_v40  ;;  %v12536_v57 = vld [vmem:[#allocation6 + $0x204] sm:$0xf]  ;;  %v8947_v58 = vor.u32 %v12480_v55, %v8944_v56  ;;  %v9360_v61 = vld [vmem:[#allocation6 + $0x390] sm:$0xf0]  ;;  %v9030_v40 = vld [vmem:[#allocation6 + $0xe8] sm:$0xf] }
  0xb1   : > { %1794 = vmatpush.bf16.msrb.mxu0 %v9343_v36  ;;  %1819 = vmatpush.bf16.msrb.mxu2 %v9107_v19  ;;  %v12504_v36 = vld [vmem:[#allocation6 + $0x104] sm:$0xf]  ;;  %v9171_v62 = vor.u32 %v12536_v57, %v9168_v59  ;;  %v8928_v1 = vld [vmem:[#allocation6 + $0x30] sm:$0xf0]  ;;  %v12535_v19 = vld [vmem:[#allocation6 + $0x1f4] sm:$0xf0] }
  0xb2   : > { %v9043_v41 = vor.u32 %v12504_v36, %v9040_v38  ;;  %v12584_v60 = vld [vmem:[#allocation6 + $0x384] sm:$0xf]  ;;  %v9344_v4 = vld [vmem:[#allocation6 + $0x370] sm:$0xf0]  ;;  %v9270_v36 = vld [vmem:[#allocation6 + $0x2c8] sm:$0xf] }
  0xb3   : > { %1805 = vmatpush.bf16.msrb.mxu1 %v8995_v20  ;;  %v9363_v63 = vor.u32 %v12584_v60, %v9360_v61  ;;  %v12476_v0 = vld [vmem:[#allocation6 + $0x24] sm:$0xf]  ;;  %v8912_v7 = vld [vmem:[#allocation6 + $0x10] sm:$0xf0]  ;;  %v9238_v55 = vld [vmem:[#allocation6 + $0x288] sm:$0xf] }
  0xb4   : > { %1832 = vmatpush.bf16.msrb.mxu3 %v9235_v23  ;;  %v8931_v3 = vor.u32 %v12476_v0, %v8928_v1  ;;  %v12472_v6 = vld [vmem:[#allocation6 + $0x4] sm:$0xf]  ;;  %v9328_v10 = vld [vmem:[#allocation6 + $0x350] sm:$0xf0]  ;;  %v9142_v23 = vld [vmem:[#allocation6 + $0x1c8] sm:$0xf] }
  0xb5   : > { %1795 = vmatpush.bf16.msrb.mxu0 %v9327_v53  ;;  %1820 = vmatpush.bf16.msrb.mxu2 %v9091_v26  ;;  %v9187_v53 = vor.u32 %v12540_v48, %v9184_v50  ;;  %v12576_v8 = vld [vmem:[#allocation6 + $0x344] sm:$0xf]  ;;  %v8915_v9 = vor.u32 %v12472_v6, %v8912_v7  ;;  %v9312_v13 = vld [vmem:[#allocation6 + $0x330] sm:$0xf0]  ;;  %v9143_v25 = vor.u32 %v12531_v24, %v9142_v23  ;;  %v9126_v26 = vld [vmem:[#allocation6 + $0x1a8] sm:$0xf] }
  0xb6   : > { %v9331_v11 = vor.u32 %v12576_v8, %v9328_v10  ;;  %v12572_v12 = vld [vmem:[#allocation6 + $0x324] sm:$0xf]  ;;  %v9296_v16 = vld [vmem:[#allocation6 + $0x310] sm:$0xf0]  ;;  %v9127_v31 = vor.u32 %v12527_v27, %v9126_v26  ;;  %v12555_v56 = vld [vmem:[#allocation6 + $0x294] sm:$0xf0] }
  0xb7   : > { %1806 = vmatpush.bf16.msrb.mxu1 %v8979_v37  ;;  %v9315_v14 = vor.u32 %v12572_v12, %v9312_v13  ;;  %v12563_v37 = vld [vmem:[#allocation6 + $0x2d4] sm:$0xf0]  ;;  %v8998_v59 = vld [vmem:[#allocation6 + $0xa8] sm:$0xf]  ;;  %v9239_v61 = vor.u32 %v12555_v56, %v9238_v55 }
  0xb8   : > { %1833 = vmatpush.bf16.msrb.mxu3 %v9219_v29  ;;  %v12567_v29 = vld [vmem:[#allocation6 + $0x2f4] sm:$0xf0]  ;;  %v9271_v39 = vor.u32 %v12563_v37, %v9270_v36  ;;  %v9222_v0 = vld [vmem:[#allocation6 + $0x268] sm:$0xf]  ;;  %v9144_v36 = vld [vmem:[#allocation6 + $0x1d8] sm:$0xf0] }
  0xb9   : > { %1796 = vmatpush.bf16.msrb.mxu0 %v9311_v2  ;;  %1821 = vmatpush.bf16.msrb.mxu2 %v9075_v30  ;;  %v12580_v2 = vld [vmem:[#allocation6 + $0x364] sm:$0xf]  ;;  %v9287_v32 = vor.u32 %v12567_v29, %v9286_v28  ;;  %v12495_v60 = vld [vmem:[#allocation6 + $0xb4] sm:$0xf0]  ;;  %v8982_v7 = vld [vmem:[#allocation6 + $0x88] sm:$0xf] }
  0xba   : > { %v9347_v5 = vor.u32 %v12580_v2, %v9344_v4  ;;  %v12551_v1 = vld [vmem:[#allocation6 + $0x274] sm:$0xf0]  ;;  %v9414_v2 = vld [vmem:[#allocation6 + $0x3e8] sm:$0xf] }
  0xbb   : > { %1807 = vmatpush.bf16.msrb.mxu1 %v8963_v49  ;;  %v9014_v49 = vld [vmem:[#allocation6 + $0xc8] sm:$0xf]  ;;  %v12491_v8 = vld [vmem:[#allocation6 + $0x94] sm:$0xf0]  ;;  %v9223_v10 = vor.u32 %v12551_v1, %v9222_v0  ;;  %v12561_v0 = vld [vmem:[#allocation6 + $0x2cc] sm:$0xf] }
  0xbc   : > { %1834 = vmatpush.bf16.msrb.mxu3 %v9203_v42  ;;  %v9094_v42 = vld [vmem:[#allocation6 + $0x168] sm:$0xf]  ;;  %v9015_v57 = vor.u32 %v12499_v52, %v9014_v49  ;;  %v12507_v13 = vld [vmem:[#allocation6 + $0x114] sm:$0xf0]  ;;  %v9128_v49 = vld [vmem:[#allocation6 + $0x1b8] sm:$0xf0] }
  0xbd   : > { %1797 = vmatpush.bf16.msrb.mxu0 %v9295_v15  ;;  %1822 = vmatpush.bf16.msrb.mxu2 %v9059_v33  ;;  %v12568_v15 = vld [vmem:[#allocation6 + $0x304] sm:$0xf]  ;;  %v9110_v33 = vld [vmem:[#allocation6 + $0x188] sm:$0xf]  ;;  %v9095_v48 = vor.u32 %v12519_v43, %v9094_v42  ;;  %v12487_v27 = vld [vmem:[#allocation6 + $0x74] sm:$0xf0] }
  0xbe   : > { %v9299_v17 = vor.u32 %v12568_v15, %v9296_v16  ;;  %v9111_v38 = vor.u32 %v12523_v35, %v9110_v33  ;;  %v9046_v12 = vld [vmem:[#allocation6 + $0x108] sm:$0xf]  ;;  %v12547_v15 = vld [vmem:[#allocation6 + $0x254] sm:$0xf0]  ;;  %v12529_v35 = vld [vmem:[#allocation6 + $0x1cc] sm:$0xf] }
  0xbf   : > { %1808 = vmatpush.bf16.msrb.mxu1 %v8947_v58  ;;  %v9398_v16 = vld [vmem:[#allocation6 + $0x3c8] sm:$0xf]  ;;  %v9047_v23 = vor.u32 %v12507_v13, %v9046_v12  ;;  %v12591_v33 = vld [vmem:[#allocation6 + $0x3b4] sm:$0xf0]  ;;  %v9288_v52 = vld [vmem:[#allocation6 + $0x2f8] sm:$0xf0] }
  0xc0   : > { %1835 = vmatpush.bf16.msrb.mxu3 %v9187_v53  ;;  %v9078_v53 = vld [vmem:[#allocation6 + $0x148] sm:$0xf]  ;;  %v12539_v43 = vld [vmem:[#allocation6 + $0x214] sm:$0xf0]  ;;  %v9272_v1 = vld [vmem:[#allocation6 + $0x2d8] sm:$0xf0] }
  0xc1   : > { %1842 = vmatpush.bf16.msra.mxu0 %v9411_v18  ;;  %1823 = vmatpush.bf16.msrb.mxu2 %v9043_v41  ;;  %v9158_v18 = vld [vmem:[#allocation6 + $0x1e8] sm:$0xf]  ;;  %v12503_v41 = vld [vmem:[#allocation6 + $0xf4] sm:$0xf0]  ;;  %v12501_v12 = vld [vmem:[#allocation6 + $0xec] sm:$0xf] }
  0xc2   : > { %v9159_v21 = vor.u32 %v12535_v19, %v9158_v18  ;;  %v9031_v47 = vor.u32 %v12503_v41, %v9030_v40  ;;  %v12533_v18 = vld [vmem:[#allocation6 + $0x1ec] sm:$0xf]  ;;  %v9160_v19 = vld [vmem:[#allocation6 + $0x1f8] sm:$0xf0]  ;;  %v8966_v26 = vld [vmem:[#allocation6 + $0x68] sm:$0xf] }
  0xc3   : > { %1809 = vmatpush.bf16.msrb.mxu1 %v8931_v3  ;;  %v12599_v3 = vld [vmem:[#allocation6 + $0x3f4] sm:$0xf0]  ;;  %v9190_v28 = vld [vmem:[#allocation6 + $0x228] sm:$0xf]  ;;  %v9163_v29 = vor.u32 %v12533_v18, %v9160_v19  ;;  %v8967_v37 = vor.u32 %v12487_v27, %v8966_v26  ;;  %v9032_v13 = vld [vmem:[#allocation6 + $0xf8] sm:$0xf0] }
  0xc4   : > { %1836 = vmatpush.bf16.msrb.mxu3 %v9171_v62  ;;  %v9062_v62 = vld [vmem:[#allocation6 + $0x128] sm:$0xf]  ;;  %v12483_v41 = vld [vmem:[#allocation6 + $0x54] sm:$0xf0]  ;;  %v12497_v27 = vld [vmem:[#allocation6 + $0xcc] sm:$0xf] }
  0xc5   : > { %1843 = vmatpush.bf16.msra.mxu0 %v9395_v45  ;;  %v12559_v45 = vld [vmem:[#allocation6 + $0x2b4] sm:$0xf0]  ;;  %v9174_v42 = vld [vmem:[#allocation6 + $0x208] sm:$0xf] }
  0xc6   : > { %v9255_v51 = vor.u32 %v12559_v45, %v9254_v44  ;;  %v9147_v44 = vor.u32 %v12529_v35, %v9144_v36  ;;  %v9366_v45 = vld [vmem:[#allocation6 + $0x388] sm:$0xf] }
  0xc7   : > { %1810 = vmatpush.bf16.msrb.mxu1 %v8915_v9  ;;  %v8934_v56 = vld [vmem:[#allocation6 + $0x28] sm:$0xf] }
  0xc9   : > { %1844 = vmatpush.bf16.msra.mxu0 %v9379_v54  ;;  %v12515_v54 = vld [vmem:[#allocation6 + $0x154] sm:$0xf0] }
  0xca   : > { %v9079_v58 = vor.u32 %v12515_v54, %v9078_v53  ;;  %v9175_v54 = vor.u32 %v12539_v43, %v9174_v42  ;;  %v9000_v42 = vld [vmem:[#allocation6 + $0xb8] sm:$0xf0]  ;;  %v12509_v43 = vld [vmem:[#allocation6 + $0x12c] sm:$0xf] }
  0xcd   : > { %1845 = vmatpush.bf16.msra.mxu0 %v9363_v63  ;;  %v12511_v63 = vld [vmem:[#allocation6 + $0x134] sm:$0xf0] }
  0xce   : > { %v9063_v6 = vor.u32 %v12511_v63, %v9062_v62  ;;  %v12521_v62 = vld [vmem:[#allocation6 + $0x18c] sm:$0xf]  ;;  %v9112_v63 = vld [vmem:[#allocation6 + $0x198] sm:$0xf0] }
  0xd1   : > { %1846 = vmatpush.bf16.msra.mxu0 %v9347_v5  ;;  %v8999_v5 = vor.u32 %v12495_v60, %v8998_v59  ;;  %v9350_v60 = vld [vmem:[#allocation6 + $0x368] sm:$0xf] }
  0xd5   : > { %1847 = vmatpush.bf16.msra.mxu0 %v9331_v11  ;;  %v9415_v11 = vor.u32 %v12599_v3, %v9414_v2  ;;  %v8918_v3 = vld [vmem:[#allocation6 + $0x8] sm:$0xf] }
  0xd9   : > { %1848 = vmatpush.bf16.msra.mxu0 %v9315_v14  ;;  %v9206_v14 = vld [vmem:[#allocation6 + $0x248] sm:$0xf] }
  0xda   : > { %v9207_v24 = vor.u32 %v12547_v15, %v9206_v14  ;;  %v12517_v14 = vld [vmem:[#allocation6 + $0x16c] sm:$0xf]  ;;  %v9096_v15 = vld [vmem:[#allocation6 + $0x178] sm:$0xf0] }
  0xdd   : > { %1849 = vmatpush.bf16.msra.mxu0 %v9299_v17  ;;  %v12595_v17 = vld [vmem:[#allocation6 + $0x3d4] sm:$0xf0] }
 0x11d   : > { %v14457_v20 = vpop.f32.mrf.mxu0 }
 0x11e   : > { %v14461_v22 = vpack.c.bf16 %v14457_v20, %v14457_v20 }
 0x120   : > { %1772 = vmatmul.bf16.vlgmr.msra.gmra.mxu2 %v14461_v22 }
 0x121   : > { %1868 = vmatpush.bf16.msra.mxu2 %v9159_v21  ;;  %v8983_v21 = vor.u32 %v12491_v8, %v8982_v7  ;;  %v9334_v7 = vld [vmem:[#allocation6 + $0x348] sm:$0xf]  ;;  %v12579_v8 = vld [vmem:[#allocation6 + $0x354] sm:$0xf0] }
 0x122   : > { %v9335_v19 = vor.u32 %v12579_v8, %v9334_v7  ;;  %v12541_v7 = vld [vmem:[#allocation6 + $0x22c] sm:$0xf]  ;;  %v9192_v8 = vld [vmem:[#allocation6 + $0x238] sm:$0xf0] }
 0x125   : > { %1869 = vmatpush.bf16.msra.mxu2 %v9143_v25  ;;  %v14464_v30 = vpop.f32.mrf.mxu0  ;;  %v9399_v25 = vor.u32 %v12595_v17, %v9398_v16  ;;  %v12557_v16 = vld [vmem:[#allocation6 + $0x2ac] sm:$0xf]  ;;  %v9256_v17 = vld [vmem:[#allocation6 + $0x2b8] sm:$0xf0] }
 0x126   : > { %v14468_v34 = vpack.c.bf16 %v14464_v30, %v14464_v30  ;;  %v9259_v26 = vor.u32 %v12557_v16, %v9256_v17  ;;  %v9662_v16 = vld [vmem:[#allocation9 + $0x1e0] sm:$0xf]  ;;  %v12662_v17 = vld [vmem:[#allocation9 + $0x1ec] sm:$0xf0] }
 0x128   : > { %1785 = vmatmul.bf16.vlgmr.msra.gmra.mxu3 %v14468_v34 }
 0x129   : > { %1870 = vmatpush.bf16.msra.mxu2 %v9127_v31  ;;  %1881 = vmatpush.bf16.msra.mxu3 %v9287_v32  ;;  %v12543_v31 = vld [vmem:[#allocation6 + $0x234] sm:$0xf0]  ;;  %v9382_v32 = vld [vmem:[#allocation6 + $0x3a8] sm:$0xf] }
 0x12a   : > { %v9383_v40 = vor.u32 %v12591_v33, %v9382_v32  ;;  %v12553_v32 = vld [vmem:[#allocation6 + $0x28c] sm:$0xf]  ;;  %v9240_v33 = vld [vmem:[#allocation6 + $0x298] sm:$0xf0] }
 0x12d   : > { %1871 = vmatpush.bf16.msra.mxu2 %v9111_v38  ;;  %1882 = vmatpush.bf16.msra.mxu3 %v9271_v39  ;;  %v14471_v46 = vpop.f32.mrf.mxu0  ;;  %v8950_v38 = vld [vmem:[#allocation6 + $0x48] sm:$0xf]  ;;  %v9191_v39 = vor.u32 %v12543_v31, %v9190_v28  ;;  %v9016_v28 = vld [vmem:[#allocation6 + $0xd8] sm:$0xf0] }
 0x12e   : > { %v14475_v50 = vpack.c.bf16 %v14471_v46, %v14471_v46  ;;  %v8951_v53 = vor.u32 %v12483_v41, %v8950_v38  ;;  %v9080_v31 = vld [vmem:[#allocation6 + $0x158] sm:$0xf0]  ;;  %v9019_v36 = vor.u32 %v12497_v27, %v9016_v28  ;;  %v12571_v38 = vld [vmem:[#allocation6 + $0x314] sm:$0xf0]  ;;  %v12493_v41 = vld [vmem:[#allocation6 + $0xac] sm:$0xf] }
 0x12f   : > { %v12477_v27 = vld [vmem:[#allocation6 + $0x2c] sm:$0xf] }
 0x130   : > { %1759 = vmatmul.bf16.vlgmr.msra.gmra.mxu1 %v14475_v50  ;;  %1824 = vmatmul.bf16.vlgmr.msrb.gmra.mxu2 %v14461_v22 }
 0x131   : > { %1855 = vmatpush.bf16.msra.mxu1 %v9031_v47  ;;  %1872 = vmatpush.bf16.msra.mxu2 %v9095_v48  ;;  %v12587_v47 = vld [vmem:[#allocation6 + $0x394] sm:$0xf0]  ;;  %v12525_v48 = vld [vmem:[#allocation6 + $0x1ac] sm:$0xf] }
 0x132   : > { %1883 = vmatpush.bf16.msra.mxu3 %v9255_v51  ;;  %v12565_v51 = vld [vmem:[#allocation6 + $0x2ec] sm:$0xf]  ;;  %v9367_v55 = vor.u32 %v12587_v47, %v9366_v45  ;;  %v9224_v47 = vld [vmem:[#allocation6 + $0x278] sm:$0xf0] }
 0x133   : > { %v9291_v59 = vor.u32 %v12565_v51, %v9288_v52  ;;  %v12549_v45 = vld [vmem:[#allocation6 + $0x26c] sm:$0xf]  ;;  %v9003_v52 = vor.u32 %v12493_v41, %v9000_v42  ;;  %v9630_v41 = vld [vmem:[#allocation9 + $0x1a0] sm:$0xf]  ;;  %v12654_v42 = vld [vmem:[#allocation9 + $0x1ac] sm:$0xf0] }
 0x135   : > { %1856 = vmatpush.bf16.msra.mxu1 %v9015_v57  ;;  %1873 = vmatpush.bf16.msra.mxu2 %v9079_v58  ;;  %v14479_v4 = vpop.f32.mrf.mxu0  ;;  %v12479_v57 = vld [vmem:[#allocation6 + $0x34] sm:$0xf0]  ;;  %v9131_v58 = vor.u32 %v12525_v48, %v9128_v49  ;;  %v12597_v48 = vld [vmem:[#allocation6 + $0x3ec] sm:$0xf]  ;;  %v9416_v49 = vld [vmem:[#allocation6 + $0x3f8] sm:$0xf0] }
 0x136   : > { %1884 = vmatpush.bf16.msra.mxu3 %v9239_v61  ;;  %v14483_v9 = vpack.c.bf16 %v14479_v4, %v14479_v4  ;;  %v12583_v61 = vld [vmem:[#allocation6 + $0x374] sm:$0xf0]  ;;  %v8935_v2 = vor.u32 %v12479_v57, %v8934_v56  ;;  %v8984_v56 = vld [vmem:[#allocation6 + $0x98] sm:$0xf0]  ;;  %v12505_v57 = vld [vmem:[#allocation6 + $0x10c] sm:$0xf] }
 0x138   : > { %1798 = vmatmul.bf16.vlgmr.msrb.gmra.mxu0 %v14483_v9  ;;  %1837 = vmatmul.bf16.vlgmr.msrb.gmra.mxu3 %v14468_v34 }
 0x139   : > { %1857 = vmatpush.bf16.msra.mxu1 %v8999_v5  ;;  %1874 = vmatpush.bf16.msra.mxu2 %v9063_v6  ;;  %v9351_v5 = vor.u32 %v12583_v61, %v9350_v60  ;;  %v12475_v6 = vld [vmem:[#allocation6 + $0x14] sm:$0xf0]  ;;  %v12545_v60 = vld [vmem:[#allocation6 + $0x24c] sm:$0xf]  ;;  %v9208_v61 = vld [vmem:[#allocation6 + $0x258] sm:$0xf0] }
 0x13a   : > { %1885 = vmatpush.bf16.msra.mxu3 %v9223_v10  ;;  %1894 = vmatpush.bf16.msrb.mxu0 %v9415_v11  ;;  %v9115_v10 = vor.u32 %v12521_v62, %v9112_v63  ;;  %v9275_v11 = vor.u32 %v12561_v0, %v9272_v1  ;;  %v8919_v18 = vor.u32 %v12475_v6, %v8918_v3  ;;  %v12593_v62 = vld [vmem:[#allocation6 + $0x3cc] sm:$0xf]  ;;  %v9400_v63 = vld [vmem:[#allocation6 + $0x3d8] sm:$0xf0] }
 0x13b   : > { %v12485_v3 = vld [vmem:[#allocation6 + $0x6c] sm:$0xf]  ;;  %v9403_v6 = vor.u32 %v12593_v62, %v9400_v63  ;;  %v9320_v62 = vld [vmem:[#allocation6 + $0x338] sm:$0xf0]  ;;  %v9790_v63 = vld [vmem:[#allocation9 + $0x2e0] sm:$0xf] }
 0x13d   : > { %1858 = vmatpush.bf16.msra.mxu1 %v8983_v21  ;;  %1875 = vmatpush.bf16.msra.mxu2 %v9047_v23  ;;  %v9035_v21 = vor.u32 %v12501_v12, %v9032_v13  ;;  %v9318_v23 = vld [vmem:[#allocation6 + $0x328] sm:$0xf]  ;;  %v12481_v13 = vld [vmem:[#allocation6 + $0x4c] sm:$0xf] }
 0x13e   : > { %1886 = vmatpush.bf16.msra.mxu3 %v9207_v24  ;;  %1895 = vmatpush.bf16.msrb.mxu0 %v9399_v25  ;;  %v12575_v24 = vld [vmem:[#allocation6 + $0x334] sm:$0xf0]  ;;  %v9099_v25 = vor.u32 %v12517_v14, %v9096_v15  ;;  %v9195_v14 = vor.u32 %v12541_v7, %v9192_v8  ;;  %v8952_v15 = vld [vmem:[#allocation6 + $0x58] sm:$0xf0]  ;;  %v12622_v7 = vld [vmem:[#allocation9 + $0xac] sm:$0xf0] }
 0x13f   : > { %v9319_v35 = vor.u32 %v12575_v24, %v9318_v23  ;;  %v9663_v23 = vor.u32 %v12662_v17, %v9662_v16  ;;  %v12585_v24 = vld [vmem:[#allocation6 + $0x38c] sm:$0xf]  ;;  %v9470_v16 = vld [vmem:[#allocation9 + $0x60] sm:$0xf]  ;;  %v12614_v17 = vld [vmem:[#allocation9 + $0x6c] sm:$0xf0] }
 0x140   : > { %1811 = vmatmul.bf16.vlgmr.msrb.gmra.mxu1 %v14475_v50  ;;  %1876 = vmatmul.bf16.vlgmr.msra.gmra.mxu2 %v14461_v22  ;;  %v12569_v8 = vld [vmem:[#allocation6 + $0x30c] sm:$0xf] }
 0x141   : > { %1920 = vmatpush.bf16.msrb.mxu2 %v9163_v29  ;;  %1859 = vmatpush.bf16.msra.mxu1 %v8967_v37  ;;  %v12513_v29 = vld [vmem:[#allocation6 + $0x14c] sm:$0xf]  ;;  %v9302_v37 = vld [vmem:[#allocation6 + $0x308] sm:$0xf] }
 0x142   : > { %1887 = vmatpush.bf16.msra.mxu3 %v9191_v39  ;;  %1896 = vmatpush.bf16.msrb.mxu0 %v9383_v40  ;;  %v9083_v39 = vor.u32 %v12513_v29, %v9080_v31  ;;  %v9243_v40 = vor.u32 %v12553_v32, %v9240_v33  ;;  %v9303_v51 = vor.u32 %v12571_v38, %v9302_v37  ;;  %v8936_v29 = vld [vmem:[#allocation6 + $0x38] sm:$0xf0]  ;;  %v9646_v31 = vld [vmem:[#allocation9 + $0x1c0] sm:$0xf]  ;;  %v12658_v32 = vld [vmem:[#allocation9 + $0x1cc] sm:$0xf0] }
 0x143   : > { %v9352_v37 = vld [vmem:[#allocation6 + $0x378] sm:$0xf0]  ;;  %v8939_v38 = vor.u32 %v12477_v27, %v8936_v29  ;;  %v9422_v27 = vld [vmem:[#allocation9] sm:$0xf]  ;;  %v12628_v29 = vld [vmem:[#allocation9 + $0xe4] sm:$0xf] }
 0x145   : > { %1921 = vmatpush.bf16.msrb.mxu2 %v9147_v44  ;;  %1860 = vmatpush.bf16.msra.mxu1 %v8951_v53  ;;  %v9064_v44 = vld [vmem:[#allocation6 + $0x138] sm:$0xf0] }
 0x146   : > { %1888 = vmatpush.bf16.msra.mxu3 %v9175_v54  ;;  %1897 = vmatpush.bf16.msrb.mxu0 %v9367_v55  ;;  %v9067_v53 = vor.u32 %v12509_v43, %v9064_v44  ;;  %v9227_v54 = vor.u32 %v12549_v45, %v9224_v47  ;;  %v12489_v55 = vld [vmem:[#allocation6 + $0x8c] sm:$0xf]  ;;  %v9534_v44 = vld [vmem:[#allocation9 + $0xe0] sm:$0xf]  ;;  %v12630_v45 = vld [vmem:[#allocation9 + $0xec] sm:$0xf0]  ;;  %v9631_v47 = vor.u32 %v12654_v42, %v9630_v41 }
 0x147   : > { %v8987_v0 = vor.u32 %v12489_v55, %v8984_v56  ;;  %v9614_v55 = vld [vmem:[#allocation9 + $0x180] sm:$0xf]  ;;  %v12650_v56 = vld [vmem:[#allocation9 + $0x18c] sm:$0xf0] }
 0x148   : > { %1850 = vmatmul.bf16.vlgmr.msra.gmra.mxu0 %v14483_v9  ;;  %v12690_v41 = vld [vmem:[#allocation9 + $0x2cc] sm:$0xf0] }
 0x149   : > { %1922 = vmatpush.bf16.msrb.mxu2 %v9131_v58  ;;  %1861 = vmatpush.bf16.msra.mxu1 %v8935_v2  ;;  %v9419_v58 = vor.u32 %v12597_v48, %v9416_v49  ;;  %v9211_v2 = vor.u32 %v12545_v60, %v9208_v61  ;;  %v12577_v48 = vld [vmem:[#allocation6 + $0x34c] sm:$0xf]  ;;  %v9336_v49 = vld [vmem:[#allocation6 + $0x358] sm:$0xf0]  ;;  %v9598_v60 = vld [vmem:[#allocation9 + $0x160] sm:$0xf] }
 0x14a   : > { %1933 = vmatpush.bf16.msrb.mxu3 %v9291_v59  ;;  %1898 = vmatpush.bf16.msrb.mxu0 %v9351_v5  ;;  %v9048_v59 = vld [vmem:[#allocation6 + $0x118] sm:$0xf0]  ;;  %v12646_v61 = vld [vmem:[#allocation9 + $0x16c] sm:$0xf0] }
 0x14b   : > { %1889 = vmatmul.bf16.vlgmr.msra.gmra.mxu3 %v14468_v34  ;;  %v9051_v1 = vor.u32 %v12505_v57, %v9048_v59  ;;  %v8968_v5 = vld [vmem:[#allocation6 + $0x78] sm:$0xf0]  ;;  %v9339_v57 = vor.u32 %v12577_v48, %v9336_v49  ;;  %v9615_v59 = vor.u32 %v12650_v56, %v9614_v55  ;;  %v12686_v48 = vld [vmem:[#allocation9 + $0x2ac] sm:$0xf0]  ;;  %v9742_v56 = vld [vmem:[#allocation9 + $0x280] sm:$0xf] }
 0x14c   : > { %v8971_v12 = vor.u32 %v12485_v3, %v8968_v5  ;;  %v9599_v3 = vor.u32 %v12646_v61, %v9598_v60  ;;  %v12634_v55 = vld [vmem:[#allocation9 + $0x10c] sm:$0xf0]  ;;  %v12616_v60 = vld [vmem:[#allocation9 + $0x84] sm:$0xf]  ;;  %v9488_v61 = vld [vmem:[#allocation9 + $0x90] sm:$0xf0] }
 0x14d   : > { %1923 = vmatpush.bf16.msrb.mxu2 %v9115_v10  ;;  %1862 = vmatpush.bf16.msra.mxu1 %v8919_v18  ;;  %v12589_v10 = vld [vmem:[#allocation6 + $0x3ac] sm:$0xf] }
 0x14e   : > { %1934 = vmatpush.bf16.msrb.mxu3 %v9275_v11  ;;  %1899 = vmatpush.bf16.msrb.mxu0 %v9335_v19  ;;  %v9384_v11 = vld [vmem:[#allocation6 + $0x3b8] sm:$0xf0]  ;;  %v12537_v19 = vld [vmem:[#allocation6 + $0x20c] sm:$0xf] }
 0x14f   : > { %v9387_v18 = vor.u32 %v12589_v10, %v9384_v11  ;;  %v9304_v10 = vld [vmem:[#allocation6 + $0x318] sm:$0xf0] }
 0x150   : > { %1863 = vmatmul.bf16.vlgmr.msra.gmra.mxu1 %v14475_v50 }
 0x151   : > { %1907 = vmatpush.bf16.msrb.mxu1 %v9035_v21  ;;  %1924 = vmatpush.bf16.msrb.mxu2 %v9099_v25  ;;  %v9176_v21 = vld [vmem:[#allocation6 + $0x218] sm:$0xf0] }
 0x152   : > { %1935 = vmatpush.bf16.msrb.mxu3 %v9259_v26  ;;  %1900 = vmatpush.bf16.msrb.mxu0 %v9319_v35  ;;  %v9368_v25 = vld [vmem:[#allocation6 + $0x398] sm:$0xf0]  ;;  %v8955_v26 = vor.u32 %v12481_v13, %v8952_v15  ;;  %v9179_v28 = vor.u32 %v12537_v19, %v9176_v21  ;;  %v9647_v35 = vor.u32 %v12658_v32, %v9646_v31  ;;  %v9486_v13 = vld [vmem:[#allocation9 + $0x80] sm:$0xf]  ;;  %v12610_v21 = vld [vmem:[#allocation9 + $0x4c] sm:$0xf0] }
 0x153   : > { %v9371_v33 = vor.u32 %v12585_v24, %v9368_v25  ;;  %v9454_v19 = vld [vmem:[#allocation9 + $0x40] sm:$0xf]  ;;  %v12606_v25 = vld [vmem:[#allocation9 + $0x2c] sm:$0xf0]  ;;  %v9536_v31 = vld [vmem:[#allocation9 + $0xf0] sm:$0xf0] }
 0x154   : > { %v9438_v24 = vld [vmem:[#allocation9 + $0x20] sm:$0xf] }
 0x155   : > { %1908 = vmatpush.bf16.msrb.mxu1 %v9019_v36  ;;  %1925 = vmatpush.bf16.msrb.mxu2 %v9083_v39  ;;  %v12581_v36 = vld [vmem:[#allocation6 + $0x36c] sm:$0xf] }
 0x156   : > { %1936 = vmatpush.bf16.msrb.mxu3 %v9243_v40  ;;  %1901 = vmatpush.bf16.msrb.mxu0 %v9303_v51  ;;  %v12473_v39 = vld [vmem:[#allocation6 + $0xc] sm:$0xf]  ;;  %v8920_v40 = vld [vmem:[#allocation6 + $0x18] sm:$0xf0]  ;;  %v9355_v43 = vor.u32 %v12581_v36, %v9352_v37  ;;  %v9774_v36 = vld [vmem:[#allocation9 + $0x2c0] sm:$0xf]  ;;  %v9539_v37 = vor.u32 %v12628_v29, %v9536_v31 }
 0x157   : > { %v8923_v51 = vor.u32 %v12473_v39, %v8920_v40  ;;  %v9520_v39 = vld [vmem:[#allocation9 + $0xd0] sm:$0xf0]  ;;  %v9775_v42 = vor.u32 %v12690_v41, %v9774_v36  ;;  %v12648_v31 = vld [vmem:[#allocation9 + $0x184] sm:$0xf]  ;;  %v12666_v36 = vld [vmem:[#allocation9 + $0x20c] sm:$0xf0] }
 0x158   : > { %v12726_v41 = vld [vmem:[#allocation9 + $0x3ec] sm:$0xf0] }
 0x159   : > { %1909 = vmatpush.bf16.msrb.mxu1 %v9003_v52  ;;  %1926 = vmatpush.bf16.msrb.mxu2 %v9067_v53  ;;  %v12573_v52 = vld [vmem:[#allocation6 + $0x32c] sm:$0xf]  ;;  %v9535_v53 = vor.u32 %v12630_v45, %v9534_v44  ;;  %v12638_v44 = vld [vmem:[#allocation9 + $0x12c] sm:$0xf0]  ;;  %v9758_v45 = vld [vmem:[#allocation9 + $0x2a0] sm:$0xf] }
 0x15a   : > { %1937 = vmatpush.bf16.msrb.mxu3 %v9227_v54  ;;  %1946 = vmatpush.bf16.msra.mxu0 %v9419_v58  ;;  %v9518_v54 = vld [vmem:[#allocation9 + $0xc0] sm:$0xf]  ;;  %v12626_v58 = vld [vmem:[#allocation9 + $0xcc] sm:$0xf0]  ;;  %v9323_v5 = vor.u32 %v12573_v52, %v9320_v62  ;;  %v9759_v49 = vor.u32 %v12686_v48, %v9758_v45  ;;  %v12620_v52 = vld [vmem:[#allocation9 + $0xa4] sm:$0xf] }
 0x15b   : > { %1902 = vmatmul.bf16.vlgmr.msrb.gmra.mxu0 %v14483_v9  ;;  %v9600_v45 = vld [vmem:[#allocation9 + $0x170] sm:$0xf0]  ;;  %v12692_v48 = vld [vmem:[#allocation9 + $0x2e4] sm:$0xf] }
 0x15d   : > { %1910 = vmatpush.bf16.msrb.mxu1 %v8987_v0  ;;  %1927 = vmatpush.bf16.msrb.mxu2 %v9051_v1  ;;  %v12694_v0 = vld [vmem:[#allocation9 + $0x2ec] sm:$0xf0] }
 0x15e   : > { %1938 = vmatpush.bf16.msrb.mxu3 %v9211_v2  ;;  %1947 = vmatpush.bf16.msra.mxu0 %v9403_v6  ;;  %v9791_v1 = vor.u32 %v12694_v0, %v9790_v63  ;;  %v9519_v2 = vor.u32 %v12626_v58, %v9518_v54  ;;  %v9502_v6 = vld [vmem:[#allocation9 + $0xa0] sm:$0xf]  ;;  %v12660_v63 = vld [vmem:[#allocation9 + $0x1e4] sm:$0xf]  ;;  %v9664_v0 = vld [vmem:[#allocation9 + $0x1f0] sm:$0xf0] }
 0x15f   : > { %v9503_v11 = vor.u32 %v12622_v7, %v9502_v6  ;;  %v9550_v54 = vld [vmem:[#allocation9 + $0x100] sm:$0xf]  ;;  %v12678_v6 = vld [vmem:[#allocation9 + $0x26c] sm:$0xf0]  ;;  %v9472_v7 = vld [vmem:[#allocation9 + $0x70] sm:$0xf0] }
 0x160   : > { %1928 = vmatmul.bf16.vlgmr.msrb.gmra.mxu2 %v14461_v22  ;;  %v9551_v58 = vor.u32 %v12634_v55, %v9550_v54  ;;  %v12722_v54 = vld [vmem:[#allocation9 + $0x3cc] sm:$0xf0]  ;;  %v12640_v55 = vld [vmem:[#allocation9 + $0x144] sm:$0xf] }
 0x161   : > { %1911 = vmatpush.bf16.msrb.mxu1 %v8971_v12  ;;  %2754 = vmatpush.bf16.msra.mxu2 %v9663_v23  ;;  %v9307_v12 = vor.u32 %v12569_v8, %v9304_v10  ;;  %v9455_v23 = vor.u32 %v12610_v21, %v9454_v19  ;;  %v12656_v10 = vld [vmem:[#allocation9 + $0x1c4] sm:$0xf]  ;;  %v9632_v21 = vld [vmem:[#allocation9 + $0x1b0] sm:$0xf0] }
 0x162   : > { %1939 = vmatpush.bf16.msrb.mxu3 %v9195_v14  ;;  %1948 = vmatpush.bf16.msra.mxu0 %v9387_v18  ;;  %v12618_v14 = vld [vmem:[#allocation9 + $0x8c] sm:$0xf0]  ;;  %v9471_v18 = vor.u32 %v12614_v17, %v9470_v16  ;;  %v12608_v17 = vld [vmem:[#allocation9 + $0x44] sm:$0xf] }
 0x163   : > { %v9487_v15 = vor.u32 %v12618_v14, %v9486_v13  ;;  %v9710_v13 = vld [vmem:[#allocation9 + $0x240] sm:$0xf]  ;;  %v12674_v14 = vld [vmem:[#allocation9 + $0x24c] sm:$0xf0]  ;;  %v12652_v19 = vld [vmem:[#allocation9 + $0x1a4] sm:$0xf] }
 0x164   : > { %v9711_v16 = vor.u32 %v12674_v14, %v9710_v13  ;;  %v12632_v13 = vld [vmem:[#allocation9 + $0x104] sm:$0xf] }
 0x165   : > { %1912 = vmatpush.bf16.msrb.mxu1 %v8955_v26  ;;  %2755 = vmatpush.bf16.msra.mxu2 %v9647_v35  ;;  %v9439_v26 = vor.u32 %v12606_v25, %v9438_v24  ;;  %v12642_v35 = vld [vmem:[#allocation9 + $0x14c] sm:$0xf0]  ;;  %v12604_v25 = vld [vmem:[#allocation9 + $0x24] sm:$0xf] }
 0x166   : > { %1940 = vmatpush.bf16.msrb.mxu3 %v9179_v28  ;;  %1949 = vmatpush.bf16.msra.mxu0 %v9371_v33  ;;  %v12602_v28 = vld [vmem:[#allocation9 + $0xc] sm:$0xf0]  ;;  %v9582_v33 = vld [vmem:[#allocation9 + $0x140] sm:$0xf] }
 0x167   : > { %v9423_v32 = vor.u32 %v12602_v28, %v9422_v27  ;;  %v9583_v40 = vor.u32 %v12642_v35, %v9582_v33  ;;  %v12670_v27 = vld [vmem:[#allocation9 + $0x22c] sm:$0xf0]  ;;  %v9440_v28 = vld [vmem:[#allocation9 + $0x30] sm:$0xf0]  ;;  %v9678_v35 = vld [vmem:[#allocation9 + $0x200] sm:$0xf] }
 0x169   : > { %1941 = vmatmul.bf16.vlgmr.msrb.gmra.mxu3 %v14468_v34  ;;  %1913 = vmatpush.bf16.msrb.mxu1 %v8939_v38  ;;  %v12624_v38 = vld [vmem:[#allocation9 + $0xc4] sm:$0xf] }
 0x16a   : > { %2756 = vmatpush.bf16.msra.mxu2 %v9631_v47  ;;  %1950 = vmatpush.bf16.msra.mxu0 %v9355_v43  ;;  %v9566_v43 = vld [vmem:[#allocation9 + $0x120] sm:$0xf] }
 0x16b   : > { %2767 = vmatpush.bf16.msra.mxu3 %v9791_v1  ;;  %v9567_v47 = vor.u32 %v12638_v44, %v9566_v43  ;;  %v9667_v1 = vor.u32 %v12660_v63, %v9664_v0  ;;  %v12644_v44 = vld [vmem:[#allocation9 + $0x164] sm:$0xf]  ;;  %v9886_v63 = vld [vmem:[#allocation9 + $0x3a0] sm:$0xf]  ;;  %v12718_v0 = vld [vmem:[#allocation9 + $0x3ac] sm:$0xf0] }
 0x16d   : > { %1914 = vmatpush.bf16.msrb.mxu1 %v8923_v51  ;;  %v9523_v51 = vor.u32 %v12624_v38, %v9520_v39  ;;  %v9443_v38 = vor.u32 %v12604_v25, %v9440_v28  ;;  %v12600_v39 = vld [vmem:[#allocation9 + $0x4] sm:$0xf]  ;;  %v9854_v25 = vld [vmem:[#allocation9 + $0x360] sm:$0xf] }
 0x16e   : > { %2757 = vmatpush.bf16.msra.mxu2 %v9615_v59  ;;  %1951 = vmatpush.bf16.msra.mxu0 %v9339_v57  ;;  %v12682_v59 = vld [vmem:[#allocation9 + $0x28c] sm:$0xf0] }
 0x16f   : > { %2768 = vmatpush.bf16.msra.mxu3 %v9775_v42  ;;  %v9743_v62 = vor.u32 %v12682_v59, %v9742_v56  ;;  %v9424_v42 = vld [vmem:[#allocation9 + $0x10] sm:$0xf0] }
 0x170   : > { %1915 = vmatmul.bf16.vlgmr.msrb.gmra.mxu1 %v14475_v50  ;;  %v9776_v59 = vld [vmem:[#allocation9 + $0x2d0] sm:$0xf0] }
 0x171   : > { %2741 = vmatpush.bf16.msra.mxu1 %v9535_v53  ;;  %v9504_v53 = vld [vmem:[#allocation9 + $0xb0] sm:$0xf0] }
 0x172   : > { %2758 = vmatpush.bf16.msra.mxu2 %v9599_v3  ;;  %1952 = vmatpush.bf16.msra.mxu0 %v9323_v5  ;;  %v9507_v57 = vor.u32 %v12620_v52, %v9504_v53  ;;  %v12612_v3 = vld [vmem:[#allocation9 + $0x64] sm:$0xf]  ;;  %v9726_v5 = vld [vmem:[#allocation9 + $0x260] sm:$0xf]  ;;  %v9427_v52 = vor.u32 %v12600_v39, %v9424_v42 }
 0x173   : > { %2769 = vmatpush.bf16.msra.mxu3 %v9759_v49  ;;  %v9727_v8 = vor.u32 %v12678_v6, %v9726_v5  ;;  %v9792_v49 = vld [vmem:[#allocation9 + $0x2f0] sm:$0xf0]  ;;  %v9902_v53 = vld [vmem:[#allocation9 + $0x3c0] sm:$0xf]  ;;  %v12684_v5 = vld [vmem:[#allocation9 + $0x2a4] sm:$0xf] }
 0x174   : > { %v9903_v56 = vor.u32 %v12722_v54, %v9902_v53  ;;  %v12668_v54 = vld [vmem:[#allocation9 + $0x224] sm:$0xf] }
 0x175   : > { %2742 = vmatpush.bf16.msra.mxu1 %v9519_v2  ;;  %v9491_v2 = vor.u32 %v12616_v60, %v9488_v61 }
 0x176   : > { %1953 = vmatpush.bf16.msra.mxu0 %v9307_v12  ;;  %2759 = vmatpush.bf16.msra.mxu2 %v9583_v40  ;;  %v9679_v40 = vor.u32 %v12666_v36, %v9678_v35  ;;  %v9838_v36 = vld [vmem:[#allocation9 + $0x340] sm:$0xf] }
 0x177   : > { %2770 = vmatpush.bf16.msra.mxu3 %v9743_v62 }
 0x179   : > { %2743 = vmatpush.bf16.msra.mxu1 %v9503_v11  ;;  %1954 = vmatmul.bf16.vlgmr.msra.gmra.mxu0 %v14483_v9  ;;  %v9648_v11 = vld [vmem:[#allocation9 + $0x1d0] sm:$0xf0] }
 0x17a   : > { %2760 = vmatpush.bf16.msra.mxu2 %v9567_v47  ;;  %v9651_v12 = vor.u32 %v12656_v10, %v9648_v11  ;;  %v9603_v47 = vor.u32 %v12644_v44, %v9600_v45  ;;  %v9870_v11 = vld [vmem:[#allocation9 + $0x380] sm:$0xf]  ;;  %v9542_v44 = vld [vmem:[#allocation9 + $0xe8] sm:$0xf] }
 0x17b   : > { %2771 = vmatpush.bf16.msra.mxu3 %v9727_v8  ;;  %v14497_v8 = vld [vmem:[#allocation8] sm:$0xf] }
 0x17d   : > { %2744 = vmatpush.bf16.msra.mxu1 %v9487_v15  ;;  %v9475_v15 = vor.u32 %v12612_v3, %v9472_v7  ;;  %v9568_v3 = vld [vmem:[#allocation9 + $0x130] sm:$0xf0] }
 0x17e   : > { %2761 = vmatpush.bf16.msra.mxu2 %v9551_v58  ;;  %v12688_v58 = vld [vmem:[#allocation9 + $0x2c4] sm:$0xf]  ;;  %v9760_v7 = vld [vmem:[#allocation9 + $0x2b0] sm:$0xf0] }
 0x17f   : > { %2772 = vmatpush.bf16.msra.mxu3 %v9711_v16  ;;  %v9779_v61 = vor.u32 %v12688_v58, %v9776_v59  ;;  %v9763_v10 = vor.u32 %v12684_v5, %v9760_v7  ;;  %v12680_v16 = vld [vmem:[#allocation9 + $0x284] sm:$0xf]  ;;  %v9526_v59 = vld [vmem:[#allocation9 + $0xc8] sm:$0xf]  ;;  %v1104_v5 = vperm.slane %v14497_v8, 1 }
 0x180   : > { %v9920_v7 = vld [vmem:[#allocation9 + $0x3f0] sm:$0xf0] }
 0x181   : > { %2745 = vmatpush.bf16.msra.mxu1 %v9471_v18  ;;  %v9456_v18 = vld [vmem:[#allocation9 + $0x50] sm:$0xf0] }
 0x182   : > { %2806 = vmatpush.bf16.msrb.mxu2 %v9667_v1  ;;  %v9459_v24 = vor.u32 %v12608_v17, %v9456_v18  ;;  %v9887_v1 = vor.u32 %v12718_v0, %v9886_v63  ;;  %v9744_v17 = vld [vmem:[#allocation9 + $0x290] sm:$0xf0]  ;;  %v1103_v18 = vperm.slane %v14497_v8, 0  ;;  %v12698_v63 = vld [vmem:[#allocation9 + $0x30c] sm:$0xf0] }
 0x185   : > { %2746 = vmatpush.bf16.msra.mxu1 %v9455_v23  ;;  %v9635_v23 = vor.u32 %v12652_v19, %v9632_v21  ;;  %v9747_v21 = vor.u32 %v12680_v16, %v9744_v17 }
 0x186   : > { %2807 = vmatpush.bf16.msrb.mxu2 %v9651_v12  ;;  %v12714_v12 = vld [vmem:[#allocation9 + $0x38c] sm:$0xf0] }
 0x187   : > { %v9871_v14 = vor.u32 %v12714_v12, %v9870_v11 }
 0x189   : > { %2747 = vmatpush.bf16.msra.mxu1 %v9439_v26  ;;  %v9694_v26 = vld [vmem:[#allocation9 + $0x220] sm:$0xf] }
 0x18a   : > { %2808 = vmatpush.bf16.msrb.mxu2 %v9635_v23  ;;  %v9695_v29 = vor.u32 %v12670_v27, %v9694_v26  ;;  %v12710_v26 = vld [vmem:[#allocation9 + $0x36c] sm:$0xf0] }
 0x18b   : > { %v9855_v28 = vor.u32 %v12710_v26, %v9854_v25  ;;  %v9494_v26 = vld [vmem:[#allocation9 + $0x88] sm:$0xf] }
 0x18c   : > { %2773 = vmatpush.bf16.msra.mxu3 %v9695_v29  ;;  %v12676_v29 = vld [vmem:[#allocation9 + $0x264] sm:$0xf] }
 0x18d   : > { %2748 = vmatpush.bf16.msra.mxu1 %v9423_v32  ;;  %v9616_v32 = vld [vmem:[#allocation9 + $0x190] sm:$0xf0] }
 0x18e   : > { %v9619_v33 = vor.u32 %v12648_v31, %v9616_v32  ;;  %v9728_v31 = vld [vmem:[#allocation9 + $0x270] sm:$0xf0] }
 0x190   : > { %2809 = vmatpush.bf16.msrb.mxu2 %v9619_v33  ;;  %2774 = vmatpush.bf16.msra.mxu3 %v9679_v40  ;;  %v9731_v33 = vor.u32 %v12676_v29, %v9728_v31  ;;  %v9712_v40 = vld [vmem:[#allocation9 + $0x250] sm:$0xf0] }
 0x191   : > { %2793 = vmatpush.bf16.msrb.mxu1 %v9539_v37  ;;  %v9918_v37 = vld [vmem:[#allocation9 + $0x3e0] sm:$0xf]  ;;  %v9888_v29 = vld [vmem:[#allocation9 + $0x3b0] sm:$0xf0] }
 0x192   : > { %v9919_v43 = vor.u32 %v12726_v41, %v9918_v37  ;;  %v12706_v37 = vld [vmem:[#allocation9 + $0x34c] sm:$0xf0] }
 0x193   : > { %v9839_v39 = vor.u32 %v12706_v37, %v9838_v36  ;;  %v9478_v36 = vld [vmem:[#allocation9 + $0x68] sm:$0xf]  ;;  %v12615_v37 = vld [vmem:[#allocation9 + $0x74] sm:$0xf0] }
 0x194   : > { %2780 = vmatpush.bf16.msrb.mxu0 %v9919_v43  ;;  %2810 = vmatpush.bf16.msrb.mxu2 %v9603_v47  ;;  %v12631_v47 = vld [vmem:[#allocation9 + $0xf4] sm:$0xf0] }
 0x195   : > { %2794 = vmatpush.bf16.msrb.mxu1 %v9523_v51  ;;  %v9795_v51 = vor.u32 %v12692_v48, %v9792_v49  ;;  %v9822_v48 = vld [vmem:[#allocation9 + $0x320] sm:$0xf]  ;;  %v12702_v49 = vld [vmem:[#allocation9 + $0x32c] sm:$0xf0]  ;;  %v9543_v58 = vor.u32 %v12631_v47, %v9542_v44 }
 0x196   : > { %v9823_v53 = vor.u32 %v12702_v49, %v9822_v48  ;;  %v9479_v48 = vor.u32 %v12615_v37, %v9478_v36  ;;  %v9798_v37 = vld [vmem:[#allocation9 + $0x2e8] sm:$0xf] }
 0x197   : > { %2819 = vmatpush.bf16.msrb.mxu3 %v9795_v51 }
 0x198   : > { %2781 = vmatpush.bf16.msrb.mxu0 %v9903_v56 }
 0x199   : > { %2795 = vmatpush.bf16.msrb.mxu1 %v9507_v57  ;;  %v9584_v57 = vld [vmem:[#allocation9 + $0x150] sm:$0xf0] }
 0x19a   : > { %v9587_v60 = vor.u32 %v12640_v55, %v9584_v57  ;;  %v9696_v55 = vld [vmem:[#allocation9 + $0x230] sm:$0xf0] }
 0x19b   : > { %2820 = vmatpush.bf16.msrb.mxu3 %v9779_v61  ;;  %v9699_v57 = vor.u32 %v12668_v54, %v9696_v55  ;;  %v12627_v61 = vld [vmem:[#allocation9 + $0xd4] sm:$0xf0]  ;;  %v9654_v54 = vld [vmem:[#allocation9 + $0x1c8] sm:$0xf] }
 0x19c   : > { %2811 = vmatpush.bf16.msrb.mxu2 %v9587_v60  ;;  %2782 = vmatpush.bf16.msrb.mxu0 %v9887_v1  ;;  %v12664_v1 = vld [vmem:[#allocation9 + $0x204] sm:$0xf]  ;;  %v9527_v12 = vor.u32 %v12627_v61, %v9526_v59  ;;  %v12659_v55 = vld [vmem:[#allocation9 + $0x1d4] sm:$0xf0] }
 0x19d   : > { %2796 = vmatpush.bf16.msrb.mxu1 %v9491_v2  ;;  %v12636_v2 = vld [vmem:[#allocation9 + $0x124] sm:$0xf] }
 0x19e   : > { %v9571_v6 = vor.u32 %v12636_v2, %v9568_v3  ;;  %v9680_v2 = vld [vmem:[#allocation9 + $0x210] sm:$0xf0]  ;;  %v12724_v3 = vld [vmem:[#allocation9 + $0x3e4] sm:$0xf] }
 0x19f   : > { %2821 = vmatpush.bf16.msrb.mxu3 %v9763_v10 }
 0x1a0   : > { %2812 = vmatpush.bf16.msrb.mxu2 %v9571_v6  ;;  %2783 = vmatpush.bf16.msrb.mxu0 %v9871_v14  ;;  %v9683_v6 = vor.u32 %v12664_v1, %v9680_v2  ;;  %v9510_v14 = vld [vmem:[#allocation9 + $0xa8] sm:$0xf]  ;;  %v12607_v2 = vld [vmem:[#allocation9 + $0x34] sm:$0xf0] }
 0x1a1   : > { %2797 = vmatpush.bf16.msrb.mxu1 %v9475_v15  ;;  %v9552_v15 = vld [vmem:[#allocation9 + $0x110] sm:$0xf0] }
 0x1a2   : > { %v9555_v19 = vor.u32 %v12632_v13, %v9552_v15  ;;  %v9923_v13 = vor.u32 %v12724_v3, %v9920_v7  ;;  %v12623_v15 = vld [vmem:[#allocation9 + $0xb4] sm:$0xf0]  ;;  %v9638_v3 = vld [vmem:[#allocation9 + $0x1a8] sm:$0xf] }
 0x1a3   : > { %v1773_v62 = vpop.f32.mrf.mxu2  ;;  %2822 = vmatpush.bf16.msrb.mxu3 %v9747_v21 }
 0x1a4   : > { %2813 = vmatpush.bf16.msrb.mxu2 %v9555_v19  ;;  %2784 = vmatpush.bf16.msrb.mxu0 %v9855_v28  ;;  %v9904_v19 = vld [vmem:[#allocation9 + $0x3d0] sm:$0xf0]  ;;  %v12716_v28 = vld [vmem:[#allocation9 + $0x3a4] sm:$0xf] }
 0x1a5   : > { %2798 = vmatpush.bf16.msrb.mxu1 %v9459_v24  ;;  %v9891_v31 = vor.u32 %v12716_v28, %v9888_v29 }
 0x1a7   : > { %2823 = vmatpush.bf16.msrb.mxu3 %v9731_v33 }
 0x1a8   : > { %2785 = vmatpush.bf16.msrb.mxu0 %v9839_v39 }
 0x1a9   : > { %2799 = vmatpush.bf16.msrb.mxu1 %v9443_v38  ;;  %v12672_v38 = vld [vmem:[#allocation9 + $0x244] sm:$0xf] }
 0x1aa   : > { %v9715_v41 = vor.u32 %v12672_v38, %v9712_v40  ;;  %v9670_v38 = vld [vmem:[#allocation9 + $0x1e8] sm:$0xf]  ;;  %v12663_v40 = vld [vmem:[#allocation9 + $0x1f4] sm:$0xf0] }
 0x1ab   : > { %v1775_v23 = vpop.f32.mrf.mxu2  ;;  %v1786_v24 = vpop.f32.mrf.mxu3  ;;  %v9671_v49 = vor.u32 %v12663_v40, %v9670_v38  ;;  %v12695_v38 = vld [vmem:[#allocation9 + $0x2f4] sm:$0xf0] }
 0x1ac   : > { %2824 = vmatpush.bf16.msrb.mxu3 %v9715_v41  ;;  %2786 = vmatpush.bf16.msrb.mxu0 %v9823_v53  ;;  %v12712_v41 = vld [vmem:[#allocation9 + $0x384] sm:$0xf]  ;;  %v12611_v53 = vld [vmem:[#allocation9 + $0x54] sm:$0xf0] }
 0x1ad   : > { %2800 = vmatpush.bf16.msrb.mxu1 %v9427_v52  ;;  %v1760_v27 = vpop.f32.mrf.mxu1 }
 0x1ae   : > { %v1761_v32 = vadd.f32 %v1760_v27, %v1103_v18  ;;  %v12720_v18 = vld [vmem:[#allocation9 + $0x3c4] sm:$0xf]  ;;  %v12619_v27 = vld [vmem:[#allocation9 + $0x94] sm:$0xf0] }
 0x1af   : > { %v9907_v23 = vor.u32 %v12720_v18, %v9904_v19  ;;  %v9622_v18 = vld [vmem:[#allocation9 + $0x188] sm:$0xf]  ;;  %v12651_v19 = vld [vmem:[#allocation9 + $0x194] sm:$0xf0] }
 0x1b0   : > { %v1774_v35 = vadd.f32 %v1773_v62, %v1761_v32  ;;  %v9806_v62 = vld [vmem:[#allocation9 + $0x300] sm:$0xf]  ;;  %2825 = vmatpush.bf16.msrb.mxu3 %v9699_v57  ;;  %v9856_v57 = vld [vmem:[#allocation9 + $0x370] sm:$0xf0]  ;;  %v9623_v29 = vor.u32 %v12651_v19, %v9622_v18  ;;  %v12613_v18 = vld [vmem:[#allocation9 + $0x6c] sm:$0xf] }
 0x1b1   : > { %v9807_v0 = vor.u32 %v12698_v63, %v9806_v62  ;;  %v9655_v63 = vor.u32 %v12659_v55, %v9654_v54  ;;  %v12643_v54 = vld [vmem:[#allocation9 + $0x154] sm:$0xf0]  ;;  %v9782_v55 = vld [vmem:[#allocation9 + $0x2c8] sm:$0xf]  ;;  %v9480_v19 = vld [vmem:[#allocation9 + $0x78] sm:$0xf0] }
 0x1b2   : > { %v1787_v45 = vadd.f32 %v1786_v24, %v1774_v35  ;;  %v9511_v24 = vor.u32 %v12623_v15, %v9510_v14  ;;  %v9495_v35 = vor.u32 %v12619_v27, %v9494_v26  ;;  %v9824_v26 = vld [vmem:[#allocation9 + $0x330] sm:$0xf0] }
 0x1b3   : > { %v1788_v42 = vpop.f32.mrf.mxu3  ;;  %v1825_v43 = vpop.f32.mrf.mxu2  ;;  %2787 = vmatpush.bf16.msrb.mxu0 %v9807_v0  ;;  %v9446_v0 = vld [vmem:[#allocation9 + $0x28] sm:$0xf] }
 0x1b4   : > { %2826 = vmatpush.bf16.msrb.mxu3 %v9683_v6  ;;  %v9872_v42 = vld [vmem:[#allocation9 + $0x390] sm:$0xf0]  ;;  %v9447_v14 = vor.u32 %v12607_v2, %v9446_v0  ;;  %v9574_v0 = vld [vmem:[#allocation9 + $0x128] sm:$0xf] }
 0x1b5   : > { %v1762_v51 = vpop.f32.mrf.mxu1  ;;  %v1799_v52 = vpop.f32.mrf.mxu0  ;;  %v9766_v2 = vld [vmem:[#allocation9 + $0x2a8] sm:$0xf] }
 0x1b6   : > { %v1800_v56 = vadd.f32 %v1799_v52, %v1787_v45  ;;  %v9462_v51 = vld [vmem:[#allocation9 + $0x48] sm:$0xf] }
 0x1b7   : > { %2832 = vmatpush.bf16.msra.mxu0 %v9923_v13  ;;  %v9463_v62 = vor.u32 %v12611_v53, %v9462_v51  ;;  %v9590_v53 = vld [vmem:[#allocation9 + $0x148] sm:$0xf] }
 0x1b8   : > { %v14500_v60 = vpack.c.bf16 %v1800_v56, %v1800_v56  ;;  %v12708_v56 = vld [vmem:[#allocation9 + $0x364] sm:$0xf] }
 0x1b9   : > { %v9859_v59 = vor.u32 %v12708_v56, %v9856_v57  ;;  %v12691_v57 = vld [vmem:[#allocation9 + $0x2d4] sm:$0xf0] }
 0x1ba   : > { %2749 = vmatmul.bf16.vlgmr.msra.gmra.mxu1 %v14500_v60 }
 0x1bb   : > { %2845 = vmatpush.bf16.msra.mxu1 %v9543_v58  ;;  %v1827_v10 = vpop.f32.mrf.mxu2  ;;  %v1838_v11 = vpop.f32.mrf.mxu3  ;;  %2833 = vmatpush.bf16.msra.mxu0 %v9907_v23  ;;  %v1105_v58 = vperm.slane %v14497_v8, 2 }
 0x1bc   : > { %v12704_v10 = vld [vmem:[#allocation9 + $0x344] sm:$0xf] }
 0x1bd   : > { %v1801_v16 = vpop.f32.mrf.mxu0  ;;  %v1812_v17 = vpop.f32.mrf.mxu1 }
 0x1be   : > { %v1813_v21 = vadd.f32 %v1812_v17, %v1104_v5  ;;  %v12655_v5 = vld [vmem:[#allocation9 + $0x1b4] sm:$0xf0]  ;;  %v9430_v16 = vld [vmem:[#allocation9 + $0x8] sm:$0xf] }
 0x1bf   : > { %2846 = vmatpush.bf16.msra.mxu1 %v9527_v12  ;;  %2834 = vmatpush.bf16.msra.mxu0 %v9891_v31  ;;  %v9639_v15 = vor.u32 %v12655_v5, %v9638_v3  ;;  %v12603_v17 = vld [vmem:[#allocation9 + $0x14] sm:$0xf0]  ;;  %v9606_v31 = vld [vmem:[#allocation9 + $0x168] sm:$0xf]  ;;  %v12617_v5 = vld [vmem:[#allocation9 + $0x8c] sm:$0xf] }
 0x1c0   : > { %v1826_v25 = vadd.f32 %v1825_v43, %v1813_v21  ;;  %v9875_v43 = vor.u32 %v12712_v41, %v9872_v42  ;;  %v12629_v21 = vld [vmem:[#allocation9 + $0xec] sm:$0xf]  ;;  %v9431_v28 = vor.u32 %v12603_v17, %v9430_v16  ;;  %v9528_v42 = vld [vmem:[#allocation9 + $0xd8] sm:$0xf0]  ;;  %v12687_v3 = vld [vmem:[#allocation9 + $0x2b4] sm:$0xf0] }
 0x1c1   : > { %v12683_v17 = vld [vmem:[#allocation9 + $0x294] sm:$0xf0] }
 0x1c2   : > { %v1839_v39 = vadd.f32 %v1838_v11, %v1826_v25  ;;  %v9840_v11 = vld [vmem:[#allocation9 + $0x350] sm:$0xf0]  ;;  %v12700_v25 = vld [vmem:[#allocation9 + $0x324] sm:$0xf] }
 0x1c3   : > { %2847 = vmatpush.bf16.msra.mxu1 %v9511_v24  ;;  %v1840_v32 = vpop.f32.mrf.mxu3  ;;  %v1877_v33 = vpop.f32.mrf.mxu2  ;;  %2835 = vmatpush.bf16.msra.mxu0 %v9875_v43  ;;  %v9843_v13 = vor.u32 %v12704_v10, %v9840_v11  ;;  %v9544_v24 = vld [vmem:[#allocation9 + $0xf8] sm:$0xf0]  ;;  %v9827_v27 = vor.u32 %v12700_v25, %v9824_v26  ;;  %v9767_v11 = vor.u32 %v12687_v3, %v9766_v2 }
 0x1c4   : > { %v12647_v32 = vld [vmem:[#allocation9 + $0x174] sm:$0xf0]  ;;  %v9547_v36 = vor.u32 %v12629_v21, %v9544_v24  ;;  %v12661_v21 = vld [vmem:[#allocation9 + $0x1ec] sm:$0xf]  ;;  %v9483_v26 = vor.u32 %v12613_v18, %v9480_v19 }
 0x1c5   : > { %v1814_v44 = vpop.f32.mrf.mxu1  ;;  %v1851_v45 = vpop.f32.mrf.mxu0 }
 0x1c6   : > { %v1852_v47 = vadd.f32 %v1851_v45, %v1839_v39  ;;  %v12625_v39 = vld [vmem:[#allocation9 + $0xcc] sm:$0xf]  ;;  %v9808_v44 = vld [vmem:[#allocation9 + $0x310] sm:$0xf0] }
 0x1c7   : > { %2848 = vmatpush.bf16.msra.mxu1 %v9495_v35  ;;  %2836 = vmatpush.bf16.msra.mxu0 %v9859_v59  ;;  %v9531_v51 = vor.u32 %v12625_v39, %v9528_v42  ;;  %v9512_v59 = vld [vmem:[#allocation9 + $0xb8] sm:$0xf0] }
 0x1c8   : > { %v14504_v52 = vpack.c.bf16 %v1852_v47, %v1852_v47 }
 0x1ca   : > { %2762 = vmatmul.bf16.vlgmr.msra.gmra.mxu2 %v14504_v52  ;;  %2801 = vmatmul.bf16.vlgmr.msrb.gmra.mxu1 %v14500_v60 }
 0x1cb   : > { %2849 = vmatpush.bf16.msra.mxu1 %v9479_v48  ;;  %2858 = vmatpush.bf16.msra.mxu2 %v9671_v49  ;;  %v1879_v61 = vpop.f32.mrf.mxu2  ;;  %v9607_v48 = vor.u32 %v12647_v32, %v9606_v31  ;;  %v9799_v49 = vor.u32 %v12695_v38, %v9798_v37  ;;  %v12609_v31 = vld [vmem:[#allocation9 + $0x4c] sm:$0xf]  ;;  %v9464_v32 = vld [vmem:[#allocation9 + $0x58] sm:$0xf0]  ;;  %v1106_v37 = vperm.slane %v14497_v8, 3 }
 0x1cc   : > { %2837 = vmatpush.bf16.msra.mxu0 %v9843_v13  ;;  %v9591_v61 = vor.u32 %v12643_v54, %v9590_v53  ;;  %v9558_v13 = vld [vmem:[#allocation9 + $0x108] sm:$0xf]  ;;  %v9467_v39 = vor.u32 %v12609_v31, %v9464_v32  ;;  %v12689_v31 = vld [vmem:[#allocation9 + $0x2cc] sm:$0xf]  ;;  %v9784_v32 = vld [vmem:[#allocation9 + $0x2d8] sm:$0xf0] }
 0x1cd   : > { %v1853_v6 = vpop.f32.mrf.mxu0  ;;  %v1864_v7 = vpop.f32.mrf.mxu1  ;;  %v9702_v54 = vld [vmem:[#allocation9 + $0x228] sm:$0xf] }
 0x1ce   : > { %v1890_v1 = vpop.f32.mrf.mxu3  ;;  %v1865_v12 = vadd.f32 %v1864_v7, %v1105_v58  ;;  %v12621_v58 = vld [vmem:[#allocation9 + $0xac] sm:$0xf]  ;;  %v9496_v6 = vld [vmem:[#allocation9 + $0x98] sm:$0xf0] }
 0x1cf   : > { %2850 = vmatpush.bf16.msra.mxu1 %v9463_v62  ;;  %2859 = vmatpush.bf16.msra.mxu2 %v9655_v63  ;;  %v9783_v62 = vor.u32 %v12691_v57, %v9782_v55  ;;  %v9515_v63 = vor.u32 %v12621_v58, %v9512_v59  ;;  %v12671_v57 = vld [vmem:[#allocation9 + $0x234] sm:$0xf0]  ;;  %v12601_v58 = vld [vmem:[#allocation9 + $0xc] sm:$0xf]  ;;  %v9432_v59 = vld [vmem:[#allocation9 + $0x18] sm:$0xf0] }
 0x1d0   : > { %v1878_v23 = vadd.f32 %v1877_v33, %v1865_v12  ;;  %2838 = vmatpush.bf16.msra.mxu0 %v9827_v27  ;;  %v12696_v33 = vld [vmem:[#allocation9 + $0x304] sm:$0xf]  ;;  %v9499_v12 = vor.u32 %v12617_v5, %v9496_v6  ;;  %v9734_v27 = vld [vmem:[#allocation9 + $0x268] sm:$0xf]  ;;  %v12667_v6 = vld [vmem:[#allocation9 + $0x214] sm:$0xf0] }
 0x1d1   : > { %v9811_v43 = vor.u32 %v12696_v33, %v9808_v44  ;;  %v12675_v44 = vld [vmem:[#allocation9 + $0x254] sm:$0xf0]  ;;  %v9686_v5 = vld [vmem:[#allocation9 + $0x208] sm:$0xf] }
 0x1d2   : > { %v1891_v41 = vadd.f32 %v1890_v1, %v1878_v23  ;;  %v12639_v1 = vld [vmem:[#allocation9 + $0x134] sm:$0xf0]  ;;  %v9672_v23 = vld [vmem:[#allocation9 + $0x1f8] sm:$0xf0] }
 0x1d3   : > { %2851 = vmatpush.bf16.msra.mxu1 %v9447_v14  ;;  %2860 = vmatpush.bf16.msra.mxu2 %v9639_v15  ;;  %v9575_v10 = vor.u32 %v12639_v1, %v9574_v0  ;;  %v12635_v14 = vld [vmem:[#allocation9 + $0x114] sm:$0xf0]  ;;  %v9750_v15 = vld [vmem:[#allocation9 + $0x288] sm:$0xf]  ;;  %v9703_v0 = vor.u32 %v12671_v57, %v9702_v54  ;;  %v9435_v1 = vor.u32 %v12601_v58, %v9432_v59 }
 0x1d4   : > { %2839 = vmatpush.bf16.msra.mxu0 %v9811_v43  ;;  %v9559_v24 = vor.u32 %v12635_v14, %v9558_v13  ;;  %v9751_v25 = vor.u32 %v12683_v17, %v9750_v15  ;;  %v9448_v43 = vld [vmem:[#allocation9 + $0x38] sm:$0xf0]  ;;  %v12727_v14 = vld [vmem:[#allocation9 + $0x3f4] sm:$0xf0]  ;;  %v12693_v15 = vld [vmem:[#allocation9 + $0x2ec] sm:$0xf] }
 0x1d5   : > { %v1866_v40 = vpop.f32.mrf.mxu1  ;;  %v9800_v17 = vld [vmem:[#allocation9 + $0x2f8] sm:$0xf0]  ;;  %v9862_v58 = vld [vmem:[#allocation9 + $0x368] sm:$0xf]  ;;  %v12711_v59 = vld [vmem:[#allocation9 + $0x374] sm:$0xf0] }
 0x1d6   : > { %v1892_v35 = vpop.f32.mrf.mxu3  ;;  %v9718_v40 = vld [vmem:[#allocation9 + $0x248] sm:$0xf] }
 0x1d7   : > { %2852 = vmatpush.bf16.msra.mxu1 %v9431_v28  ;;  %2861 = vmatpush.bf16.msra.mxu2 %v9623_v29  ;;  %v9675_v28 = vor.u32 %v12661_v21, %v9672_v23  ;;  %v12679_v29 = vld [vmem:[#allocation9 + $0x274] sm:$0xf0]  ;;  %v12657_v35 = vld [vmem:[#allocation9 + $0x1cc] sm:$0xf]  ;;  %v9719_v8 = vor.u32 %v12675_v44, %v9718_v40  ;;  %v9576_v40 = vld [vmem:[#allocation9 + $0x138] sm:$0xf0] }
 0x1d8   : > { %v1903_v45 = vpop.f32.mrf.mxu0  ;;  %v9735_v38 = vor.u32 %v12679_v29, %v9734_v27  ;;  %v9592_v27 = vld [vmem:[#allocation9 + $0x158] sm:$0xf0]  ;;  %v12723_v29 = vld [vmem:[#allocation9 + $0x3d4] sm:$0xf0] }
 0x1d9   : > { %v1904_v47 = vadd.f32 %v1903_v45, %v1891_v41  ;;  %v12605_v45 = vld [vmem:[#allocation9 + $0x2c] sm:$0xf] }
 0x1da   : > { %2814 = vmatmul.bf16.vlgmr.msrb.gmra.mxu2 %v14504_v52  ;;  %2853 = vmatmul.bf16.vlgmr.msra.gmra.mxu1 %v14500_v60  ;;  %v9451_v53 = vor.u32 %v12605_v45, %v9448_v43 }
 0x1db   : > { %2897 = vmatpush.bf16.msrb.mxu1 %v9547_v36  ;;  %v14509_v56 = vpack.c.bf16 %v1904_v47, %v1904_v47  ;;  %2862 = vmatpush.bf16.msra.mxu2 %v9607_v48  ;;  %v9656_v36 = vld [vmem:[#allocation9 + $0x1d8] sm:$0xf0]  ;;  %v12653_v48 = vld [vmem:[#allocation9 + $0x1ac] sm:$0xf] }
 0x1dc   : > { %v9659_v33 = vor.u32 %v12657_v35, %v9656_v36 }
 0x1dd   : > { %2775 = vmatmul.bf16.vlgmr.msra.gmra.mxu3 %v14509_v56 }
 0x1de   : > { %2871 = vmatpush.bf16.msra.mxu3 %v9799_v49  ;;  %v9640_v49 = vld [vmem:[#allocation9 + $0x1b8] sm:$0xf0] }
 0x1df   : > { %2898 = vmatpush.bf16.msrb.mxu1 %v9531_v51  ;;  %2863 = vmatpush.bf16.msra.mxu2 %v9591_v61  ;;  %v9643_v55 = vor.u32 %v12653_v48, %v9640_v49  ;;  %v12649_v61 = vld [vmem:[#allocation9 + $0x18c] sm:$0xf]  ;;  %v9560_v49 = vld [vmem:[#allocation9 + $0x118] sm:$0xf0] }
 0x1e0   : > { %v1905_v7 = vpop.f32.mrf.mxu0  ;;  %v12633_v48 = vld [vmem:[#allocation9 + $0x10c] sm:$0xf] }
 0x1e1   : > { %v9563_v54 = vor.u32 %v12633_v48, %v9560_v49  ;;  %v12732_v48 = vld [vmem:[#allocation21 + $0x20] sm:$0xff] }
 0x1e2   : > { %2872 = vmatpush.bf16.msra.mxu3 %v9783_v62  ;;  %v9624_v62 = vld [vmem:[#allocation9 + $0x198] sm:$0xf0] }
 0x1e3   : > { %2899 = vmatpush.bf16.msrb.mxu1 %v9515_v63  ;;  %v1929_v16 = vpop.f32.mrf.mxu2  ;;  %2864 = vmatpush.bf16.msra.mxu2 %v9575_v10  ;;  %v9627_v3 = vor.u32 %v12649_v61, %v9624_v62  ;;  %v9926_v10 = vld [vmem:[#allocation9 + $0x3e8] sm:$0xf]  ;;  %v12677_v61 = vld [vmem:[#allocation9 + $0x26c] sm:$0xf]  ;;  %v9736_v62 = vld [vmem:[#allocation9 + $0x278] sm:$0xf0] }
 0x1e4   : > { %v9927_v23 = vor.u32 %v12727_v14, %v9926_v10  ;;  %v9830_v10 = vld [vmem:[#allocation9 + $0x328] sm:$0xf] }
 0x1e6   : > { %2873 = vmatpush.bf16.msra.mxu3 %v9767_v11  ;;  %v12645_v11 = vld [vmem:[#allocation9 + $0x16c] sm:$0xf] }
 0x1e7   : > { %2900 = vmatpush.bf16.msrb.mxu1 %v9499_v12  ;;  %2865 = vmatpush.bf16.msra.mxu2 %v9559_v24  ;;  %v9608_v12 = vld [vmem:[#allocation9 + $0x178] sm:$0xf0]  ;;  %v9803_v24 = vor.u32 %v12693_v15, %v9800_v17  ;;  %v9814_v17 = vld [vmem:[#allocation9 + $0x308] sm:$0xf] }
 0x1e8   : > { %v9611_v21 = vor.u32 %v12645_v11, %v9608_v12  ;;  %v12703_v11 = vld [vmem:[#allocation9 + $0x334] sm:$0xf0]  ;;  %v12669_v12 = vld [vmem:[#allocation9 + $0x22c] sm:$0xf] }
 0x1e9   : > { %v9831_v14 = vor.u32 %v12703_v11, %v9830_v10  ;;  %v10134_v10 = vld [vmem:[#allocation12 + $0x90] sm:$0xf]  ;;  %v12779_v11 = vld [vmem:[#allocation12 + $0x98] sm:$0xf0] }
 0x1ea   : > { %2874 = vmatpush.bf16.msra.mxu3 %v9751_v25  ;;  %2866 = vmatmul.bf16.vlgmr.msra.gmra.mxu2 %v14504_v52  ;;  %v9910_v25 = vld [vmem:[#allocation9 + $0x3c8] sm:$0xf] }
 0x1eb   : > { %2901 = vmatpush.bf16.msrb.mxu1 %v9483_v26  ;;  %v1931_v41 = vpop.f32.mrf.mxu2  ;;  %2910 = vmatpush.bf16.msrb.mxu2 %v9675_v28  ;;  %v12641_v26 = vld [vmem:[#allocation9 + $0x14c] sm:$0xf]  ;;  %v9911_v36 = vor.u32 %v12723_v29, %v9910_v25 }
 0x1ec   : > { %v1942_v42 = vpop.f32.mrf.mxu3  ;;  %v9595_v35 = vor.u32 %v12641_v26, %v9592_v27  ;;  %v12719_v41 = vld [vmem:[#allocation9 + $0x3b4] sm:$0xf0]  ;;  %v12721_v26 = vld [vmem:[#allocation9 + $0x3cc] sm:$0xf]  ;;  %v9912_v27 = vld [vmem:[#allocation9 + $0x3d8] sm:$0xf0] }
 0x1ed   : > { %v1916_v47 = vpop.f32.mrf.mxu1  ;;  %2827 = vmatmul.bf16.vlgmr.msrb.gmra.mxu3 %v14509_v56  ;;  %v9915_v29 = vor.u32 %v12721_v26, %v9912_v27  ;;  %v10242_v26 = vld [vmem:[#allocation12 + $0x168] sm:$0xf]  ;;  %v12736_v27 = vld [vmem:[#allocation21 + $0x40] sm:$0xff] }
 0x1ee   : > { %v1917_v51 = vadd.f32 %v1916_v47, %v1106_v37  ;;  %2875 = vmatpush.bf16.msra.mxu3 %v9735_v38  ;;  %v9787_v37 = vor.u32 %v12689_v31, %v9784_v32  ;;  %v9894_v38 = vld [vmem:[#allocation9 + $0x3a8] sm:$0xf]  ;;  %v12717_v31 = vld [vmem:[#allocation9 + $0x3ac] sm:$0xf]  ;;  %v9896_v32 = vld [vmem:[#allocation9 + $0x3b8] sm:$0xf0] }
 0x1ef   : > { %2902 = vmatpush.bf16.msrb.mxu1 %v9467_v39  ;;  %2911 = vmatpush.bf16.msrb.mxu2 %v9659_v33  ;;  %v12637_v39 = vld [vmem:[#allocation9 + $0x12c] sm:$0xf]  ;;  %v9895_v45 = vor.u32 %v12719_v41, %v9894_v38  ;;  %v9878_v47 = vld [vmem:[#allocation9 + $0x388] sm:$0xf]  ;;  %v9880_v38 = vld [vmem:[#allocation9 + $0x398] sm:$0xf0] }
 0x1f0   : > { %v1930_v63 = vadd.f32 %v1929_v16, %v1917_v51  ;;  %v9687_v16 = vor.u32 %v12667_v6, %v9686_v5  ;;  %v9579_v44 = vor.u32 %v12637_v39, %v9576_v40  ;;  %v12715_v51 = vld [vmem:[#allocation9 + $0x394] sm:$0xf0]  ;;  %v9720_v5 = vld [vmem:[#allocation9 + $0x258] sm:$0xf0]  ;;  %v12734_v40 = vld [vmem:[#allocation21 + $0x30] sm:$0xff] }
 0x1f1   : > { %v12709_v41 = vld [vmem:[#allocation9 + $0x36c] sm:$0xf] }
 0x1f2   : > { %2876 = vmatpush.bf16.msra.mxu3 %v9719_v8  ;;  %v1943_v13 = vadd.f32 %v1942_v42, %v1930_v63  ;;  %v12685_v42 = vld [vmem:[#allocation9 + $0x2ac] sm:$0xf]  ;;  %v9863_v63 = vor.u32 %v12711_v59, %v9862_v58  ;;  %v12729_v59 = vld [vmem:[#allocation21 + $0x8] sm:$0xff] }
 0x1f3   : > { %2903 = vmatpush.bf16.msrb.mxu1 %v9451_v53  ;;  %2912 = vmatpush.bf16.msrb.mxu2 %v9643_v55  ;;  %v12681_v8 = vld [vmem:[#allocation9 + $0x28c] sm:$0xf]  ;;  %v9752_v53 = vld [vmem:[#allocation9 + $0x298] sm:$0xf0]  ;;  %v9879_v55 = vor.u32 %v12715_v51, %v9878_v47 }
 0x1f4   : > { %v1944_v2 = vpop.f32.mrf.mxu3  ;;  %v9755_v57 = vor.u32 %v12681_v8, %v9752_v53  ;;  %v9832_v47 = vld [vmem:[#allocation9 + $0x338] sm:$0xf0]  ;;  %v12697_v51 = vld [vmem:[#allocation9 + $0x30c] sm:$0xf]  ;;  %v12731_v53 = vld [vmem:[#allocation21 + $0x18] sm:$0xff] }
 0x1f5   : > { %v1918_v7 = vpop.f32.mrf.mxu1  ;;  %v12707_v2 = vld [vmem:[#allocation9 + $0x354] sm:$0xf0]  ;;  %v9816_v8 = vld [vmem:[#allocation9 + $0x318] sm:$0xf0]  ;;  %v12742_v58 = vld [vmem:[#allocation21 + $0x70] sm:$0xff] }
 0x1f6   : > { %v1955_v18 = vpop.f32.mrf.mxu0  ;;  %2877 = vmatpush.bf16.msra.mxu3 %v9703_v0  ;;  %v9739_v0 = vor.u32 %v12677_v61, %v9736_v62  ;;  %v12741_v61 = vld [vmem:[#allocation21 + $0x68] sm:$0xff] }
 0x1f7   : > { %2904 = vmatpush.bf16.msrb.mxu1 %v9435_v1  ;;  %v1956_v19 = vadd.f32 %v1955_v18, %v1943_v13  ;;  %2913 = vmatpush.bf16.msrb.mxu2 %v9627_v3  ;;  %v9846_v1 = vld [vmem:[#allocation9 + $0x348] sm:$0xf]  ;;  %v12673_v3 = vld [vmem:[#allocation9 + $0x24c] sm:$0xf]  ;;  %v9704_v13 = vld [vmem:[#allocation9 + $0x238] sm:$0xf0] }
 0x1f8   : > { %v9847_v6 = vor.u32 %v12707_v2, %v9846_v1  ;;  %v9723_v7 = vor.u32 %v12673_v3, %v9720_v5  ;;  %v9707_v15 = vor.u32 %v12669_v12, %v9704_v13  ;;  %v12699_v18 = vld [vmem:[#allocation9 + $0x314] sm:$0xf0]  ;;  %v10146_v1 = vld [vmem:[#allocation12 + $0xa8] sm:$0xf] }
 0x1f9   : > { %v14517_v28 = vpack.c.bf16 %v1956_v19, %v1956_v19  ;;  %v9688_v19 = vld [vmem:[#allocation9 + $0x218] sm:$0xf0]  ;;  %v12782_v2 = vld [vmem:[#allocation12 + $0xb0] sm:$0xf0]  ;;  %v12738_v12 = vld [vmem:[#allocation21 + $0x50] sm:$0xff] }
 0x1fa   : > { %2905 = vmatmul.bf16.vlgmr.msrb.gmra.mxu1 %v14500_v60  ;;  %2878 = vmatpush.bf16.msra.mxu3 %v9687_v16  ;;  %v9768_v60 = vld [vmem:[#allocation9 + $0x2b8] sm:$0xf0]  ;;  %v12665_v16 = vld [vmem:[#allocation9 + $0x20c] sm:$0xf]  ;;  %v10147_v3 = vor.u32 %v12782_v2, %v10146_v1 }
 0x1fb   : > { %2788 = vmatmul.bf16.vlgmr.msrb.gmra.mxu0 %v14517_v28  ;;  %2914 = vmatpush.bf16.msrb.mxu2 %v9611_v21  ;;  %v9771_v43 = vor.u32 %v12685_v42, %v9768_v60  ;;  %v12725_v21 = vld [vmem:[#allocation9 + $0x3ec] sm:$0xf]  ;;  %v9864_v42 = vld [vmem:[#allocation9 + $0x378] sm:$0xf0]  ;;  %v12733_v60 = vld [vmem:[#allocation21 + $0x28] sm:$0xff] }
 0x1fc   : > { %2884 = vmatpush.bf16.msrb.mxu0 %v9927_v23  ;;  %v9815_v23 = vor.u32 %v12699_v18, %v9814_v17  ;;  %v12750_v13 = vld [vmem:[#allocation21 + $0xb0] sm:$0xff]  ;;  %v12737_v18 = vld [vmem:[#allocation21 + $0x48] sm:$0xff] }
 0x1fd   : > { %2879 = vmatmul.bf16.vlgmr.msra.gmra.mxu3 %v14509_v56  ;;  %v10194_v1 = vld [vmem:[#allocation12 + $0x108] sm:$0xf] }
 0x1fe   : > { %2923 = vmatpush.bf16.msrb.mxu3 %v9803_v24  ;;  %v1957_v33 = vpop.f32.mrf.mxu0  ;;  %v9691_v24 = vor.u32 %v12665_v16, %v9688_v19  ;;  %v12749_v16 = vld [vmem:[#allocation21 + $0xa8] sm:$0xff] }
 0x1ff   : > { %2915 = vmatpush.bf16.msrb.mxu2 %v9595_v35  ;;  %v12735_v35 = vld [vmem:[#allocation21 + $0x38] sm:$0xff]  ;;  %v9867_v33 = vor.u32 %v12709_v41, %v9864_v42  ;;  %v10110_v19 = vld [vmem:[#allocation12 + $0x60] sm:$0xf] }
 0x200   : > { %2885 = vmatpush.bf16.msrb.mxu0 %v9911_v36  ;;  %3213 = vmatpush.bf16.msra.mxu1 %v12735_v35  ;;  %v9899_v36 = vor.u32 %v12717_v31, %v9896_v32  ;;  %v12806_v31 = vld [vmem:[#allocation12 + $0x170] sm:$0xf0]  ;;  %v10230_v42 = vld [vmem:[#allocation12 + $0x150] sm:$0xf] }
 0x201   : > { %v10243_v32 = vor.u32 %v12806_v31, %v10242_v26  ;;  %v10314_v26 = vld [vmem:[#allocation12 + $0x1f8] sm:$0xf] }
 0x202   : > { %2924 = vmatpush.bf16.msrb.mxu3 %v9787_v37  ;;  %v12713_v37 = vld [vmem:[#allocation9 + $0x38c] sm:$0xf] }
 0x203   : > { %2916 = vmatpush.bf16.msrb.mxu2 %v9579_v44  ;;  %v9883_v39 = vor.u32 %v12713_v37, %v9880_v38  ;;  %v12705_v44 = vld [vmem:[#allocation9 + $0x34c] sm:$0xf]  ;;  %v12747_v38 = vld [vmem:[#allocation21 + $0x98] sm:$0xff] }
 0x204   : > { %2886 = vmatpush.bf16.msrb.mxu0 %v9895_v45  ;;  %3214 = vmatpush.bf16.msra.mxu1 %v12734_v40  ;;  %v9848_v45 = vld [vmem:[#allocation9 + $0x358] sm:$0xf0]  ;;  %v12767_v40 = vld [vmem:[#allocation12 + $0x38] sm:$0xf0] }
 0x206   : > { %2925 = vmatpush.bf16.msrb.mxu3 %v9771_v43  ;;  %v9851_v43 = vor.u32 %v12705_v44, %v9848_v45  ;;  %v12746_v44 = vld [vmem:[#allocation21 + $0x90] sm:$0xff]  ;;  %v10074_v45 = vld [vmem:[#allocation12 + $0x18] sm:$0xf] }
 0x207   : > { %2917 = vmatpush.bf16.msrb.mxu2 %v9563_v54  ;;  %v12743_v54 = vld [vmem:[#allocation21 + $0x78] sm:$0xff] }
 0x208   : > { %2887 = vmatpush.bf16.msrb.mxu0 %v9879_v55  ;;  %3215 = vmatpush.bf16.msra.mxu1 %v12733_v60  ;;  %v9819_v55 = vor.u32 %v12697_v51, %v9816_v8  ;;  %v12803_v60 = vld [vmem:[#allocation12 + $0x158] sm:$0xf0] }
 0x20a   : > { %2926 = vmatpush.bf16.msrb.mxu3 %v9755_v57  ;;  %2918 = vmatmul.bf16.vlgmr.msrb.gmra.mxu2 %v14504_v52  ;;  %v9928_v52 = vld [vmem:[#allocation9 + $0x3f8] sm:$0xf0]  ;;  %v12730_v57 = vld [vmem:[#allocation21 + $0x10] sm:$0xff] }
 0x20b   : > { %2840 = vmatmul.bf16.vlgmr.msra.gmra.mxu0 %v14517_v28  ;;  %v9931_v25 = vor.u32 %v12725_v21, %v9928_v52  ;;  %3226 = vmatpush.bf16.msra.mxu2 %v12743_v54  ;;  %v12773_v52 = vld [vmem:[#allocation12 + $0x68] sm:$0xf0]  ;;  %v10062_v54 = vld [vmem:[#allocation12] sm:$0xf] }
 0x20c   : > { %2888 = vmatpush.bf16.msrb.mxu0 %v9863_v63  ;;  %3216 = vmatpush.bf16.msra.mxu1 %v12732_v48  ;;  %v12728_v63 = vld [vmem:[#allocation21] sm:$0xff] }
 0x20e   : > { %2927 = vmatpush.bf16.msrb.mxu3 %v9739_v0  ;;  %v12740_v0 = vld [vmem:[#allocation21 + $0x60] sm:$0xff] }
 0x20f   : > { %3227 = vmatpush.bf16.msra.mxu2 %v12742_v58  ;;  %v10206_v58 = vld [vmem:[#allocation12 + $0x120] sm:$0xf] }
 0x210   : > { %2889 = vmatpush.bf16.msrb.mxu0 %v9847_v6  ;;  %3217 = vmatpush.bf16.msra.mxu1 %v12731_v53  ;;  %v12739_v6 = vld [vmem:[#allocation21 + $0x58] sm:$0xff]  ;;  %v12745_v53 = vld [vmem:[#allocation21 + $0x88] sm:$0xff] }
 0x212   : > { %2928 = vmatpush.bf16.msrb.mxu3 %v9723_v7  ;;  %v12751_v7 = vld [vmem:[#allocation21 + $0xb8] sm:$0xff] }
 0x213   : > { %3228 = vmatpush.bf16.msra.mxu2 %v12741_v61 }
 0x214   : > { %2890 = vmatpush.bf16.msrb.mxu0 %v9831_v14  ;;  %3218 = vmatpush.bf16.msra.mxu1 %v12730_v57  ;;  %v10122_v14 = vld [vmem:[#allocation12 + $0x78] sm:$0xf] }
 0x216   : > { %2929 = vmatpush.bf16.msrb.mxu3 %v9707_v15  ;;  %v12776_v15 = vld [vmem:[#allocation12 + $0x80] sm:$0xf0] }
 0x217   : > { %3229 = vmatpush.bf16.msra.mxu2 %v12740_v0  ;;  %v10123_v17 = vor.u32 %v12776_v15, %v10122_v14  ;;  %v12759_v0 = vld [vmem:[#allocation21 + $0xf8] sm:$0xff]  ;;  %v12791_v14 = vld [vmem:[#allocation12 + $0xf8] sm:$0xf0] }
 0x218   : > { %2891 = vmatpush.bf16.msrb.mxu0 %v9815_v23  ;;  %3219 = vmatpush.bf16.msra.mxu1 %v12729_v59  ;;  %v10111_v23 = vor.u32 %v12773_v52, %v10110_v19  ;;  %v12797_v59 = vld [vmem:[#allocation12 + $0x128] sm:$0xf0]  ;;  %v12757_v19 = vld [vmem:[#allocation21 + $0xe8] sm:$0xff]  ;;  %v10170_v52 = vld [vmem:[#allocation12 + $0xd8] sm:$0xf] }
 0x219   : > { %v10207_v61 = vor.u32 %v12797_v59, %v10206_v58  ;;  %v12753_v58 = vld [vmem:[#allocation21 + $0xc8] sm:$0xff]  ;;  %v10266_v59 = vld [vmem:[#allocation12 + $0x198] sm:$0xf] }
 0x21a   : > { %2930 = vmatpush.bf16.msrb.mxu3 %v9691_v24  ;;  %v10098_v24 = vld [vmem:[#allocation12 + $0x48] sm:$0xf] }
 0x21b   : > { %2892 = vmatmul.bf16.vlgmr.msrb.gmra.mxu0 %v14517_v28  ;;  %3230 = vmatpush.bf16.msra.mxu2 %v12739_v6  ;;  %v12830_v6 = vld [vmem:[#allocation12 + $0x230] sm:$0xf0] }
 0x21c   : > { %2936 = vmatpush.bf16.msra.mxu0 %v9931_v25  ;;  %3220 = vmatpush.bf16.msra.mxu1 %v12728_v63  ;;  %v12770_v25 = vld [vmem:[#allocation12 + $0x50] sm:$0xf0]  ;;  %v12744_v63 = vld [vmem:[#allocation21 + $0x80] sm:$0xff] }
 0x21d   : > { %2931 = vmatmul.bf16.vlgmr.msrb.gmra.mxu3 %v14509_v56  ;;  %v12701_v56 = vld [vmem:[#allocation9 + $0x32c] sm:$0xf]  ;;  %v10099_v35 = vor.u32 %v12770_v25, %v10098_v24 }
 0x21e   : > { %v9835_v49 = vor.u32 %v12701_v56, %v9832_v47  ;;  %3239 = vmatpush.bf16.msra.mxu3 %v12751_v7  ;;  %v10218_v56 = vld [vmem:[#allocation12 + $0x138] sm:$0xf] }
 0x21f   : > { %3231 = vmatpush.bf16.msra.mxu2 %v12738_v12 }
 0x220   : > { %2937 = vmatpush.bf16.msra.mxu0 %v9915_v29  ;;  %3761 = vmatpush.bf16.msrb.mxu1 %v10147_v3  ;;  %v12748_v29 = vld [vmem:[#allocation21 + $0xa0] sm:$0xff]  ;;  %v12794_v3 = vld [vmem:[#allocation12 + $0x110] sm:$0xf0] }
 0x222   : > { %3240 = vmatpush.bf16.msra.mxu3 %v12750_v13  ;;  %v10182_v13 = vld [vmem:[#allocation12 + $0xf0] sm:$0xf] }
 0x223   : > { %3232 = vmatpush.bf16.msra.mxu2 %v12737_v18  ;;  %v10183_v15 = vor.u32 %v12791_v14, %v10182_v13  ;;  %v12827_v18 = vld [vmem:[#allocation12 + $0x218] sm:$0xf0]  ;;  %v12809_v13 = vld [vmem:[#allocation12 + $0x188] sm:$0xf0] }
 0x224   : > { %2938 = vmatpush.bf16.msra.mxu0 %v9899_v36 }
 0x226   : > { %3241 = vmatpush.bf16.msra.mxu3 %v12749_v16 }
 0x227   : > { %3233 = vmatpush.bf16.msra.mxu2 %v12736_v27  ;;  %v12824_v27 = vld [vmem:[#allocation12 + $0x200] sm:$0xf0] }
 0x228   : > { %2939 = vmatpush.bf16.msra.mxu0 %v9883_v39  ;;  %v10086_v39 = vld [vmem:[#allocation12 + $0x30] sm:$0xf]  ;;  %v10315_v31 = vor.u32 %v12824_v27, %v10314_v26  ;;  %v12778_v26 = vld [vmem:[#allocation12 + $0x94] sm:$0xf]  ;;  %v10136_v27 = vld [vmem:[#allocation12 + $0x9c] sm:$0xf0] }
 0x229   : > { %v10087_v41 = vor.u32 %v12767_v40, %v10086_v39  ;;  %v10302_v39 = vld [vmem:[#allocation12 + $0x1e0] sm:$0xf]  ;;  %v12821_v40 = vld [vmem:[#allocation12 + $0x1e8] sm:$0xf0] }
 0x22a   : > { %3242 = vmatpush.bf16.msra.mxu3 %v12748_v29 }
 0x22b   : > { %3774 = vmatpush.bf16.msrb.mxu2 %v10243_v32  ;;  %v12756_v32 = vld [vmem:[#allocation21 + $0xe0] sm:$0xff] }
 0x22c   : > { %2940 = vmatpush.bf16.msra.mxu0 %v9867_v33  ;;  %v10231_v33 = vor.u32 %v12803_v60, %v10230_v42  ;;  %v10303_v42 = vor.u32 %v12821_v40, %v10302_v39  ;;  %v12755_v60 = vld [vmem:[#allocation21 + $0xd8] sm:$0xff]  ;;  %v12775_v40 = vld [vmem:[#allocation12 + $0x7c] sm:$0xf] }
 0x22d   : > { %v10208_v39 = vld [vmem:[#allocation12 + $0x12c] sm:$0xf0] }
 0x22e   : > { %3243 = vmatpush.bf16.msra.mxu3 %v12747_v38 }
 0x22f   : > { %3775 = vmatpush.bf16.msrb.mxu2 %v10231_v33  ;;  %v10290_v33 = vld [vmem:[#allocation12 + $0x1c8] sm:$0xf] }
 0x230   : > { %2941 = vmatpush.bf16.msra.mxu0 %v9851_v43  ;;  %v12764_v43 = vld [vmem:[#allocation12 + $0x20] sm:$0xf0] }
 0x231   : > { %v10075_v48 = vor.u32 %v12764_v43, %v10074_v45 }
 0x232   : > { %3244 = vmatpush.bf16.msra.mxu3 %v12746_v44  ;;  %v12818_v44 = vld [vmem:[#allocation12 + $0x1d0] sm:$0xf0] }
 0x234   : > { %2942 = vmatpush.bf16.msra.mxu0 %v9835_v49  ;;  %v12800_v49 = vld [vmem:[#allocation12 + $0x140] sm:$0xf0] }
 0x235   : > { %v10219_v51 = vor.u32 %v12800_v49, %v10218_v56  ;;  %v10291_v56 = vor.u32 %v12818_v44, %v10290_v33  ;;  %v10278_v49 = vld [vmem:[#allocation12 + $0x1b0] sm:$0xf] }
 0x236   : > { %3245 = vmatpush.bf16.msra.mxu3 %v12745_v53 }
 0x237   : > { %v14527_v62 = vpop.f32.mrf.mxu1  ;;  %3776 = vmatpush.bf16.msrb.mxu2 %v10219_v51  ;;  %v12815_v51 = vld [vmem:[#allocation12 + $0x1b8] sm:$0xf0] }
 0x238   : > { %2943 = vmatpush.bf16.msra.mxu0 %v9819_v55  ;;  %v12761_v55 = vld [vmem:[#allocation12 + $0x8] sm:$0xf0] }
 0x239   : > { %v10063_v57 = vor.u32 %v12761_v55, %v10062_v54  ;;  %v10279_v54 = vor.u32 %v12815_v51, %v10278_v49  ;;  %v10340_v51 = vld [vmem:[#allocation12 + $0x234] sm:$0xf0] }
 0x23a   : > { %3246 = vmatpush.bf16.msra.mxu3 %v12744_v63 }
 0x23b   : > { %2944 = vmatmul.bf16.vlgmr.msra.gmra.mxu0 %v14517_v28  ;;  %v10135_v28 = vor.u32 %v12779_v11, %v10134_v10  ;;  %3777 = vmatpush.bf16.msrb.mxu2 %v10207_v61  ;;  %v10195_v10 = vor.u32 %v12794_v3, %v10194_v1  ;;  %v12812_v61 = vld [vmem:[#allocation12 + $0x1a0] sm:$0xf0]  ;;  %v12805_v1 = vld [vmem:[#allocation12 + $0x16c] sm:$0xf]  ;;  %v10244_v3 = vld [vmem:[#allocation12 + $0x174] sm:$0xf0] }
 0x23c   : > { %3252 = vmatpush.bf16.msrb.mxu0 %v12759_v0 }
 0x23d   : > { %3762 = vmatpush.bf16.msrb.mxu1 %v10135_v28  ;;  %v12758_v28 = vld [vmem:[#allocation21 + $0xf0] sm:$0xff] }
 0x23f   : > { %v2752_v5 = vpop.f32.mrf.mxu1  ;;  %3778 = vmatpush.bf16.msrb.mxu2 %v10195_v10 }
 0x240   : > { %v10338_v5 = vld [vmem:[#allocation12 + $0x228] sm:$0xf]  ;;  %3253 = vmatpush.bf16.msrb.mxu0 %v12758_v28  ;;  %v12752_v28 = vld [vmem:[#allocation21 + $0xc0] sm:$0xff] }
 0x241   : > { %3763 = vmatpush.bf16.msrb.mxu1 %v10123_v17  ;;  %v10339_v11 = vor.u32 %v12830_v6, %v10338_v5  ;;  %v10326_v17 = vld [vmem:[#allocation12 + $0x210] sm:$0xf]  ;;  %v10267_v5 = vor.u32 %v12812_v61, %v10266_v59 }
 0x242   : > { %v10327_v16 = vor.u32 %v12827_v18, %v10326_v17  ;;  %v12781_v18 = vld [vmem:[#allocation12 + $0xac] sm:$0xf] }
 0x243   : > { %3787 = vmatpush.bf16.msrb.mxu3 %v10339_v11  ;;  %3779 = vmatpush.bf16.msrb.mxu2 %v10183_v15  ;;  %v10232_v15 = vld [vmem:[#allocation12 + $0x15c] sm:$0xf0] }
 0x244   : > { %3254 = vmatpush.bf16.msrb.mxu0 %v12757_v19 }
 0x245   : > { %3764 = vmatpush.bf16.msrb.mxu1 %v10111_v23  ;;  %v12788_v23 = vld [vmem:[#allocation12 + $0xe0] sm:$0xf0] }
 0x246   : > { %v10171_v25 = vor.u32 %v12788_v23, %v10170_v52 }
 0x247   : > { %v14529_v21 = vpop.f32.mrf.mxu1  ;;  %3788 = vmatpush.bf16.msrb.mxu3 %v10327_v16  ;;  %v10148_v16 = vld [vmem:[#allocation12 + $0xb4] sm:$0xf0] }
 0x248   : > { %3780 = vmatpush.bf16.msrb.mxu2 %v10171_v25  ;;  %3255 = vmatpush.bf16.msrb.mxu0 %v12756_v32  ;;  %v10220_v25 = vld [vmem:[#allocation12 + $0x144] sm:$0xf0]  ;;  %v10139_v32 = vor.u32 %v12778_v26, %v10136_v27  ;;  %v10304_v27 = vld [vmem:[#allocation12 + $0x1ec] sm:$0xf0] }
 0x249   : > { %3765 = vmatpush.bf16.msrb.mxu1 %v10099_v35  ;;  %v10158_v35 = vld [vmem:[#allocation12 + $0xc0] sm:$0xf] }
 0x24b   : > { %3789 = vmatpush.bf16.msrb.mxu3 %v10315_v31 }
 0x24c   : > { %3256 = vmatpush.bf16.msrb.mxu0 %v12755_v60 }
 0x24d   : > { %v14531_v36 = vpop.f32.mrf.mxu2  ;;  %3766 = vmatpush.bf16.msrb.mxu1 %v10087_v41  ;;  %v14537_v41 = vld [vmem:[#allocation11] sm:$0xf] }
 0x24e   : > { %v2093_v45 = vperm.slane %v14537_v41, 0  ;;  %v2094_v19 = vperm.slane %v14537_v41, 1 }
 0x24f   : > { %v2804_v37 = vpop.f32.mrf.mxu1  ;;  %3790 = vmatpush.bf16.msrb.mxu3 %v10303_v42  ;;  %v10124_v42 = vld [vmem:[#allocation12 + $0x84] sm:$0xf0] }
 0x250   : > { %v12785_v37 = vld [vmem:[#allocation12 + $0xc8] sm:$0xf0]  ;;  %v2751_v53 = vadd.f32 %v14527_v62, %v2093_v45  ;;  %v12802_v62 = vld [vmem:[#allocation12 + $0x154] sm:$0xf]  ;;  %v10127_v60 = vor.u32 %v12775_v40, %v10124_v42 }
 0x251   : > { %3767 = vmatpush.bf16.msrb.mxu1 %v10075_v48  ;;  %v10159_v38 = vor.u32 %v12785_v37, %v10158_v35  ;;  %v12754_v48 = vld [vmem:[#allocation21 + $0xd0] sm:$0xff]  ;;  %v10235_v23 = vor.u32 %v12802_v62, %v10232_v15  ;;  %v12796_v37 = vld [vmem:[#allocation12 + $0x124] sm:$0xf] }
 0x252   : > { %3257 = vmatpush.bf16.msrb.mxu0 %v12754_v48  ;;  %v2764_v55 = vadd.f32 %v14531_v36, %v2751_v53  ;;  %v10254_v36 = vld [vmem:[#allocation12 + $0x180] sm:$0xf]  ;;  %v10211_v44 = vor.u32 %v12796_v37, %v10208_v39  ;;  %v12793_v45 = vld [vmem:[#allocation12 + $0x10c] sm:$0xf]  ;;  %v12772_v53 = vld [vmem:[#allocation12 + $0x64] sm:$0xf] }
 0x253   : > { %3781 = vmatpush.bf16.msrb.mxu2 %v10159_v38  ;;  %3791 = vmatpush.bf16.msrb.mxu3 %v10291_v56  ;;  %v10255_v17 = vor.u32 %v12809_v13, %v10254_v36  ;;  %v2803_v38 = vadd.f32 %v14529_v21, %v2094_v19  ;;  %v10196_v56 = vld [vmem:[#allocation12 + $0x114] sm:$0xf0]  ;;  %v12829_v48 = vld [vmem:[#allocation12 + $0x22c] sm:$0xf]  ;;  %v12787_v36 = vld [vmem:[#allocation12 + $0xdc] sm:$0xf] }
 0x254   : > { %v10199_v61 = vor.u32 %v12793_v45, %v10196_v56  ;;  %v10172_v13 = vld [vmem:[#allocation12 + $0xe4] sm:$0xf0]  ;;  %v12831_v37 = vld [vmem:[#allocation12 + $0x238] sm:$0xf0] }
 0x255   : > { %v2765_v47 = vpop.f32.mrf.mxu2  ;;  %3768 = vmatpush.bf16.msrb.mxu1 %v10063_v57  ;;  %v10316_v15 = vld [vmem:[#allocation12 + $0x204] sm:$0xf0]  ;;  %v10175_v19 = vor.u32 %v12787_v36, %v10172_v13  ;;  %v10130_v36 = vld [vmem:[#allocation12 + $0x80] sm:$0xf] }
 0x256   : > { %3258 = vmatpush.bf16.msrb.mxu0 %v12753_v58 }
 0x257   : > { %v14533_v8 = vpop.f32.mrf.mxu1  ;;  %3792 = vmatpush.bf16.msrb.mxu3 %v10279_v54  ;;  %v10112_v54 = vld [vmem:[#allocation12 + $0x6c] sm:$0xf0] }
 0x258   : > { %v10115_v58 = vor.u32 %v12772_v53, %v10112_v54  ;;  %v12783_v53 = vld [vmem:[#allocation12 + $0xb8] sm:$0xf0]  ;;  %v10334_v54 = vld [vmem:[#allocation12 + $0x218] sm:$0xf] }
 0x25a   : > { %3259 = vmatpush.bf16.msrb.mxu0 %v12752_v28 }
 0x25b   : > { %3793 = vmatpush.bf16.msrb.mxu3 %v10267_v5  ;;  %v10328_v5 = vld [vmem:[#allocation12 + $0x21c] sm:$0xf0] }
 0x25d   : > { %v14535_v2 = vpop.f32.mrf.mxu2 }
 0x25e   : > { %v2816_v33 = vadd.f32 %v14535_v2, %v2803_v38  ;;  %v10184_v2 = vld [vmem:[#allocation12 + $0xfc] sm:$0xf0] }
 0x25f   : > { %v2856_v12 = vpop.f32.mrf.mxu1  ;;  %3794 = vmatpush.bf16.msrb.mxu3 %v10255_v17  ;;  %v12766_v17 = vld [vmem:[#allocation12 + $0x34] sm:$0xf] }
 0x260   : > { %v2776_v7 = vpop.f32.mrf.mxu3  ;;  %v10247_v12 = vor.u32 %v12805_v1, %v10244_v3  ;;  %v12826_v1 = vld [vmem:[#allocation12 + $0x214] sm:$0xf] }
 0x261   : > { %v2777_v63 = vadd.f32 %v2776_v7, %v2764_v55  ;;  %v10151_v7 = vor.u32 %v12781_v18, %v10148_v16  ;;  %v10331_v28 = vor.u32 %v12826_v1, %v10328_v5  ;;  %v10088_v18 = vld [vmem:[#allocation12 + $0x3c] sm:$0xf0]  ;;  %v12780_v1 = vld [vmem:[#allocation12 + $0xa0] sm:$0xf0]  ;;  %v12825_v5 = vld [vmem:[#allocation12 + $0x208] sm:$0xf0] }
 0x263   : > { %3800 = vmatpush.bf16.msra.mxu0 %v10151_v7  ;;  %v10091_v7 = vor.u32 %v12766_v17, %v10088_v18  ;;  %v12822_v17 = vld [vmem:[#allocation12 + $0x1f0] sm:$0xf0] }
 0x265   : > { %v2817_v24 = vpop.f32.mrf.mxu2 }
 0x266   : > { %v12799_v24 = vld [vmem:[#allocation12 + $0x13c] sm:$0xf] }
 0x267   : > { %v10223_v35 = vor.u32 %v12799_v24, %v10220_v25  ;;  %3801 = vmatpush.bf16.msra.mxu0 %v10139_v32  ;;  %v10160_v24 = vld [vmem:[#allocation12 + $0xcc] sm:$0xf0]  ;;  %v12820_v25 = vld [vmem:[#allocation12 + $0x1e4] sm:$0xf]  ;;  %v10076_v32 = vld [vmem:[#allocation12 + $0x24] sm:$0xf0] }
 0x268   : > { %v2778_v29 = vpop.f32.mrf.mxu3 }
 0x26b   : > { %3802 = vmatpush.bf16.msra.mxu0 %v10127_v60  ;;  %v10307_v60 = vor.u32 %v12820_v25, %v10304_v27  ;;  %v10298_v25 = vld [vmem:[#allocation12 + $0x1d0] sm:$0xf]  ;;  %v10434_v27 = vld [vmem:[#allocation12 + $0x2e8] sm:$0xf] }
 0x26d   : > { %v14540_v43 = vpop.f32.mrf.mxu2 }
 0x26f   : > { %3803 = vmatpush.bf16.msra.mxu0 %v10115_v58 }
 0x270   : > { %v14542_v47 = vpop.f32.mrf.mxu3 }
 0x271   : > { %v2829_v49 = vadd.f32 %v14542_v47, %v2816_v33  ;;  %v12817_v33 = vld [vmem:[#allocation12 + $0x1cc] sm:$0xf] }
 0x275   : > { %v2869_v0 = vpop.f32.mrf.mxu2 }
 0x276   : > { %v12790_v0 = vld [vmem:[#allocation12 + $0xf4] sm:$0xf] }
 0x277   : > { %v14546_v57 = vpop.f32.mrf.mxu1 }
 0x278   : > { %v2789_v6 = vpop.f32.mrf.mxu0  ;;  %v2830_v10 = vpop.f32.mrf.mxu3 }
 0x279   : > { %v2790_v11 = vadd.f32 %v2789_v6, %v2777_v63  ;;  %v10343_v63 = vor.u32 %v12829_v48, %v10340_v51  ;;  %v12769_v6 = vld [vmem:[#allocation12 + $0x4c] sm:$0xf]  ;;  %v10100_v10 = vld [vmem:[#allocation12 + $0x54] sm:$0xf0]  ;;  %v12760_v48 = vld [vmem:[#allocation12 + $0x4] sm:$0xf] }
 0x27a   : > { %v10103_v47 = vor.u32 %v12769_v6, %v10100_v10 }
 0x27b   : > { %v3013_v14 = vpack.c.bf16 %v2790_v11, %v2790_v11  ;;  %v2095_v11 = vperm.slane %v14537_v41, 2 }
 0x27c   : > { %3804 = vmatpush.bf16.msra.mxu0 %v10103_v47 }
 0x27d   : > { %3221 = vmatmul.bf16.vlgmr.msra.gmra.mxu1 %v3013_v14  ;;  %v12823_v14 = vld [vmem:[#allocation12 + $0x1fc] sm:$0xf]  ;;  %v2855_v26 = vadd.f32 %v14533_v8, %v2095_v11  ;;  %v10154_v8 = vld [vmem:[#allocation12 + $0xb0] sm:$0xf] }
 0x27e   : > { %3813 = vmatpush.bf16.msra.mxu1 %v10247_v12  ;;  %v10187_v12 = vor.u32 %v12790_v0, %v10184_v2  ;;  %v12814_v0 = vld [vmem:[#allocation12 + $0x1b4] sm:$0xf]  ;;  %v10142_v2 = vld [vmem:[#allocation12 + $0x98] sm:$0xf] }
 0x27f   : > { %v2908_v52 = vpop.f32.mrf.mxu1  ;;  %v2868_v39 = vadd.f32 %v14540_v43, %v2855_v26  ;;  %v10143_v47 = vor.u32 %v12780_v1, %v10142_v2  ;;  %v12819_v26 = vld [vmem:[#allocation12 + $0x1d8] sm:$0xf0]  ;;  %v12810_v2 = vld [vmem:[#allocation12 + $0x190] sm:$0xf0]  ;;  %v10398_v1 = vld [vmem:[#allocation12 + $0x2a0] sm:$0xf] }
 0x280   : > { %v2791_v29 = vpop.f32.mrf.mxu0  ;;  %v14549_v31 = vpop.f32.mrf.mxu3  ;;  %v10319_v52 = vor.u32 %v12823_v14, %v10316_v15  ;;  %3805 = vmatpush.bf16.msra.mxu0 %v10091_v7  ;;  %v12777_v14 = vld [vmem:[#allocation12 + $0x88] sm:$0xf0]  ;;  %v10310_v15 = vld [vmem:[#allocation12 + $0x1e8] sm:$0xf] }
 0x281   : > { %v12763_v29 = vld [vmem:[#allocation12 + $0x1c] sm:$0xf]  ;;  %v2881_v45 = vadd.f32 %v14549_v31, %v2868_v39  ;;  %v10280_v31 = vld [vmem:[#allocation12 + $0x1bc] sm:$0xf0]  ;;  %v10311_v7 = vor.u32 %v12822_v17, %v10310_v15  ;;  %v10106_v39 = vld [vmem:[#allocation12 + $0x50] sm:$0xf] }
 0x282   : > { %3814 = vmatpush.bf16.msra.mxu1 %v10235_v23  ;;  %v12784_v23 = vld [vmem:[#allocation12 + $0xc4] sm:$0xf]  ;;  %v10079_v38 = vor.u32 %v12763_v29, %v10076_v32  ;;  %v10283_v10 = vor.u32 %v12814_v0, %v10280_v31  ;;  %v12854_v29 = vld [vmem:[#allocation12 + $0x2f0] sm:$0xf0]  ;;  %v10262_v31 = vld [vmem:[#allocation12 + $0x188] sm:$0xf] }
 0x283   : > { %v10163_v42 = vor.u32 %v12784_v23, %v10160_v24  ;;  %v10118_v23 = vld [vmem:[#allocation12 + $0x68] sm:$0xf]  ;;  %v12774_v24 = vld [vmem:[#allocation12 + $0x70] sm:$0xf0]  ;;  %v10250_v15 = vld [vmem:[#allocation12 + $0x170] sm:$0xf] }
 0x284   : > { %3806 = vmatpush.bf16.msra.mxu0 %v10079_v38  ;;  %v10299_v38 = vor.u32 %v12819_v26, %v10298_v25  ;;  %v12807_v17 = vld [vmem:[#allocation12 + $0x178] sm:$0xf0] }
 0x285   : > { %v10251_v26 = vor.u32 %v12807_v17, %v10250_v15 }
 0x286   : > { %3815 = vmatpush.bf16.msra.mxu1 %v10223_v35  ;;  %v10346_v35 = vld [vmem:[#allocation12 + $0x230] sm:$0xf] }
 0x287   : > { %v10347_v56 = vor.u32 %v12831_v37, %v10346_v35  ;;  %v10119_v37 = vor.u32 %v12774_v24, %v10118_v23  ;;  %v10424_v24 = vld [vmem:[#allocation12 + $0x2dc] sm:$0xf0] }
 0x288   : > { %v2841_v55 = vpop.f32.mrf.mxu0  ;;  %v2882_v21 = vpop.f32.mrf.mxu3 }
 0x289   : > { %v2842_v59 = vadd.f32 %v2841_v55, %v2829_v49  ;;  %v10064_v49 = vld [vmem:[#allocation12 + $0xc] sm:$0xf0]  ;;  %v12828_v55 = vld [vmem:[#allocation12 + $0x220] sm:$0xf0] }
 0x28a   : > { %3816 = vmatpush.bf16.msra.mxu1 %v10211_v44  ;;  %v10292_v44 = vld [vmem:[#allocation12 + $0x1d4] sm:$0xf0]  ;;  %v10067_v21 = vor.u32 %v12760_v48, %v10064_v49 }
 0x28b   : > { %v3014_v3 = vpack.c.bf16 %v2842_v59, %v2842_v59  ;;  %v10295_v58 = vor.u32 %v12817_v33, %v10292_v44  ;;  %v12816_v33 = vld [vmem:[#allocation12 + $0x1c0] sm:$0xf0]  ;;  %v10422_v44 = vld [vmem:[#allocation12 + $0x2d0] sm:$0xf]  ;;  %v10094_v49 = vld [vmem:[#allocation12 + $0x38] sm:$0xf] }
 0x28c   : > { %3807 = vmatpush.bf16.msra.mxu0 %v10067_v21  ;;  %v10410_v21 = vld [vmem:[#allocation12 + $0x2b8] sm:$0xf] }
 0x28d   : > { %3234 = vmatmul.bf16.vlgmr.msra.gmra.mxu2 %v3014_v3  ;;  %3769 = vmatmul.bf16.vlgmr.msrb.gmra.mxu1 %v14475_v50  ;;  %v14556_v62 = vpop.f32.mrf.mxu2  ;;  %v10322_v3 = vld [vmem:[#allocation12 + $0x200] sm:$0xf] }
 0x28e   : > { %3817 = vmatpush.bf16.msra.mxu1 %v10199_v61  ;;  %3826 = vmatpush.bf16.msra.mxu2 %v10343_v63  ;;  %v10155_v61 = vor.u32 %v12783_v53, %v10154_v8  ;;  %v10335_v63 = vor.u32 %v12828_v55, %v10334_v54  ;;  %v10323_v11 = vor.u32 %v12825_v5, %v10322_v3  ;;  %v12768_v53 = vld [vmem:[#allocation12 + $0x40] sm:$0xf0]  ;;  %v10274_v54 = vld [vmem:[#allocation12 + $0x1a0] sm:$0xf]  ;;  %v12813_v55 = vld [vmem:[#allocation12 + $0x1a8] sm:$0xf0] }
 0x28f   : > { %v12845_v3 = vld [vmem:[#allocation12 + $0x2a8] sm:$0xf0] }
 0x290   : > { %v2843_v16 = vpop.f32.mrf.mxu0  ;;  %v12853_v5 = vld [vmem:[#allocation12 + $0x2ec] sm:$0xf] }
 0x291   : > { %v10131_v16 = vor.u32 %v12777_v14, %v10130_v36  ;;  %v12762_v36 = vld [vmem:[#allocation12 + $0x10] sm:$0xf0] }
 0x292   : > { %3818 = vmatpush.bf16.msra.mxu1 %v10187_v12  ;;  %3827 = vmatpush.bf16.msra.mxu2 %v10331_v28  ;;  %v12811_v12 = vld [vmem:[#allocation12 + $0x19c] sm:$0xf]  ;;  %v10268_v28 = vld [vmem:[#allocation12 + $0x1a4] sm:$0xf0] }
 0x293   : > { %v10271_v18 = vor.u32 %v12811_v12, %v10268_v28  ;;  %v10263_v12 = vor.u32 %v12810_v2, %v10262_v31  ;;  %v10070_v28 = vld [vmem:[#allocation12 + $0x8] sm:$0xf]  ;;  %v10350_v31 = vld [vmem:[#allocation12 + $0x240] sm:$0xf]  ;;  %v12833_v2 = vld [vmem:[#allocation12 + $0x248] sm:$0xf0] }
 0x294   : > { %v10071_v25 = vor.u32 %v12762_v36, %v10070_v28  ;;  %v10351_v36 = vor.u32 %v12833_v2, %v10350_v31  ;;  %v10626_v31 = vld [vmem:[#allocation12 + $0x468] sm:$0xf]  ;;  %v12902_v2 = vld [vmem:[#allocation12 + $0x470] sm:$0xf0] }
 0x295   : > { %v2921_v40 = vpop.f32.mrf.mxu2 }
 0x296   : > { %3819 = vmatpush.bf16.msra.mxu1 %v10175_v19  ;;  %3828 = vmatpush.bf16.msra.mxu2 %v10319_v52  ;;  %v12808_v19 = vld [vmem:[#allocation12 + $0x184] sm:$0xf]  ;;  %v10256_v52 = vld [vmem:[#allocation12 + $0x18c] sm:$0xf0]  ;;  %v10435_v40 = vor.u32 %v12854_v29, %v10434_v27 }
 0x297   : > { %v10259_v35 = vor.u32 %v12808_v19, %v10256_v52  ;;  %v10530_v19 = vld [vmem:[#allocation12 + $0x3a8] sm:$0xf]  ;;  %v12878_v52 = vld [vmem:[#allocation12 + $0x3b0] sm:$0xf0] }
 0x298   : > { %v2893_v51 = vpop.f32.mrf.mxu0  ;;  %v10531_v29 = vor.u32 %v12878_v52, %v10530_v19  ;;  %v10376_v19 = vld [vmem:[#allocation12 + $0x27c] sm:$0xf0]  ;;  %v12874_v52 = vld [vmem:[#allocation12 + $0x394] sm:$0xf] }
 0x299   : > { %v2894_v43 = vadd.f32 %v2893_v51, %v2881_v45  ;;  %v12851_v45 = vld [vmem:[#allocation12 + $0x2d8] sm:$0xf0] }
 0x29a   : > { %3820 = vmatpush.bf16.msra.mxu1 %v10163_v42  ;;  %3829 = vmatpush.bf16.msra.mxu2 %v10307_v60  ;;  %v12771_v42 = vld [vmem:[#allocation12 + $0x58] sm:$0xf0]  ;;  %v10286_v60 = vld [vmem:[#allocation12 + $0x1b8] sm:$0xf]  ;;  %v10423_v51 = vor.u32 %v12851_v45, %v10422_v44 }
 0x29b   : > { %v3015_v59 = vpack.c.bf16 %v2894_v43, %v2894_v43  ;;  %v10107_v8 = vor.u32 %v12771_v42, %v10106_v39  ;;  %v10287_v48 = vor.u32 %v12816_v33, %v10286_v60  ;;  %v12848_v43 = vld [vmem:[#allocation12 + $0x2c0] sm:$0xf0]  ;;  %v12839_v39 = vld [vmem:[#allocation12 + $0x278] sm:$0xf0]  ;;  %v10412_v33 = vld [vmem:[#allocation12 + $0x2c4] sm:$0xf0] }
 0x29c   : > { %v10411_v0 = vor.u32 %v12848_v43, %v10410_v21  ;;  %v12875_v42 = vld [vmem:[#allocation12 + $0x398] sm:$0xf0]  ;;  %v12872_v21 = vld [vmem:[#allocation12 + $0x380] sm:$0xf0] }
 0x29d   : > { %3247 = vmatmul.bf16.vlgmr.msra.gmra.mxu3 %v3015_v59  ;;  %3782 = vmatmul.bf16.vlgmr.msrb.gmra.mxu2 %v14483_v9  ;;  %v10082_v59 = vld [vmem:[#allocation12 + $0x20] sm:$0xf]  ;;  %v12847_v60 = vld [vmem:[#allocation12 + $0x2bc] sm:$0xf]  ;;  %v12844_v43 = vld [vmem:[#allocation12 + $0x2a4] sm:$0xf] }
 0x29e   : > { %3865 = vmatpush.bf16.msrb.mxu1 %v10347_v56  ;;  %3830 = vmatpush.bf16.msra.mxu2 %v10295_v58  ;;  %v2096_v56 = vperm.slane %v14537_v41, 3  ;;  %v10095_v58 = vor.u32 %v12768_v53, %v10094_v49  ;;  %v10275_v41 = vor.u32 %v12813_v55, %v10274_v54  ;;  %v10362_v49 = vld [vmem:[#allocation12 + $0x258] sm:$0xf]  ;;  %v10415_v53 = vor.u32 %v12847_v60, %v10412_v33  ;;  %v12836_v54 = vld [vmem:[#allocation12 + $0x260] sm:$0xf0] }
 0x29f   : > { %3821 = vmatmul.bf16.vlgmr.msra.gmra.mxu1 %v14483_v9  ;;  %3839 = vmatpush.bf16.msra.mxu3 %v10155_v61  ;;  %v12765_v61 = vld [vmem:[#allocation12 + $0x28] sm:$0xf0]  ;;  %v10506_v55 = vld [vmem:[#allocation12 + $0x378] sm:$0xf]  ;;  %v10178_v60 = vld [vmem:[#allocation12 + $0xe0] sm:$0xf] }
 0x2a0   : > { %v14563_v6 = vpop.f32.mrf.mxu3  ;;  %v2895_v13 = vpop.f32.mrf.mxu0  ;;  %v12789_v33 = vld [vmem:[#allocation12 + $0xe8] sm:$0xf0] }
 0x2a2   : > { %3866 = vmatpush.bf16.msrb.mxu1 %v10335_v63  ;;  %3831 = vmatpush.bf16.msra.mxu2 %v10283_v10  ;;  %v2907_v63 = vadd.f32 %v14546_v57, %v2096_v56  ;;  %v10436_v10 = vld [vmem:[#allocation12 + $0x2f4] sm:$0xf0]  ;;  %v10399_v57 = vor.u32 %v12845_v3, %v10398_v1  ;;  %v10494_v3 = vld [vmem:[#allocation12 + $0x360] sm:$0xf] }
 0x2a3   : > { %3840 = vmatpush.bf16.msra.mxu3 %v10143_v47  ;;  %v10439_v14 = vor.u32 %v12853_v5, %v10436_v10  ;;  %v12869_v5 = vld [vmem:[#allocation12 + $0x368] sm:$0xf0] }
 0x2a4   : > { %v2920_v47 = vadd.f32 %v14556_v62, %v2907_v63  ;;  %v12850_v62 = vld [vmem:[#allocation12 + $0x2d4] sm:$0xf]  ;;  %v10507_v63 = vor.u32 %v12872_v21, %v10506_v55  ;;  %v12841_v10 = vld [vmem:[#allocation12 + $0x28c] sm:$0xf]  ;;  %v10538_v55 = vld [vmem:[#allocation12 + $0x3b0] sm:$0xf] }
 0x2a5   : > { %v12879_v21 = vld [vmem:[#allocation12 + $0x3b8] sm:$0xf0] }
 0x2a6   : > { %3867 = vmatpush.bf16.msrb.mxu1 %v10323_v11  ;;  %3832 = vmatpush.bf16.msra.mxu2 %v10271_v18  ;;  %v10083_v11 = vor.u32 %v12765_v61, %v10082_v59  ;;  %v2933_v13 = vadd.f32 %v14563_v6, %v2920_v47  ;;  %v10386_v18 = vld [vmem:[#allocation12 + $0x288] sm:$0xf]  ;;  %v10363_v61 = vor.u32 %v12836_v54, %v10362_v49  ;;  %v10388_v47 = vld [vmem:[#allocation12 + $0x294] sm:$0xf0]  ;;  %v10352_v49 = vld [vmem:[#allocation12 + $0x24c] sm:$0xf0] }
 0x2a7   : > { %3841 = vmatpush.bf16.msra.mxu3 %v10131_v16  ;;  %v10214_v59 = vld [vmem:[#allocation12 + $0x128] sm:$0xf]  ;;  %v10391_v15 = vor.u32 %v12841_v10, %v10388_v47  ;;  %v10179_v54 = vor.u32 %v12789_v33, %v10178_v60  ;;  %v12901_v10 = vld [vmem:[#allocation12 + $0x46c] sm:$0xf]  ;;  %v10590_v33 = vld [vmem:[#allocation12 + $0x420] sm:$0xf] }
 0x2a8   : > { %v2934_v32 = vpop.f32.mrf.mxu3 }
 0x2a9   : > { %v10238_v32 = vld [vmem:[#allocation12 + $0x158] sm:$0xf] }
 0x2aa   : > { %3868 = vmatpush.bf16.msrb.mxu1 %v10311_v7  ;;  %3833 = vmatpush.bf16.msra.mxu2 %v10259_v35  ;;  %v12842_v7 = vld [vmem:[#allocation12 + $0x290] sm:$0xf0]  ;;  %v12804_v35 = vld [vmem:[#allocation12 + $0x160] sm:$0xf0] }
 0x2ab   : > { %3842 = vmatpush.bf16.msra.mxu3 %v10119_v37  ;;  %v10387_v6 = vor.u32 %v12842_v7, %v10386_v18  ;;  %v10374_v37 = vld [vmem:[#allocation12 + $0x270] sm:$0xf]  ;;  %v10239_v44 = vor.u32 %v12804_v35, %v10238_v32  ;;  %v10482_v18 = vld [vmem:[#allocation12 + $0x348] sm:$0xf]  ;;  %v12838_v7 = vld [vmem:[#allocation12 + $0x274] sm:$0xf] }
 0x2ac   : > { %v10375_v45 = vor.u32 %v12839_v39, %v10374_v37  ;;  %v12863_v32 = vld [vmem:[#allocation12 + $0x338] sm:$0xf0]  ;;  %v10364_v37 = vld [vmem:[#allocation12 + $0x264] sm:$0xf0] }
 0x2ad   : > { %3795 = vmatmul.bf16.vlgmr.msrb.gmra.mxu3 %v14461_v22  ;;  %3834 = vmatmul.bf16.vlgmr.msra.gmra.mxu2 %v14461_v22  ;;  %v12835_v35 = vld [vmem:[#allocation12 + $0x25c] sm:$0xf]  ;;  %v10508_v39 = vld [vmem:[#allocation12 + $0x384] sm:$0xf0] }
 0x2ae   : > { %3869 = vmatpush.bf16.msrb.mxu1 %v10299_v38  ;;  %4368 = vmatpush.bf16.msrb.mxu2 %v10435_v40  ;;  %v10427_v38 = vor.u32 %v12850_v62, %v10424_v24  ;;  %v10518_v40 = vld [vmem:[#allocation12 + $0x390] sm:$0xf] }
 0x2af   : > { %3843 = vmatpush.bf16.msra.mxu3 %v10107_v8  ;;  %v10519_v56 = vor.u32 %v12875_v42, %v10518_v40  ;;  %v10226_v8 = vld [vmem:[#allocation12 + $0x140] sm:$0xf] }
 0x2b2   : > { %3870 = vmatpush.bf16.msrb.mxu1 %v10287_v48  ;;  %4369 = vmatpush.bf16.msrb.mxu2 %v10423_v51  ;;  %v12801_v48 = vld [vmem:[#allocation12 + $0x148] sm:$0xf0] }
 0x2b3   : > { %3844 = vmatpush.bf16.msra.mxu3 %v10095_v58  ;;  %v10400_v58 = vld [vmem:[#allocation12 + $0x2ac] sm:$0xf0] }
 0x2b4   : > { %v10403_v1 = vor.u32 %v12844_v43, %v10400_v58  ;;  %v10166_v58 = vld [vmem:[#allocation12 + $0xc8] sm:$0xf] }
 0x2b6   : > { %3871 = vmatpush.bf16.msrb.mxu1 %v10275_v41  ;;  %4370 = vmatpush.bf16.msrb.mxu2 %v10411_v0  ;;  %v10227_v41 = vor.u32 %v12801_v48, %v10226_v8  ;;  %v12798_v0 = vld [vmem:[#allocation12 + $0x130] sm:$0xf0]  ;;  %v12860_v8 = vld [vmem:[#allocation12 + $0x320] sm:$0xf0] }
 0x2b7   : > { %3845 = vmatpush.bf16.msra.mxu3 %v10083_v11  ;;  %v12877_v11 = vld [vmem:[#allocation12 + $0x3ac] sm:$0xf]  ;;  %v10215_v28 = vor.u32 %v12798_v0, %v10214_v59  ;;  %v12832_v48 = vld [vmem:[#allocation12 + $0x244] sm:$0xf]  ;;  %v10446_v59 = vld [vmem:[#allocation12 + $0x300] sm:$0xf] }
 0x2b8   : > { %v2945_v16 = vpop.f32.mrf.mxu0  ;;  %v12857_v0 = vld [vmem:[#allocation12 + $0x308] sm:$0xf0] }
 0x2b9   : > { %v2946_v23 = vadd.f32 %v2945_v16, %v2933_v13  ;;  %v10495_v13 = vor.u32 %v12869_v5, %v10494_v3  ;;  %v12866_v16 = vld [vmem:[#allocation12 + $0x350] sm:$0xf0]  ;;  %v12865_v3 = vld [vmem:[#allocation12 + $0x34c] sm:$0xf]  ;;  %v10484_v5 = vld [vmem:[#allocation12 + $0x354] sm:$0xf0] }
 0x2ba   : > { %3872 = vmatpush.bf16.msrb.mxu1 %v10263_v12  ;;  %4371 = vmatpush.bf16.msrb.mxu2 %v10399_v57  ;;  %v10532_v12 = vld [vmem:[#allocation12 + $0x3b4] sm:$0xf0]  ;;  %v10202_v57 = vld [vmem:[#allocation12 + $0x110] sm:$0xf]  ;;  %v10483_v24 = vor.u32 %v12866_v16, %v10482_v18  ;;  %v12862_v16 = vld [vmem:[#allocation12 + $0x334] sm:$0xf] }
 0x2bb   : > { %v3016_v27 = vpack.c.bf16 %v2946_v23, %v2946_v23  ;;  %3846 = vmatpush.bf16.msra.mxu3 %v10071_v25  ;;  %v10535_v17 = vor.u32 %v12877_v11, %v10532_v12  ;;  %v10520_v23 = vld [vmem:[#allocation12 + $0x39c] sm:$0xf0]  ;;  %v10190_v25 = vld [vmem:[#allocation12 + $0xf8] sm:$0xf] }
 0x2bc   : > { %v10628_v11 = vld [vmem:[#allocation12 + $0x474] sm:$0xf0] }
 0x2bd   : > { %3260 = vmatmul.bf16.vlgmr.msrb.gmra.mxu0 %v3016_v27  ;;  %3873 = vmatmul.bf16.vlgmr.msrb.gmra.mxu1 %v14461_v22  ;;  %v10379_v27 = vor.u32 %v12838_v7, %v10376_v19  ;;  %v10526_v12 = vld [vmem:[#allocation12 + $0x398] sm:$0xf]  ;;  %v10472_v7 = vld [vmem:[#allocation12 + $0x33c] sm:$0xf0]  ;;  %v12898_v19 = vld [vmem:[#allocation12 + $0x454] sm:$0xf] }
 0x2be   : > { %4407 = vmatpush.bf16.msra.mxu1 %v10439_v14  ;;  %3852 = vmatpush.bf16.msrb.mxu0 %v10251_v26  ;;  %v12795_v14 = vld [vmem:[#allocation12 + $0x118] sm:$0xf0]  ;;  %v12792_v26 = vld [vmem:[#allocation12 + $0x100] sm:$0xf0] }
 0x2bf   : > { %4372 = vmatpush.bf16.msrb.mxu2 %v10387_v6  ;;  %4381 = vmatpush.bf16.msrb.mxu3 %v10531_v29  ;;  %v10203_v62 = vor.u32 %v12795_v14, %v10202_v57  ;;  %v10523_v6 = vor.u32 %v12874_v52, %v10520_v23  ;;  %v10470_v29 = vld [vmem:[#allocation12 + $0x330] sm:$0xf]  ;;  %v10191_v40 = vor.u32 %v12792_v26, %v10190_v25  ;;  %v10616_v52 = vld [vmem:[#allocation12 + $0x45c] sm:$0xf0]  ;;  %v10602_v26 = vld [vmem:[#allocation12 + $0x438] sm:$0xf] }
 0x2c0   : > { %v2947_v51 = vpop.f32.mrf.mxu0  ;;  %3847 = vmatmul.bf16.vlgmr.msra.gmra.mxu3 %v14475_v50  ;;  %v10471_v42 = vor.u32 %v12863_v32, %v10470_v29  ;;  %v10487_v57 = vor.u32 %v12865_v3, %v10484_v5  ;;  %v10614_v14 = vld [vmem:[#allocation12 + $0x450] sm:$0xf]  ;;  %v10514_v23 = vld [vmem:[#allocation12 + $0x380] sm:$0xf]  ;;  %v10475_v25 = vor.u32 %v12862_v16, %v10472_v7  ;;  %v12859_v32 = vld [vmem:[#allocation12 + $0x31c] sm:$0xf] }
 0x2c1   : > { %v12868_v51 = vld [vmem:[#allocation12 + $0x364] sm:$0xf]  ;;  %v10610_v16 = vld [vmem:[#allocation12 + $0x440] sm:$0xf]  ;;  %v12897_v7 = vld [vmem:[#allocation12 + $0x448] sm:$0xf0] }
 0x2c2   : > { %4408 = vmatpush.bf16.msra.mxu1 %v10427_v38  ;;  %3853 = vmatpush.bf16.msrb.mxu0 %v10239_v44  ;;  %v12871_v38 = vld [vmem:[#allocation12 + $0x37c] sm:$0xf]  ;;  %v10367_v44 = vor.u32 %v12835_v35, %v10364_v37  ;;  %v10460_v35 = vld [vmem:[#allocation12 + $0x324] sm:$0xf0]  ;;  %v12864_v3 = vld [vmem:[#allocation12 + $0x340] sm:$0xf0] }
 0x2c3   : > { %4373 = vmatpush.bf16.msrb.mxu2 %v10375_v45  ;;  %4382 = vmatpush.bf16.msrb.mxu3 %v10519_v56  ;;  %v10511_v45 = vor.u32 %v12871_v38, %v10508_v39  ;;  %v10458_v56 = vld [vmem:[#allocation12 + $0x318] sm:$0xf]  ;;  %v12895_v37 = vld [vmem:[#allocation12 + $0x43c] sm:$0xf]  ;;  %v10604_v38 = vld [vmem:[#allocation12 + $0x444] sm:$0xf0]  ;;  %v10463_v60 = vor.u32 %v12859_v32, %v10460_v35 }
 0x2c4   : > { %v10459_v43 = vor.u32 %v12860_v8, %v10458_v56  ;;  %v10502_v39 = vld [vmem:[#allocation12 + $0x368] sm:$0xf]  ;;  %v12856_v8 = vld [vmem:[#allocation12 + $0x304] sm:$0xf]  ;;  %v12894_v35 = vld [vmem:[#allocation12 + $0x430] sm:$0xf0] }
 0x2c6   : > { %4409 = vmatpush.bf16.msra.mxu1 %v10415_v53  ;;  %3854 = vmatpush.bf16.msrb.mxu0 %v10227_v41  ;;  %v10496_v53 = vld [vmem:[#allocation12 + $0x36c] sm:$0xf0]  ;;  %v12786_v41 = vld [vmem:[#allocation12 + $0xd0] sm:$0xf0] }
 0x2c7   : > { %4374 = vmatpush.bf16.msrb.mxu2 %v10363_v61  ;;  %4383 = vmatpush.bf16.msrb.mxu3 %v10507_v63  ;;  %v10355_v61 = vor.u32 %v12832_v48, %v10352_v49  ;;  %v10499_v63 = vor.u32 %v12868_v51, %v10496_v53  ;;  %v10167_v47 = vor.u32 %v12786_v41, %v10166_v58  ;;  %v10448_v48 = vld [vmem:[#allocation12 + $0x30c] sm:$0xf0]  ;;  %v12892_v49 = vld [vmem:[#allocation12 + $0x424] sm:$0xf]  ;;  %v10578_v41 = vld [vmem:[#allocation12 + $0x408] sm:$0xf] }
 0x2c8   : > { %v10592_v51 = vld [vmem:[#allocation12 + $0x42c] sm:$0xf0]  ;;  %v10451_v58 = vor.u32 %v12856_v8, %v10448_v48  ;;  %v12880_v8 = vld [vmem:[#allocation12 + $0x3c4] sm:$0xf] }
 0x2c9   : > { %v10490_v53 = vld [vmem:[#allocation12 + $0x350] sm:$0xf] }
 0x2ca   : > { %4410 = vmatpush.bf16.msra.mxu1 %v10403_v1  ;;  %3855 = vmatpush.bf16.msrb.mxu0 %v10215_v28  ;;  %v10539_v1 = vor.u32 %v12879_v21, %v10538_v55  ;;  %v12876_v28 = vld [vmem:[#allocation12 + $0x3a0] sm:$0xf0]  ;;  %v10634_v21 = vld [vmem:[#allocation12 + $0x470] sm:$0xf] }
 0x2cb   : > { %4375 = vmatpush.bf16.msrb.mxu2 %v10351_v36  ;;  %4384 = vmatpush.bf16.msrb.mxu3 %v10495_v13  ;;  %v10447_v36 = vor.u32 %v12857_v0, %v10446_v59  ;;  %v10627_v13 = vor.u32 %v12902_v2, %v10626_v31  ;;  %v10527_v18 = vor.u32 %v12876_v28, %v10526_v12  ;;  %v12890_v59 = vld [vmem:[#allocation12 + $0x410] sm:$0xf0]  ;;  %v12889_v0 = vld [vmem:[#allocation12 + $0x40c] sm:$0xf]  ;;  %v10580_v2 = vld [vmem:[#allocation12 + $0x414] sm:$0xf0] }
 0x2cc   : > { %v10579_v5 = vor.u32 %v12890_v59, %v10578_v41  ;;  %v12887_v12 = vld [vmem:[#allocation12 + $0x3f8] sm:$0xf0]  ;;  %v10583_v28 = vor.u32 %v12889_v0, %v10580_v2  ;;  %v10544_v48 = vld [vmem:[#allocation12 + $0x3cc] sm:$0xf0]  ;;  %v10430_v59 = vld [vmem:[#allocation12 + $0x2d8] sm:$0xf] }
 0x2cd   : > { %3808 = vmatmul.bf16.vlgmr.msra.gmra.mxu0 %v14475_v50  ;;  %v10547_v41 = vor.u32 %v12880_v8, %v10544_v48  ;;  %v12925_v8 = vld [vmem:[#allocation15 + $0xa4] sm:$0xf0]  ;;  %v11070_v48 = vld [vmem:[#allocation15 + $0x360] sm:$0xf] }
 0x2ce   : > { %4411 = vmatpush.bf16.msra.mxu1 %v10391_v15  ;;  %3856 = vmatpush.bf16.msrb.mxu0 %v10203_v62  ;;  %v12899_v15 = vld [vmem:[#allocation12 + $0x458] sm:$0xf0]  ;;  %v12873_v62 = vld [vmem:[#allocation12 + $0x388] sm:$0xf0] }
 0x2cf   : > { %4420 = vmatpush.bf16.msra.mxu2 %v10535_v17  ;;  %4385 = vmatpush.bf16.msrb.mxu3 %v10483_v24  ;;  %v10631_v17 = vor.u32 %v12901_v10, %v10628_v11  ;;  %v10615_v24 = vor.u32 %v12899_v15, %v10614_v14  ;;  %v10515_v29 = vor.u32 %v12873_v62, %v10514_v23  ;;  %v10622_v10 = vld [vmem:[#allocation12 + $0x458] sm:$0xf]  ;;  %v10566_v11 = vld [vmem:[#allocation12 + $0x3f0] sm:$0xf]  ;;  %v10568_v14 = vld [vmem:[#allocation12 + $0x3fc] sm:$0xf0] }
 0x2d0   : > { %4376 = vmatmul.bf16.vlgmr.msrb.gmra.mxu2 %v14475_v50  ;;  %v10466_v15 = vld [vmem:[#allocation12 + $0x320] sm:$0xf] }
 0x2d2   : > { %4412 = vmatpush.bf16.msra.mxu1 %v10379_v27  ;;  %3857 = vmatpush.bf16.msrb.mxu0 %v10191_v40  ;;  %v12896_v27 = vld [vmem:[#allocation12 + $0x440] sm:$0xf0]  ;;  %v12870_v40 = vld [vmem:[#allocation12 + $0x370] sm:$0xf0] }
 0x2d3   : > { %4421 = vmatpush.bf16.msra.mxu2 %v10523_v6  ;;  %4386 = vmatpush.bf16.msrb.mxu3 %v10471_v42  ;;  %v10619_v6 = vor.u32 %v12898_v19, %v10616_v52  ;;  %v10603_v42 = vor.u32 %v12896_v27, %v10602_v26  ;;  %v10503_v56 = vor.u32 %v12870_v40, %v10502_v39  ;;  %v10554_v19 = vld [vmem:[#allocation12 + $0x3d8] sm:$0xf]  ;;  %v12884_v52 = vld [vmem:[#allocation12 + $0x3e0] sm:$0xf0]  ;;  %v10454_v27 = vld [vmem:[#allocation12 + $0x308] sm:$0xf] }
 0x2d4   : > { %v10611_v26 = vor.u32 %v12897_v7, %v10610_v16  ;;  %v10555_v32 = vor.u32 %v12884_v52, %v10554_v19  ;;  %v10542_v39 = vld [vmem:[#allocation12 + $0x3c0] sm:$0xf]  ;;  %v12881_v40 = vld [vmem:[#allocation12 + $0x3c8] sm:$0xf0]  ;;  %v11118_v16 = vld [vmem:[#allocation15 + $0x3c0] sm:$0xf] }
 0x2d5   : > { %v13027_v7 = vld [vmem:[#allocation15 + $0x3d4] sm:$0xf0]  ;;  %v10406_v52 = vld [vmem:[#allocation12 + $0x2a8] sm:$0xf] }
 0x2d6   : > { %4413 = vmatpush.bf16.msra.mxu1 %v10367_v44  ;;  %3858 = vmatpush.bf16.msrb.mxu0 %v10179_v54  ;;  %v12893_v44 = vld [vmem:[#allocation12 + $0x428] sm:$0xf0]  ;;  %v12867_v54 = vld [vmem:[#allocation12 + $0x358] sm:$0xf0] }
 0x2d7   : > { %4422 = vmatpush.bf16.msra.mxu2 %v10511_v45  ;;  %4387 = vmatpush.bf16.msrb.mxu3 %v10459_v43  ;;  %v10607_v45 = vor.u32 %v12895_v37, %v10604_v38  ;;  %v10591_v55 = vor.u32 %v12893_v44, %v10590_v33  ;;  %v12903_v43 = vld [vmem:[#allocation12 + $0x478] sm:$0xf0]  ;;  %v11190_v37 = vld [vmem:[#allocation15 + $0x450] sm:$0xf]  ;;  %v13045_v38 = vld [vmem:[#allocation15 + $0x464] sm:$0xf0] }
 0x2d8   : > { %v10635_v31 = vor.u32 %v12903_v43, %v10634_v21  ;;  %v10442_v33 = vld [vmem:[#allocation12 + $0x2f0] sm:$0xf]  ;;  %v12855_v44 = vld [vmem:[#allocation12 + $0x2f8] sm:$0xf0]  ;;  %v11166_v43 = vld [vmem:[#allocation15 + $0x420] sm:$0xf] }
 0x2d9   : > { %v10443_v21 = vor.u32 %v12855_v44, %v10442_v33 }
 0x2da   : > { %4414 = vmatpush.bf16.msra.mxu1 %v10355_v61  ;;  %3859 = vmatpush.bf16.msrb.mxu0 %v10167_v47  ;;  %v10595_v61 = vor.u32 %v12892_v49, %v10592_v51  ;;  %v12900_v47 = vld [vmem:[#allocation12 + $0x460] sm:$0xf0]  ;;  %v10586_v49 = vld [vmem:[#allocation12 + $0x410] sm:$0xf]  ;;  %v10543_v51 = vor.u32 %v12881_v40, %v10542_v39 }
 0x2db   : > { %4423 = vmatpush.bf16.msra.mxu2 %v10499_v63  ;;  %4388 = vmatpush.bf16.msrb.mxu3 %v10447_v36  ;;  %v10491_v63 = vor.u32 %v12867_v54, %v10490_v53  ;;  %v12891_v53 = vld [vmem:[#allocation12 + $0x418] sm:$0xf0]  ;;  %v10806_v54 = vld [vmem:[#allocation15 + $0x150] sm:$0xf]  ;;  %v10808_v39 = vld [vmem:[#allocation15 + $0x168] sm:$0xf0] }
 0x2dc   : > { %v10394_v40 = vld [vmem:[#allocation12 + $0x290] sm:$0xf] }
 0x2dd   : > { %4415 = vmatmul.bf16.vlgmr.msra.gmra.mxu1 %v14475_v50  ;;  %3860 = vmatmul.bf16.vlgmr.msrb.gmra.mxu0 %v14483_v9 }
 0x2de   : > { %4459 = vmatpush.bf16.msrb.mxu1 %v10539_v1  ;;  %4394 = vmatpush.bf16.msra.mxu0 %v10627_v13  ;;  %v10478_v1 = vld [vmem:[#allocation12 + $0x338] sm:$0xf]  ;;  %v12886_v13 = vld [vmem:[#allocation12 + $0x3f4] sm:$0xf] }
 0x2df   : > { %4424 = vmatpush.bf16.msra.mxu2 %v10487_v57  ;;  %4433 = vmatpush.bf16.msra.mxu3 %v10631_v17  ;;  %v10479_v36 = vor.u32 %v12864_v3, %v10478_v1  ;;  %v10623_v57 = vor.u32 %v12900_v47, %v10622_v10  ;;  %v12861_v17 = vld [vmem:[#allocation12 + $0x328] sm:$0xf0]  ;;  %v10571_v23 = vor.u32 %v12886_v13, %v10568_v14  ;;  %v12888_v1 = vld [vmem:[#allocation12 + $0x400] sm:$0xf0]  ;;  %v11142_v47 = vld [vmem:[#allocation15 + $0x3f0] sm:$0xf] }
 0x2e0   : > { %4389 = vmatmul.bf16.vlgmr.msrb.gmra.mxu3 %v14483_v9  ;;  %v10467_v62 = vor.u32 %v12861_v17, %v10466_v15  ;;  %v10782_v3 = vld [vmem:[#allocation15 + $0x120] sm:$0xf]  ;;  %v12885_v15 = vld [vmem:[#allocation12 + $0x3e8] sm:$0xf0]  ;;  %v10758_v17 = vld [vmem:[#allocation15 + $0xf0] sm:$0xf] }
 0x2e2   : > { %4460 = vmatpush.bf16.msrb.mxu1 %v10527_v18  ;;  %4395 = vmatpush.bf16.msra.mxu0 %v10615_v24  ;;  %v10567_v18 = vor.u32 %v12887_v12, %v10566_v11  ;;  %v12883_v24 = vld [vmem:[#allocation12 + $0x3dc] sm:$0xf]  ;;  %v13033_v11 = vld [vmem:[#allocation15 + $0x404] sm:$0xf0]  ;;  %v10418_v12 = vld [vmem:[#allocation12 + $0x2c0] sm:$0xf] }
 0x2e3   : > { %4425 = vmatpush.bf16.msra.mxu2 %v10475_v25  ;;  %4434 = vmatpush.bf16.msra.mxu3 %v10619_v6  ;;  %v10556_v25 = vld [vmem:[#allocation12 + $0x3e4] sm:$0xf0]  ;;  %v12858_v6 = vld [vmem:[#allocation12 + $0x310] sm:$0xf0]  ;;  %v11143_v14 = vor.u32 %v13033_v11, %v11142_v47 }
 0x2e4   : > { %v10662_v11 = vld [vmem:[#allocation15 + $0x30] sm:$0xf] }
 0x2e6   : > { %4461 = vmatpush.bf16.msrb.mxu1 %v10515_v29  ;;  %4396 = vmatpush.bf16.msra.mxu0 %v10603_v42  ;;  %v10598_v29 = vld [vmem:[#allocation12 + $0x428] sm:$0xf]  ;;  %v10559_v42 = vor.u32 %v12883_v24, %v10556_v25 }
 0x2e7   : > { %4426 = vmatpush.bf16.msra.mxu2 %v10463_v60  ;;  %4435 = vmatpush.bf16.msra.mxu3 %v10607_v45  ;;  %v10455_v60 = vor.u32 %v12858_v6, %v10454_v27  ;;  %v10599_v45 = vor.u32 %v12894_v35, %v10598_v29  ;;  %v10550_v25 = vld [vmem:[#allocation12 + $0x3c8] sm:$0xf]  ;;  %v11119_v27 = vor.u32 %v13027_v7, %v11118_v16  ;;  %v12931_v29 = vld [vmem:[#allocation15 + $0xd4] sm:$0xf0]  ;;  %v12950_v16 = vld [vmem:[#allocation15 + $0x16c] sm:$0xf0] }
 0x2e8   : > { %v10734_v6 = vld [vmem:[#allocation15 + $0xc0] sm:$0xf] }
 0x2e9   : > { %v10735_v33 = vor.u32 %v12931_v29, %v10734_v6  ;;  %v10358_v7 = vld [vmem:[#allocation12 + $0x248] sm:$0xf]  ;;  %v12907_v29 = vld [vmem:[#allocation15 + $0x14] sm:$0xf0] }
 0x2ea   : > { %4462 = vmatpush.bf16.msrb.mxu1 %v10503_v56  ;;  %4397 = vmatpush.bf16.msra.mxu0 %v10591_v55  ;;  %v11191_v56 = vor.u32 %v13045_v38, %v11190_v37  ;;  %v12949_v55 = vld [vmem:[#allocation15 + $0x164] sm:$0xf0]  ;;  %v12946_v38 = vld [vmem:[#allocation15 + $0x154] sm:$0xf]  ;;  %v10638_v6 = vld [vmem:[#allocation15] sm:$0xf] }
 0x2eb   : > { %4427 = vmatpush.bf16.msra.mxu2 %v10451_v58  ;;  %4436 = vmatpush.bf16.msra.mxu3 %v10595_v61  ;;  %v13039_v58 = vld [vmem:[#allocation15 + $0x434] sm:$0xf0]  ;;  %v12852_v61 = vld [vmem:[#allocation12 + $0x2e0] sm:$0xf0]  ;;  %v10807_v0 = vor.u32 %v12949_v55, %v10806_v54  ;;  %v13021_v37 = vld [vmem:[#allocation15 + $0x3a4] sm:$0xf0] }
 0x2ec   : > { %v11167_v2 = vor.u32 %v13039_v58, %v11166_v43  ;;  %v10431_v10 = vor.u32 %v12852_v61, %v10430_v59  ;;  %v10784_v54 = vld [vmem:[#allocation15 + $0x138] sm:$0xf0]  ;;  %v10686_v61 = vld [vmem:[#allocation15 + $0x60] sm:$0xf] }
 0x2ed   : > { %v12840_v43 = vld [vmem:[#allocation12 + $0x280] sm:$0xf0] }
 0x2ee   : > { %4463 = vmatpush.bf16.msrb.mxu1 %v10491_v63  ;;  %4398 = vmatpush.bf16.msra.mxu0 %v10579_v5  ;;  %v10587_v63 = vor.u32 %v12891_v53, %v10586_v49  ;;  %v12943_v5 = vld [vmem:[#allocation15 + $0x134] sm:$0xf0]  ;;  %v12940_v53 = vld [vmem:[#allocation15 + $0x124] sm:$0xf] }
 0x2ef   : > { %4472 = vmatpush.bf16.msrb.mxu2 %v10635_v31  ;;  %4437 = vmatpush.bf16.msra.mxu3 %v10583_v28  ;;  %v10574_v31 = vld [vmem:[#allocation12 + $0x3f8] sm:$0xf]  ;;  %v12849_v28 = vld [vmem:[#allocation12 + $0x2c8] sm:$0xf0]  ;;  %v10783_v13 = vor.u32 %v12943_v5, %v10782_v3  ;;  %v10787_v59 = vor.u32 %v12940_v53, %v10784_v54  ;;  %v10760_v3 = vld [vmem:[#allocation15 + $0x108] sm:$0xf0] }
 0x2f0   : > { %4428 = vmatmul.bf16.vlgmr.msra.gmra.mxu2 %v14483_v9  ;;  %v10370_v5 = vld [vmem:[#allocation12 + $0x260] sm:$0xf]  ;;  %v12916_v53 = vld [vmem:[#allocation15 + $0x64] sm:$0xf] }
 0x2f2   : > { %4464 = vmatpush.bf16.msrb.mxu1 %v10479_v36  ;;  %4399 = vmatpush.bf16.msra.mxu0 %v10567_v18  ;;  %v10575_v36 = vor.u32 %v12888_v1, %v10574_v31  ;;  %v12937_v18 = vld [vmem:[#allocation15 + $0x104] sm:$0xf0]  ;;  %v12934_v1 = vld [vmem:[#allocation15 + $0xf4] sm:$0xf] }
 0x2f3   : > { %4473 = vmatpush.bf16.msrb.mxu2 %v10623_v57  ;;  %4438 = vmatpush.bf16.msra.mxu3 %v10571_v23  ;;  %v10562_v57 = vld [vmem:[#allocation12 + $0x3e0] sm:$0xf]  ;;  %v12846_v23 = vld [vmem:[#allocation12 + $0x2b0] sm:$0xf0]  ;;  %v10759_v24 = vor.u32 %v12937_v18, %v10758_v17 }
 0x2f4   : > { %v10407_v35 = vor.u32 %v12846_v23, %v10406_v52  ;;  %v10736_v17 = vld [vmem:[#allocation15 + $0xd8] sm:$0xf0]  ;;  %v10814_v18 = vld [vmem:[#allocation15 + $0x158] sm:$0xf]  ;;  %v12834_v52 = vld [vmem:[#allocation12 + $0x250] sm:$0xf0] }
 0x2f5   : > { %v13568_v23 = vld [vmem:[#allocation23] ss:$0 sm:$0xff] }
 0x2f6   : > { %4465 = vmatpush.bf16.msrb.mxu1 %v10467_v62  ;;  %4400 = vmatpush.bf16.msra.mxu0 %v10555_v32  ;;  %v10563_v62 = vor.u32 %v12885_v15, %v10562_v57  ;;  %v11094_v32 = vld [vmem:[#allocation15 + $0x390] sm:$0xf]  ;;  %v13003_v57 = vld [vmem:[#allocation15 + $0x314] sm:$0xf0]  ;;  %v12928_v15 = vld [vmem:[#allocation15 + $0xc4] sm:$0xf] }
 0x2f7   : > { %4474 = vmatpush.bf16.msrb.mxu2 %v10611_v26  ;;  %4439 = vmatpush.bf16.msra.mxu3 %v10559_v42  ;;  %v12882_v26 = vld [vmem:[#allocation12 + $0x3d0] sm:$0xf0]  ;;  %v12843_v42 = vld [vmem:[#allocation12 + $0x298] sm:$0xf0]  ;;  %v11095_v44 = vor.u32 %v13021_v37, %v11094_v32  ;;  %v10359_v37 = vor.u32 %v12834_v52, %v10358_v7  ;;  %v12976_v52 = vld [vmem:[#allocation15 + $0x244] sm:$0xf] }
 0x2f8   : > { %v10395_v49 = vor.u32 %v12843_v42, %v10394_v40  ;;  %v12922_v32 = vld [vmem:[#allocation15 + $0x94] sm:$0xf]  ;;  %v11000_v40 = vld [vmem:[#allocation15 + $0x2e8] sm:$0xf0] }
 0x2fa   : > { %4466 = vmatpush.bf16.msrb.mxu1 %v10455_v60  ;;  %4401 = vmatpush.bf16.msra.mxu0 %v10543_v51  ;;  %v14582_v19 = vpop.f32.mrf.mxu1  ;;  %v10551_v60 = vor.u32 %v12882_v26, %v10550_v25  ;;  %v13015_v51 = vld [vmem:[#allocation15 + $0x374] sm:$0xf0]  ;;  %v12997_v25 = vld [vmem:[#allocation15 + $0x2e4] sm:$0xf0] }
 0x2fb   : > { %4475 = vmatpush.bf16.msrb.mxu2 %v10599_v45  ;;  %4440 = vmatpush.bf16.msra.mxu3 %v10547_v41  ;;  %v10811_v45 = vor.u32 %v12946_v38, %v10808_v39  ;;  %v11071_v41 = vor.u32 %v13015_v51, %v11070_v48  ;;  %v10712_v38 = vld [vmem:[#allocation15 + $0xa8] sm:$0xf0]  ;;  %v12994_v39 = vld [vmem:[#allocation15 + $0x2d4] sm:$0xf] }
 0x2fc   : > { %v11003_v51 = vor.u32 %v12994_v39, %v11000_v40  ;;  %v12970_v39 = vld [vmem:[#allocation15 + $0x214] sm:$0xf] }
 0x2fd   : > { %4467 = vmatmul.bf16.vlgmr.msrb.gmra.mxu1 %v14483_v9  ;;  %4402 = vmatmul.bf16.vlgmr.msra.gmra.mxu0 %v14468_v34  ;;  %v10419_v9 = vor.u32 %v12849_v28, %v10418_v12  ;;  %v10763_v28 = vor.u32 %v12934_v1, %v10760_v3  ;;  %v12910_v1 = vld [vmem:[#allocation15 + $0x34] sm:$0xf] }
 0x2fe   : > { %5389 = vmatpush.bf16.msra.mxu1 %v11191_v56  ;;  %4446 = vmatpush.bf16.msrb.mxu0 %v10443_v21  ;;  %v10710_v56 = vld [vmem:[#allocation15 + $0x90] sm:$0xf] }
 0x2ff   : > { %4476 = vmatpush.bf16.msrb.mxu2 %v10587_v63  ;;  %5363 = vmatpush.bf16.msrb.mxu3 %v10807_v0  ;;  %v10382_v21 = vld [vmem:[#allocation12 + $0x278] sm:$0xf]  ;;  %v10711_v58 = vor.u32 %v12925_v8, %v10710_v56  ;;  %v12919_v63 = vld [vmem:[#allocation15 + $0x74] sm:$0xf0]  ;;  %v10974_v56 = vld [vmem:[#allocation15 + $0x2a0] sm:$0xf] }
 0x300   : > { %4441 = vmatmul.bf16.vlgmr.msra.gmra.mxu3 %v14468_v34  ;;  %v11046_v0 = vld [vmem:[#allocation15 + $0x330] sm:$0xf]  ;;  %v10383_v31 = vor.u32 %v12840_v43, %v10382_v21  ;;  %v10687_v47 = vor.u32 %v12919_v63, %v10686_v61  ;;  %v12991_v8 = vld [vmem:[#allocation15 + $0x2b4] sm:$0xf0]  ;;  %v10688_v21 = vld [vmem:[#allocation15 + $0x78] sm:$0xf0] }
 0x301   : > { %v12988_v43 = vld [vmem:[#allocation15 + $0x2a4] sm:$0xf]  ;;  %v12938_v61 = vld [vmem:[#allocation15 + $0x10c] sm:$0xf0] }
 0x302   : > { %5390 = vmatpush.bf16.msra.mxu1 %v11167_v2  ;;  %4447 = vmatpush.bf16.msrb.mxu0 %v10431_v10  ;;  %v3224_v55 = vpop.f32.mrf.mxu1  ;;  %v13009_v2 = vld [vmem:[#allocation15 + $0x344] sm:$0xf0]  ;;  %v10950_v63 = vld [vmem:[#allocation15 + $0x270] sm:$0xf] }
 0x303   : > { %4477 = vmatpush.bf16.msrb.mxu2 %v10575_v36  ;;  %5364 = vmatpush.bf16.msrb.mxu3 %v10783_v13  ;;  %v12837_v10 = vld [vmem:[#allocation12 + $0x268] sm:$0xf0]  ;;  %v11047_v12 = vor.u32 %v13009_v2, %v11046_v0  ;;  %v11022_v13 = vld [vmem:[#allocation15 + $0x300] sm:$0xf] }
 0x304   : > { %v12913_v36 = vld [vmem:[#allocation15 + $0x44] sm:$0xf0]  ;;  %v11023_v26 = vor.u32 %v13003_v57, %v11022_v13  ;;  %v12979_v13 = vld [vmem:[#allocation15 + $0x254] sm:$0xf0] }
 0x305   : > { %v12985_v0 = vld [vmem:[#allocation15 + $0x284] sm:$0xf0]  ;;  %v14593_v57 = vld [vmem:[#allocation14] sm:$0x7] }
 0x306   : > { %5391 = vmatpush.bf16.msra.mxu1 %v11143_v14  ;;  %4448 = vmatpush.bf16.msrb.mxu0 %v10419_v9  ;;  %v10371_v14 = vor.u32 %v12837_v10, %v10370_v5  ;;  %v10664_v5 = vld [vmem:[#allocation15 + $0x48] sm:$0xf0]  ;;  %v12982_v10 = vld [vmem:[#allocation15 + $0x274] sm:$0xf] }
 0x307   : > { %4478 = vmatpush.bf16.msrb.mxu2 %v10563_v62  ;;  %5365 = vmatpush.bf16.msrb.mxu3 %v10759_v24  ;;  %v10663_v62 = vor.u32 %v12913_v36, %v10662_v11  ;;  %v10998_v24 = vld [vmem:[#allocation15 + $0x2d0] sm:$0xf]  ;;  %v10951_v11 = vor.u32 %v12985_v0, %v10950_v63  ;;  %v10926_v36 = vld [vmem:[#allocation15 + $0x240] sm:$0xf]  ;;  %v10670_v63 = vld [vmem:[#allocation15 + $0x38] sm:$0xf] }
 0x308   : > { %v10999_v42 = vor.u32 %v12997_v25, %v10998_v24  ;;  %v10927_v24 = vor.u32 %v12979_v13, %v10926_v36  ;;  %v12926_v25 = vld [vmem:[#allocation15 + $0xac] sm:$0xf0]  ;;  %v12908_v36 = vld [vmem:[#allocation15 + $0x1c] sm:$0xf0] }
 0x309   : > { %v12914_v0 = vld [vmem:[#allocation15 + $0x4c] sm:$0xf0] }
 0x30a   : > { %5392 = vmatpush.bf16.msra.mxu1 %v11119_v27  ;;  %4449 = vmatpush.bf16.msrb.mxu0 %v10407_v35  ;;  %v14585_v9 = vpop.f32.mrf.mxu1  ;;  %v10739_v27 = vor.u32 %v12928_v15, %v10736_v17  ;;  %v10815_v35 = vor.u32 %v12950_v16, %v10814_v18  ;;  %v10667_v15 = vor.u32 %v12910_v1, %v10664_v5  ;;  %v12904_v18 = vld [vmem:[#allocation15 + $0x4] sm:$0xf]  ;;  %v10640_v16 = vld [vmem:[#allocation15 + $0x18] sm:$0xf0]  ;;  %v12961_v5 = vld [vmem:[#allocation15 + $0x1c4] sm:$0xf0] }
 0x30b   : > { %4479 = vmatpush.bf16.msrb.mxu2 %v10551_v60  ;;  %5366 = vmatpush.bf16.msrb.mxu3 %v10735_v33  ;;  %v10790_v60 = vld [vmem:[#allocation15 + $0x128] sm:$0xf]  ;;  %v12944_v33 = vld [vmem:[#allocation15 + $0x13c] sm:$0xf0] }
 0x30c   : > { %v10791_v55 = vor.u32 %v12944_v33, %v10790_v60  ;;  %v10904_v60 = vld [vmem:[#allocation15 + $0x228] sm:$0xf0]  ;;  %v10694_v33 = vld [vmem:[#allocation15 + $0x68] sm:$0xf] }
 0x30e   : > { %5393 = vmatpush.bf16.msra.mxu1 %v11095_v44  ;;  %4450 = vmatpush.bf16.msrb.mxu0 %v10395_v49  ;;  %v3223_v44 = vadd.f32 %v13568_v23, %v14582_v19  ;;  %v10715_v49 = vor.u32 %v12922_v32, %v10712_v38  ;;  %v10928_v23 = vld [vmem:[#allocation15 + $0x258] sm:$0xf0]  ;;  %v10902_v32 = vld [vmem:[#allocation15 + $0x210] sm:$0xf] }
 0x30f   : > { %5402 = vmatpush.bf16.msra.mxu2 %v10811_v45  ;;  %5367 = vmatpush.bf16.msrb.mxu3 %v10711_v58  ;;  %v10639_v45 = vor.u32 %v12907_v29, %v10638_v6  ;;  %v10976_v58 = vld [vmem:[#allocation15 + $0x2b8] sm:$0xf0]  ;;  %v3371_v6 = vperm.slane %v14593_v57, 0  ;;  %v10931_v38 = vor.u32 %v12976_v52, %v10928_v23 }
 0x310   : > { %4480 = vmatmul.bf16.vlgmr.msrb.gmra.mxu2 %v14468_v34  ;;  %v3235_v48 = vpop.f32.mrf.mxu2  ;;  %v10979_v2 = vor.u32 %v12988_v43, %v10976_v58 }
 0x311   : > { %v14588_v54 = vadd.f32 %v3235_v48, %v3223_v44  ;;  %v12920_v44 = vld [vmem:[#allocation15 + $0x7c] sm:$0xf0]  ;;  %v3771_v48 = vadd.f32 %v14585_v9, %v3371_v6  ;;  %v12952_v6 = vld [vmem:[#allocation15 + $0x184] sm:$0xf] }
 0x312   : > { %5394 = vmatpush.bf16.msra.mxu1 %v11071_v41  ;;  %4451 = vmatpush.bf16.msrb.mxu0 %v10383_v31  ;;  %v3772_v19 = vpop.f32.mrf.mxu1  ;;  %v10975_v41 = vor.u32 %v12991_v8, %v10974_v56  ;;  %v10691_v31 = vor.u32 %v12916_v53, %v10688_v21  ;;  %v10982_v56 = vld [vmem:[#allocation15 + $0x2a8] sm:$0xf]  ;;  %v12992_v8 = vld [vmem:[#allocation15 + $0x2bc] sm:$0xf0]  ;;  %v10907_v21 = vor.u32 %v12970_v39, %v10904_v60  ;;  %v12974_v39 = vld [vmem:[#allocation15 + $0x22c] sm:$0xf0] }
 0x313   : > { %5403 = vmatpush.bf16.msra.mxu2 %v10787_v59  ;;  %5368 = vmatpush.bf16.msrb.mxu3 %v10687_v47  ;;  %v10766_v59 = vld [vmem:[#allocation15 + $0xf8] sm:$0xf]  ;;  %v10952_v47 = vld [vmem:[#allocation15 + $0x288] sm:$0xf0]  ;;  %v10695_v43 = vor.u32 %v12920_v44, %v10694_v33  ;;  %v10984_v44 = vld [vmem:[#allocation15 + $0x2c0] sm:$0xf0] }
 0x314   : > { %v10767_v3 = vor.u32 %v12938_v61, %v10766_v59  ;;  %v10955_v17 = vor.u32 %v12982_v10, %v10952_v47  ;;  %v12964_v59 = vld [vmem:[#allocation15 + $0x1e4] sm:$0xf]  ;;  %v10880_v61 = vld [vmem:[#allocation15 + $0x1f8] sm:$0xf0]  ;;  %v10671_v47 = vor.u32 %v12914_v0, %v10670_v63  ;;  %v12989_v33 = vld [vmem:[#allocation15 + $0x2ac] sm:$0xf] }
 0x315   : > { %v10883_v10 = vor.u32 %v12964_v59, %v10880_v61  ;;  %v12983_v59 = vld [vmem:[#allocation15 + $0x27c] sm:$0xf]  ;;  %v10960_v61 = vld [vmem:[#allocation15 + $0x290] sm:$0xf0] }
 0x316   : > { %5395 = vmatpush.bf16.msra.mxu1 %v11047_v12  ;;  %4452 = vmatpush.bf16.msrb.mxu0 %v10371_v14  ;;  %v10742_v12 = vld [vmem:[#allocation15 + $0xc8] sm:$0xf]  ;;  %v13030_v0 = vld [vmem:[#allocation15 + $0x3f4] sm:$0xf] }
 0x317   : > { %5404 = vmatpush.bf16.msra.mxu2 %v10763_v28  ;;  %5369 = vmatpush.bf16.msrb.mxu3 %v10663_v62  ;;  %v12932_v28 = vld [vmem:[#allocation15 + $0xdc] sm:$0xf0]  ;;  %v10718_v62 = vld [vmem:[#allocation15 + $0x98] sm:$0xf] }
 0x318   : > { %v3237_v14 = vpop.f32.mrf.mxu2  ;;  %v10743_v7 = vor.u32 %v12932_v28, %v10742_v12  ;;  %v10719_v40 = vor.u32 %v12926_v25, %v10718_v62  ;;  %v10856_v12 = vld [vmem:[#allocation15 + $0x1c8] sm:$0xf0]  ;;  %v10646_v28 = vld [vmem:[#allocation15 + $0x8] sm:$0xf] }
 0x319   : > { %v10934_v14 = vld [vmem:[#allocation15 + $0x248] sm:$0xf]  ;;  %v11192_v25 = vld [vmem:[#allocation15 + $0x468] sm:$0xf0] }
 0x31a   : > { %5396 = vmatpush.bf16.msra.mxu1 %v11023_v26  ;;  %4453 = vmatpush.bf16.msrb.mxu0 %v10359_v37  ;;  %v11006_v26 = vld [vmem:[#allocation15 + $0x2d8] sm:$0xf]  ;;  %v10643_v37 = vor.u32 %v12904_v18, %v10640_v16  ;;  %v11008_v18 = vld [vmem:[#allocation15 + $0x2f0] sm:$0xf0]  ;;  %v10830_v16 = vld [vmem:[#allocation15 + $0x180] sm:$0xf] }
 0x31b   : > { %5405 = vmatpush.bf16.msra.mxu2 %v10739_v27  ;;  %5370 = vmatpush.bf16.msrb.mxu3 %v10639_v45  ;;  %v12998_v27 = vld [vmem:[#allocation15 + $0x2ec] sm:$0xf0] }
 0x31c   : > { %v14596_v29 = vpop.f32.mrf.mxu1 }
 0x31d   : > { %5397 = vmatmul.bf16.vlgmr.msra.gmra.mxu1 %v14475_v50  ;;  %4454 = vmatmul.bf16.vlgmr.msrb.gmra.mxu0 %v14475_v50 }
 0x31e   : > { %5441 = vmatpush.bf16.msrb.mxu1 %v10815_v35  ;;  %5376 = vmatpush.bf16.msra.mxu0 %v10999_v42  ;;  %v12973_v35 = vld [vmem:[#allocation15 + $0x224] sm:$0xf0]  ;;  %v11007_v42 = vor.u32 %v12998_v27, %v11006_v26  ;;  %v10647_v26 = vor.u32 %v12908_v36, %v10646_v28  ;;  %v12977_v28 = vld [vmem:[#allocation15 + $0x24c] sm:$0xf]  ;;  %v10936_v36 = vld [vmem:[#allocation15 + $0x260] sm:$0xf0] }
 0x31f   : > { %5406 = vmatpush.bf16.msra.mxu2 %v10715_v49  ;;  %5415 = vmatpush.bf16.msra.mxu3 %v11003_v51  ;;  %v10903_v45 = vor.u32 %v12973_v35, %v10902_v32  ;;  %v10878_v49 = vld [vmem:[#allocation15 + $0x1e0] sm:$0xf]  ;;  %v12967_v51 = vld [vmem:[#allocation15 + $0x1f4] sm:$0xf0]  ;;  %v10832_v32 = vld [vmem:[#allocation15 + $0x198] sm:$0xf0] }
 0x320   : > { %5371 = vmatmul.bf16.vlgmr.msrb.gmra.mxu3 %v14461_v22  ;;  %v3248_v53 = vpop.f32.mrf.mxu3  ;;  %v10879_v9 = vor.u32 %v12967_v51, %v10878_v49  ;;  %v10910_v35 = vld [vmem:[#allocation15 + $0x218] sm:$0xf]  ;;  %v10886_v51 = vld [vmem:[#allocation15 + $0x1e8] sm:$0xf] }
 0x321   : > { %v14600_v58 = vadd.f32 %v3248_v53, %v14588_v54  ;;  %v12958_v54 = vld [vmem:[#allocation15 + $0x1b4] sm:$0xf]  ;;  %v10987_v53 = vor.u32 %v12989_v33, %v10984_v44  ;;  %v11102_v44 = vld [vmem:[#allocation15 + $0x398] sm:$0xf] }
 0x322   : > { %5442 = vmatpush.bf16.msrb.mxu1 %v10791_v55  ;;  %5377 = vmatpush.bf16.msra.mxu0 %v10975_v41  ;;  %v3783_v55 = vpop.f32.mrf.mxu2  ;;  %v10983_v41 = vor.u32 %v12992_v8, %v10982_v56  ;;  %v10859_v62 = vor.u32 %v12958_v54, %v10856_v12  ;;  %v13036_v56 = vld [vmem:[#allocation15 + $0x424] sm:$0xf]  ;;  %v11168_v8 = vld [vmem:[#allocation15 + $0x438] sm:$0xf0]  ;;  %v12962_v54 = vld [vmem:[#allocation15 + $0x1cc] sm:$0xf0] }
 0x323   : > { %5407 = vmatpush.bf16.msra.mxu2 %v10691_v31  ;;  %5416 = vmatpush.bf16.msra.mxu3 %v10979_v2  ;;  %v14602_v19 = vadd.f32 %v3783_v55, %v3771_v48  ;;  %v10958_v31 = vld [vmem:[#allocation15 + $0x278] sm:$0xf]  ;;  %v12986_v2 = vld [vmem:[#allocation15 + $0x28c] sm:$0xf0]  ;;  %v10911_v48 = vor.u32 %v12974_v39, %v10910_v35  ;;  %v12968_v55 = vld [vmem:[#allocation15 + $0x1fc] sm:$0xf0] }
 0x324   : > { %v3824_v1 = vpop.f32.mrf.mxu1  ;;  %v11096_v39 = vld [vmem:[#allocation15 + $0x3a8] sm:$0xf0] }
 0x325   : > { %v10887_v1 = vor.u32 %v12968_v55, %v10886_v51  ;;  %v13012_v51 = vld [vmem:[#allocation15 + $0x364] sm:$0xf] }
 0x326   : > { %5443 = vmatpush.bf16.msrb.mxu1 %v10767_v3  ;;  %5378 = vmatpush.bf16.msra.mxu0 %v10951_v11  ;;  %v10854_v3 = vld [vmem:[#allocation15 + $0x1b0] sm:$0xf]  ;;  %v10959_v11 = vor.u32 %v12986_v2, %v10958_v31  ;;  %v11144_v31 = vld [vmem:[#allocation15 + $0x408] sm:$0xf0] }
 0x327   : > { %5408 = vmatpush.bf16.msra.mxu2 %v10667_v15  ;;  %5417 = vmatpush.bf16.msra.mxu3 %v10955_v17  ;;  %v10855_v13 = vor.u32 %v12961_v5, %v10854_v3  ;;  %v12980_v15 = vld [vmem:[#allocation15 + $0x25c] sm:$0xf0]  ;;  %v12995_v17 = vld [vmem:[#allocation15 + $0x2dc] sm:$0xf]  ;;  %v10862_v5 = vld [vmem:[#allocation15 + $0x1b8] sm:$0xf]  ;;  %v11147_v12 = vor.u32 %v13030_v0, %v11144_v31 }
 0x328   : > { %v3250_v52 = vpop.f32.mrf.mxu3  ;;  %v10935_v27 = vor.u32 %v12980_v15, %v10934_v14  ;;  %v11120_v14 = vld [vmem:[#allocation15 + $0x3d8] sm:$0xf0] }
 0x329   : > { %v13028_v52 = vld [vmem:[#allocation15 + $0x3dc] sm:$0xf0] }
 0x32a   : > { %5444 = vmatpush.bf16.msrb.mxu1 %v10743_v7  ;;  %5379 = vmatpush.bf16.msra.mxu0 %v10927_v24  ;;  %v12955_v7 = vld [vmem:[#allocation15 + $0x194] sm:$0xf0]  ;;  %v3785_v23 = vpop.f32.mrf.mxu2  ;;  %v13042_v24 = vld [vmem:[#allocation15 + $0x454] sm:$0xf] }
 0x32b   : > { %5409 = vmatpush.bf16.msra.mxu2 %v10643_v37  ;;  %5418 = vmatpush.bf16.msra.mxu3 %v10931_v38  ;;  %v11011_v37 = vor.u32 %v12995_v17, %v11008_v18  ;;  %v10831_v38 = vor.u32 %v12955_v7, %v10830_v16  ;;  %v11195_v60 = vor.u32 %v13042_v24, %v11192_v25  ;;  %v10838_v17 = vld [vmem:[#allocation15 + $0x188] sm:$0xf]  ;;  %v12956_v18 = vld [vmem:[#allocation15 + $0x19c] sm:$0xf0]  ;;  %v12971_v23 = vld [vmem:[#allocation15 + $0x21c] sm:$0xf] }
 0x32c   : > { %v10939_v16 = vor.u32 %v12977_v28, %v10936_v36  ;;  %v11126_v7 = vld [vmem:[#allocation15 + $0x3c8] sm:$0xf]  ;;  %v13010_v28 = vld [vmem:[#allocation15 + $0x34c] sm:$0xf0] }
 0x32e   : > { %5445 = vmatpush.bf16.msrb.mxu1 %v10719_v40  ;;  %5380 = vmatpush.bf16.msra.mxu0 %v10903_v45  ;;  %v11198_v40 = vld [vmem:[#allocation15 + $0x458] sm:$0xf]  ;;  %v10835_v45 = vor.u32 %v12952_v6, %v10832_v32  ;;  %v11200_v6 = vld [vmem:[#allocation15 + $0x470] sm:$0xf0] }
 0x32f   : > { %5454 = vmatpush.bf16.msrb.mxu2 %v11007_v42  ;;  %5419 = vmatpush.bf16.msra.mxu3 %v10907_v21  ;;  %v13046_v42 = vld [vmem:[#allocation15 + $0x46c] sm:$0xf0]  ;;  %v11174_v21 = vld [vmem:[#allocation15 + $0x428] sm:$0xf] }
 0x330   : > { %5410 = vmatmul.bf16.vlgmr.msra.gmra.mxu2 %v14461_v22  ;;  %v11199_v49 = vor.u32 %v13046_v42, %v11198_v40  ;;  %v3796_v63 = vpop.f32.mrf.mxu3  ;;  %v10839_v40 = vor.u32 %v12956_v18, %v10838_v17  ;;  %v11127_v42 = vor.u32 %v13028_v52, %v11126_v7  ;;  %v13025_v18 = vld [vmem:[#allocation15 + $0x3cc] sm:$0xf]  ;;  %v11206_v7 = vld [vmem:[#allocation15 + $0x460] sm:$0xf]  ;;  %v13047_v52 = vld [vmem:[#allocation15 + $0x474] sm:$0xf0] }
 0x331   : > { %v14609_v2 = vadd.f32 %v3796_v63, %v14602_v19  ;;  %v10863_v19 = vor.u32 %v12962_v54, %v10862_v5  ;;  %v11152_v5 = vld [vmem:[#allocation15 + $0x410] sm:$0xf0]  ;;  %v11048_v54 = vld [vmem:[#allocation15 + $0x348] sm:$0xf0] }
 0x332   : > { %5446 = vmatpush.bf16.msrb.mxu1 %v10695_v43  ;;  %5381 = vmatpush.bf16.msra.mxu0 %v10879_v9  ;;  %v13040_v43 = vld [vmem:[#allocation15 + $0x43c] sm:$0xf0]  ;;  %v14606_v9 = vpop.f32.mrf.mxu2 }
 0x333   : > { %5455 = vmatpush.bf16.msrb.mxu2 %v10983_v41  ;;  %5420 = vmatpush.bf16.msra.mxu3 %v10883_v10  ;;  %v11171_v41 = vor.u32 %v13036_v56, %v11168_v8  ;;  %v11175_v3 = vor.u32 %v13040_v43, %v11174_v21  ;;  %v10963_v10 = vor.u32 %v12983_v59, %v10960_v61  ;;  %v12965_v56 = vld [vmem:[#allocation15 + $0x1ec] sm:$0xf]  ;;  %v13016_v59 = vld [vmem:[#allocation15 + $0x37c] sm:$0xf0]  ;;  %v12959_v61 = vld [vmem:[#allocation15 + $0x1bc] sm:$0xf] }
 0x336   : > { %5447 = vmatpush.bf16.msrb.mxu1 %v10671_v47  ;;  %5382 = vmatpush.bf16.msra.mxu0 %v10855_v13  ;;  %v11150_v47 = vld [vmem:[#allocation15 + $0x3f8] sm:$0xf]  ;;  %v13024_v13 = vld [vmem:[#allocation15 + $0x3c4] sm:$0xf] }
 0x337   : > { %5456 = vmatpush.bf16.msrb.mxu2 %v10959_v11  ;;  %5421 = vmatpush.bf16.msra.mxu3 %v10859_v62  ;;  %v13034_v11 = vld [vmem:[#allocation15 + $0x40c] sm:$0xf0]  ;;  %v11123_v25 = vor.u32 %v13024_v13, %v11120_v14  ;;  %v3372_v14 = vperm.slane %v14593_v57, 1 }
 0x338   : > { %v11151_v15 = vor.u32 %v13034_v11, %v11150_v47  ;;  %v3798_v35 = vpop.f32.mrf.mxu3 }
 0x33a   : > { %5448 = vmatpush.bf16.msrb.mxu1 %v10647_v26  ;;  %5383 = vmatpush.bf16.msra.mxu0 %v10831_v38  ;;  %v3261_v62 = vpop.f32.mrf.mxu0  ;;  %v14613_v24 = vpop.f32.mrf.mxu1  ;;  %v10912_v26 = vld [vmem:[#allocation15 + $0x230] sm:$0xf0] }
 0x33b   : > { %5457 = vmatpush.bf16.msrb.mxu2 %v10935_v27  ;;  %5422 = vmatpush.bf16.msra.mxu3 %v10835_v45  ;;  %v13043_v27 = vld [vmem:[#allocation15 + $0x45c] sm:$0xf]  ;;  %v14616_v32 = vadd.f32 %v3261_v62, %v14600_v58  ;;  %v13018_v38 = vld [vmem:[#allocation15 + $0x394] sm:$0xf]  ;;  %v13022_v45 = vld [vmem:[#allocation15 + $0x3ac] sm:$0xf0] }
 0x33c   : > { %v11203_v33 = vor.u32 %v13043_v27, %v11200_v6  ;;  %v11099_v8 = vor.u32 %v13018_v38, %v11096_v39  ;;  %v11176_v58 = vld [vmem:[#allocation15 + $0x440] sm:$0xf0]  ;;  %v11103_v55 = vor.u32 %v13022_v45, %v11102_v44  ;;  %v11024_v62 = vld [vmem:[#allocation15 + $0x318] sm:$0xf0]  ;;  %v10816_v27 = vld [vmem:[#allocation15 + $0x170] sm:$0xf0] }
 0x33d   : > { %5449 = vmatmul.bf16.vlgmr.msrb.gmra.mxu1 %v14461_v22  ;;  %5384 = vmatmul.bf16.vlgmr.msra.gmra.mxu0 %v14468_v34  ;;  %v13004_v38 = vld [vmem:[#allocation15 + $0x31c] sm:$0xf0]  ;;  %v13019_v39 = vld [vmem:[#allocation15 + $0x39c] sm:$0xf]  ;;  %v12951_v45 = vld [vmem:[#allocation15 + $0x174] sm:$0xf0] }
 0x33e   : > { %5493 = vmatpush.bf16.msra.mxu1 %v11011_v37  ;;  %5428 = vmatpush.bf16.msrb.mxu0 %v11195_v60  ;;  %v3837_v37 = vpop.f32.mrf.mxu2  ;;  %v10915_v60 = vor.u32 %v12971_v23, %v10912_v26  ;;  %v13000_v23 = vld [vmem:[#allocation15 + $0x304] sm:$0xf]  ;;  %v12947_v26 = vld [vmem:[#allocation15 + $0x15c] sm:$0xf]  ;;  %v10822_v44 = vld [vmem:[#allocation15 + $0x160] sm:$0xf] }
 0x33f   : > { %5458 = vmatpush.bf16.msrb.mxu2 %v10911_v48  ;;  %5467 = vmatpush.bf16.msrb.mxu3 %v11199_v49  ;;  %v10888_v48 = vld [vmem:[#allocation15 + $0x200] sm:$0xf0]  ;;  %v13037_v49 = vld [vmem:[#allocation15 + $0x42c] sm:$0xf]  ;;  %v11030_v37 = vld [vmem:[#allocation15 + $0x308] sm:$0xf] }
 0x340   : > { %5423 = vmatmul.bf16.vlgmr.msra.gmra.mxu3 %v14468_v34  ;;  %v10891_v21 = vor.u32 %v12965_v56, %v10888_v48  ;;  %v11179_v43 = vor.u32 %v13037_v49, %v11176_v58  ;;  %v11182_v48 = vld [vmem:[#allocation15 + $0x430] sm:$0xf]  ;;  %v13041_v49 = vld [vmem:[#allocation15 + $0x444] sm:$0xf0] }
 0x342   : > { %5494 = vmatpush.bf16.msra.mxu1 %v10987_v53  ;;  %5429 = vmatpush.bf16.msrb.mxu0 %v11171_v41  ;;  %v11072_v53 = vld [vmem:[#allocation15 + $0x378] sm:$0xf0]  ;;  %v11078_v41 = vld [vmem:[#allocation15 + $0x368] sm:$0xf]  ;;  %v3263_v63 = vpop.f32.mrf.mxu0  ;;  %v3876_v0 = vpop.f32.mrf.mxu1 }
 0x343   : > { %5459 = vmatpush.bf16.msrb.mxu2 %v10887_v1  ;;  %5468 = vmatpush.bf16.msrb.mxu3 %v11175_v3  ;;  %v11075_v31 = vor.u32 %v13012_v51, %v11072_v53  ;;  %v10864_v1 = vld [vmem:[#allocation15 + $0x1d0] sm:$0xf0]  ;;  %v13031_v3 = vld [vmem:[#allocation15 + $0x3fc] sm:$0xf]  ;;  %v14619_v47 = vpop.f32.mrf.mxu3  ;;  %v11079_v11 = vor.u32 %v13016_v59, %v11078_v41  ;;  %v11031_v51 = vor.u32 %v13004_v38, %v11030_v37  ;;  %v12941_v53 = vld [vmem:[#allocation15 + $0x12c] sm:$0xf] }
 0x344   : > { %v10867_v36 = vor.u32 %v12959_v61, %v10864_v1  ;;  %v11155_v13 = vor.u32 %v13031_v3, %v11152_v5  ;;  %v10823_v41 = vor.u32 %v12951_v45, %v10822_v44  ;;  %v13013_v59 = vld [vmem:[#allocation15 + $0x36c] sm:$0xf]  ;;  %v11183_v61 = vor.u32 %v13041_v49, %v11182_v48  ;;  %v11080_v63 = vld [vmem:[#allocation15 + $0x380] sm:$0xf0]  ;;  %v10798_v0 = vld [vmem:[#allocation15 + $0x130] sm:$0xf] }
 0x345   : > { %v11158_v5 = vld [vmem:[#allocation15 + $0x400] sm:$0xf]  ;;  %v12933_v37 = vld [vmem:[#allocation15 + $0xe4] sm:$0xf0]  ;;  %v10720_v44 = vld [vmem:[#allocation15 + $0xb0] sm:$0xf0] }
 0x346   : > { %5495 = vmatpush.bf16.msra.mxu1 %v10963_v10  ;;  %5430 = vmatpush.bf16.msrb.mxu0 %v11147_v12  ;;  %v13006_v10 = vld [vmem:[#allocation15 + $0x334] sm:$0xf]  ;;  %v11054_v12 = vld [vmem:[#allocation15 + $0x338] sm:$0xf]  ;;  %v11110_v38 = vld [vmem:[#allocation15 + $0x3a0] sm:$0xf] }
 0x347   : > { %5460 = vmatpush.bf16.msrb.mxu2 %v10863_v19  ;;  %5469 = vmatpush.bf16.msrb.mxu3 %v11151_v15  ;;  %v12953_v19 = vld [vmem:[#allocation15 + $0x18c] sm:$0xf]  ;;  %v10840_v15 = vld [vmem:[#allocation15 + $0x1a0] sm:$0xf0]  ;;  %v11051_v17 = vor.u32 %v13006_v10, %v11048_v54  ;;  %v13035_v10 = vld [vmem:[#allocation15 + $0x414] sm:$0xf0] }
 0x348   : > { %v10843_v6 = vor.u32 %v12953_v19, %v10840_v15  ;;  %v10768_v54 = vld [vmem:[#allocation15 + $0x110] sm:$0xf0]  ;;  %v10774_v19 = vld [vmem:[#allocation15 + $0x100] sm:$0xf]  ;;  %v12939_v15 = vld [vmem:[#allocation15 + $0x114] sm:$0xf0] }
 0x349   : > { %v14632_v45 = vld [vmem:[#allocation14 + $0x3] sm:$0x7] }
 0x34a   : > { %5496 = vmatpush.bf16.msra.mxu1 %v10939_v16  ;;  %5431 = vmatpush.bf16.msrb.mxu0 %v11123_v25  ;;  %v11128_v16 = vld [vmem:[#allocation15 + $0x3e0] sm:$0xf0]  ;;  %v11055_v25 = vor.u32 %v13010_v28, %v11054_v12  ;;  %v11083_v12 = vor.u32 %v13013_v59, %v11080_v63  ;;  %v13017_v59 = vld [vmem:[#allocation15 + $0x384] sm:$0xf0]  ;;  %v10800_v63 = vld [vmem:[#allocation15 + $0x148] sm:$0xf0] }
 0x34b   : > { %5461 = vmatpush.bf16.msrb.mxu2 %v10839_v40  ;;  %5470 = vmatpush.bf16.msrb.mxu3 %v11127_v42  ;;  %v11131_v35 = vor.u32 %v13025_v18, %v11128_v16  ;;  %v3809_v40 = vpop.f32.mrf.mxu0  ;;  %v11207_v42 = vor.u32 %v13047_v52, %v11206_v7  ;;  %v3850_v58 = vpop.f32.mrf.mxu3  ;;  %v11134_v18 = vld [vmem:[#allocation15 + $0x3d0] sm:$0xf]  ;;  %v13029_v16 = vld [vmem:[#allocation15 + $0x3e4] sm:$0xf0]  ;;  %v12929_v7 = vld [vmem:[#allocation15 + $0xcc] sm:$0xf] }
 0x34c   : > { %v3810_v56 = vadd.f32 %v3809_v40, %v3372_v14  ;;  %v11056_v14 = vld [vmem:[#allocation15 + $0x350] sm:$0xf0]  ;;  %v10744_v52 = vld [vmem:[#allocation15 + $0xe0] sm:$0xf0]  ;;  %v13023_v40 = vld [vmem:[#allocation15 + $0x3b4] sm:$0xf0] }
 0x34d   : > { %v11111_v58 = vor.u32 %v13023_v40, %v11110_v38  ;;  %v10752_v38 = vld [vmem:[#allocation15 + $0xe8] sm:$0xf0]  ;;  %v13070_v40 = vld [vmem:[#allocation18 + $0xb0] sm:$0xf0] }
 0x34e   : > { %5497 = vmatpush.bf16.msra.mxu1 %v10915_v60  ;;  %5432 = vmatpush.bf16.msrb.mxu0 %v11099_v8  ;;  %v11027_v60 = vor.u32 %v13000_v23, %v11024_v62  ;;  %v10819_v8 = vor.u32 %v12947_v26, %v10816_v27  ;;  %v3373_v23 = vperm.slane %v14593_v57, 2  ;;  %v13001_v26 = vld [vmem:[#allocation15 + $0x30c] sm:$0xf]  ;;  %v11032_v27 = vld [vmem:[#allocation15 + $0x320] sm:$0xf0] }
 0x34f   : > { %5506 = vmatpush.bf16.msra.mxu2 %v11203_v33  ;;  %5471 = vmatpush.bf16.msrb.mxu3 %v11103_v55  ;;  %v11104_v33 = vld [vmem:[#allocation15 + $0x3b0] sm:$0xf0]  ;;  %v10792_v55 = vld [vmem:[#allocation15 + $0x140] sm:$0xf0] }
 0x350   : > { %5462 = vmatmul.bf16.vlgmr.msrb.gmra.mxu2 %v14468_v34  ;;  %v10795_v3 = vor.u32 %v12941_v53, %v10792_v55  ;;  %v3849_v49 = vadd.f32 %v14619_v47, %v3373_v23  ;;  %v10726_v53 = vld [vmem:[#allocation15 + $0xa0] sm:$0xf]  ;;  %v12927_v55 = vld [vmem:[#allocation15 + $0xb4] sm:$0xf0] }
 0x351   : > { %v10727_v47 = vor.u32 %v12927_v55, %v10726_v53 }
 0x352   : > { %5498 = vmatpush.bf16.msra.mxu1 %v10891_v21  ;;  %5433 = vmatpush.bf16.msrb.mxu0 %v11075_v31  ;;  %v3823_v21 = vadd.f32 %v14596_v29, %v3810_v56  ;;  %v12945_v31 = vld [vmem:[#allocation15 + $0x144] sm:$0xf0]  ;;  %v12935_v29 = vld [vmem:[#allocation15 + $0xfc] sm:$0xf] }
 0x353   : > { %5507 = vmatpush.bf16.msra.mxu2 %v11179_v43  ;;  %5472 = vmatpush.bf16.msrb.mxu3 %v11079_v11  ;;  %v11107_v43 = vor.u32 %v13019_v39, %v11104_v33  ;;  %v14627_v11 = vpop.f32.mrf.mxu2  ;;  %v10799_v28 = vor.u32 %v12945_v31, %v10798_v0  ;;  %v10747_v39 = vor.u32 %v12929_v7, %v10744_v52  ;;  %v12923_v33 = vld [vmem:[#allocation15 + $0x9c] sm:$0xf]  ;;  %v3978_v0 = vperm.slane %v14632_v45, 0  ;;  %v10678_v52 = vld [vmem:[#allocation15 + $0x40] sm:$0xf] }
 0x354   : > { %v14624_v1 = vadd.f32 %v14606_v9, %v3823_v21  ;;  %v3811_v9 = vpop.f32.mrf.mxu0  ;;  %v11086_v21 = vld [vmem:[#allocation15 + $0x370] sm:$0xf] }
 0x356   : > { %5499 = vmatpush.bf16.msra.mxu1 %v10867_v36  ;;  %5434 = vmatpush.bf16.msrb.mxu0 %v11051_v17  ;;  %v13007_v36 = vld [vmem:[#allocation15 + $0x33c] sm:$0xf]  ;;  %v10771_v17 = vor.u32 %v12935_v29, %v10768_v54  ;;  %v11087_v29 = vor.u32 %v13017_v59, %v11086_v21 }
 0x357   : > { %5508 = vmatpush.bf16.msra.mxu2 %v11155_v13  ;;  %5473 = vmatpush.bf16.msrb.mxu3 %v11055_v25  ;;  %v11159_v13 = vor.u32 %v13035_v10, %v11158_v5  ;;  %v11059_v62 = vor.u32 %v13007_v36, %v11056_v14  ;;  %v10775_v25 = vor.u32 %v12939_v15, %v10774_v19  ;;  %v10696_v5 = vld [vmem:[#allocation15 + $0x80] sm:$0xf0]  ;;  %v11062_v36 = vld [vmem:[#allocation15 + $0x340] sm:$0xf]  ;;  %v10776_v19 = vld [vmem:[#allocation15 + $0x118] sm:$0xf0] }
 0x358   : > { %v12936_v14 = vld [vmem:[#allocation15 + $0x104] sm:$0xf]  ;;  %v4378_v15 = vadd.f32 %v14627_v11, %v3978_v0  ;;  %v10728_v21 = vld [vmem:[#allocation15 + $0xb8] sm:$0xf0]  ;;  %v3979_v0 = vperm.slane %v14632_v45, 1 }
 0x35a   : > { %5500 = vmatpush.bf16.msra.mxu1 %v10843_v6  ;;  %5435 = vmatpush.bf16.msrb.mxu0 %v11027_v60  ;;  %v11135_v6 = vor.u32 %v13029_v16, %v11134_v18  ;;  %v10824_v60 = vld [vmem:[#allocation15 + $0x178] sm:$0xf0]  ;;  %v14634_v57 = vpop.f32.mrf.mxu1  ;;  %v10672_v18 = vld [vmem:[#allocation15 + $0x50] sm:$0xf0] }
 0x35b   : > { %5509 = vmatpush.bf16.msra.mxu2 %v11131_v35  ;;  %5474 = vmatpush.bf16.msrb.mxu3 %v11031_v51  ;;  %v10750_v35 = vld [vmem:[#allocation15 + $0xd0] sm:$0xf]  ;;  %v4379_v56 = vpop.f32.mrf.mxu2 }
 0x35c   : > { %v10751_v48 = vor.u32 %v12933_v37, %v10750_v35  ;;  %v12930_v37 = vld [vmem:[#allocation15 + $0xd4] sm:$0xf]  ;;  %v12999_v56 = vld [vmem:[#allocation15 + $0x2f4] sm:$0xf0] }
 0x35d   : > { %5501 = vmatmul.bf16.vlgmr.msra.gmra.mxu1 %v14468_v34  ;;  %5436 = vmatmul.bf16.vlgmr.msrb.gmra.mxu0 %v14475_v50 }
 0x35e   : > { %5545 = vmatpush.bf16.msrb.mxu1 %v11207_v42  ;;  %5480 = vmatpush.bf16.msra.mxu0 %v10819_v8  ;;  %v12948_v42 = vld [vmem:[#allocation15 + $0x164] sm:$0xf]  ;;  %v11035_v8 = vor.u32 %v13001_v26, %v11032_v27  ;;  %v12915_v26 = vld [vmem:[#allocation15 + $0x54] sm:$0xf0]  ;;  %v11038_v27 = vld [vmem:[#allocation15 + $0x310] sm:$0xf] }
 0x35f   : > { %5510 = vmatpush.bf16.msra.mxu2 %v11107_v43  ;;  %5519 = vmatpush.bf16.msra.mxu3 %v10823_v41  ;;  %v10827_v51 = vor.u32 %v12948_v42, %v10824_v60  ;;  %v3861_v43 = vpop.f32.mrf.mxu0  ;;  %v10723_v41 = vor.u32 %v12923_v33, %v10720_v44  ;;  %v12905_v42 = vld [vmem:[#allocation15 + $0xc] sm:$0xf]  ;;  %v10648_v60 = vld [vmem:[#allocation15 + $0x20] sm:$0xf0]  ;;  %v10679_v33 = vor.u32 %v12915_v26, %v10678_v52  ;;  %v11014_v44 = vld [vmem:[#allocation15 + $0x2e0] sm:$0xf] }
 0x360   : > { %5475 = vmatmul.bf16.vlgmr.msrb.gmra.mxu3 %v14475_v50  ;;  %v3862_v31 = vadd.f32 %v3861_v43, %v3849_v49  ;;  %v10654_v49 = vld [vmem:[#allocation15 + $0x10] sm:$0xf]  ;;  %v10651_v55 = vor.u32 %v12905_v42, %v10648_v60  ;;  %v12996_v43 = vld [vmem:[#allocation15 + $0x2e4] sm:$0xf]  ;;  %v11015_v59 = vor.u32 %v12999_v56, %v11014_v44  ;;  %v12906_v60 = vld [vmem:[#allocation15 + $0x14] sm:$0xf] }
 0x361   : > { %v12978_v56 = vld [vmem:[#allocation15 + $0x254] sm:$0xf] }
 0x362   : > { %5546 = vmatpush.bf16.msrb.mxu1 %v11183_v61  ;;  %5481 = vmatpush.bf16.msra.mxu0 %v10795_v3  ;;  %v12942_v61 = vld [vmem:[#allocation15 + $0x134] sm:$0xf]  ;;  %v12917_v3 = vld [vmem:[#allocation15 + $0x6c] sm:$0xf]  ;;  %v14639_v10 = vadd.f32 %v14613_v24, %v3862_v31  ;;  %v4418_v24 = vpop.f32.mrf.mxu1 }
 0x363   : > { %5511 = vmatpush.bf16.msra.mxu2 %v11083_v12  ;;  %5520 = vmatpush.bf16.msra.mxu3 %v10799_v28  ;;  %v10803_v54 = vor.u32 %v12942_v61, %v10800_v63  ;;  %v10702_v12 = vld [vmem:[#allocation15 + $0x70] sm:$0xf]  ;;  %v12921_v28 = vld [vmem:[#allocation15 + $0x84] sm:$0xf0]  ;;  %v10699_v9 = vor.u32 %v12917_v3, %v10696_v5  ;;  %v4390_v16 = vpop.f32.mrf.mxu3  ;;  %v11286_v61 = vld [vmem:[#allocation18 + $0x90] sm:$0xf] }
 0x364   : > { %v10703_v7 = vor.u32 %v12921_v28, %v10702_v12  ;;  %v14643_v23 = vadd.f32 %v4390_v16, %v4378_v15  ;;  %v13067_v63 = vld [vmem:[#allocation18 + $0x98] sm:$0xf0]  ;;  %v10990_v5 = vld [vmem:[#allocation15 + $0x2b0] sm:$0xf]  ;;  %v12918_v12 = vld [vmem:[#allocation15 + $0x74] sm:$0xf] }
 0x365   : > { %v11287_v28 = vor.u32 %v13067_v63, %v11286_v61  ;;  %v13064_v15 = vld [vmem:[#allocation18 + $0x80] sm:$0xf0]  ;;  %v12987_v24 = vld [vmem:[#allocation15 + $0x294] sm:$0xf0] }
 0x366   : > { %5547 = vmatpush.bf16.msrb.mxu1 %v11159_v13  ;;  %5482 = vmatpush.bf16.msra.mxu0 %v10771_v17  ;;  %v13011_v13 = vld [vmem:[#allocation15 + $0x354] sm:$0xf0]  ;;  %v12911_v17 = vld [vmem:[#allocation15 + $0x3c] sm:$0xf] }
 0x367   : > { %5512 = vmatpush.bf16.msra.mxu2 %v11059_v62  ;;  %5521 = vmatpush.bf16.msra.mxu3 %v10775_v25  ;;  %v11063_v62 = vor.u32 %v13011_v13, %v11062_v36  ;;  %v10779_v25 = vor.u32 %v12936_v14, %v10776_v19  ;;  %v3863_v35 = vpop.f32.mrf.mxu0  ;;  %v10675_v11 = vor.u32 %v12911_v17, %v10672_v18  ;;  %v10704_v36 = vld [vmem:[#allocation15 + $0x88] sm:$0xf0]  ;;  %v11274_v19 = vld [vmem:[#allocation18 + $0x78] sm:$0xf] }
 0x368   : > { %v10992_v13 = vld [vmem:[#allocation15 + $0x2c8] sm:$0xf0]  ;;  %v4417_v17 = vadd.f32 %v14634_v57, %v3979_v0  ;;  %v10966_v18 = vld [vmem:[#allocation15 + $0x280] sm:$0xf]  ;;  %v11275_v26 = vor.u32 %v13064_v15, %v11274_v19  ;;  %v10968_v57 = vld [vmem:[#allocation15 + $0x298] sm:$0xf0] }
 0x369   : > { %v10967_v35 = vor.u32 %v12987_v24, %v10966_v18  ;;  %v10896_v18 = vld [vmem:[#allocation15 + $0x208] sm:$0xf0]  ;;  %v11226_v24 = vld [vmem:[#allocation18 + $0x18] sm:$0xf] }
 0x36a   : > { %5548 = vmatpush.bf16.msrb.mxu1 %v11135_v6  ;;  %5483 = vmatpush.bf16.msra.mxu0 %v10747_v39  ;;  %v13005_v6 = vld [vmem:[#allocation15 + $0x324] sm:$0xf0]  ;;  %v11298_v39 = vld [vmem:[#allocation18 + $0xa8] sm:$0xf] }
 0x36b   : > { %5513 = vmatpush.bf16.msra.mxu2 %v11035_v8  ;;  %5522 = vmatpush.bf16.msra.mxu3 %v10751_v48  ;;  %v11039_v8 = vor.u32 %v13005_v6, %v11038_v27  ;;  %v10755_v48 = vor.u32 %v12930_v37, %v10752_v38  ;;  %v11299_v53 = vor.u32 %v13070_v40, %v11298_v39  ;;  %v4392_v31 = vpop.f32.mrf.mxu3  ;;  %v10680_v27 = vld [vmem:[#allocation15 + $0x58] sm:$0xf0]  ;;  %v12984_v6 = vld [vmem:[#allocation15 + $0x284] sm:$0xf]  ;;  %v13061_v37 = vld [vmem:[#allocation18 + $0x68] sm:$0xf0] }
 0x36c   : > { %v10942_v38 = vld [vmem:[#allocation15 + $0x250] sm:$0xf]  ;;  %v12981_v39 = vld [vmem:[#allocation15 + $0x264] sm:$0xf0]  ;;  %v10971_v42 = vor.u32 %v12984_v6, %v10968_v57  ;;  %v12972_v31 = vld [vmem:[#allocation15 + $0x224] sm:$0xf] }
 0x36d   : > { %v12960_v57 = vld [vmem:[#allocation15 + $0x1c4] sm:$0xf] }
 0x36e   : > { %5549 = vmatpush.bf16.msrb.mxu1 %v11111_v58  ;;  %5484 = vmatpush.bf16.msra.mxu0 %v10723_v41  ;;  %v12909_v58 = vld [vmem:[#allocation15 + $0x24] sm:$0xf0]  ;;  %v11016_v41 = vld [vmem:[#allocation15 + $0x2f8] sm:$0xf0] }
 0x36f   : > { %5558 = vmatpush.bf16.msrb.mxu2 %v10827_v51  ;;  %5523 = vmatpush.bf16.msra.mxu3 %v10727_v47  ;;  %v12924_v51 = vld [vmem:[#allocation15 + $0xa4] sm:$0xf]  ;;  %v10655_v3 = vor.u32 %v12909_v58, %v10654_v49  ;;  %v12993_v47 = vld [vmem:[#allocation15 + $0x2c4] sm:$0xf0]  ;;  %v10943_v49 = vor.u32 %v12981_v39, %v10942_v38  ;;  %v13058_v58 = vld [vmem:[#allocation18 + $0x50] sm:$0xf0] }
 0x370   : > { %5514 = vmatmul.bf16.vlgmr.msra.gmra.mxu2 %v14475_v50  ;;  %v10991_v14 = vor.u32 %v12993_v47, %v10990_v5  ;;  %v11238_v5 = vld [vmem:[#allocation18 + $0x30] sm:$0xf]  ;;  %v10872_v38 = vld [vmem:[#allocation15 + $0x1d8] sm:$0xf0]  ;;  %v11214_v39 = vld [vmem:[#allocation18] sm:$0xf] }
 0x372   : > { %5550 = vmatpush.bf16.msrb.mxu1 %v11087_v29  ;;  %5485 = vmatpush.bf16.msra.mxu0 %v10699_v9  ;;  %v10731_v29 = vor.u32 %v12924_v51, %v10728_v21  ;;  %v12990_v9 = vld [vmem:[#allocation15 + $0x2b4] sm:$0xf]  ;;  %v11394_v51 = vld [vmem:[#allocation18 + $0x168] sm:$0xf]  ;;  %v10918_v21 = vld [vmem:[#allocation15 + $0x220] sm:$0xf] }
 0x373   : > { %5559 = vmatpush.bf16.msrb.mxu2 %v10803_v54  ;;  %5524 = vmatpush.bf16.msra.mxu3 %v10703_v7  ;;  %v11019_v54 = vor.u32 %v12996_v43, %v11016_v41  ;;  %v4429_v16 = vpop.f32.mrf.mxu2  ;;  %v10707_v7 = vor.u32 %v12918_v12, %v10704_v36  ;;  %v10995_v52 = vor.u32 %v12990_v9, %v10992_v13  ;;  %v12975_v43 = vld [vmem:[#allocation15 + $0x234] sm:$0xf0]  ;;  %v10894_v9 = vld [vmem:[#allocation15 + $0x1f0] sm:$0xf]  ;;  %v12969_v13 = vld [vmem:[#allocation15 + $0x204] sm:$0xf0] }
 0x374   : > { %v11382_v12 = vld [vmem:[#allocation18 + $0x150] sm:$0xf] }
 0x376   : > { %5551 = vmatpush.bf16.msrb.mxu1 %v11063_v62  ;;  %5486 = vmatpush.bf16.msra.mxu0 %v10675_v11  ;;  %v12912_v62 = vld [vmem:[#allocation15 + $0x44] sm:$0xf] }
 0x377   : > { %5560 = vmatpush.bf16.msrb.mxu2 %v10779_v25  ;;  %5525 = vmatpush.bf16.msra.mxu3 %v10679_v33  ;;  %v14648_v25 = vadd.f32 %v4429_v16, %v4417_v17  ;;  %v11262_v11 = vld [vmem:[#allocation18 + $0x60] sm:$0xf]  ;;  %v10683_v40 = vor.u32 %v12912_v62, %v10680_v27  ;;  %v10656_v33 = vld [vmem:[#allocation15 + $0x28] sm:$0xf0]  ;;  %v12966_v17 = vld [vmem:[#allocation15 + $0x1f4] sm:$0xf]  ;;  %v10895_v16 = vor.u32 %v12969_v13, %v10894_v9 }
 0x378   : > { %v11263_v44 = vor.u32 %v13061_v37, %v11262_v11  ;;  %v13088_v62 = vld [vmem:[#allocation18 + $0x140] sm:$0xf0]  ;;  %v12963_v27 = vld [vmem:[#allocation15 + $0x1d4] sm:$0xf0]  ;;  %v10899_v6 = vor.u32 %v12966_v17, %v10896_v18  ;;  %v13079_v18 = vld [vmem:[#allocation18 + $0xf8] sm:$0xf0] }
 0x37a   : > { %5552 = vmatpush.bf16.msrb.mxu1 %v11039_v8  ;;  %5487 = vmatpush.bf16.msra.mxu0 %v10651_v55  ;;  %v10944_v8 = vld [vmem:[#allocation15 + $0x268] sm:$0xf0]  ;;  %v14652_v55 = vpop.f32.mrf.mxu1  ;;  %v4403_v47 = vpop.f32.mrf.mxu0 }
 0x37b   : > { %5561 = vmatpush.bf16.msrb.mxu2 %v10755_v48  ;;  %5526 = vmatpush.bf16.msra.mxu3 %v10655_v3  ;;  %v11250_v48 = vld [vmem:[#allocation18 + $0x48] sm:$0xf]  ;;  %v4431_v41 = vpop.f32.mrf.mxu2  ;;  %v10947_v61 = vor.u32 %v12978_v56, %v10944_v8  ;;  %v10920_v3 = vld [vmem:[#allocation15 + $0x238] sm:$0xf0]  ;;  %v14655_v36 = vadd.f32 %v4403_v47, %v14643_v23  ;;  %v13093_v56 = vld [vmem:[#allocation18 + $0x16c] sm:$0xf] }
 0x37c   : > { %v11251_v63 = vor.u32 %v13058_v58, %v11250_v48  ;;  %v11396_v8 = vld [vmem:[#allocation18 + $0x174] sm:$0xf0]  ;;  %v10846_v48 = vld [vmem:[#allocation15 + $0x190] sm:$0xf]  ;;  %v10875_v58 = vor.u32 %v12960_v57, %v10872_v38  ;;  %v12954_v41 = vld [vmem:[#allocation15 + $0x194] sm:$0xf] }
 0x37d   : > { %5553 = vmatmul.bf16.vlgmr.msrb.gmra.mxu1 %v14475_v50  ;;  %5488 = vmatmul.bf16.vlgmr.msra.gmra.mxu0 %v14461_v22  ;;  %v13090_v47 = vld [vmem:[#allocation18 + $0x154] sm:$0xf]  ;;  %v13112_v38 = vld [vmem:[#allocation18 + $0x200] sm:$0xf0] }
 0x37e   : > { %6088 = vmatpush.bf16.msra.mxu1 %v11299_v53  ;;  %5532 = vmatpush.bf16.msrb.mxu0 %v11015_v59  ;;  %v13094_v53 = vld [vmem:[#allocation18 + $0x170] sm:$0xf0]  ;;  %v10659_v59 = vor.u32 %v12906_v60, %v10656_v33  ;;  %v11358_v33 = vld [vmem:[#allocation18 + $0x120] sm:$0xf] }
 0x37f   : > { %5562 = vmatpush.bf16.msrb.mxu2 %v10731_v29  ;;  %5571 = vmatpush.bf16.msrb.mxu3 %v11019_v54  ;;  %v11395_v0 = vor.u32 %v13094_v53, %v11394_v51  ;;  %v10919_v29 = vor.u32 %v12975_v43, %v10918_v21  ;;  %v13055_v54 = vld [vmem:[#allocation18 + $0x38] sm:$0xf0]  ;;  %v11208_v53 = vld [vmem:[#allocation15 + $0x478] sm:$0xf0] }
 0x380   : > { %5527 = vmatmul.bf16.vlgmr.msra.gmra.mxu3 %v14461_v22  ;;  %v11239_v19 = vor.u32 %v13055_v54, %v11238_v5  ;;  %v13044_v51 = vld [vmem:[#allocation15 + $0x464] sm:$0xf] }
 0x381   : > { %v11211_v5 = vor.u32 %v13044_v51, %v11208_v53  ;;  %v13109_v51 = vld [vmem:[#allocation18 + $0x1e8] sm:$0xf0] }
 0x382   : > { %6089 = vmatpush.bf16.msra.mxu1 %v11287_v28  ;;  %5533 = vmatpush.bf16.msrb.mxu0 %v10991_v14  ;;  %v13091_v28 = vld [vmem:[#allocation18 + $0x158] sm:$0xf0]  ;;  %v10923_v14 = vor.u32 %v12972_v31, %v10920_v3  ;;  %v4470_v23 = vpop.f32.mrf.mxu1  ;;  %v4405_v60 = vpop.f32.mrf.mxu0  ;;  %v11490_v31 = vld [vmem:[#allocation18 + $0x228] sm:$0xf]  ;;  %v13118_v3 = vld [vmem:[#allocation18 + $0x230] sm:$0xf0] }
 0x383   : > { %5563 = vmatpush.bf16.msrb.mxu2 %v10707_v7  ;;  %5572 = vmatpush.bf16.msrb.mxu3 %v10995_v52  ;;  %v11383_v15 = vor.u32 %v13091_v28, %v11382_v12  ;;  %v13052_v7 = vld [vmem:[#allocation18 + $0x20] sm:$0xf0]  ;;  %v11370_v52 = vld [vmem:[#allocation18 + $0x138] sm:$0xf]  ;;  %v13038_v12 = vld [vmem:[#allocation15 + $0x434] sm:$0xf] }
 0x384   : > { %v11227_v11 = vor.u32 %v13052_v7, %v11226_v24  ;;  %v11371_v37 = vor.u32 %v13088_v62, %v11370_v52  ;;  %v11184_v28 = vld [vmem:[#allocation15 + $0x448] sm:$0xf0]  ;;  %v11478_v24 = vld [vmem:[#allocation18 + $0x210] sm:$0xf]  ;;  %v13087_v52 = vld [vmem:[#allocation18 + $0x13c] sm:$0xf] }
 0x385   : > { %v11187_v7 = vor.u32 %v13038_v12, %v11184_v28  ;;  %v11372_v62 = vld [vmem:[#allocation18 + $0x144] sm:$0xf0]  ;;  %v13032_v23 = vld [vmem:[#allocation15 + $0x404] sm:$0xf]  ;;  %v11360_v60 = vld [vmem:[#allocation18 + $0x12c] sm:$0xf0] }
 0x386   : > { %6090 = vmatpush.bf16.msra.mxu1 %v11275_v26  ;;  %5534 = vmatpush.bf16.msrb.mxu0 %v10967_v35  ;;  %v10870_v26 = vld [vmem:[#allocation15 + $0x1c0] sm:$0xf]  ;;  %v4442_v35 = vpop.f32.mrf.mxu3  ;;  %v13081_v53 = vld [vmem:[#allocation18 + $0x10c] sm:$0xf]  ;;  %v13078_v12 = vld [vmem:[#allocation18 + $0xf4] sm:$0xf] }
 0x387   : > { %5564 = vmatpush.bf16.msrb.mxu2 %v10683_v40  ;;  %5573 = vmatpush.bf16.msrb.mxu3 %v10971_v42  ;;  %v13049_v40 = vld [vmem:[#allocation18 + $0x8] sm:$0xf0]  ;;  %v14659_v42 = vadd.f32 %v4442_v35, %v14648_v25  ;;  %v10848_v25 = vld [vmem:[#allocation15 + $0x1a8] sm:$0xf0]  ;;  %v11375_v35 = vor.u32 %v13087_v52, %v11372_v62 }
 0x388   : > { %v11215_v21 = vor.u32 %v13049_v40, %v11214_v39  ;;  %v10851_v54 = vor.u32 %v12954_v41, %v10848_v25  ;;  %v13084_v40 = vld [vmem:[#allocation18 + $0x124] sm:$0xf]  ;;  %v11492_v41 = vld [vmem:[#allocation18 + $0x234] sm:$0xf0]  ;;  %v3980_v25 = vperm.slane %v14632_v45, 2 }
 0x389   : > { %v13114_v45 = vld [vmem:[#allocation18 + $0x214] sm:$0xf] }
 0x38a   : > { %6091 = vmatpush.bf16.msra.mxu1 %v11263_v44  ;;  %5535 = vmatpush.bf16.msrb.mxu0 %v10943_v49  ;;  %v13085_v44 = vld [vmem:[#allocation18 + $0x128] sm:$0xf0]  ;;  %v12957_v49 = vld [vmem:[#allocation15 + $0x1a4] sm:$0xf0] }
 0x38b   : > { %5565 = vmatpush.bf16.msrb.mxu2 %v10659_v59  ;;  %5574 = vmatpush.bf16.msrb.mxu3 %v10947_v61  ;;  %v11359_v43 = vor.u32 %v13085_v44, %v11358_v33  ;;  %v11346_v59 = vld [vmem:[#allocation18 + $0x108] sm:$0xf]  ;;  %v11399_v61 = vor.u32 %v13093_v56, %v11396_v8  ;;  %v11310_v8 = vld [vmem:[#allocation18 + $0xc0] sm:$0xf] }
 0x38c   : > { %v11136_v33 = vld [vmem:[#allocation15 + $0x3e8] sm:$0xf0] }
 0x38e   : > { %6092 = vmatpush.bf16.msra.mxu1 %v11251_v63  ;;  %5536 = vmatpush.bf16.msrb.mxu0 %v10919_v29  ;;  %v10847_v63 = vor.u32 %v12957_v49, %v10846_v48  ;;  %v11384_v29 = vld [vmem:[#allocation18 + $0x15c] sm:$0xf0]  ;;  %v4444_v9 = vpop.f32.mrf.mxu3  ;;  %v13073_v48 = vld [vmem:[#allocation18 + $0xc8] sm:$0xf0]  ;;  %v11363_v49 = vor.u32 %v13084_v40, %v11360_v60  ;;  %v11418_v40 = vld [vmem:[#allocation18 + $0x198] sm:$0xf] }
 0x38f   : > { %6101 = vmatpush.bf16.msra.mxu2 %v11395_v0  ;;  %5575 = vmatpush.bf16.msrb.mxu3 %v10923_v14  ;;  %v13082_v0 = vld [vmem:[#allocation18 + $0x110] sm:$0xf0]  ;;  %v11491_v14 = vor.u32 %v13118_v3, %v11490_v31  ;;  %v11387_v17 = vor.u32 %v13090_v47, %v11384_v29  ;;  %v11442_v29 = vld [vmem:[#allocation18 + $0x1c8] sm:$0xf] }
 0x390   : > { %5566 = vmatmul.bf16.vlgmr.msrb.gmra.mxu2 %v14461_v22  ;;  %v10871_v22 = vor.u32 %v12963_v27, %v10870_v26  ;;  %v11347_v13 = vor.u32 %v13082_v0, %v11346_v59  ;;  %v11160_v26 = vld [vmem:[#allocation15 + $0x418] sm:$0xf0]  ;;  %v13020_v59 = vld [vmem:[#allocation15 + $0x3a4] sm:$0xf]  ;;  %v11311_v0 = vor.u32 %v13073_v48, %v11310_v8  ;;  %v11312_v8 = vld [vmem:[#allocation18 + $0xcc] sm:$0xf0] }
 0x391   : > { %v11163_v39 = vor.u32 %v13032_v23, %v11160_v26  ;;  %v11430_v23 = vld [vmem:[#allocation18 + $0x1b0] sm:$0xf]  ;;  %v13103_v26 = vld [vmem:[#allocation18 + $0x1b8] sm:$0xf0] }
 0x392   : > { %6093 = vmatpush.bf16.msra.mxu1 %v11239_v19  ;;  %5537 = vmatpush.bf16.msrb.mxu0 %v10895_v16  ;;  %v11334_v19 = vld [vmem:[#allocation18 + $0xf0] sm:$0xf]  ;;  %v13115_v16 = vld [vmem:[#allocation18 + $0x218] sm:$0xf0] }
 0x393   : > { %6102 = vmatpush.bf16.msra.mxu2 %v11383_v15  ;;  %5576 = vmatpush.bf16.msrb.mxu3 %v10899_v6  ;;  %v14663_v15 = vpack.c.bf16 %v14609_v2, %v14609_v2  ;;  %v11335_v27 = vor.u32 %v13079_v18, %v11334_v19  ;;  %v11479_v2 = vor.u32 %v13115_v16, %v11478_v24  ;;  %v11322_v6 = vld [vmem:[#allocation18 + $0xd8] sm:$0xf]  ;;  %v14666_v57 = vpop.f32.mrf.mxu2  ;;  %v11088_v18 = vld [vmem:[#allocation15 + $0x388] sm:$0xf0] }
 0x394   : > { %v14675_v24 = vpack.c.bf16 %v14624_v1, %v14624_v1 }
 0x396   : > { %6094 = vmatpush.bf16.msra.mxu1 %v11227_v11  ;;  %5538 = vmatpush.bf16.msrb.mxu0 %v10871_v22  ;;  %v13076_v11 = vld [vmem:[#allocation18 + $0xe0] sm:$0xf0]  ;;  %v13026_v22 = vld [vmem:[#allocation15 + $0x3d4] sm:$0xf] }
 0x397   : > { %6103 = vmatpush.bf16.msra.mxu2 %v11371_v37  ;;  %5577 = vmatpush.bf16.msrb.mxu3 %v10875_v58  ;;  %v11466_v37 = vld [vmem:[#allocation18 + $0x1f8] sm:$0xf]  ;;  %v11323_v44 = vor.u32 %v13076_v11, %v11322_v6  ;;  %v11454_v58 = vld [vmem:[#allocation18 + $0x1e0] sm:$0xf]  ;;  %v11324_v6 = vld [vmem:[#allocation18 + $0xe4] sm:$0xf0] }
 0x398   : > { %v11467_v56 = vor.u32 %v13112_v38, %v11466_v37  ;;  %v11455_v31 = vor.u32 %v13109_v51, %v11454_v58  ;;  %v11468_v11 = vld [vmem:[#allocation18 + $0x204] sm:$0xf0]  ;;  %v13008_v37 = vld [vmem:[#allocation15 + $0x344] sm:$0xf]  ;;  %v11064_v38 = vld [vmem:[#allocation15 + $0x358] sm:$0xf0] }
 0x399   : > { %v11456_v58 = vld [vmem:[#allocation18 + $0x1ec] sm:$0xf0] }
 0x39a   : > { %6095 = vmatpush.bf16.msra.mxu1 %v11215_v21  ;;  %5539 = vmatpush.bf16.msrb.mxu0 %v10847_v63  ;;  %v11139_v21 = vor.u32 %v13026_v22, %v11136_v33  ;;  %v14671_v63 = vpop.f32.mrf.mxu1  ;;  %v4455_v28 = vpop.f32.mrf.mxu0  ;;  %v11498_v51 = vld [vmem:[#allocation18 + $0x230] sm:$0xf] }
 0x39b   : > { %6104 = vmatpush.bf16.msra.mxu2 %v11359_v43  ;;  %5578 = vmatpush.bf16.msrb.mxu3 %v10851_v54  ;;  %v13117_v43 = vld [vmem:[#allocation18 + $0x22c] sm:$0xf]  ;;  %v4483_v3 = vpop.f32.mrf.mxu2  ;;  %v13106_v54 = vld [vmem:[#allocation18 + $0x1d0] sm:$0xf0]  ;;  %v4456_v19 = vadd.f32 %v4455_v28, %v3980_v25  ;;  %v11300_v25 = vld [vmem:[#allocation18 + $0xb4] sm:$0xf0] }
 0x39c   : > { %v11495_v47 = vor.u32 %v13117_v43, %v11492_v41  ;;  %v11443_v16 = vor.u32 %v13106_v54, %v11442_v29  ;;  %v13069_v41 = vld [vmem:[#allocation18 + $0xac] sm:$0xf]  ;;  %v11444_v29 = vld [vmem:[#allocation18 + $0x1d4] sm:$0xf0]  ;;  %v11306_v54 = vld [vmem:[#allocation18 + $0xb0] sm:$0xf] }
 0x39d   : > { %6096 = vmatmul.bf16.vlgmr.msra.gmra.mxu1 %v14663_v15  ;;  %5540 = vmatmul.bf16.vlgmr.msrb.gmra.mxu0 %v14468_v34  ;;  %v13105_v3 = vld [vmem:[#allocation18 + $0x1cc] sm:$0xf]  ;;  %v11303_v28 = vor.u32 %v13069_v41, %v11300_v25  ;;  %v11270_v41 = vld [vmem:[#allocation18 + $0x68] sm:$0xf]  ;;  %v13062_v25 = vld [vmem:[#allocation18 + $0x70] sm:$0xf0] }
 0x39e   : > { %6140 = vmatpush.bf16.msrb.mxu1 %v11399_v61  ;;  %5584 = vmatpush.bf16.msra.mxu0 %v11211_v5  ;;  %v11112_v61 = vld [vmem:[#allocation15 + $0x3b8] sm:$0xf0] }
 0x39f   : > { %6105 = vmatpush.bf16.msra.mxu2 %v11347_v13  ;;  %6114 = vmatpush.bf16.msra.mxu3 %v11491_v14  ;;  %v11115_v9 = vor.u32 %v13020_v59, %v11112_v61  ;;  %v11336_v13 = vld [vmem:[#allocation18 + $0xfc] sm:$0xf0] }
 0x3a0   : > { %5579 = vmatmul.bf16.vlgmr.msrb.gmra.mxu3 %v14468_v34  ;;  %v11348_v34 = vld [vmem:[#allocation18 + $0x114] sm:$0xf0]  ;;  %v11480_v14 = vld [vmem:[#allocation18 + $0x21c] sm:$0xf0]  ;;  %v11339_v52 = vor.u32 %v13078_v12, %v11336_v13  ;;  %v13071_v12 = vld [vmem:[#allocation18 + $0xb8] sm:$0xf0] }
 0x3a1   : > { %v11351_v5 = vor.u32 %v13081_v53, %v11348_v34  ;;  %v11483_v62 = vor.u32 %v13114_v45, %v11480_v14  ;;  %v13119_v53 = vld [vmem:[#allocation18 + $0x238] sm:$0xf0]  ;;  %v11040_v34 = vld [vmem:[#allocation15 + $0x328] sm:$0xf0]  ;;  %v13066_v14 = vld [vmem:[#allocation18 + $0x94] sm:$0xf] }
 0x3a2   : > { %6141 = vmatpush.bf16.msrb.mxu1 %v11387_v17  ;;  %5585 = vmatpush.bf16.msra.mxu0 %v11187_v7  ;;  %v13014_v17 = vld [vmem:[#allocation15 + $0x374] sm:$0xf]  ;;  %v4469_v7 = vadd.f32 %v14652_v55, %v4456_v19  ;;  %v5400_v55 = vpop.f32.mrf.mxu1  ;;  %v4457_v48 = vpop.f32.mrf.mxu0  ;;  %v13116_v13 = vld [vmem:[#allocation18 + $0x220] sm:$0xf0]  ;;  %v11288_v19 = vld [vmem:[#allocation18 + $0x9c] sm:$0xf0] }
 0x3a3   : > { %6106 = vmatpush.bf16.msra.mxu2 %v11335_v27  ;;  %6115 = vmatpush.bf16.msra.mxu3 %v11479_v2  ;;  %v13075_v27 = vld [vmem:[#allocation18 + $0xdc] sm:$0xf]  ;;  %v11091_v2 = vor.u32 %v13014_v17, %v11088_v18  ;;  %v14682_v60 = vpop.f32.mrf.mxu3  ;;  %v11447_v18 = vor.u32 %v13105_v3, %v11444_v29  ;;  %v11462_v48 = vld [vmem:[#allocation18 + $0x1e8] sm:$0xf]  ;;  %v13142_v3 = vld [vmem:[#allocation18 + $0x2f0] sm:$0xf0] }
 0x3a4   : > { %v14679_v1 = vadd.f32 %v14666_v57, %v4469_v7  ;;  %v11327_v22 = vor.u32 %v13075_v27, %v11324_v6  ;;  %v11067_v57 = vor.u32 %v13008_v37, %v11064_v38  ;;  %v13102_v7 = vld [vmem:[#allocation18 + $0x1b4] sm:$0xf]  ;;  %v11291_v27 = vor.u32 %v13066_v14, %v11288_v19  ;;  %v13113_v6 = vld [vmem:[#allocation18 + $0x208] sm:$0xf0]  ;;  %v14689_v38 = vld [vmem:[#allocation17] sm:$0x3f] }
 0x3a5   : > { %v14687_v37 = vpack.c.bf16 %v14639_v10, %v14639_v10  ;;  %v11258_v14 = vld [vmem:[#allocation18 + $0x50] sm:$0xf]  ;;  %v13059_v19 = vld [vmem:[#allocation18 + $0x58] sm:$0xf0] }
 0x3a6   : > { %6142 = vmatpush.bf16.msrb.mxu1 %v11375_v35  ;;  %5586 = vmatpush.bf16.msra.mxu0 %v11163_v39  ;;  %v13111_v35 = vld [vmem:[#allocation18 + $0x1fc] sm:$0xf]  ;;  %v11431_v39 = vor.u32 %v13103_v26, %v11430_v23  ;;  %v11294_v23 = vld [vmem:[#allocation18 + $0x98] sm:$0xf]  ;;  %v13068_v26 = vld [vmem:[#allocation18 + $0xa0] sm:$0xf0] }
 0x3a7   : > { %6107 = vmatpush.bf16.msra.mxu2 %v11323_v44  ;;  %6116 = vmatpush.bf16.msra.mxu3 %v11467_v56  ;;  %v11471_v33 = vor.u32 %v13111_v35, %v11468_v11  ;;  %v13100_v44 = vld [vmem:[#allocation18 + $0x1a0] sm:$0xf0]  ;;  %v13063_v35 = vld [vmem:[#allocation18 + $0x7c] sm:$0xf]  ;;  %v11276_v11 = vld [vmem:[#allocation18 + $0x84] sm:$0xf0] }
 0x3a8   : > { %v13072_v56 = vld [vmem:[#allocation18 + $0xc4] sm:$0xf]  ;;  %v11419_v43 = vor.u32 %v13100_v44, %v11418_v40  ;;  %v13099_v40 = vld [vmem:[#allocation18 + $0x19c] sm:$0xf]  ;;  %v11420_v44 = vld [vmem:[#allocation18 + $0x1a4] sm:$0xf0]  ;;  %v11279_v10 = vor.u32 %v13063_v35, %v11276_v11 }
 0x3a9   : > { %v11315_v59 = vor.u32 %v13072_v56, %v11312_v8  ;;  %v11282_v56 = vld [vmem:[#allocation18 + $0x80] sm:$0xf]  ;;  %v13065_v8 = vld [vmem:[#allocation18 + $0x88] sm:$0xf0] }
 0x3aa   : > { %6143 = vmatpush.bf16.msrb.mxu1 %v11363_v49  ;;  %5587 = vmatpush.bf16.msra.mxu0 %v11139_v21  ;;  %v13108_v49 = vld [vmem:[#allocation18 + $0x1e4] sm:$0xf]  ;;  %v13002_v21 = vld [vmem:[#allocation15 + $0x314] sm:$0xf] }
 0x3ab   : > { %6108 = vmatpush.bf16.msra.mxu2 %v11311_v0  ;;  %6117 = vmatpush.bf16.msra.mxu3 %v11455_v31  ;;  %v11459_v61 = vor.u32 %v13108_v49, %v11456_v58  ;;  %v11406_v0 = vld [vmem:[#allocation18 + $0x180] sm:$0xf]  ;;  %v13097_v31 = vld [vmem:[#allocation18 + $0x188] sm:$0xf0]  ;;  %v5374_v17 = vpop.f32.mrf.mxu3  ;;  %v13060_v49 = vld [vmem:[#allocation18 + $0x64] sm:$0xf] }
 0x3ac   : > { %v11407_v45 = vor.u32 %v13097_v31, %v11406_v0  ;;  %v11264_v58 = vld [vmem:[#allocation18 + $0x6c] sm:$0xf0]  ;;  %v13107_v0 = vld [vmem:[#allocation18 + $0x1d8] sm:$0xf0]  ;;  %v11586_v31 = vld [vmem:[#allocation18 + $0x2e8] sm:$0xf] }
 0x3ad   : > { %v11438_v17 = vld [vmem:[#allocation18 + $0x1b8] sm:$0xf] }
 0x3ae   : > { %6144 = vmatpush.bf16.msrb.mxu1 %v11351_v5  ;;  %5588 = vmatpush.bf16.msra.mxu0 %v11115_v9  ;;  %v11499_v5 = vor.u32 %v13119_v53, %v11498_v51  ;;  %v11486_v9 = vld [vmem:[#allocation18 + $0x218] sm:$0xf]  ;;  %v4631_v51 = vperm.slane %v14689_v38, 0  ;;  %v11423_v53 = vor.u32 %v13099_v40, %v11420_v44  ;;  %v11426_v40 = vld [vmem:[#allocation18 + $0x1a0] sm:$0xf] }
 0x3af   : > { %6153 = vmatpush.bf16.msrb.mxu2 %v11495_v47  ;;  %6118 = vmatpush.bf16.msra.mxu3 %v11443_v16  ;;  %v11043_v47 = vor.u32 %v13002_v21, %v11040_v34  ;;  %v11307_v16 = vor.u32 %v13071_v12, %v11306_v54  ;;  %v11283_v21 = vor.u32 %v13065_v8, %v11282_v56  ;;  %v11408_v34 = vld [vmem:[#allocation18 + $0x18c] sm:$0xf0]  ;;  %v13101_v44 = vld [vmem:[#allocation18 + $0x1a8] sm:$0xf0]  ;;  %v11562_v56 = vld [vmem:[#allocation18 + $0x2b8] sm:$0xf] }
 0x3b0   : > { %6109 = vmatmul.bf16.vlgmr.msra.gmra.mxu2 %v14675_v24  ;;  %v11271_v12 = vor.u32 %v13062_v25, %v11270_v41  ;;  %v13136_v8 = vld [vmem:[#allocation18 + $0x2c0] sm:$0xf0] }
 0x3b2   : > { %6145 = vmatpush.bf16.msrb.mxu1 %v11339_v52  ;;  %5589 = vmatpush.bf16.msra.mxu0 %v11091_v2  ;;  %v11487_v52 = vor.u32 %v13116_v13, %v11486_v9  ;;  %v11474_v2 = vld [vmem:[#allocation18 + $0x200] sm:$0xf] }
 0x3b3   : > { %6154 = vmatpush.bf16.msrb.mxu2 %v11483_v62  ;;  %6119 = vmatpush.bf16.msra.mxu3 %v11431_v39  ;;  %v11432_v62 = vld [vmem:[#allocation18 + $0x1bc] sm:$0xf0]  ;;  %v11295_v39 = vor.u32 %v13068_v26, %v11294_v23  ;;  %v13054_v26 = vld [vmem:[#allocation18 + $0x34] sm:$0xf] }
 0x3b4   : > { %v11435_v55 = vor.u32 %v13102_v7, %v11432_v62  ;;  %v13104_v7 = vld [vmem:[#allocation18 + $0x1c0] sm:$0xf0]  ;;  %v13139_v62 = vld [vmem:[#allocation18 + $0x2d8] sm:$0xf0] }
 0x3b5   : > { %v11439_v35 = vor.u32 %v13104_v7, %v11438_v17  ;;  %v13166_v7 = vld [vmem:[#allocation18 + $0x3b0] sm:$0xf0] }
 0x3b6   : > { %6146 = vmatpush.bf16.msrb.mxu1 %v11327_v22  ;;  %5590 = vmatpush.bf16.msra.mxu0 %v11067_v57  ;;  %v14691_v22 = vpop.f32.mrf.mxu2  ;;  %v13110_v57 = vld [vmem:[#allocation18 + $0x1f0] sm:$0xf0] }
 0x3b7   : > { %6155 = vmatpush.bf16.msrb.mxu2 %v11471_v33  ;;  %6120 = vmatpush.bf16.msra.mxu3 %v11419_v43  ;;  %v11475_v33 = vor.u32 %v13113_v6, %v11474_v2  ;;  %v11463_v43 = vor.u32 %v13110_v57, %v11462_v48  ;;  %v4632_v2 = vperm.slane %v14689_v38, 1  ;;  %v11228_v48 = vld [vmem:[#allocation18 + $0x24] sm:$0xf0] }
 0x3b9   : > { %v5412_v57 = vadd.f32 %v14691_v22, %v4632_v2  ;;  %v13141_v22 = vld [vmem:[#allocation18 + $0x2ec] sm:$0xf]  ;;  %v13092_v2 = vld [vmem:[#allocation18 + $0x160] sm:$0xf0] }
 0x3ba   : > { %6147 = vmatpush.bf16.msrb.mxu1 %v11315_v59  ;;  %5591 = vmatpush.bf16.msra.mxu0 %v11043_v47  ;;  %v11450_v59 = vld [vmem:[#allocation18 + $0x1d0] sm:$0xf]  ;;  %v11252_v47 = vld [vmem:[#allocation18 + $0x54] sm:$0xf0]  ;;  %v14696_v29 = vpop.f32.mrf.mxu1 }
 0x3bb   : > { %6156 = vmatpush.bf16.msrb.mxu2 %v11459_v61  ;;  %6121 = vmatpush.bf16.msra.mxu3 %v11407_v45  ;;  %v11267_v61 = vor.u32 %v13060_v49, %v11264_v58  ;;  %v11451_v13 = vor.u32 %v13107_v0, %v11450_v59  ;;  %v11587_v45 = vor.u32 %v13142_v3, %v11586_v31  ;;  %v11234_v58 = vld [vmem:[#allocation18 + $0x20] sm:$0xf]  ;;  %v13133_v0 = vld [vmem:[#allocation18 + $0x2a8] sm:$0xf0]  ;;  %v11588_v31 = vld [vmem:[#allocation18 + $0x2f4] sm:$0xf0] }
 0x3bc   : > { %v13048_v3 = vld [vmem:[#allocation18 + $0x4] sm:$0xf] }
 0x3bd   : > { %6148 = vmatmul.bf16.vlgmr.msrb.gmra.mxu1 %v14675_v24  ;;  %5592 = vmatmul.bf16.vlgmr.msra.gmra.mxu0 %v14475_v50  ;;  %v13096_v50 = vld [vmem:[#allocation18 + $0x184] sm:$0xf] }
 0x3be   : > { %6192 = vmatpush.bf16.msra.mxu1 %v11499_v5  ;;  %6127 = vmatpush.bf16.msrb.mxu0 %v11303_v28  ;;  %v13057_v5 = vld [vmem:[#allocation18 + $0x4c] sm:$0xf]  ;;  %v11411_v54 = vor.u32 %v13096_v50, %v11408_v34  ;;  %v5373_v28 = vadd.f32 %v14682_v60, %v4631_v51  ;;  %v5413_v9 = vpop.f32.mrf.mxu2  ;;  %v11259_v60 = vor.u32 %v13059_v19, %v11258_v14  ;;  %v11414_v34 = vld [vmem:[#allocation18 + $0x188] sm:$0xf] }
 0x3bf   : > { %6157 = vmatpush.bf16.msrb.mxu2 %v11447_v18  ;;  %6166 = vmatpush.bf16.msrb.mxu3 %v11307_v16  ;;  %v5385_v18 = vpop.f32.mrf.mxu0  ;;  %v11255_v16 = vor.u32 %v13057_v5, %v11252_v47  ;;  %v13053_v50 = vld [vmem:[#allocation18 + $0x28] sm:$0xf0]  ;;  %v11216_v5 = vld [vmem:[#allocation18 + $0xc] sm:$0xf0]  ;;  %v11538_v14 = vld [vmem:[#allocation18 + $0x288] sm:$0xf]  ;;  %v11591_v19 = vor.u32 %v13141_v22, %v11588_v31 }
 0x3c0   : > { %6122 = vmatmul.bf16.vlgmr.msra.gmra.mxu3 %v14687_v37  ;;  %v5386_v23 = vadd.f32 %v5385_v18, %v5373_v28  ;;  %v11235_v47 = vor.u32 %v13053_v50, %v11234_v58  ;;  %v11219_v17 = vor.u32 %v13048_v3, %v11216_v5  ;;  %v13130_v18 = vld [vmem:[#allocation18 + $0x290] sm:$0xf0]  ;;  %v11502_v5 = vld [vmem:[#allocation18 + $0x240] sm:$0xf] }
 0x3c1   : > { %v13086_v22 = vld [vmem:[#allocation18 + $0x130] sm:$0xf0] }
 0x3c2   : > { %6193 = vmatpush.bf16.msra.mxu1 %v11487_v52  ;;  %6128 = vmatpush.bf16.msrb.mxu0 %v11291_v27  ;;  %v11574_v52 = vld [vmem:[#allocation18 + $0x2d0] sm:$0xf]  ;;  %v11240_v27 = vld [vmem:[#allocation18 + $0x3c] sm:$0xf0]  ;;  %v14701_v6 = vadd.f32 %v14671_v63, %v5386_v23  ;;  %v5452_v63 = vpop.f32.mrf.mxu1 }
 0x3c3   : > { %6158 = vmatpush.bf16.msrb.mxu2 %v11435_v55  ;;  %6167 = vmatpush.bf16.msrb.mxu3 %v11295_v39  ;;  %v11575_v11 = vor.u32 %v13139_v62, %v11574_v52  ;;  %v11246_v55 = vld [vmem:[#allocation18 + $0x38] sm:$0xf]  ;;  %v13056_v39 = vld [vmem:[#allocation18 + $0x40] sm:$0xf0]  ;;  %v5424_v51 = vpop.f32.mrf.mxu3  ;;  %v13138_v62 = vld [vmem:[#allocation18 + $0x2d4] sm:$0xf] }
 0x3c4   : > { %v11247_v49 = vor.u32 %v13056_v39, %v11246_v55  ;;  %v14705_v41 = vadd.f32 %v5424_v51, %v5412_v57  ;;  %v11576_v23 = vld [vmem:[#allocation18 + $0x2dc] sm:$0xf0]  ;;  %v11526_v39 = vld [vmem:[#allocation18 + $0x270] sm:$0xf]  ;;  %v13089_v63 = vld [vmem:[#allocation18 + $0x148] sm:$0xf0] }
 0x3c5   : > { %v11378_v57 = vld [vmem:[#allocation18 + $0x140] sm:$0xf] }
 0x3c6   : > { %6194 = vmatpush.bf16.msra.mxu1 %v11475_v33  ;;  %6129 = vmatpush.bf16.msrb.mxu0 %v11279_v10  ;;  %v11243_v33 = vor.u32 %v13054_v26, %v11240_v27  ;;  %v13051_v10 = vld [vmem:[#allocation18 + $0x1c] sm:$0xf]  ;;  %v11390_v27 = vld [vmem:[#allocation18 + $0x158] sm:$0xf] }
 0x3c7   : > { %6159 = vmatpush.bf16.msrb.mxu2 %v11423_v53  ;;  %6168 = vmatpush.bf16.msrb.mxu3 %v11283_v21  ;;  %v11427_v53 = vor.u32 %v13101_v44, %v11426_v40  ;;  %v11563_v21 = vor.u32 %v13136_v8, %v11562_v56  ;;  %v5387_v25 = vpop.f32.mrf.mxu0  ;;  %v11231_v59 = vor.u32 %v13051_v10, %v11228_v48  ;;  %v11670_v44 = vld [vmem:[#allocation18 + $0x390] sm:$0xf]  ;;  %v13163_v56 = vld [vmem:[#allocation18 + $0x398] sm:$0xf0]  ;;  %v11564_v48 = vld [vmem:[#allocation18 + $0x2c4] sm:$0xf0] }
 0x3c8   : > { %v11579_v40 = vor.u32 %v13138_v62, %v11576_v23  ;;  %v11391_v8 = vor.u32 %v13092_v2, %v11390_v27  ;;  %v13135_v10 = vld [vmem:[#allocation18 + $0x2bc] sm:$0xf]  ;;  %v11671_v51 = vor.u32 %v13163_v56, %v11670_v44  ;;  %v13160_v25 = vld [vmem:[#allocation18 + $0x380] sm:$0xf0]  ;;  %v13154_v27 = vld [vmem:[#allocation18 + $0x350] sm:$0xf0] }
 0x3c9   : > { %v11567_v50 = vor.u32 %v13135_v10, %v11564_v48  ;;  %v13126_v2 = vld [vmem:[#allocation18 + $0x274] sm:$0xf]  ;;  %v13080_v44 = vld [vmem:[#allocation18 + $0x100] sm:$0xf0] }
 0x3ca   : > { %6195 = vmatpush.bf16.msra.mxu1 %v11463_v43  ;;  %6130 = vmatpush.bf16.msrb.mxu0 %v11267_v61  ;;  %v13098_v43 = vld [vmem:[#allocation18 + $0x190] sm:$0xf0]  ;;  %v11550_v61 = vld [vmem:[#allocation18 + $0x2a0] sm:$0xf] }
 0x3cb   : > { %6160 = vmatpush.bf16.msrb.mxu2 %v11411_v54  ;;  %6169 = vmatpush.bf16.msrb.mxu3 %v11271_v12  ;;  %v11402_v54 = vld [vmem:[#allocation18 + $0x170] sm:$0xf]  ;;  %v13095_v12 = vld [vmem:[#allocation18 + $0x178] sm:$0xf0]  ;;  %v11415_v28 = vor.u32 %v13098_v43, %v11414_v34  ;;  %v11551_v9 = vor.u32 %v13133_v0, %v11550_v61  ;;  %v13124_v34 = vld [vmem:[#allocation18 + $0x260] sm:$0xf0] }
 0x3cc   : > { %v11403_v52 = vor.u32 %v13095_v12, %v11402_v54  ;;  %v11658_v43 = vld [vmem:[#allocation18 + $0x378] sm:$0xf]  ;;  %v11552_v61 = vld [vmem:[#allocation18 + $0x2ac] sm:$0xf0]  ;;  %v11366_v0 = vld [vmem:[#allocation18 + $0x128] sm:$0xf] }
 0x3cd   : > { %v11659_v3 = vor.u32 %v13160_v25, %v11658_v43  ;;  %v11646_v12 = vld [vmem:[#allocation18 + $0x360] sm:$0xf]  ;;  %v11610_v43 = vld [vmem:[#allocation18 + $0x318] sm:$0xf] }
 0x3ce   : > { %6196 = vmatpush.bf16.msra.mxu1 %v11451_v13  ;;  %6131 = vmatpush.bf16.msrb.mxu0 %v11255_v16  ;;  %v11222_v13 = vld [vmem:[#allocation18 + $0x8] sm:$0xf] }
 0x3cf   : > { %6698 = vmatpush.bf16.msra.mxu2 %v11587_v45  ;;  %6170 = vmatpush.bf16.msrb.mxu3 %v11259_v60  ;;  %v13050_v45 = vld [vmem:[#allocation18 + $0x10] sm:$0xf0]  ;;  %v11682_v16 = vld [vmem:[#allocation18 + $0x3a8] sm:$0xf]  ;;  %v4633_v60 = vperm.slane %v14689_v38, 2 }
 0x3d0   : > { %6161 = vmatmul.bf16.vlgmr.msrb.gmra.mxu2 %v14687_v37  ;;  %v11223_v26 = vor.u32 %v13050_v45, %v11222_v13  ;;  %v11683_v55 = vor.u32 %v13166_v7, %v11682_v16  ;;  %v11367_v13 = vor.u32 %v13086_v22, %v11366_v0  ;;  %v13165_v45 = vld [vmem:[#allocation18 + $0x3ac] sm:$0xf]  ;;  %v13120_v0 = vld [vmem:[#allocation18 + $0x244] sm:$0xf]  ;;  %v11504_v22 = vld [vmem:[#allocation18 + $0x24c] sm:$0xf0] }
 0x3d2   : > { %6197 = vmatpush.bf16.msra.mxu1 %v11439_v35  ;;  %6132 = vmatpush.bf16.msrb.mxu0 %v11243_v33  ;;  %v5426_v35 = vpop.f32.mrf.mxu3  ;;  %v13127_v33 = vld [vmem:[#allocation18 + $0x278] sm:$0xf0] }
 0x3d3   : > { %6699 = vmatpush.bf16.msra.mxu2 %v11575_v11  ;;  %6171 = vmatpush.bf16.msrb.mxu3 %v11247_v49  ;;  %v11539_v11 = vor.u32 %v13130_v18, %v11538_v14  ;;  %v5451_v49 = vadd.f32 %v14696_v29, %v4633_v60  ;;  %v11527_v58 = vor.u32 %v13127_v33, %v11526_v39  ;;  %v13132_v29 = vld [vmem:[#allocation18 + $0x2a4] sm:$0xf]  ;;  %v11684_v14 = vld [vmem:[#allocation18 + $0x3b4] sm:$0xf0]  ;;  %v11672_v39 = vld [vmem:[#allocation18 + $0x39c] sm:$0xf0] }
 0x3d4   : > { %v11555_v54 = vor.u32 %v13132_v29, %v11552_v61  ;;  %v11687_v23 = vor.u32 %v13165_v45, %v11684_v14  ;;  %v11342_v33 = vld [vmem:[#allocation18 + $0xf8] sm:$0xf]  ;;  %v13148_v61 = vld [vmem:[#allocation18 + $0x320] sm:$0xf0]  ;;  %v11778_v45 = vld [vmem:[#allocation18 + $0x468] sm:$0xf] }
 0x3d5   : > { %v13190_v14 = vld [vmem:[#allocation18 + $0x470] sm:$0xf0] }
 0x3d6   : > { %6198 = vmatpush.bf16.msra.mxu1 %v11427_v53  ;;  %6133 = vmatpush.bf16.msrb.mxu0 %v11231_v59  ;;  %v11514_v53 = vld [vmem:[#allocation18 + $0x258] sm:$0xf] }
 0x3d7   : > { %6700 = vmatpush.bf16.msra.mxu2 %v11563_v21  ;;  %6172 = vmatpush.bf16.msrb.mxu3 %v11235_v47  ;;  %v5463_v21 = vpop.f32.mrf.mxu2  ;;  %v11515_v31 = vor.u32 %v13124_v34, %v11514_v53  ;;  %v13121_v47 = vld [vmem:[#allocation18 + $0x248] sm:$0xf0]  ;;  %v11660_v53 = vld [vmem:[#allocation18 + $0x384] sm:$0xf0] }
 0x3d8   : > { %v14711_v59 = vadd.f32 %v5463_v21, %v5451_v49  ;;  %v11503_v16 = vor.u32 %v13121_v47, %v11502_v5  ;;  %v13123_v49 = vld [vmem:[#allocation18 + $0x25c] sm:$0xf]  ;;  %v11330_v21 = vld [vmem:[#allocation18 + $0xe0] sm:$0xf]  ;;  %v13156_v47 = vld [vmem:[#allocation18 + $0x364] sm:$0xf] }
 0x3da   : > { %6199 = vmatpush.bf16.msra.mxu1 %v11415_v28  ;;  %6134 = vmatpush.bf16.msrb.mxu0 %v11219_v17  ;;  %v13157_v28 = vld [vmem:[#allocation18 + $0x368] sm:$0xf0]  ;;  %v13083_v17 = vld [vmem:[#allocation18 + $0x118] sm:$0xf0]  ;;  %v14714_v18 = vpop.f32.mrf.mxu1  ;;  %v5437_v60 = vpop.f32.mrf.mxu0 }
 0x3db   : > { %6701 = vmatpush.bf16.msra.mxu2 %v11551_v9  ;;  %6173 = vmatpush.bf16.msrb.mxu3 %v11223_v26  ;;  %v13129_v9 = vld [vmem:[#allocation18 + $0x28c] sm:$0xf]  ;;  %v11647_v7 = vor.u32 %v13157_v28, %v11646_v12  ;;  %v11634_v26 = vld [vmem:[#allocation18 + $0x348] sm:$0xf]  ;;  %v11690_v12 = vld [vmem:[#allocation18 + $0x3b0] sm:$0xf] }
 0x3dc   : > { %v11635_v56 = vor.u32 %v13154_v27, %v11634_v26  ;;  %v13167_v28 = vld [vmem:[#allocation18 + $0x3b8] sm:$0xf0]  ;;  %v13189_v26 = vld [vmem:[#allocation18 + $0x46c] sm:$0xf]  ;;  %v11780_v27 = vld [vmem:[#allocation18 + $0x474] sm:$0xf0] }
 0x3dd   : > { %6200 = vmatmul.bf16.vlgmr.msra.gmra.mxu1 %v14687_v37  ;;  %6135 = vmatmul.bf16.vlgmr.msrb.gmra.mxu0 %v14663_v15  ;;  %v11379_v37 = vor.u32 %v13089_v63, %v11378_v57  ;;  %v11622_v57 = vld [vmem:[#allocation18 + $0x330] sm:$0xf]  ;;  %v13151_v63 = vld [vmem:[#allocation18 + $0x338] sm:$0xf0] }
 0x3de   : > { %6737 = vmatpush.bf16.msrb.mxu1 %v11591_v19  ;;  %6179 = vmatpush.bf16.msra.mxu0 %v11403_v52  ;;  %v11354_v19 = vld [vmem:[#allocation18 + $0x110] sm:$0xf] }
 0x3df   : > { %6702 = vmatpush.bf16.msra.mxu2 %v11539_v11  ;;  %6711 = vmatpush.bf16.msra.mxu3 %v11683_v55  ;;  %v5465_v52 = vpop.f32.mrf.mxu2  ;;  %v11355_v35 = vor.u32 %v13083_v17, %v11354_v19  ;;  %v11528_v11 = vld [vmem:[#allocation18 + $0x27c] sm:$0xf0]  ;;  %v13162_v55 = vld [vmem:[#allocation18 + $0x394] sm:$0xf]  ;;  %v11507_v19 = vor.u32 %v13120_v0, %v11504_v22  ;;  %v11756_v0 = vld [vmem:[#allocation18 + $0x444] sm:$0xf0] }
 0x3e0   : > { %6174 = vmatmul.bf16.vlgmr.msrb.gmra.mxu3 %v14663_v15  ;;  %v11540_v15 = vld [vmem:[#allocation18 + $0x294] sm:$0xf0]  ;;  %v11531_v10 = vor.u32 %v13126_v2, %v11528_v11  ;;  %v11675_v48 = vor.u32 %v13162_v55, %v11672_v39  ;;  %v11691_v52 = vor.u32 %v13167_v28, %v11690_v12  ;;  %v11779_v2 = vor.u32 %v13190_v14, %v11778_v45  ;;  %v11766_v55 = vld [vmem:[#allocation18 + $0x450] sm:$0xf]  ;;  %v13187_v39 = vld [vmem:[#allocation18 + $0x458] sm:$0xf0] }
 0x3e1   : > { %v11543_v62 = vor.u32 %v13129_v9, %v11540_v15  ;;  %v11318_v9 = vld [vmem:[#allocation18 + $0xc8] sm:$0xf]  ;;  %v11611_v15 = vor.u32 %v13148_v61, %v11610_v43  ;;  %v13147_v43 = vld [vmem:[#allocation18 + $0x31c] sm:$0xf]  ;;  %v13144_v28 = vld [vmem:[#allocation18 + $0x304] sm:$0xf] }
 0x3e2   : > { %6738 = vmatpush.bf16.msrb.mxu1 %v11579_v40  ;;  %6180 = vmatpush.bf16.msra.mxu0 %v11391_v8  ;;  %v14717_v40 = vadd.f32 %v5437_v60, %v14705_v41  ;;  %v14721_v8 = vpack.c.bf16 %v14655_v36, %v14655_v36  ;;  %v11516_v41 = vld [vmem:[#allocation18 + $0x264] sm:$0xf0]  ;;  %v5504_v34 = vpop.f32.mrf.mxu1  ;;  %v11623_v36 = vor.u32 %v13151_v63, %v11622_v57  ;;  %v11678_v60 = vld [vmem:[#allocation18 + $0x398] sm:$0xf]  ;;  %v11624_v57 = vld [vmem:[#allocation18 + $0x33c] sm:$0xf0] }
 0x3e3   : > { %6703 = vmatpush.bf16.msra.mxu2 %v11527_v58  ;;  %6712 = vmatpush.bf16.msra.mxu3 %v11671_v51  ;;  %v11343_v58 = vor.u32 %v13080_v44, %v11342_v33  ;;  %v13159_v51 = vld [vmem:[#allocation18 + $0x37c] sm:$0xf]  ;;  %v5476_v25 = vpop.f32.mrf.mxu3  ;;  %v13186_v63 = vld [vmem:[#allocation18 + $0x454] sm:$0xf]  ;;  %v11642_v45 = vld [vmem:[#allocation18 + $0x350] sm:$0xf] }
 0x3e4   : > { %v11663_v29 = vor.u32 %v13159_v51, %v11660_v53  ;;  %v13161_v51 = vld [vmem:[#allocation18 + $0x388] sm:$0xf0]  ;;  %v11754_v53 = vld [vmem:[#allocation18 + $0x438] sm:$0xf]  ;;  %v13183_v61 = vld [vmem:[#allocation18 + $0x43c] sm:$0xf] }
 0x3e5   : > { %v11759_v12 = vor.u32 %v13183_v61, %v11756_v0  ;;  %v11706_v0 = vld [vmem:[#allocation18 + $0x3d8] sm:$0xf] }
 0x3e6   : > { %6739 = vmatpush.bf16.msrb.mxu1 %v11567_v50  ;;  %6181 = vmatpush.bf16.msra.mxu0 %v11379_v37  ;;  %v13077_v50 = vld [vmem:[#allocation18 + $0xe8] sm:$0xf0]  ;;  %v11519_v37 = vor.u32 %v13123_v49, %v11516_v41  ;;  %v11768_v49 = vld [vmem:[#allocation18 + $0x45c] sm:$0xf0] }
 0x3e7   : > { %6704 = vmatpush.bf16.msra.mxu2 %v11515_v31  ;;  %6713 = vmatpush.bf16.msra.mxu3 %v11659_v3  ;;  %v14725_v31 = vadd.f32 %v5476_v25, %v14711_v59  ;;  %v5439_v3 = vpop.f32.mrf.mxu0  ;;  %v11331_v5 = vor.u32 %v13077_v50, %v11330_v21  ;;  %v13145_v59 = vld [vmem:[#allocation18 + $0x308] sm:$0xf0]  ;;  %v11666_v41 = vld [vmem:[#allocation18 + $0x380] sm:$0xf]  ;;  %v13184_v21 = vld [vmem:[#allocation18 + $0x440] sm:$0xf0]  ;;  %v14730_v50 = vpack.c.bf16 %v14659_v42, %v14659_v42 }
 0x3e8   : > { %v11755_v22 = vor.u32 %v13184_v21, %v11754_v53  ;;  %v11654_v42 = vld [vmem:[#allocation18 + $0x368] sm:$0xf]  ;;  %v13158_v3 = vld [vmem:[#allocation18 + $0x370] sm:$0xf0]  ;;  %v11720_v21 = vld [vmem:[#allocation18 + $0x3fc] sm:$0xf0] }
 0x3e9   : > { %v13174_v53 = vld [vmem:[#allocation18 + $0x3f4] sm:$0xf] }
 0x3ea   : > { %6740 = vmatpush.bf16.msrb.mxu1 %v11555_v54  ;;  %6182 = vmatpush.bf16.msra.mxu0 %v11367_v13  ;;  %v11648_v54 = vld [vmem:[#allocation18 + $0x36c] sm:$0xf0]  ;;  %v13074_v13 = vld [vmem:[#allocation18 + $0xd0] sm:$0xf0] }
 0x3eb   : > { %6705 = vmatpush.bf16.msra.mxu2 %v11503_v16  ;;  %6714 = vmatpush.bf16.msra.mxu3 %v11647_v7  ;;  %v11651_v17 = vor.u32 %v13156_v47, %v11648_v54  ;;  %v11598_v16 = vld [vmem:[#allocation18 + $0x300] sm:$0xf]  ;;  %v13153_v7 = vld [vmem:[#allocation18 + $0x34c] sm:$0xf]  ;;  %v5478_v33 = vpop.f32.mrf.mxu3 }
 0x3ec   : > { %v11599_v11 = vor.u32 %v13145_v59, %v11598_v16  ;;  %v13181_v47 = vld [vmem:[#allocation18 + $0x428] sm:$0xf0]  ;;  %v13191_v16 = vld [vmem:[#allocation18 + $0x478] sm:$0xf0]  ;;  %v4634_v59 = vperm.slane %v14689_v38, 3 }
 0x3ee   : > { %6741 = vmatpush.bf16.msrb.mxu1 %v11543_v62  ;;  %6183 = vmatpush.bf16.msra.mxu0 %v11355_v35  ;;  %v11319_v62 = vor.u32 %v13074_v13, %v11318_v9  ;;  %v13164_v35 = vld [vmem:[#allocation18 + $0x3a0] sm:$0xf0]  ;;  %v11600_v9 = vld [vmem:[#allocation18 + $0x30c] sm:$0xf0] }
 0x3ef   : > { %6750 = vmatpush.bf16.msrb.mxu2 %v11687_v23  ;;  %6715 = vmatpush.bf16.msra.mxu3 %v11635_v56  ;;  %v11636_v23 = vld [vmem:[#allocation18 + $0x354] sm:$0xf0]  ;;  %v11783_v56 = vor.u32 %v13189_v26, %v11780_v27  ;;  %v13180_v13 = vld [vmem:[#allocation18 + $0x424] sm:$0xf] }
 0x3f0   : > { %6706 = vmatmul.bf16.vlgmr.msra.gmra.mxu2 %v14721_v8  ;;  %v11639_v44 = vor.u32 %v13153_v7, %v11636_v23  ;;  %v11730_v7 = vld [vmem:[#allocation18 + $0x408] sm:$0xf]  ;;  %v11603_v23 = vor.u32 %v13144_v28, %v11600_v9  ;;  %v13146_v9 = vld [vmem:[#allocation18 + $0x310] sm:$0xf0] }
 0x3f1   : > { %v11606_v28 = vld [vmem:[#allocation18 + $0x308] sm:$0xf] }
 0x3f2   : > { %6742 = vmatpush.bf16.msrb.mxu1 %v11531_v10  ;;  %6184 = vmatpush.bf16.msra.mxu0 %v11343_v58  ;;  %v13150_v10 = vld [vmem:[#allocation18 + $0x334] sm:$0xf]  ;;  %v11767_v58 = vor.u32 %v13187_v39, %v11766_v55  ;;  %v11630_v55 = vld [vmem:[#allocation18 + $0x338] sm:$0xf] }
 0x3f3   : > { %6751 = vmatpush.bf16.msrb.mxu2 %v11675_v48  ;;  %6716 = vmatpush.bf16.msra.mxu3 %v11623_v36  ;;  %v11679_v48 = vor.u32 %v13164_v35, %v11678_v60  ;;  %v11627_v34 = vor.u32 %v13150_v10, %v11624_v57  ;;  %v11771_v36 = vor.u32 %v13186_v63, %v11768_v49  ;;  %v14732_v25 = vpop.f32.mrf.mxu2  ;;  %v13177_v35 = vld [vmem:[#allocation18 + $0x40c] sm:$0xf]  ;;  %v13188_v10 = vld [vmem:[#allocation18 + $0x460] sm:$0xf0]  ;;  %v11718_v57 = vld [vmem:[#allocation18 + $0x3f0] sm:$0xf] }
 0x3f4   : > { %v13175_v63 = vld [vmem:[#allocation18 + $0x3f8] sm:$0xf0] }
 0x3f6   : > { %6743 = vmatpush.bf16.msrb.mxu1 %v11519_v37  ;;  %6185 = vmatpush.bf16.msra.mxu0 %v11331_v5  ;;  %v11667_v37 = vor.u32 %v13161_v51, %v11666_v41  ;;  %v11742_v5 = vld [vmem:[#allocation18 + $0x420] sm:$0xf] }
 0x3f7   : > { %6752 = vmatpush.bf16.msrb.mxu2 %v11663_v29  ;;  %6717 = vmatpush.bf16.msra.mxu3 %v11611_v15  ;;  %v11612_v29 = vld [vmem:[#allocation18 + $0x324] sm:$0xf0]  ;;  %v11744_v15 = vld [vmem:[#allocation18 + $0x42c] sm:$0xf0]  ;;  %v11743_v14 = vor.u32 %v13181_v47, %v11742_v5 }
 0x3f8   : > { %v11615_v54 = vor.u32 %v13147_v43, %v11612_v29  ;;  %v11747_v26 = vor.u32 %v13180_v13, %v11744_v15  ;;  %v13149_v43 = vld [vmem:[#allocation18 + $0x328] sm:$0xf0]  ;;  %v11750_v13 = vld [vmem:[#allocation18 + $0x428] sm:$0xf]  ;;  %v13182_v15 = vld [vmem:[#allocation18 + $0x430] sm:$0xf0] }
 0x3f9   : > { %v13185_v29 = vld [vmem:[#allocation18 + $0x448] sm:$0xf0] }
 0x3fa   : > { %6744 = vmatpush.bf16.msrb.mxu1 %v11507_v19  ;;  %6186 = vmatpush.bf16.msra.mxu0 %v11319_v62  ;;  %v13155_v19 = vld [vmem:[#allocation18 + $0x358] sm:$0xf0]  ;;  %v14737_v62 = vpop.f32.mrf.mxu1  ;;  %v5489_v39 = vpop.f32.mrf.mxu0 }
 0x3fb   : > { %6753 = vmatpush.bf16.msrb.mxu2 %v11651_v17  ;;  %6718 = vmatpush.bf16.msra.mxu3 %v11599_v11  ;;  %v11786_v17 = vld [vmem:[#allocation18 + $0x470] sm:$0xf]  ;;  %v5517_v27 = vpop.f32.mrf.mxu2  ;;  %v11732_v11 = vld [vmem:[#allocation18 + $0x414] sm:$0xf0] }
 0x3fc   : > { %v11787_v60 = vor.u32 %v13191_v16, %v11786_v17  ;;  %v11735_v49 = vor.u32 %v13177_v35, %v11732_v11  ;;  %v13169_v17 = vld [vmem:[#allocation18 + $0x3c8] sm:$0xf0]  ;;  %v11696_v27 = vld [vmem:[#allocation18 + $0x3cc] sm:$0xf0]  ;;  %v13179_v11 = vld [vmem:[#allocation18 + $0x418] sm:$0xf0] }
 0x3fd   : > { %6745 = vmatmul.bf16.vlgmr.msrb.gmra.mxu1 %v14721_v8  ;;  %6187 = vmatmul.bf16.vlgmr.msra.gmra.mxu0 %v14675_v24  ;;  %v11655_v24 = vor.u32 %v13158_v3, %v11654_v42  ;;  %v11723_v42 = vor.u32 %v13174_v53, %v11720_v21  ;;  %v13171_v3 = vld [vmem:[#allocation18 + $0x3dc] sm:$0xf]  ;;  %v13176_v53 = vld [vmem:[#allocation18 + $0x400] sm:$0xf0]  ;;  %v11862_v21 = vld [vmem:[#allocation18 + $0x510] sm:$0xf] }
 0x3fe   : > { %6789 = vmatpush.bf16.msra.mxu1 %v11691_v52  ;;  %6724 = vmatpush.bf16.msrb.mxu0 %v11779_v2  ;;  %v13178_v52 = vld [vmem:[#allocation18 + $0x410] sm:$0xf0]  ;;  %v11643_v2 = vor.u32 %v13155_v19, %v11642_v45  ;;  %v12066_v45 = vld [vmem:[#allocation18 + $0x6a8] sm:$0xf]  ;;  %v11694_v19 = vld [vmem:[#allocation18 + $0x3c0] sm:$0xf] }
 0x3ff   : > { %6754 = vmatpush.bf16.msrb.mxu2 %v11639_v44  ;;  %6763 = vmatpush.bf16.msrb.mxu3 %v11783_v56  ;;  %v11731_v33 = vor.u32 %v13178_v52, %v11730_v7  ;;  %v13152_v44 = vld [vmem:[#allocation18 + $0x340] sm:$0xf0]  ;;  %v11774_v56 = vld [vmem:[#allocation18 + $0x458] sm:$0xf]  ;;  %v13143_v7 = vld [vmem:[#allocation18 + $0x2f8] sm:$0xf0]  ;;  %v11607_v52 = vor.u32 %v13146_v9, %v11606_v28  ;;  %v11695_v35 = vor.u32 %v13169_v17, %v11694_v19 }
 0x400   : > { %6719 = vmatmul.bf16.vlgmr.msra.gmra.mxu3 %v14730_v50  ;;  %v11631_v41 = vor.u32 %v13152_v44, %v11630_v55  ;;  %v11775_v51 = vor.u32 %v13188_v10, %v11774_v56  ;;  %v11874_v55 = vld [vmem:[#allocation18 + $0x528] sm:$0xf]  ;;  %v12054_v44 = vld [vmem:[#allocation18 + $0x690] sm:$0xf]  ;;  %v13259_v56 = vld [vmem:[#allocation18 + $0x698] sm:$0xf0] }
 0x401   : > { %v11850_v28 = vld [vmem:[#allocation18 + $0x4f8] sm:$0xf]  ;;  %v12030_v9 = vld [vmem:[#allocation18 + $0x660] sm:$0xf]  ;;  %v11702_v19 = vld [vmem:[#allocation18 + $0x3c8] sm:$0xf] }
 0x402   : > { %6790 = vmatpush.bf16.msra.mxu1 %v11679_v48  ;;  %6725 = vmatpush.bf16.msrb.mxu0 %v11767_v58  ;;  %v5490_v48 = vadd.f32 %v5489_v39, %v4634_v59  ;;  %v11594_v59 = vld [vmem:[#allocation18 + $0x2f0] sm:$0xf]  ;;  %v13214_v39 = vld [vmem:[#allocation18 + $0x530] sm:$0xf0] }
 0x403   : > { %6755 = vmatpush.bf16.msrb.mxu2 %v11627_v34  ;;  %6764 = vmatpush.bf16.msrb.mxu3 %v11771_v36  ;;  %v11618_v34 = vld [vmem:[#allocation18 + $0x320] sm:$0xf]  ;;  %v11719_v36 = vor.u32 %v13175_v63, %v11718_v57  ;;  %v14744_v5 = vpop.f32.mrf.mxu3  ;;  %v13140_v57 = vld [vmem:[#allocation18 + $0x2e0] sm:$0xf0]  ;;  %v13170_v17 = vld [vmem:[#allocation18 + $0x3d0] sm:$0xf0] }
 0x404   : > { %v5503_v58 = vadd.f32 %v14714_v18, %v5490_v48  ;;  %v5556_v18 = vpop.f32.mrf.mxu1  ;;  %v11619_v47 = vor.u32 %v13149_v43, %v11618_v34  ;;  %v11582_v48 = vld [vmem:[#allocation18 + $0x2d8] sm:$0xf]  ;;  %v13211_v34 = vld [vmem:[#allocation18 + $0x518] sm:$0xf0] }
 0x405   : > { %v12042_v43 = vld [vmem:[#allocation18 + $0x678] sm:$0xf] }
 0x406   : > { %6791 = vmatpush.bf16.msra.mxu1 %v11667_v37  ;;  %6726 = vmatpush.bf16.msrb.mxu0 %v11755_v22  ;;  %v11762_v37 = vld [vmem:[#allocation18 + $0x440] sm:$0xf]  ;;  %v14741_v61 = vadd.f32 %v14732_v25, %v5503_v58  ;;  %v13172_v22 = vld [vmem:[#allocation18 + $0x3e0] sm:$0xf0]  ;;  %v11875_v58 = vor.u32 %v13214_v39, %v11874_v55  ;;  %v11703_v55 = vor.u32 %v13170_v17, %v11702_v19  ;;  %v13241_v17 = vld [vmem:[#allocation18 + $0x608] sm:$0xf0] }
 0x407   : > { %6756 = vmatpush.bf16.msrb.mxu2 %v11615_v54  ;;  %6765 = vmatpush.bf16.msrb.mxu3 %v11759_v12  ;;  %v11763_v54 = vor.u32 %v13185_v29, %v11762_v37  ;;  %v11708_v12 = vld [vmem:[#allocation18 + $0x3e4] sm:$0xf0]  ;;  %v11707_v25 = vor.u32 %v13172_v22, %v11706_v0  ;;  %v13256_v37 = vld [vmem:[#allocation18 + $0x680] sm:$0xf0]  ;;  %v14748_v29 = vpack.c.bf16 %v14679_v1, %v14679_v1  ;;  %v11570_v0 = vld [vmem:[#allocation18 + $0x2c0] sm:$0xf] }
 0x408   : > { %v11711_v16 = vor.u32 %v13171_v3, %v11708_v12  ;;  %v13137_v22 = vld [vmem:[#allocation18 + $0x2c8] sm:$0xf0]  ;;  %v11714_v3 = vld [vmem:[#allocation18 + $0x3e0] sm:$0xf]  ;;  %v13208_v1 = vld [vmem:[#allocation18 + $0x500] sm:$0xf0] }
 0x409   : > { %v13173_v12 = vld [vmem:[#allocation18 + $0x3e8] sm:$0xf0]  ;;  %v11982_v19 = vld [vmem:[#allocation18 + $0x600] sm:$0xf] }
 0x40a   : > { %6792 = vmatpush.bf16.msra.mxu1 %v11655_v24  ;;  %6727 = vmatpush.bf16.msrb.mxu0 %v11743_v14  ;;  %v5491_v24 = vpop.f32.mrf.mxu0  ;;  %v13262_v14 = vld [vmem:[#allocation18 + $0x6b0] sm:$0xf0] }
 0x40b   : > { %6757 = vmatpush.bf16.msrb.mxu2 %v11603_v23  ;;  %6766 = vmatpush.bf16.msrb.mxu3 %v11747_v26  ;;  %v11751_v23 = vor.u32 %v13182_v15, %v11750_v13  ;;  %v13168_v26 = vld [vmem:[#allocation18 + $0x3c4] sm:$0xf]  ;;  %v5530_v63 = vpop.f32.mrf.mxu3  ;;  %v13253_v24 = vld [vmem:[#allocation18 + $0x668] sm:$0xf0]  ;;  %v13134_v13 = vld [vmem:[#allocation18 + $0x2b0] sm:$0xf0] }
 0x40c   : > { %v11699_v10 = vor.u32 %v13168_v26, %v11696_v27  ;;  %v4635_v15 = vperm.slane %v14689_v38, 4  ;;  %v13250_v26 = vld [vmem:[#allocation18 + $0x650] sm:$0xf0]  ;;  %v13213_v27 = vld [vmem:[#allocation18 + $0x52c] sm:$0xf] }
 0x40d   : > { %v12006_v63 = vld [vmem:[#allocation18 + $0x630] sm:$0xf] }
 0x40e   : > { %6793 = vmatpush.bf16.msra.mxu1 %v11643_v2  ;;  %6728 = vmatpush.bf16.msrb.mxu0 %v11731_v33  ;;  %v11738_v2 = vld [vmem:[#allocation18 + $0x410] sm:$0xf]  ;;  %v11595_v33 = vor.u32 %v13143_v7, %v11594_v59  ;;  %v11838_v59 = vld [vmem:[#allocation18 + $0x4e0] sm:$0xf]  ;;  %v13205_v7 = vld [vmem:[#allocation18 + $0x4e8] sm:$0xf0] }
 0x40f   : > { %6802 = vmatpush.bf16.msra.mxu2 %v11787_v60  ;;  %6767 = vmatpush.bf16.msrb.mxu3 %v11735_v49  ;;  %v12067_v60 = vor.u32 %v13262_v14, %v12066_v45  ;;  %v11739_v49 = vor.u32 %v13179_v11, %v11738_v2  ;;  %v11715_v45 = vor.u32 %v13173_v12, %v11714_v3  ;;  %v11876_v2 = vld [vmem:[#allocation18 + $0x534] sm:$0xf0]  ;;  %v13244_v12 = vld [vmem:[#allocation18 + $0x620] sm:$0xf0] }
 0x410   : > { %6758 = vmatmul.bf16.vlgmr.msrb.gmra.mxu2 %v14730_v50  ;;  %v11851_v14 = vor.u32 %v13208_v1, %v11850_v28  ;;  %v11839_v39 = vor.u32 %v13205_v7, %v11838_v59  ;;  %v11994_v3 = vld [vmem:[#allocation18 + $0x618] sm:$0xf]  ;;  %v13207_v28 = vld [vmem:[#allocation18 + $0x4fc] sm:$0xf]  ;;  %v11852_v1 = vld [vmem:[#allocation18 + $0x504] sm:$0xf0] }
 0x411   : > { %v13204_v7 = vld [vmem:[#allocation18 + $0x4e4] sm:$0xf] }
 0x412   : > { %6794 = vmatpush.bf16.msra.mxu1 %v11631_v41  ;;  %6729 = vmatpush.bf16.msrb.mxu0 %v11719_v36  ;;  %v11726_v41 = vld [vmem:[#allocation18 + $0x3f8] sm:$0xf]  ;;  %v11583_v36 = vor.u32 %v13140_v57, %v11582_v48  ;;  %v11826_v48 = vld [vmem:[#allocation18 + $0x4c8] sm:$0xf]  ;;  %v13202_v57 = vld [vmem:[#allocation18 + $0x4d0] sm:$0xf0] }
 0x413   : > { %6803 = vmatpush.bf16.msra.mxu2 %v11775_v51  ;;  %6768 = vmatpush.bf16.msrb.mxu3 %v11723_v42  ;;  %v12055_v51 = vor.u32 %v13259_v56, %v12054_v44  ;;  %v11727_v18 = vor.u32 %v13176_v53, %v11726_v41  ;;  %v11863_v42 = vor.u32 %v13211_v34, %v11862_v21  ;;  %v13247_v41 = vld [vmem:[#allocation18 + $0x638] sm:$0xf0]  ;;  %v11864_v53 = vld [vmem:[#allocation18 + $0x51c] sm:$0xf0]  ;;  %v11534_v34 = vld [vmem:[#allocation18 + $0x278] sm:$0xf] }
 0x416   : > { %6795 = vmatpush.bf16.msra.mxu1 %v11619_v47  ;;  %6730 = vmatpush.bf16.msrb.mxu0 %v11707_v25  ;;  %v14751_v47 = vpop.f32.mrf.mxu2  ;;  %v11558_v25 = vld [vmem:[#allocation18 + $0x2a8] sm:$0xf] }
 0x417   : > { %6804 = vmatpush.bf16.msra.mxu2 %v11763_v54  ;;  %6769 = vmatpush.bf16.msrb.mxu3 %v11711_v16  ;;  %v12043_v54 = vor.u32 %v13256_v37, %v12042_v43  ;;  %v12031_v16 = vor.u32 %v13253_v24, %v12030_v9  ;;  %v4636_v43 = vperm.slane %v14689_v38, 5  ;;  %v11522_v38 = vld [vmem:[#allocation18 + $0x260] sm:$0xf] }
 0x419   : > { %v5568_v9 = vadd.f32 %v14751_v47, %v4636_v43  ;;  %v11882_v47 = vld [vmem:[#allocation18 + $0x530] sm:$0xf] }
 0x41a   : > { %6796 = vmatpush.bf16.msra.mxu1 %v11607_v52  ;;  %6731 = vmatpush.bf16.msrb.mxu0 %v11695_v35  ;;  %v12018_v52 = vld [vmem:[#allocation18 + $0x648] sm:$0xf]  ;;  %v13131_v35 = vld [vmem:[#allocation18 + $0x298] sm:$0xf0]  ;;  %v14756_v11 = vpop.f32.mrf.mxu1 }
 0x41b   : > { %6805 = vmatpush.bf16.msra.mxu2 %v11751_v23  ;;  %6770 = vmatpush.bf16.msrb.mxu3 %v11699_v10  ;;  %v11559_v23 = vor.u32 %v13134_v13, %v11558_v25  ;;  %v12019_v56 = vor.u32 %v13250_v26, %v12018_v52  ;;  %v11879_v10 = vor.u32 %v13213_v27, %v11876_v2  ;;  %v11802_v25 = vld [vmem:[#allocation18 + $0x498] sm:$0xf]  ;;  %v11840_v52 = vld [vmem:[#allocation18 + $0x4ec] sm:$0xf0]  ;;  %v11510_v26 = vld [vmem:[#allocation18 + $0x248] sm:$0xf] }
 0x41c   : > { %v13122_v27 = vld [vmem:[#allocation18 + $0x250] sm:$0xf0]  ;;  %v14767_v2 = vld [vmem:[#allocation20] sm:$0x7] }
 0x41d   : > { %6797 = vmatmul.bf16.vlgmr.msra.gmra.mxu1 %v14730_v50  ;;  %6732 = vmatmul.bf16.vlgmr.msrb.gmra.mxu0 %v14748_v29  ;;  %v11571_v50 = vor.u32 %v13137_v22, %v11570_v0  ;;  %v12007_v0 = vor.u32 %v13247_v41, %v12006_v63  ;;  %v11828_v63 = vld [vmem:[#allocation18 + $0x4d4] sm:$0xf0]  ;;  %v5698_v43 = vperm.slane %v14767_v2, 0 }
 0x41e   : > { %7334 = vmatpush.bf16.msrb.mxu1 %v12067_v60  ;;  %6776 = vmatpush.bf16.msra.mxu0 %v11595_v33  ;;  %v11546_v60 = vld [vmem:[#allocation18 + $0x290] sm:$0xf]  ;;  %v5529_v33 = vadd.f32 %v14744_v5, %v4635_v15  ;;  %v5569_v44 = vpop.f32.mrf.mxu2  ;;  %v11827_v5 = vor.u32 %v13202_v57, %v11826_v48  ;;  %v11995_v15 = vor.u32 %v13244_v12, %v11994_v3  ;;  %v13234_v12 = vld [vmem:[#allocation18 + $0x5d4] sm:$0xf] }
 0x41f   : > { %6806 = vmatpush.bf16.msra.mxu2 %v11739_v49  ;;  %7308 = vmatpush.bf16.msra.mxu3 %v11875_v58  ;;  %v5541_v49 = vpop.f32.mrf.mxu0  ;;  %v11547_v58 = vor.u32 %v13131_v35, %v11546_v60  ;;  %v11970_v35 = vld [vmem:[#allocation18 + $0x5e8] sm:$0xf]  ;;  %v11790_v44 = vld [vmem:[#allocation18 + $0x480] sm:$0xf]  ;;  %v11511_v57 = vor.u32 %v13122_v27, %v11510_v26  ;;  %v11792_v27 = vld [vmem:[#allocation18 + $0x48c] sm:$0xf0] }
 0x420   : > { %6771 = vmatmul.bf16.vlgmr.msrb.gmra.mxu3 %v14748_v29  ;;  %v5542_v21 = vadd.f32 %v5541_v49, %v5529_v33  ;;  %v11843_v33 = vor.u32 %v13204_v7, %v11840_v52  ;;  %v13237_v49 = vld [vmem:[#allocation18 + $0x5ec] sm:$0xf]  ;;  %v13206_v7 = vld [vmem:[#allocation18 + $0x4f0] sm:$0xf0]  ;;  %v11934_v52 = vld [vmem:[#allocation18 + $0x5a0] sm:$0xf] }
 0x422   : > { %7335 = vmatpush.bf16.msrb.mxu1 %v12055_v51  ;;  %6777 = vmatpush.bf16.msra.mxu0 %v11583_v36  ;;  %v13210_v51 = vld [vmem:[#allocation18 + $0x514] sm:$0xf]  ;;  %v13128_v36 = vld [vmem:[#allocation18 + $0x280] sm:$0xf0]  ;;  %v14761_v37 = vadd.f32 %v14737_v62, %v5542_v21  ;;  %v6099_v62 = vpop.f32.mrf.mxu1 }
 0x423   : > { %6807 = vmatpush.bf16.msra.mxu2 %v11727_v18  ;;  %7309 = vmatpush.bf16.msra.mxu3 %v11863_v42  ;;  %v11867_v22 = vor.u32 %v13210_v51, %v11864_v53  ;;  %v11814_v18 = vld [vmem:[#allocation18 + $0x4b0] sm:$0xf]  ;;  %v13199_v42 = vld [vmem:[#allocation18 + $0x4b8] sm:$0xf0]  ;;  %v5580_v13 = vpop.f32.mrf.mxu3  ;;  %v11870_v51 = vld [vmem:[#allocation18 + $0x518] sm:$0xf] }
 0x424   : > { %v11815_v24 = vor.u32 %v13199_v42, %v11814_v18  ;;  %v13212_v53 = vld [vmem:[#allocation18 + $0x520] sm:$0xf0]  ;;  %v13198_v18 = vld [vmem:[#allocation18 + $0x4b4] sm:$0xf]  ;;  %v14772_v42 = vpack.c.bf16 %v14725_v31, %v14725_v31  ;;  %v11946_v62 = vld [vmem:[#allocation18 + $0x5b8] sm:$0xf] }
 0x425   : > { %v11871_v3 = vor.u32 %v13212_v53, %v11870_v51  ;;  %v13232_v31 = vld [vmem:[#allocation18 + $0x5c0] sm:$0xf0] }
 0x426   : > { %7336 = vmatpush.bf16.msrb.mxu1 %v12043_v54  ;;  %6778 = vmatpush.bf16.msra.mxu0 %v11571_v50  ;;  %v11535_v54 = vor.u32 %v13128_v36, %v11534_v34  ;;  %v13125_v50 = vld [vmem:[#allocation18 + $0x268] sm:$0xf0]  ;;  %v11958_v34 = vld [vmem:[#allocation18 + $0x5d0] sm:$0xf]  ;;  %v13235_v36 = vld [vmem:[#allocation18 + $0x5d8] sm:$0xf0] }
 0x427   : > { %6808 = vmatpush.bf16.msra.mxu2 %v11715_v45  ;;  %7310 = vmatpush.bf16.msra.mxu3 %v11851_v14  ;;  %v11855_v45 = vor.u32 %v13207_v28, %v11852_v1  ;;  %v13196_v14 = vld [vmem:[#allocation18 + $0x4a0] sm:$0xf0]  ;;  %v5543_v59 = vpop.f32.mrf.mxu0  ;;  %v11960_v28 = vld [vmem:[#allocation18 + $0x5dc] sm:$0xf0]  ;;  %v11959_v1 = vor.u32 %v13235_v36, %v11958_v34  ;;  %v11924_v34 = vld [vmem:[#allocation18 + $0x594] sm:$0xf0] }
 0x428   : > { %v11803_v60 = vor.u32 %v13196_v14, %v11802_v25  ;;  %v11822_v36 = vld [vmem:[#allocation18 + $0x4b8] sm:$0xf] }
 0x42a   : > { %7337 = vmatpush.bf16.msrb.mxu1 %v12031_v16  ;;  %6779 = vmatpush.bf16.msra.mxu0 %v11559_v23  ;;  %v14765_v16 = vadd.f32 %v5580_v13, %v5568_v9  ;;  %v13215_v23 = vld [vmem:[#allocation18 + $0x538] sm:$0xf0]  ;;  %v14776_v9 = vpack.c.bf16 %v14701_v6, %v14701_v6  ;;  %v11963_v13 = vor.u32 %v13234_v12, %v11960_v28 }
 0x42b   : > { %6809 = vmatpush.bf16.msra.mxu2 %v11703_v55  ;;  %7311 = vmatpush.bf16.msra.mxu3 %v11839_v39  ;;  %v13238_v55 = vld [vmem:[#allocation18 + $0x5f0] sm:$0xf0]  ;;  %v11983_v39 = vor.u32 %v13241_v17, %v11982_v19  ;;  %v11883_v48 = vor.u32 %v13215_v23, %v11882_v47  ;;  %v11804_v19 = vld [vmem:[#allocation18 + $0x4a4] sm:$0xf0]  ;;  %v13231_v6 = vld [vmem:[#allocation18 + $0x5bc] sm:$0xf] }
 0x42c   : > { %v11971_v41 = vor.u32 %v13238_v55, %v11970_v35  ;;  %v11948_v17 = vld [vmem:[#allocation18 + $0x5c4] sm:$0xf0]  ;;  %v13229_v47 = vld [vmem:[#allocation18 + $0x5a8] sm:$0xf0]  ;;  %v13228_v35 = vld [vmem:[#allocation18 + $0x5a4] sm:$0xf] }
 0x42d   : > { %v11951_v26 = vor.u32 %v13231_v6, %v11948_v17  ;;  %v11936_v55 = vld [vmem:[#allocation18 + $0x5ac] sm:$0xf0]  ;;  %v13219_v6 = vld [vmem:[#allocation18 + $0x55c] sm:$0xf] }
 0x42e   : > { %7338 = vmatpush.bf16.msrb.mxu1 %v12019_v56  ;;  %6780 = vmatpush.bf16.msra.mxu0 %v11547_v58  ;;  %v13193_v56 = vld [vmem:[#allocation18 + $0x488] sm:$0xf0]  ;;  %v11972_v58 = vld [vmem:[#allocation18 + $0x5f4] sm:$0xf0] }
 0x42f   : > { %7347 = vmatpush.bf16.msrb.mxu2 %v11879_v10  ;;  %7312 = vmatpush.bf16.msra.mxu3 %v11827_v5  ;;  %v13201_v10 = vld [vmem:[#allocation18 + $0x4cc] sm:$0xf]  ;;  %v11791_v21 = vor.u32 %v13193_v56, %v11790_v44  ;;  %v5582_v5 = vpop.f32.mrf.mxu3  ;;  %v13203_v44 = vld [vmem:[#allocation18 + $0x4d8] sm:$0xf0]  ;;  %v11978_v56 = vld [vmem:[#allocation18 + $0x5f0] sm:$0xf] }
 0x430   : > { %6810 = vmatmul.bf16.vlgmr.msra.gmra.mxu2 %v14748_v29  ;;  %v11523_v29 = vor.u32 %v13125_v50, %v11522_v38  ;;  %v11858_v38 = vld [vmem:[#allocation18 + $0x500] sm:$0xf]  ;;  %v13209_v50 = vld [vmem:[#allocation18 + $0x508] sm:$0xf0] }
 0x431   : > { %v11859_v14 = vor.u32 %v13209_v50, %v11858_v38  ;;  %v13222_v38 = vld [vmem:[#allocation18 + $0x574] sm:$0xf]  ;;  %v11912_v50 = vld [vmem:[#allocation18 + $0x57c] sm:$0xf0] }
 0x432   : > { %7339 = vmatpush.bf16.msrb.mxu1 %v12007_v0  ;;  %6781 = vmatpush.bf16.msra.mxu0 %v11535_v54  ;;  %v11831_v0 = vor.u32 %v13201_v10, %v11828_v63  ;;  %v11816_v54 = vld [vmem:[#allocation18 + $0x4bc] sm:$0xf0]  ;;  %v13239_v10 = vld [vmem:[#allocation18 + $0x5f8] sm:$0xf0] }
 0x433   : > { %7348 = vmatpush.bf16.msrb.mxu2 %v11867_v22  ;;  %7313 = vmatpush.bf16.msra.mxu3 %v11815_v24  ;;  %v11975_v22 = vor.u32 %v13237_v49, %v11972_v58  ;;  %v6098_v24 = vadd.f32 %v14756_v11, %v5698_v43  ;;  %v11819_v25 = vor.u32 %v13198_v18, %v11816_v54  ;;  %v11846_v11 = vld [vmem:[#allocation18 + $0x4e8] sm:$0xf]  ;;  %v13236_v18 = vld [vmem:[#allocation18 + $0x5e0] sm:$0xf0]  ;;  %v13223_v54 = vld [vmem:[#allocation18 + $0x578] sm:$0xf0] }
 0x434   : > { %v11939_v58 = vor.u32 %v13228_v35, %v11936_v55  ;;  %v11979_v53 = vor.u32 %v13239_v10, %v11978_v56  ;;  %v12258_v35 = vld [vmem:[#allocation18 + $0x828] sm:$0xf]  ;;  %v13310_v55 = vld [vmem:[#allocation18 + $0x830] sm:$0xf0]  ;;  %v13261_v56 = vld [vmem:[#allocation18 + $0x6ac] sm:$0xf] }
 0x435   : > { %v12068_v10 = vld [vmem:[#allocation18 + $0x6b4] sm:$0xf0] }
 0x436   : > { %7340 = vmatpush.bf16.msrb.mxu1 %v11995_v15  ;;  %6782 = vmatpush.bf16.msra.mxu0 %v11523_v29  ;;  %v13195_v15 = vld [vmem:[#allocation18 + $0x49c] sm:$0xf]  ;;  %v11947_v29 = vor.u32 %v13232_v31, %v11946_v62  ;;  %v11810_v62 = vld [vmem:[#allocation18 + $0x4a0] sm:$0xf] }
 0x437   : > { %7349 = vmatpush.bf16.msrb.mxu2 %v11855_v45  ;;  %7314 = vmatpush.bf16.msra.mxu3 %v11803_v60  ;;  %v6110_v45 = vpop.f32.mrf.mxu2  ;;  %v11807_v23 = vor.u32 %v13195_v15, %v11804_v19  ;;  %v11847_v60 = vor.u32 %v13206_v7, %v11846_v11  ;;  %v11898_v15 = vld [vmem:[#allocation18 + $0x558] sm:$0xf]  ;;  %v11915_v19 = vor.u32 %v13222_v38, %v11912_v50  ;;  %v11900_v7 = vld [vmem:[#allocation18 + $0x564] sm:$0xf0]  ;;  %v13224_v50 = vld [vmem:[#allocation18 + $0x580] sm:$0xf0] }
 0x438   : > { %v14781_v59 = vadd.f32 %v6110_v45, %v6098_v24  ;;  %v13197_v24 = vld [vmem:[#allocation18 + $0x4a8] sm:$0xf0]  ;;  %v13220_v45 = vld [vmem:[#allocation18 + $0x560] sm:$0xf0] }
 0x43a   : > { %7341 = vmatpush.bf16.msrb.mxu1 %v11983_v39  ;;  %6783 = vmatpush.bf16.msra.mxu0 %v11511_v57  ;;  %v11834_v39 = vld [vmem:[#allocation18 + $0x4d0] sm:$0xf]  ;;  %v13226_v57 = vld [vmem:[#allocation18 + $0x590] sm:$0xf0]  ;;  %v14784_v63 = vpop.f32.mrf.mxu1  ;;  %v14786_v43 = vpop.f32.mrf.mxu0 }
 0x43b   : > { %7350 = vmatpush.bf16.msrb.mxu2 %v11843_v33  ;;  %7315 = vmatpush.bf16.msra.mxu3 %v11791_v21  ;;  %v11935_v33 = vor.u32 %v13229_v47, %v11934_v52  ;;  %v11835_v51 = vor.u32 %v13203_v44, %v11834_v39  ;;  %v13225_v21 = vld [vmem:[#allocation18 + $0x58c] sm:$0xf]  ;;  %v11798_v52 = vld [vmem:[#allocation18 + $0x488] sm:$0xf]  ;;  %v13194_v47 = vld [vmem:[#allocation18 + $0x490] sm:$0xf0]  ;;  %v11903_v44 = vor.u32 %v13219_v6, %v11900_v7 }
 0x43c   : > { %v11927_v12 = vor.u32 %v13225_v21, %v11924_v34  ;;  %v11886_v39 = vld [vmem:[#allocation18 + $0x540] sm:$0xf]  ;;  %v12074_v21 = vld [vmem:[#allocation18 + $0x6b0] sm:$0xf]  ;;  %v13263_v34 = vld [vmem:[#allocation18 + $0x6b8] sm:$0xf0] }
 0x43d   : > { %7342 = vmatmul.bf16.vlgmr.msrb.gmra.mxu1 %v14772_v42  ;;  %6784 = vmatmul.bf16.vlgmr.msra.gmra.mxu0 %v14721_v8  ;;  %v13192_v8 = vld [vmem:[#allocation18 + $0x484] sm:$0xf]  ;;  %v13221_v7 = vld [vmem:[#allocation18 + $0x568] sm:$0xf0] }
 0x43e   : > { %7386 = vmatpush.bf16.msra.mxu1 %v11883_v48  ;;  %7321 = vmatpush.bf16.msrb.mxu0 %v11971_v41  ;;  %v11922_v48 = vld [vmem:[#allocation18 + $0x588] sm:$0xf]  ;;  %v11795_v49 = vor.u32 %v13192_v8, %v11792_v27  ;;  %v11899_v8 = vor.u32 %v13220_v45, %v11898_v15  ;;  %v14794_v15 = vpack.c.bf16 %v14717_v40, %v14717_v40  ;;  %v13255_v45 = vld [vmem:[#allocation18 + $0x67c] sm:$0xf]  ;;  %v13257_v40 = vld [vmem:[#allocation18 + $0x688] sm:$0xf0] }
 0x43f   : > { %7351 = vmatpush.bf16.msrb.mxu2 %v11831_v0  ;;  %7360 = vmatpush.bf16.msrb.mxu3 %v11975_v22  ;;  %v6112_v41 = vpop.f32.mrf.mxu2  ;;  %v11923_v5 = vor.u32 %v13226_v57, %v11922_v48  ;;  %v13200_v0 = vld [vmem:[#allocation18 + $0x4c0] sm:$0xf0]  ;;  %v11966_v22 = vld [vmem:[#allocation18 + $0x5d8] sm:$0xf]  ;;  %v11942_v27 = vld [vmem:[#allocation18 + $0x5a8] sm:$0xf]  ;;  %v11799_v48 = vor.u32 %v13194_v47, %v11798_v52 }
 0x440   : > { %7316 = vmatmul.bf16.vlgmr.msra.gmra.mxu3 %v14776_v9  ;;  %v11823_v28 = vor.u32 %v13200_v0, %v11822_v36  ;;  %v12259_v41 = vor.u32 %v13310_v55, %v12258_v35  ;;  %v12071_v36 = vor.u32 %v13261_v56, %v12068_v10  ;;  %v13307_v0 = vld [vmem:[#allocation18 + $0x818] sm:$0xf0]  ;;  %v12050_v52 = vld [vmem:[#allocation18 + $0x680] sm:$0xf]  ;;  %v11894_v55 = vld [vmem:[#allocation18 + $0x548] sm:$0xf] }
 0x441   : > { %v12222_v47 = vld [vmem:[#allocation18 + $0x7e0] sm:$0xf]  ;;  %v12051_v35 = vor.u32 %v13257_v40, %v12050_v52  ;;  %v13254_v56 = vld [vmem:[#allocation18 + $0x670] sm:$0xf0]  ;;  %v12210_v10 = vld [vmem:[#allocation18 + $0x7c8] sm:$0xf] }
 0x442   : > { %7387 = vmatpush.bf16.msra.mxu1 %v11871_v3  ;;  %7322 = vmatpush.bf16.msrb.mxu0 %v11959_v1  ;;  %v11910_v3 = vld [vmem:[#allocation18 + $0x570] sm:$0xf]  ;;  %v11967_v1 = vor.u32 %v13236_v18, %v11966_v22  ;;  %v13258_v18 = vld [vmem:[#allocation18 + $0x694] sm:$0xf]  ;;  %v13328_v52 = vld [vmem:[#allocation18 + $0x8c0] sm:$0xf0] }
 0x443   : > { %7352 = vmatpush.bf16.msrb.mxu2 %v11819_v25  ;;  %7361 = vmatpush.bf16.msrb.mxu3 %v11963_v13  ;;  %v11911_v31 = vor.u32 %v13223_v54, %v11910_v3  ;;  %v11954_v25 = vld [vmem:[#allocation18 + $0x5c0] sm:$0xf]  ;;  %v13233_v13 = vld [vmem:[#allocation18 + $0x5c8] sm:$0xf0]  ;;  %v6123_v17 = vpop.f32.mrf.mxu3  ;;  %v13243_v40 = vld [vmem:[#allocation18 + $0x61c] sm:$0xf] }
 0x444   : > { %v11955_v11 = vor.u32 %v13233_v13, %v11954_v25  ;;  %v12056_v3 = vld [vmem:[#allocation18 + $0x69c] sm:$0xf0]  ;;  %v12234_v25 = vld [vmem:[#allocation18 + $0x7f8] sm:$0xf]  ;;  %v13304_v13 = vld [vmem:[#allocation18 + $0x800] sm:$0xf0] }
 0x446   : > { %7388 = vmatpush.bf16.msra.mxu1 %v11859_v14  ;;  %7323 = vmatpush.bf16.msrb.mxu0 %v11947_v29  ;;  %v6151_v14 = vpop.f32.mrf.mxu1  ;;  %v11811_v29 = vor.u32 %v13197_v24, %v11810_v62  ;;  %v12062_v62 = vld [vmem:[#allocation18 + $0x698] sm:$0xf]  ;;  %v12059_v24 = vor.u32 %v13258_v18, %v12056_v3  ;;  %v13251_v18 = vld [vmem:[#allocation18 + $0x658] sm:$0xf0]  ;;  %v12198_v3 = vld [vmem:[#allocation18 + $0x7b0] sm:$0xf] }
 0x447   : > { %7353 = vmatpush.bf16.msrb.mxu2 %v11807_v23  ;;  %7362 = vmatpush.bf16.msrb.mxu3 %v11951_v26  ;;  %v14790_v23 = vadd.f32 %v6123_v17, %v14781_v59  ;;  %v5595_v26 = vpop.f32.mrf.mxu0  ;;  %v11888_v59 = vld [vmem:[#allocation18 + $0x54c] sm:$0xf0]  ;;  %v12044_v14 = vld [vmem:[#allocation18 + $0x684] sm:$0xf0]  ;;  %v11906_v17 = vld [vmem:[#allocation18 + $0x560] sm:$0xf] }
 0x448   : > { %v13301_v26 = vld [vmem:[#allocation18 + $0x7e8] sm:$0xf0] }
 0x44a   : > { %7389 = vmatpush.bf16.msra.mxu1 %v11847_v60  ;;  %7324 = vmatpush.bf16.msrb.mxu0 %v11935_v33  ;;  %v13230_v60 = vld [vmem:[#allocation18 + $0x5b0] sm:$0xf0]  ;;  %v13217_v33 = vld [vmem:[#allocation18 + $0x548] sm:$0xf0] }
 0x44b   : > { %7354 = vmatpush.bf16.msrb.mxu2 %v11795_v49  ;;  %7363 = vmatpush.bf16.msrb.mxu3 %v11939_v58  ;;  %v11943_v57 = vor.u32 %v13230_v60, %v11942_v27  ;;  %v13216_v49 = vld [vmem:[#allocation18 + $0x544] sm:$0xf]  ;;  %v11930_v58 = vld [vmem:[#allocation18 + $0x590] sm:$0xf]  ;;  %v6125_v54 = vpop.f32.mrf.mxu3  ;;  %v11907_v60 = vor.u32 %v13221_v7, %v11906_v17  ;;  %v12330_v7 = vld [vmem:[#allocation18 + $0x8b8] sm:$0xf] }
 0x44c   : > { %v11891_v22 = vor.u32 %v13216_v49, %v11888_v59  ;;  %v12032_v27 = vld [vmem:[#allocation18 + $0x66c] sm:$0xf0]  ;;  %v12354_v49 = vld [vmem:[#allocation18 + $0x8e8] sm:$0xf]  ;;  %v13334_v59 = vld [vmem:[#allocation18 + $0x8f0] sm:$0xf0] }
 0x44e   : > { %7390 = vmatpush.bf16.msra.mxu1 %v11835_v51  ;;  %7325 = vmatpush.bf16.msrb.mxu0 %v11923_v5  ;;  %v11887_v51 = vor.u32 %v13217_v33, %v11886_v39  ;;  %v12246_v5 = vld [vmem:[#allocation18 + $0x810] sm:$0xf]  ;;  %v13218_v39 = vld [vmem:[#allocation18 + $0x550] sm:$0xf0]  ;;  %v12223_v33 = vor.u32 %v13301_v26, %v12222_v47 }
 0x44f   : > { %7399 = vmatpush.bf16.msra.mxu2 %v11979_v53  ;;  %7364 = vmatpush.bf16.msrb.mxu3 %v11927_v12  ;;  %v13227_v53 = vld [vmem:[#allocation18 + $0x598] sm:$0xf0]  ;;  %v12247_v38 = vor.u32 %v13307_v0, %v12246_v5  ;;  %v12355_v0 = vor.u32 %v13334_v59, %v12354_v49  ;;  %v11984_v49 = vld [vmem:[#allocation18 + $0x60c] sm:$0xf0] }
 0x450   : > { %7355 = vmatmul.bf16.vlgmr.msrb.gmra.mxu2 %v14776_v9  ;;  %v11931_v12 = vor.u32 %v13227_v53, %v11930_v58  ;;  %v5699_v58 = vperm.slane %v14767_v2, 1 }
 0x452   : > { %7391 = vmatpush.bf16.msra.mxu1 %v11823_v28  ;;  %7326 = vmatpush.bf16.msrb.mxu0 %v11911_v31  ;;  %v12075_v28 = vor.u32 %v13263_v34, %v12074_v21  ;;  %v13260_v31 = vld [vmem:[#allocation18 + $0x6a0] sm:$0xf0]  ;;  %v11895_v21 = vor.u32 %v13218_v39, %v11894_v55  ;;  %v13245_v55 = vld [vmem:[#allocation18 + $0x628] sm:$0xf0]  ;;  %v12174_v39 = vld [vmem:[#allocation18 + $0x780] sm:$0xf] }
 0x453   : > { %7400 = vmatpush.bf16.msra.mxu2 %v11967_v1  ;;  %7365 = vmatpush.bf16.msrb.mxu3 %v11915_v19  ;;  %v11918_v1 = vld [vmem:[#allocation18 + $0x578] sm:$0xf]  ;;  %v12063_v6 = vor.u32 %v13260_v31, %v12062_v62  ;;  %v13246_v62 = vld [vmem:[#allocation18 + $0x634] sm:$0xf]  ;;  %v12008_v31 = vld [vmem:[#allocation18 + $0x63c] sm:$0xf0] }
 0x454   : > { %v11919_v19 = vor.u32 %v13224_v50, %v11918_v1  ;;  %v12342_v1 = vld [vmem:[#allocation18 + $0x8d0] sm:$0xf]  ;;  %v12011_v17 = vor.u32 %v13246_v62, %v12008_v31  ;;  %v13283_v62 = vld [vmem:[#allocation18 + $0x758] sm:$0xf0] }
 0x456   : > { %7392 = vmatpush.bf16.msra.mxu1 %v11811_v29  ;;  %7327 = vmatpush.bf16.msrb.mxu0 %v11899_v8  ;;  %v14797_v29 = vpop.f32.mrf.mxu2  ;;  %v13252_v8 = vld [vmem:[#allocation18 + $0x664] sm:$0xf] }
 0x457   : > { %7401 = vmatpush.bf16.msra.mxu2 %v11955_v11  ;;  %7366 = vmatpush.bf16.msrb.mxu3 %v11903_v44  ;;  %v12235_v11 = vor.u32 %v13304_v13, %v12234_v25  ;;  %v12038_v44 = vld [vmem:[#allocation18 + $0x668] sm:$0xf] }
 0x458   : > { %v12039_v34 = vor.u32 %v13254_v56, %v12038_v44  ;;  %v12318_v56 = vld [vmem:[#allocation18 + $0x8a0] sm:$0xf] }
 0x45a   : > { %7393 = vmatpush.bf16.msra.mxu1 %v11799_v48  ;;  %7328 = vmatpush.bf16.msrb.mxu0 %v11887_v51  ;;  %v12035_v48 = vor.u32 %v13252_v8, %v12032_v27  ;;  %v12020_v51 = vld [vmem:[#allocation18 + $0x654] sm:$0xf0]  ;;  %v14802_v53 = vpop.f32.mrf.mxu1  ;;  %v6136_v54 = vpop.f32.mrf.mxu0  ;;  %v12002_v8 = vld [vmem:[#allocation18 + $0x620] sm:$0xf] }
 0x45b   : > { %7402 = vmatpush.bf16.msra.mxu2 %v11943_v57  ;;  %7367 = vmatpush.bf16.msrb.mxu3 %v11891_v22  ;;  %v13298_v57 = vld [vmem:[#allocation18 + $0x7d0] sm:$0xf0]  ;;  %v12026_v22 = vld [vmem:[#allocation18 + $0x650] sm:$0xf]  ;;  %v6137_v50 = vadd.f32 %v6136_v54, %v5699_v58  ;;  %v12003_v59 = vor.u32 %v13245_v55, %v12002_v8  ;;  %v12162_v58 = vld [vmem:[#allocation18 + $0x768] sm:$0xf] }
 0x45c   : > { %v12211_v5 = vor.u32 %v13298_v57, %v12210_v10  ;;  %v13325_v10 = vld [vmem:[#allocation18 + $0x8a8] sm:$0xf0]  ;;  %v13240_v57 = vld [vmem:[#allocation18 + $0x604] sm:$0xf]  ;;  %v12164_v54 = vld [vmem:[#allocation18 + $0x774] sm:$0xf0] }
 0x45d   : > { %7394 = vmatmul.bf16.vlgmr.msra.gmra.mxu1 %v14776_v9  ;;  %7329 = vmatmul.bf16.vlgmr.msrb.gmra.mxu0 %v14794_v15  ;;  %v12047_v9 = vor.u32 %v13255_v45, %v12044_v14  ;;  %v6150_v25 = vadd.f32 %v14784_v63, %v6137_v50  ;;  %v12014_v14 = vld [vmem:[#allocation18 + $0x638] sm:$0xf]  ;;  %v12150_v50 = vld [vmem:[#allocation18 + $0x750] sm:$0xf]  ;;  %v13279_v55 = vld [vmem:[#allocation18 + $0x73c] sm:$0xf] }
 0x45e   : > { %7931 = vmatpush.bf16.msrb.mxu1 %v12259_v41  ;;  %7373 = vmatpush.bf16.msra.mxu0 %v12071_v36  ;;  %v13249_v41 = vld [vmem:[#allocation18 + $0x64c] sm:$0xf]  ;;  %v6164_v36 = vpop.f32.mrf.mxu2 }
 0x45f   : > { %7403 = vmatpush.bf16.msra.mxu2 %v11931_v12  ;;  %7412 = vmatpush.bf16.msra.mxu3 %v12075_v28  ;;  %v12023_v12 = vor.u32 %v13249_v41, %v12020_v51  ;;  %v13295_v28 = vld [vmem:[#allocation18 + $0x7b8] sm:$0xf0]  ;;  %v14807_v47 = vadd.f32 %v14797_v29, %v6150_v25  ;;  %v13333_v29 = vld [vmem:[#allocation18 + $0x8ec] sm:$0xf]  ;;  %v13286_v41 = vld [vmem:[#allocation18 + $0x770] sm:$0xf0] }
 0x460   : > { %7368 = vmatmul.bf16.vlgmr.msrb.gmra.mxu3 %v14794_v15  ;;  %v12199_v13 = vor.u32 %v13295_v28, %v12198_v3  ;;  %v13242_v36 = vld [vmem:[#allocation18 + $0x610] sm:$0xf0]  ;;  %v13285_v3 = vld [vmem:[#allocation18 + $0x76c] sm:$0xf] }
 0x461   : > { %v13330_v28 = vld [vmem:[#allocation18 + $0x8d4] sm:$0xf]  ;;  %v12167_v25 = vor.u32 %v13285_v3, %v12164_v54 }
 0x462   : > { %7932 = vmatpush.bf16.msrb.mxu1 %v12247_v38  ;;  %7374 = vmatpush.bf16.msra.mxu0 %v12059_v24  ;;  %v13331_v38 = vld [vmem:[#allocation18 + $0x8d8] sm:$0xf0]  ;;  %v12027_v24 = vor.u32 %v13251_v18, %v12026_v22  ;;  %v6203_v63 = vpop.f32.mrf.mxu1  ;;  %v6138_v44 = vpop.f32.mrf.mxu0  ;;  %v11987_v22 = vor.u32 %v13240_v57, %v11984_v49  ;;  %v13322_v18 = vld [vmem:[#allocation18 + $0x890] sm:$0xf0]  ;;  %v12270_v49 = vld [vmem:[#allocation18 + $0x840] sm:$0xf] }
 0x463   : > { %7404 = vmatpush.bf16.msra.mxu2 %v11919_v19  ;;  %7413 = vmatpush.bf16.msra.mxu3 %v12063_v6  ;;  %v12343_v45 = vor.u32 %v13331_v38, %v12342_v1  ;;  %v13248_v19 = vld [vmem:[#allocation18 + $0x640] sm:$0xf0]  ;;  %v12186_v6 = vld [vmem:[#allocation18 + $0x798] sm:$0xf]  ;;  %v14809_v27 = vpop.f32.mrf.mxu3  ;;  %v12344_v1 = vld [vmem:[#allocation18 + $0x8dc] sm:$0xf0] }
 0x464   : > { %v12015_v26 = vor.u32 %v13248_v19, %v12014_v14  ;;  %v12347_v14 = vor.u32 %v13330_v28, %v12344_v1  ;;  %v13319_v19 = vld [vmem:[#allocation18 + $0x878] sm:$0xf0]  ;;  %v13324_v44 = vld [vmem:[#allocation18 + $0x8a4] sm:$0xf] }
 0x466   : > { %7933 = vmatpush.bf16.msrb.mxu1 %v12235_v11  ;;  %7375 = vmatpush.bf16.msra.mxu0 %v12047_v9  ;;  %v13292_v11 = vld [vmem:[#allocation18 + $0x7a0] sm:$0xf0]  ;;  %v11996_v9 = vld [vmem:[#allocation18 + $0x624] sm:$0xf0] }
 0x467   : > { %7405 = vmatpush.bf16.msra.mxu2 %v11907_v60  ;;  %7414 = vmatpush.bf16.msra.mxu3 %v12051_v35  ;;  %v12187_v60 = vor.u32 %v13292_v11, %v12186_v6  ;;  %v12331_v35 = vor.u32 %v13328_v52, %v12330_v7  ;;  %v13282_v6 = vld [vmem:[#allocation18 + $0x754] sm:$0xf]  ;;  %v12151_v11 = vor.u32 %v13283_v62, %v12150_v50  ;;  %v13327_v7 = vld [vmem:[#allocation18 + $0x8bc] sm:$0xf]  ;;  %v12332_v52 = vld [vmem:[#allocation18 + $0x8c4] sm:$0xf0] }
 0x468   : > { %v13273_v50 = vld [vmem:[#allocation18 + $0x70c] sm:$0xf]  ;;  %v12116_v62 = vld [vmem:[#allocation18 + $0x714] sm:$0xf0] }
 0x46a   : > { %7934 = vmatpush.bf16.msrb.mxu1 %v12223_v33  ;;  %7376 = vmatpush.bf16.msra.mxu0 %v12035_v48  ;;  %v13289_v33 = vld [vmem:[#allocation18 + $0x788] sm:$0xf0]  ;;  %v12356_v48 = vld [vmem:[#allocation18 + $0x8f4] sm:$0xf0] }
 0x46b   : > { %7406 = vmatpush.bf16.msra.mxu2 %v11895_v21  ;;  %7415 = vmatpush.bf16.msra.mxu3 %v12039_v34  ;;  %v12175_v51 = vor.u32 %v13289_v33, %v12174_v39  ;;  %v12319_v21 = vor.u32 %v13325_v10, %v12318_v56  ;;  %v11990_v34 = vld [vmem:[#allocation18 + $0x608] sm:$0xf]  ;;  %v6177_v31 = vpop.f32.mrf.mxu3  ;;  %v12126_v56 = vld [vmem:[#allocation18 + $0x720] sm:$0xf]  ;;  %v13277_v10 = vld [vmem:[#allocation18 + $0x728] sm:$0xf0] }
 0x46c   : > { %v11991_v38 = vor.u32 %v13242_v36, %v11990_v34  ;;  %v12140_v39 = vld [vmem:[#allocation18 + $0x744] sm:$0xf0]  ;;  %v12308_v34 = vld [vmem:[#allocation18 + $0x894] sm:$0xf0]  ;;  %v12170_v36 = vld [vmem:[#allocation18 + $0x770] sm:$0xf] }
 0x46d   : > { %v12143_v57 = vor.u32 %v13279_v55, %v12140_v39  ;;  %v13318_v31 = vld [vmem:[#allocation18 + $0x874] sm:$0xf]  ;;  %v12090_v55 = vld [vmem:[#allocation18 + $0x6d8] sm:$0xf]  ;;  %v13268_v39 = vld [vmem:[#allocation18 + $0x6e0] sm:$0xf0] }
 0x46e   : > { %7935 = vmatpush.bf16.msrb.mxu1 %v12211_v5  ;;  %7377 = vmatpush.bf16.msra.mxu0 %v12023_v12  ;;  %v12306_v5 = vld [vmem:[#allocation18 + $0x888] sm:$0xf]  ;;  %v12163_v12 = vor.u32 %v13286_v41, %v12162_v58  ;;  %v13276_v41 = vld [vmem:[#allocation18 + $0x724] sm:$0xf] }
 0x46f   : > { %7944 = vmatpush.bf16.msrb.mxu2 %v12355_v0  ;;  %7416 = vmatpush.bf16.msra.mxu3 %v12027_v24  ;;  %v12359_v0 = vor.u32 %v13333_v29, %v12356_v48  ;;  %v12307_v24 = vor.u32 %v13322_v18, %v12306_v5  ;;  %v5700_v29 = vperm.slane %v14767_v2, 2  ;;  %v13287_v5 = vld [vmem:[#allocation18 + $0x778] sm:$0xf0]  ;;  %v5594_v2 = vadd.f32 %v14786_v43, %v14765_v16  ;;  %v12158_v16 = vld [vmem:[#allocation18 + $0x758] sm:$0xf] }
 0x470   : > { %7407 = vmatmul.bf16.vlgmr.msra.gmra.mxu2 %v14794_v15  ;;  %v11999_v15 = vor.u32 %v13243_v40, %v11996_v9  ;;  %v12138_v40 = vld [vmem:[#allocation18 + $0x738] sm:$0xf]  ;;  %v13280_v9 = vld [vmem:[#allocation18 + $0x740] sm:$0xf0] }
 0x471   : > { %v12139_v33 = vor.u32 %v13280_v9, %v12138_v40  ;;  %v13284_v43 = vld [vmem:[#allocation18 + $0x760] sm:$0xf0]  ;;  %v13270_v40 = vld [vmem:[#allocation18 + $0x6f4] sm:$0xf]  ;;  %v12104_v9 = vld [vmem:[#allocation18 + $0x6fc] sm:$0xf0] }
 0x472   : > { %7936 = vmatpush.bf16.msrb.mxu1 %v12199_v13  ;;  %7378 = vmatpush.bf16.msra.mxu0 %v12011_v17  ;;  %v12294_v13 = vld [vmem:[#allocation18 + $0x870] sm:$0xf]  ;;  %v12152_v17 = vld [vmem:[#allocation18 + $0x75c] sm:$0xf0] }
 0x473   : > { %7945 = vmatpush.bf16.msrb.mxu2 %v12343_v45  ;;  %7417 = vmatpush.bf16.msra.mxu3 %v12015_v26  ;;  %v14813_v45 = vpack.c.bf16 %v14761_v37, %v14761_v37  ;;  %v12295_v63 = vor.u32 %v13319_v19, %v12294_v13  ;;  %v12155_v37 = vor.u32 %v13282_v6, %v12152_v17  ;;  %v12282_v26 = vld [vmem:[#allocation18 + $0x858] sm:$0xf]  ;;  %v14816_v8 = vpop.f32.mrf.mxu2  ;;  %v12296_v13 = vld [vmem:[#allocation18 + $0x87c] sm:$0xf0]  ;;  %v12102_v19 = vld [vmem:[#allocation18 + $0x6f0] sm:$0xf] }
 0x474   : > { %v13271_v6 = vld [vmem:[#allocation18 + $0x6f8] sm:$0xf0]  ;;  %v14826_v17 = vpack.c.bf16 %v5594_v2, %v5594_v2  ;;  %v13264_v2 = vld [vmem:[#allocation18 + $0x6c4] sm:$0xf] }
 0x476   : > { %7937 = vmatpush.bf16.msrb.mxu1 %v12187_v60  ;;  %7379 = vmatpush.bf16.msra.mxu0 %v11999_v15  ;;  %v12335_v60 = vor.u32 %v13327_v7, %v12332_v52  ;;  %v12320_v15 = vld [vmem:[#allocation18 + $0x8ac] sm:$0xf0]  ;;  %v12299_v7 = vor.u32 %v13318_v31, %v12296_v13  ;;  %v12159_v52 = vor.u32 %v13284_v43, %v12158_v16  ;;  %v13306_v31 = vld [vmem:[#allocation18 + $0x814] sm:$0xf]  ;;  %v13342_v43 = vld [vmem:[#allocation24 + $0x30] sm:$0xff] }
 0x477   : > { %7946 = vmatpush.bf16.msrb.mxu2 %v12331_v35  ;;  %7418 = vmatpush.bf16.msra.mxu3 %v12003_v59  ;;  %v13316_v35 = vld [vmem:[#allocation18 + $0x860] sm:$0xf0]  ;;  %v13313_v59 = vld [vmem:[#allocation18 + $0x848] sm:$0xf0]  ;;  %v12323_v58 = vor.u32 %v13324_v44, %v12320_v15 }
 0x478   : > { %v12283_v48 = vor.u32 %v13316_v35, %v12282_v26  ;;  %v12271_v3 = vor.u32 %v13313_v59, %v12270_v49  ;;  %v12284_v26 = vld [vmem:[#allocation18 + $0x864] sm:$0xf0]  ;;  %v13281_v35 = vld [vmem:[#allocation18 + $0x748] sm:$0xf0]  ;;  %v12091_v49 = vor.u32 %v13268_v39, %v12090_v55  ;;  %v12272_v59 = vld [vmem:[#allocation18 + $0x84c] sm:$0xf0] }
 0x479   : > { %v13269_v55 = vld [vmem:[#allocation18 + $0x6e8] sm:$0xf0]  ;;  %v12242_v39 = vld [vmem:[#allocation18 + $0x800] sm:$0xf] }
 0x47a   : > { %7938 = vmatpush.bf16.msrb.mxu1 %v12175_v51  ;;  %7380 = vmatpush.bf16.msra.mxu0 %v11987_v22  ;;  %v12128_v51 = vld [vmem:[#allocation18 + $0x72c] sm:$0xf0]  ;;  %v13274_v22 = vld [vmem:[#allocation18 + $0x710] sm:$0xf0]  ;;  %v14823_v18 = vpop.f32.mrf.mxu1 }
 0x47b   : > { %7947 = vmatpush.bf16.msrb.mxu2 %v12319_v21  ;;  %7419 = vmatpush.bf16.msra.mxu3 %v11991_v38  ;;  %v13321_v21 = vld [vmem:[#allocation18 + $0x88c] sm:$0xf]  ;;  %v12131_v54 = vor.u32 %v13276_v41, %v12128_v51  ;;  %v6709_v28 = vpop.f32.mrf.mxu2  ;;  %v12171_v38 = vor.u32 %v13287_v5, %v12170_v36  ;;  %v13278_v41 = vld [vmem:[#allocation18 + $0x730] sm:$0xf0]  ;;  %v12078_v51 = vld [vmem:[#allocation18 + $0x6c0] sm:$0xf] }
 0x47c   : > { %v12311_v1 = vor.u32 %v13321_v21, %v12308_v34  ;;  %v13265_v21 = vld [vmem:[#allocation18 + $0x6c8] sm:$0xf0]  ;;  %v12260_v5 = vld [vmem:[#allocation18 + $0x834] sm:$0xf0]  ;;  %v13275_v28 = vld [vmem:[#allocation18 + $0x718] sm:$0xf0] }
 0x47d   : > { %7939 = vmatmul.bf16.vlgmr.msrb.gmra.mxu1 %v14813_v45  ;;  %7381 = vmatmul.bf16.vlgmr.msra.gmra.mxu0 %v14772_v42  ;;  %v13343_v34 = vld [vmem:[#allocation24 + $0x38] sm:$0xff] }
 0x47e   : > { %7983 = vmatpush.bf16.msra.mxu1 %v12359_v0  ;;  %7918 = vmatpush.bf16.msrb.mxu0 %v12163_v12  ;;  %v12114_v0 = vld [vmem:[#allocation18 + $0x708] sm:$0xf]  ;;  %v6176_v12 = vadd.f32 %v14809_v27, %v5700_v29  ;;  %v12119_v27 = vor.u32 %v13273_v50, %v12116_v62  ;;  %v13309_v36 = vld [vmem:[#allocation18 + $0x82c] sm:$0xf] }
 0x47f   : > { %7948 = vmatpush.bf16.msrb.mxu2 %v12307_v24  ;;  %7957 = vmatpush.bf16.msrb.mxu3 %v12167_v25  ;;  %v6188_v24 = vpop.f32.mrf.mxu0  ;;  %v12115_v25 = vor.u32 %v13274_v22, %v12114_v0  ;;  %v12092_v29 = vld [vmem:[#allocation18 + $0x6e4] sm:$0xf0]  ;;  %v12263_v50 = vor.u32 %v13309_v36, %v12260_v5 }
 0x480   : > { %7420 = vmatmul.bf16.vlgmr.msra.gmra.mxu3 %v14772_v42  ;;  %v12127_v42 = vor.u32 %v13277_v10, %v12126_v56  ;;  %v13267_v10 = vld [vmem:[#allocation18 + $0x6dc] sm:$0xf]  ;;  %v13339_v36 = vld [vmem:[#allocation24 + $0x18] sm:$0xff] }
 0x482   : > { %7984 = vmatpush.bf16.msra.mxu1 %v12347_v14  ;;  %7919 = vmatpush.bf16.msrb.mxu0 %v12151_v11  ;;  %v6189_v14 = vadd.f32 %v6188_v24, %v6176_v12  ;;  %v12079_v12 = vor.u32 %v13265_v21, %v12078_v51  ;;  %v12248_v24 = vld [vmem:[#allocation18 + $0x81c] sm:$0xf0]  ;;  %v12212_v51 = vld [vmem:[#allocation18 + $0x7d4] sm:$0xf0] }
 0x483   : > { %7949 = vmatpush.bf16.msrb.mxu2 %v12295_v63  ;;  %7958 = vmatpush.bf16.msrb.mxu3 %v12155_v37  ;;  %v13315_v63 = vld [vmem:[#allocation18 + $0x85c] sm:$0xf]  ;;  %v12103_v37 = vor.u32 %v13271_v6, %v12102_v19  ;;  %v14832_v44 = vpop.f32.mrf.mxu3  ;;  %v13272_v19 = vld [vmem:[#allocation18 + $0x700] sm:$0xf0]  ;;  %v12254_v6 = vld [vmem:[#allocation18 + $0x818] sm:$0xf] }
 0x484   : > { %v14829_v11 = vadd.f32 %v14802_v53, %v6189_v14  ;;  %v12107_v53 = vor.u32 %v13270_v40, %v12104_v9  ;;  %v12287_v15 = vor.u32 %v13315_v63, %v12284_v26  ;;  %v12110_v14 = vld [vmem:[#allocation18 + $0x6f8] sm:$0xf]  ;;  %v13303_v40 = vld [vmem:[#allocation18 + $0x7fc] sm:$0xf]  ;;  %v12236_v9 = vld [vmem:[#allocation18 + $0x804] sm:$0xf0] }
 0x485   : > { %v12111_v63 = vor.u32 %v13272_v19, %v12110_v14  ;;  %v13341_v26 = vld [vmem:[#allocation24 + $0x28] sm:$0xff] }
 0x486   : > { %7985 = vmatpush.bf16.msra.mxu1 %v12335_v60  ;;  %7920 = vmatpush.bf16.msrb.mxu0 %v12139_v33  ;;  %v12146_v60 = vld [vmem:[#allocation18 + $0x740] sm:$0xf]  ;;  %v6748_v33 = vpop.f32.mrf.mxu1 }
 0x487   : > { %7950 = vmatpush.bf16.msrb.mxu2 %v12283_v48  ;;  %7959 = vmatpush.bf16.msrb.mxu3 %v12143_v57  ;;  %v12147_v56 = vor.u32 %v13281_v35, %v12146_v60  ;;  %v13312_v48 = vld [vmem:[#allocation18 + $0x844] sm:$0xf]  ;;  %v6190_v57 = vpop.f32.mrf.mxu0  ;;  %v12098_v60 = vld [vmem:[#allocation18 + $0x6e0] sm:$0xf]  ;;  %v12239_v33 = vor.u32 %v13303_v40, %v12236_v9  ;;  %v13293_v9 = vld [vmem:[#allocation18 + $0x7a8] sm:$0xf0] }
 0x488   : > { %v12275_v0 = vor.u32 %v13312_v48, %v12272_v59  ;;  %v12086_v48 = vld [vmem:[#allocation18 + $0x6c8] sm:$0xf]  ;;  %v13266_v57 = vld [vmem:[#allocation18 + $0x6d0] sm:$0xf0]  ;;  %v12194_v40 = vld [vmem:[#allocation18 + $0x7a0] sm:$0xf] }
 0x489   : > { %v13302_v59 = vld [vmem:[#allocation18 + $0x7f0] sm:$0xf0] }
 0x48a   : > { %7986 = vmatpush.bf16.msra.mxu1 %v12323_v58  ;;  %7921 = vmatpush.bf16.msrb.mxu0 %v12127_v42  ;;  %v12134_v58 = vld [vmem:[#allocation18 + $0x728] sm:$0xf]  ;;  %v12095_v42 = vor.u32 %v13267_v10, %v12092_v29  ;;  %v13340_v29 = vld [vmem:[#allocation24 + $0x20] sm:$0xff] }
 0x48b   : > { %7951 = vmatpush.bf16.msrb.mxu2 %v12271_v3  ;;  %7960 = vmatpush.bf16.msrb.mxu3 %v12131_v54  ;;  %v12135_v22 = vor.u32 %v13278_v41, %v12134_v58  ;;  %v12080_v3 = vld [vmem:[#allocation18 + $0x6cc] sm:$0xf0]  ;;  %v13297_v41 = vld [vmem:[#allocation18 + $0x7cc] sm:$0xf] }
 0x48c   : > { %v12122_v54 = vld [vmem:[#allocation18 + $0x710] sm:$0xf]  ;;  %v12083_v62 = vor.u32 %v13264_v2, %v12080_v3  ;;  %v13299_v2 = vld [vmem:[#allocation18 + $0x7d8] sm:$0xf0] }
 0x48d   : > { %v12123_v13 = vor.u32 %v13275_v28, %v12122_v54  ;;  %v12215_v54 = vor.u32 %v13297_v41, %v12212_v51  ;;  %v13294_v28 = vld [vmem:[#allocation18 + $0x7b4] sm:$0xf]  ;;  %v13359_v41 = vld [vmem:[#allocation24 + $0xb8] sm:$0xff] }
 0x48e   : > { %7987 = vmatpush.bf16.msra.mxu1 %v12311_v1  ;;  %7922 = vmatpush.bf16.msrb.mxu0 %v12115_v25  ;;  %v12266_v1 = vld [vmem:[#allocation18 + $0x830] sm:$0xf]  ;;  %v6722_v25 = vpop.f32.mrf.mxu3 }
 0x48f   : > { %7996 = vmatpush.bf16.msra.mxu2 %v12171_v38  ;;  %7961 = vmatpush.bf16.msrb.mxu3 %v12119_v27  ;;  %v13311_v38 = vld [vmem:[#allocation18 + $0x838] sm:$0xf0]  ;;  %v13308_v27 = vld [vmem:[#allocation18 + $0x820] sm:$0xf0] }
 0x490   : > { %7952 = vmatmul.bf16.vlgmr.msrb.gmra.mxu2 %v14826_v17  ;;  %v12267_v16 = vor.u32 %v13311_v38, %v12266_v1  ;;  %v12200_v1 = vld [vmem:[#allocation18 + $0x7bc] sm:$0xf0] }
 0x492   : > { %7988 = vmatpush.bf16.msra.mxu1 %v12299_v7  ;;  %7923 = vmatpush.bf16.msrb.mxu0 %v12103_v37  ;;  %v12251_v7 = vor.u32 %v13306_v31, %v12248_v24  ;;  %v12255_v37 = vor.u32 %v13308_v27, %v12254_v6  ;;  %v12206_v31 = vld [vmem:[#allocation18 + $0x7b8] sm:$0xf]  ;;  %v13296_v24 = vld [vmem:[#allocation18 + $0x7c0] sm:$0xf0] }
 0x493   : > { %7997 = vmatpush.bf16.msra.mxu2 %v12159_v52  ;;  %7962 = vmatpush.bf16.msrb.mxu3 %v12107_v53  ;;  %v14836_v52 = vpack.c.bf16 %v14741_v61, %v14741_v61  ;;  %v14839_v35 = vpop.f32.mrf.mxu2  ;;  %v13305_v61 = vld [vmem:[#allocation18 + $0x808] sm:$0xf0]  ;;  %v13300_v53 = vld [vmem:[#allocation18 + $0x7e4] sm:$0xf]  ;;  %v12207_v19 = vor.u32 %v13296_v24, %v12206_v31  ;;  %v13337_v6 = vld [vmem:[#allocation24 + $0x8] sm:$0xff] }
 0x494   : > { %v12243_v10 = vor.u32 %v13305_v61, %v12242_v39  ;;  %v12195_v39 = vor.u32 %v13293_v9, %v12194_v40  ;;  %v13336_v61 = vld [vmem:[#allocation24] sm:$0xff]  ;;  %v13323_v24 = vld [vmem:[#allocation18 + $0x898] sm:$0xf0] }
 0x495   : > { %v12314_v31 = vld [vmem:[#allocation18 + $0x890] sm:$0xf] }
 0x496   : > { %7989 = vmatpush.bf16.msra.mxu1 %v12287_v15  ;;  %7924 = vmatpush.bf16.msrb.mxu0 %v12091_v49  ;;  %v12224_v15 = vld [vmem:[#allocation18 + $0x7ec] sm:$0xf0]  ;;  %v12230_v49 = vld [vmem:[#allocation18 + $0x7e8] sm:$0xf] }
 0x497   : > { %7998 = vmatpush.bf16.msra.mxu2 %v12147_v56  ;;  %7963 = vmatpush.bf16.msrb.mxu3 %v12095_v42  ;;  %v12099_v56 = vor.u32 %v13269_v55, %v12098_v60  ;;  %v12227_v58 = vor.u32 %v13300_v53, %v12224_v15  ;;  %v12087_v42 = vor.u32 %v13266_v57, %v12086_v48  ;;  %v13288_v60 = vld [vmem:[#allocation18 + $0x784] sm:$0xf]  ;;  %v13335_v53 = vld [vmem:[#allocation18 + $0x8f8] sm:$0xf0]  ;;  %v13348_v15 = vld [vmem:[#allocation24 + $0x60] sm:$0xff] }
 0x49a   : > { %7990 = vmatpush.bf16.msra.mxu1 %v12275_v0  ;;  %7925 = vmatpush.bf16.msrb.mxu0 %v12079_v12  ;;  %v14843_v21 = vpop.f32.mrf.mxu1  ;;  %v13351_v0 = vld [vmem:[#allocation24 + $0x78] sm:$0xff]  ;;  %v6733_v3 = vpop.f32.mrf.mxu0  ;;  %v14845_v12 = vld [vmem:[#allocation20 + $0x3] sm:$0x7] }
 0x49b   : > { %7999 = vmatpush.bf16.msra.mxu2 %v12135_v22  ;;  %7964 = vmatpush.bf16.msrb.mxu3 %v12083_v62  ;;  %v6761_v5 = vpop.f32.mrf.mxu2  ;;  %v12218_v22 = vld [vmem:[#allocation18 + $0x7d0] sm:$0xf]  ;;  %v13350_v62 = vld [vmem:[#allocation24 + $0x70] sm:$0xff]  ;;  %v6308_v25 = vperm.slane %v14845_v12, 0  ;;  %v6310_v40 = vperm.slane %v14845_v12, 2 }
 0x49c   : > { %v12219_v38 = vor.u32 %v13299_v2, %v12218_v22  ;;  %v13346_v5 = vld [vmem:[#allocation24 + $0x50] sm:$0xff]  ;;  %v6309_v22 = vperm.slane %v14845_v12, 1 }
 0x49d   : > { %7991 = vmatmul.bf16.vlgmr.msra.gmra.mxu1 %v14826_v17  ;;  %7926 = vmatmul.bf16.vlgmr.msrb.gmra.mxu0 %v14836_v52 }
 0x49e   : > { %8237 = vmatpush.bf16.msrb.mxu1 %v13343_v34  ;;  %7970 = vmatpush.bf16.msra.mxu0 %v12263_v50  ;;  %v12231_v34 = vor.u32 %v13302_v59, %v12230_v49  ;;  %v13338_v50 = vld [vmem:[#allocation24 + $0x10] sm:$0xff]  ;;  %v12350_v49 = vld [vmem:[#allocation18 + $0x8d8] sm:$0xf] }
 0x49f   : > { %8000 = vmatpush.bf16.msra.mxu2 %v12123_v13  ;;  %8009 = vmatpush.bf16.msra.mxu3 %v12267_v16  ;;  %v12203_v13 = vor.u32 %v13294_v28, %v12200_v1  ;;  %v13291_v16 = vld [vmem:[#allocation18 + $0x79c] sm:$0xf]  ;;  %v13332_v59 = vld [vmem:[#allocation18 + $0x8e0] sm:$0xf0] }
 0x4a0   : > { %7965 = vmatmul.bf16.vlgmr.msrb.gmra.mxu3 %v14836_v52  ;;  %v13345_v28 = vld [vmem:[#allocation24 + $0x48] sm:$0xff] }
 0x4a1   : > { %v13357_v1 = vld [vmem:[#allocation24 + $0xa8] sm:$0xff] }
 0x4a2   : > { %8238 = vmatpush.bf16.msrb.mxu1 %v13342_v43  ;;  %7971 = vmatpush.bf16.msra.mxu0 %v12251_v7  ;;  %v12188_v43 = vld [vmem:[#allocation18 + $0x7a4] sm:$0xf0]  ;;  %v6800_v14 = vpop.f32.mrf.mxu1  ;;  %v13349_v7 = vld [vmem:[#allocation24 + $0x68] sm:$0xff] }
 0x4a3   : > { %8001 = vmatpush.bf16.msra.mxu2 %v12111_v63  ;;  %8010 = vmatpush.bf16.msra.mxu3 %v12255_v37  ;;  %v14849_v27 = vpop.f32.mrf.mxu3  ;;  %v6708_v63 = vadd.f32 %v14816_v8, %v6308_v25  ;;  %v6735_v37 = vpop.f32.mrf.mxu0 }
 0x4a4   : > { %v13317_v37 = vld [vmem:[#allocation18 + $0x868] sm:$0xf0] }
 0x4a5   : > { %v6721_v55 = vadd.f32 %v14832_v44, %v6708_v63  ;;  %v13347_v44 = vld [vmem:[#allocation24 + $0x58] sm:$0xff]  ;;  %v12290_v63 = vld [vmem:[#allocation18 + $0x860] sm:$0xf] }
 0x4a6   : > { %8239 = vmatpush.bf16.msrb.mxu1 %v13341_v26  ;;  %7972 = vmatpush.bf16.msra.mxu0 %v12239_v33  ;;  %v12191_v26 = vor.u32 %v13291_v16, %v12188_v43  ;;  %v12362_v33 = vld [vmem:[#allocation18 + $0x8f0] sm:$0xf] }
 0x4a7   : > { %8002 = vmatpush.bf16.msra.mxu2 %v12099_v56  ;;  %8011 = vmatpush.bf16.msra.mxu3 %v12243_v10  ;;  %v12182_v56 = vld [vmem:[#allocation18 + $0x788] sm:$0xf]  ;;  %v13290_v10 = vld [vmem:[#allocation18 + $0x790] sm:$0xf0]  ;;  %v12363_v48 = vor.u32 %v13335_v53, %v12362_v33 }
 0x4a8   : > { %v12183_v57 = vor.u32 %v13290_v10, %v12182_v56  ;;  %v13314_v33 = vld [vmem:[#allocation18 + $0x850] sm:$0xf0] }
 0x4a9   : > { %v13353_v53 = vld [vmem:[#allocation24 + $0x88] sm:$0xff] }
 0x4aa   : > { %8240 = vmatpush.bf16.msrb.mxu1 %v13340_v29  ;;  %7973 = vmatpush.bf16.msra.mxu0 %v12227_v58  ;;  %v6734_v29 = vadd.f32 %v6733_v3, %v6721_v55  ;;  %v12326_v3 = vld [vmem:[#allocation18 + $0x8a8] sm:$0xf] }
 0x4ab   : > { %8003 = vmatpush.bf16.msra.mxu2 %v12087_v42  ;;  %8012 = vmatpush.bf16.msra.mxu3 %v12231_v34  ;;  %v6774_v58 = vpop.f32.mrf.mxu3  ;;  %v12351_v42 = vor.u32 %v13332_v59, %v12350_v49  ;;  %v12338_v34 = vld [vmem:[#allocation18 + $0x8c0] sm:$0xf] }
 0x4ac   : > { %v8083_v51 = vpack.c.bf16 %v6734_v29, %v14790_v23 }
 0x4ae   : > { %8241 = vmatpush.bf16.msrb.mxu1 %v13339_v36  ;;  %7974 = vmatpush.bf16.msra.mxu0 %v12215_v54  ;;  %v13329_v36 = vld [vmem:[#allocation18 + $0x8c8] sm:$0xf0]  ;;  %v13326_v54 = vld [vmem:[#allocation18 + $0x8b0] sm:$0xf0] }
 0x4af   : > { %8256 = vmatpush.bf16.msrb.mxu2 %v13351_v0  ;;  %8013 = vmatpush.bf16.msra.mxu3 %v12219_v38  ;;  %v13358_v0 = vld [vmem:[#allocation24 + $0xb0] sm:$0xff]  ;;  %v12339_v23 = vor.u32 %v13329_v36, %v12338_v34  ;;  %v6747_v38 = vadd.f32 %v14823_v18, %v6309_v22  ;;  %v13355_v18 = vld [vmem:[#allocation24 + $0x98] sm:$0xff] }
 0x4b0   : > { %8004 = vmatmul.bf16.vlgmr.msra.gmra.mxu2 %v14836_v52  ;;  %v12176_v52 = vld [vmem:[#allocation18 + $0x78c] sm:$0xf0] }
 0x4b1   : > { %v12179_v8 = vor.u32 %v13288_v60, %v12176_v52 }
 0x4b2   : > { %8242 = vmatpush.bf16.msrb.mxu1 %v13338_v50  ;;  %7975 = vmatpush.bf16.msra.mxu0 %v12203_v13  ;;  %v12327_v50 = vor.u32 %v13326_v54, %v12326_v3  ;;  %v13356_v13 = vld [vmem:[#allocation24 + $0xa0] sm:$0xff] }
 0x4b3   : > { %8257 = vmatpush.bf16.msrb.mxu2 %v13350_v62  ;;  %8014 = vmatpush.bf16.msra.mxu3 %v12207_v19  ;;  %v6811_v2 = vpop.f32.mrf.mxu2  ;;  %v6760_v62 = vadd.f32 %v14839_v35, %v6747_v38  ;;  %v12315_v19 = vor.u32 %v13323_v24, %v12314_v31 }
 0x4b5   : > { %v6773_v16 = vadd.f32 %v14849_v27, %v6760_v62  ;;  %v13354_v27 = vld [vmem:[#allocation24 + $0x90] sm:$0xff] }
 0x4b6   : > { %8243 = vmatpush.bf16.msrb.mxu1 %v13337_v6  ;;  %7976 = vmatpush.bf16.msra.mxu0 %v12191_v26  ;;  %v12302_v6 = vld [vmem:[#allocation18 + $0x878] sm:$0xf] }
 0x4b7   : > { %8258 = vmatpush.bf16.msrb.mxu2 %v13349_v7  ;;  %8015 = vmatpush.bf16.msra.mxu3 %v12195_v39  ;;  %v13320_v7 = vld [vmem:[#allocation18 + $0x880] sm:$0xf0]  ;;  %v8084_v35 = vpack.c.bf16 %v6773_v16, %v14807_v47  ;;  %v12291_v39 = vor.u32 %v13317_v37, %v12290_v63 }
 0x4b8   : > { %v12303_v9 = vor.u32 %v13320_v7, %v12302_v6 }
 0x4ba   : > { %8244 = vmatpush.bf16.msrb.mxu1 %v13336_v61  ;;  %7977 = vmatpush.bf16.msra.mxu0 %v12179_v8  ;;  %v7343_v25 = vpop.f32.mrf.mxu1  ;;  %v6785_v14 = vpop.f32.mrf.mxu0  ;;  %v12278_v61 = vld [vmem:[#allocation18 + $0x848] sm:$0xf] }
 0x4bb   : > { %8259 = vmatpush.bf16.msrb.mxu2 %v13348_v15  ;;  %8016 = vmatpush.bf16.msra.mxu3 %v12183_v57  ;;  %v6813_v43 = vpop.f32.mrf.mxu2  ;;  %v6786_v60 = vadd.f32 %v6785_v14, %v6310_v40  ;;  %v12279_v12 = vor.u32 %v13314_v33, %v12278_v61  ;;  %v13352_v15 = vld [vmem:[#allocation24 + $0x80] sm:$0xff] }
 0x4bd   : > { %8245 = vmatmul.bf16.vlgmr.msrb.gmra.mxu1 %v8083_v51  ;;  %7978 = vmatmul.bf16.vlgmr.msra.gmra.mxu0 %v14813_v45  ;;  %v6799_v47 = vadd.f32 %v14843_v21, %v6786_v60 }
 0x4be   : > { %8022 = vmatpush.bf16.msrb.mxu0 %v12363_v48  ;;  %8017 = vmatmul.bf16.vlgmr.msra.gmra.mxu3 %v14813_v45  ;;  %v13344_v45 = vld [vmem:[#allocation24 + $0x40] sm:$0xff]  ;;  %v6916_v48 = vld [vmem:[#allocation20 + $0x6] sm:$0x7] }
 0x4bf   : > { %8260 = vmatpush.bf16.msrb.mxu2 %v13347_v44  ;;  %8275 = vmatpush.bf16.msrb.mxu3 %v13359_v41  ;;  %v6812_v56 = vadd.f32 %v6811_v2, %v6799_v47  ;;  %v6918_v57 = vperm.slane %v6916_v48, 0  ;;  %v6919_v41 = vperm.slane %v6916_v48, 1  ;;  %v6920_v22 = vperm.slane %v6916_v48, 2 }
 0x4c1   : > { %v8085_v29 = vpack.c.bf16 %v6812_v56, %v14829_v11 }
 0x4c2   : > { %8023 = vmatpush.bf16.msrb.mxu0 %v12351_v42  ;;  %v7345_v26 = vpop.f32.mrf.mxu1  ;;  %v6787_v55 = vpop.f32.mrf.mxu0 }
 0x4c3   : > { %8261 = vmatpush.bf16.msrb.mxu2 %v13346_v5  ;;  %8276 = vmatpush.bf16.msrb.mxu3 %v13358_v0  ;;  %v7317_v52 = vpop.f32.mrf.mxu3 }
 0x4c4   : > { %v7318_v59 = vadd.f32 %v7317_v52, %v6918_v57 }
 0x4c6   : > { %8024 = vmatpush.bf16.msrb.mxu0 %v12339_v23 }
 0x4c7   : > { %8262 = vmatpush.bf16.msrb.mxu2 %v13345_v28  ;;  %8277 = vmatpush.bf16.msrb.mxu3 %v13357_v1 }
 0x4ca   : > { %8025 = vmatpush.bf16.msrb.mxu0 %v12327_v50 }
 0x4cb   : > { %8263 = vmatpush.bf16.msrb.mxu2 %v13344_v45  ;;  %8278 = vmatpush.bf16.msrb.mxu3 %v13356_v13  ;;  %v7319_v10 = vpop.f32.mrf.mxu3 }
 0x4ce   : > { %8026 = vmatpush.bf16.msrb.mxu0 %v12315_v19  ;;  %8264 = vmatmul.bf16.vlgmr.msrb.gmra.mxu2 %v8084_v35 }
 0x4cf   : > { %8279 = vmatpush.bf16.msrb.mxu3 %v13355_v18 }
 0x4d2   : > { %8027 = vmatpush.bf16.msrb.mxu0 %v12303_v9 }
 0x4d3   : > { %8280 = vmatpush.bf16.msrb.mxu3 %v13354_v27  ;;  %v7356_v8 = vpop.f32.mrf.mxu2 }
 0x4d4   : > { %v7357_v42 = vadd.f32 %v7356_v8, %v6919_v41  ;;  %v13569_v8 = vld [vmem:[#allocation26] ss:$0 sm:$0xff] }
 0x4d6   : > { %8028 = vmatpush.bf16.msrb.mxu0 %v12291_v39 }
 0x4d7   : > { %8281 = vmatpush.bf16.msrb.mxu3 %v13353_v53 }
 0x4da   : > { %8029 = vmatpush.bf16.msrb.mxu0 %v12279_v12  ;;  %v7395_v49 = vpop.f32.mrf.mxu1  ;;  %v7330_v21 = vpop.f32.mrf.mxu0 }
 0x4db   : > { %8282 = vmatpush.bf16.msrb.mxu3 %v13352_v15  ;;  %v7358_v58 = vpop.f32.mrf.mxu2  ;;  %v7331_v44 = vadd.f32 %v7330_v21, %v7318_v59  ;;  %v7396_v2 = vadd.f32 %v7395_v49, %v6920_v22 }
 0x4dd   : > { %8030 = vmatmul.bf16.vlgmr.msrb.gmra.mxu0 %v14826_v17  ;;  %v7344_v51 = vadd.f32 %v7343_v25, %v7331_v44  ;;  %v7526_v25 = vld [vmem:[#allocation20 + $0x9] sm:$0x7] }
 0x4de   : > { %8283 = vmatmul.bf16.vlgmr.msrb.gmra.mxu3 %v8085_v29  ;;  %v7528_v45 = vperm.slane %v7526_v25, 0  ;;  %v7529_v37 = vperm.slane %v7526_v25, 1  ;;  %v7530_v12 = vperm.slane %v7526_v25, 2 }
 0x4e2   : > { %v7397_v34 = vpop.f32.mrf.mxu1  ;;  %v7332_v0 = vpop.f32.mrf.mxu0 }
 0x4e3   : > { %v7369_v36 = vpop.f32.mrf.mxu3 }
 0x4e4   : > { %v7370_v5 = vadd.f32 %v7369_v36, %v7357_v42 }
 0x4eb   : > { %v7371_v11 = vpop.f32.mrf.mxu3 }
 0x4f3   : > { %v7408_v17 = vpop.f32.mrf.mxu2 }
 0x4f4   : > { %v7409_v23 = vadd.f32 %v7408_v17, %v7396_v2 }
 0x4fa   : > { %v7940_v3 = vpop.f32.mrf.mxu1  ;;  %v7382_v28 = vpop.f32.mrf.mxu0 }
 0x4fb   : > { %v7410_v54 = vpop.f32.mrf.mxu2  ;;  %v7383_v55 = vadd.f32 %v7382_v28, %v7370_v5 }
 0x502   : > { %v7942_v1 = vpop.f32.mrf.mxu1  ;;  %v7384_v62 = vpop.f32.mrf.mxu0 }
 0x503   : > { %v7421_v38 = vpop.f32.mrf.mxu3 }
 0x504   : > { %v7422_v50 = vadd.f32 %v7421_v38, %v7409_v23 }
 0x50b   : > { %v7423_v31 = vpop.f32.mrf.mxu3 }
 0x513   : > { %v7953_v24 = vpop.f32.mrf.mxu2 }
 0x51a   : > { %v7992_v13 = vpop.f32.mrf.mxu1  ;;  %v7927_v43 = vpop.f32.mrf.mxu0 }
 0x51b   : > { %v7955_v16 = vpop.f32.mrf.mxu2  ;;  %v7928_v14 = vadd.f32 %v7927_v43, %v7528_v45 }
 0x51d   : > { %v7941_v19 = vadd.f32 %v7940_v3, %v7928_v14 }
 0x51f   : > { %v7954_v6 = vadd.f32 %v7953_v24, %v7941_v19 }
 0x521   : > { %v8086_v35 = vpack.c.bf16 %v7954_v6, %v7344_v51 }
 0x522   : > { %v7994_v7 = vpop.f32.mrf.mxu1  ;;  %v7929_v40 = vpop.f32.mrf.mxu0 }
 0x523   : > { %v7966_v18 = vpop.f32.mrf.mxu3  ;;  %8250 = vmatmul.bf16.gmra.mxu1 %v8086_v35 }
 0x524   : > { %v7967_v26 = vadd.f32 %v7966_v18, %v7529_v37 }
 0x52b   : > { %v7968_v9 = vpop.f32.mrf.mxu3 }
 0x533   : > { %v8005_v63 = vpop.f32.mrf.mxu2 }
 0x534   : > { %v8006_v15 = vadd.f32 %v8005_v63, %v7530_v12 }
 0x53a   : > { %v7979_v60 = vpop.f32.mrf.mxu0  ;;  %v8246_v10 = vpop.f32.mrf.mxu1 }
 0x53b   : > { %v8007_v27 = vpop.f32.mrf.mxu2  ;;  %v7980_v52 = vadd.f32 %v7979_v60, %v7967_v26  ;;  %v8247_v59 = vadd.f32 %v13569_v8, %v8246_v10 }
 0x53d   : > { %v7993_v39 = vadd.f32 %v7992_v13, %v7980_v52 }
 0x53f   : > { %v8087_v61 = vpack.c.bf16 %v7993_v39, %v7383_v55 }
 0x541   : > { %v8018_v33 = vpop.f32.mrf.mxu3  ;;  %8269 = vmatmul.bf16.gmra.mxu2 %v8087_v61 }
 0x542   : > { %v7981_v53 = vpop.f32.mrf.mxu0  ;;  %v8019_v56 = vadd.f32 %v8018_v33, %v8006_v15  ;;  %v8248_v51 = vpop.f32.mrf.mxu1 }
 0x543   : > { %v8249_v34 = vadd.f32 %v13569_v8, %v8248_v51 }
 0x549   : > { %v8020_v47 = vpop.f32.mrf.mxu3 }
 0x551   : > { %v8265_v57 = vpop.f32.mrf.mxu2 }
 0x552   : > { %v8266_v58 = vadd.f32 %v8265_v57, %v8247_v59 }
 0x559   : > { %v8267_v42 = vpop.f32.mrf.mxu2 }
 0x55a   : > { %v8031_v29 = vpop.f32.mrf.mxu0  ;;  %v8268_v36 = vadd.f32 %v8267_v42, %v8249_v34 }
 0x55b   : > { %v8032_v48 = vadd.f32 %v8031_v29, %v8019_v56 }
 0x55d   : > { %v8088_v49 = vpack.c.bf16 %v8032_v48, %v7422_v50 }
 0x55f   : > { %8288 = vmatmul.bf16.gmra.mxu3 %v8088_v49 }
 0x561   : > { %v8284_v21 = vpop.f32.mrf.mxu3 }
 0x562   : > { %v8033_v44 = vpop.f32.mrf.mxu0  ;;  %v8285_v41 = vadd.f32 %v8284_v21, %v8266_v58 }
 0x564   : > { %8302 = vmax.xlane.f32.xlu1 %v8285_v41  ;;  %8294 = vmin.xlane.f32.xlu0 %v8285_v41 }
 0x569   : > { %v8286_v5 = vpop.f32.mrf.mxu3 }
 0x56a   : > { %v8287_v0 = vadd.f32 %v8286_v5, %v8268_v36 }
 0x56c   : > { %8304 = vmax.xlane.f32.xlu1 %v8287_v0  ;;  %8296 = vmin.xlane.f32.xlu0 %v8287_v0 }
 0x5a0   : > { %v8251_v22 = vpop.f32.mrf.mxu1 }
 0x5a1   : > { %v8252_v2 = vadd.f32 %v13569_v8, %v8251_v22 }
 0x5a8   : > { %v8253_v54 = vpop.f32.mrf.mxu1 }
 0x5a9   : > { %v8254_v1 = vadd.f32 %v13569_v8, %v8253_v54 }
 0x5c4   : > { %v8270_v11 = vpop.f32.mrf.mxu2 }
 0x5c5   : > { %v8271_v17 = vadd.f32 %v8270_v11, %v8252_v2 }
 0x5cc   : > { %v8272_v28 = vpop.f32.mrf.mxu2 }
 0x5cd   : > { %v8273_v38 = vadd.f32 %v8272_v28, %v8254_v1 }
 0x5d7   : > { %v8303_v31 = vpop.xlane.xlu1 %8302  ;;  %v8295_v24 = vpop.xlane.xlu0 %8294 }
 0x5d8   : > { %v8310_v43 = vsub.f32 %v8303_v31, %v8295_v24  ;;  %v8318_v26 = vsub.f32 %v8285_v41, %v8295_v24 }
 0x5df   : > { %v8305_v45 = vpop.xlane.xlu1 %8304  ;;  %v8297_v13 = vpop.xlane.xlu0 %8296 }
 0x5e0   : > { %v8311_v16 = vsub.f32 %v8305_v45, %v8297_v13  ;;  %v8319_v40 = vsub.f32 %v8287_v0, %v8297_v13 }
 0x5e2   : > { %v8289_v23 = vpop.f32.mrf.mxu3  ;;  %13570 = vrcp.f32 %v8311_v16 }
 0x5e3   : > { %v8290_v3 = vadd.f32 %v8289_v23, %v8271_v17  ;;  %13572 = vrcp.f32 %v8310_v43 }
 0x5e5   : > { %8298 = vmin.xlane.f32.xlu2 %v8290_v3 }
 0x5e8   : > { %v13571_v35 = vpop.eup %13570 }
 0x5e9   : > { %v13573_v9 = vpop.eup %13572  ;;  %v8323_v27 = vmul.f32 %v13571_v35, %v8319_v40 }
 0x5ea   : > { %v8291_v50 = vpop.f32.mrf.mxu3  ;;  %v8322_v39 = vmul.f32 %v13573_v9, %v8318_v26 }
 0x5eb   : > { %v8292_v62 = vadd.f32 %v8291_v50, %v8273_v38 }
 0x5ec   : > { %v8326_v33 = vadd.f32 %v8323_v27, %v8322_v39 }
 0x5ed   : > { %8306 = vmax.xlane.f32.xlu2 %v8290_v3  ;;  %8308 = vmax.xlane.f32.xlu1 %v8292_v62 }
 0x5ee   : > { %8300 = vmin.xlane.f32.xlu0 %v8292_v62 }
 0x5f5   : > { %3265 = vmin.xlane.f32.xlu2 %v14616_v32 }
 0x5f6   : > { %3267 = vmax.xlane.f32.xlu0 %v14616_v32 }
 0x658   : > { %v8299_v25 = vpop.xlane.xlu2 %8298 }
 0x659   : > { %v8320_v60 = vsub.f32 %v8290_v3, %v8299_v25 }
 0x660   : > { %v8307_v14 = vpop.xlane.xlu2 %8306  ;;  %v8309_v6 = vpop.xlane.xlu1 %8308 }
 0x661   : > { %v8312_v19 = vsub.f32 %v8307_v14, %v8299_v25  ;;  %v8301_v7 = vpop.xlane.xlu0 %8300 }
 0x662   : > { %v8313_v18 = vsub.f32 %v8309_v6, %v8301_v7  ;;  %v8321_v12 = vsub.f32 %v8292_v62, %v8301_v7 }
 0x663   : > { %13574 = vrcp.f32 %v8312_v19 }
 0x664   : > { %13576 = vrcp.f32 %v8313_v18 }
 0x668   : > { %v3266_v63 = vpop.xlane.xlu2 %3265 }
 0x669   : > { %v13575_v37 = vpop.eup %13574  ;;  %v3268_v52 = vpop.xlane.xlu0 %3267  ;;  %v3271_v56 = vsub.f32 %v14616_v32, %v3266_v63 }
 0x66a   : > { %v3269_v55 = vsub.f32 %v3268_v52, %v3266_v63  ;;  %v8324_v61 = vmul.f32 %v13575_v37, %v8320_v60  ;;  %v13577_v53 = vpop.eup %13576 }
 0x66b   : > { %v8325_v15 = vmul.f32 %v13577_v53, %v8321_v12 }
 0x66c   : > { %13578 = vrcp.f32 %v3269_v55  ;;  %v8327_v47 = vadd.f32 %v8326_v33, %v8324_v61 }
 0x66e   : > { %v8328_v29 = vadd.f32 %v8327_v47, %v8325_v15 }
 0x672   : > { %v13579_v10 = vpop.eup %13578 }
 0x673   : > { %v3272_v8 = vmul.f32 %v13579_v10, %v3271_v56 }
 0x675   : > { %v8329_v48 = vadd.f32 %v8328_v29, %v3272_v8 }
 0x677   : > { %8332 = vmax.xlane.f32.xlu2 %v8329_v48  ;;  %8330 = vmin.xlane.f32.xlu1 %v8329_v48 }
 0x6ea   : > { %v8333_v57 = vpop.xlane.xlu2 %8332  ;;  %v8331_v49 = vpop.xlane.xlu1 %8330 }
 0x6eb   : > { %v8334_v59 = vsub.f32 %v8333_v57, %v8331_v49  ;;  %v8336_v58 = vsub.f32 %v8329_v48, %v8331_v49 }
 0x6ed   : > { %13580 = vrcp.f32 %v8334_v59 }
 0x6f3   : > { %v13581_v21 = vpop.eup %13580 }
 0x6f4   : > { %v8337_v44 = vmul.f32 %v13581_v21, %v8336_v58 }
 0x6f6   : > { %v8340_v41 = vmul.f32 %v8337_v44, %v14457_v20  ;;  %v8341_v51 = vmul.f32 %v8337_v44, %v14464_v30  ;;  %v8343_v42 = vsub.f32 1.0, %v8337_v44  ;;  %8338 = vst [vmem:[%s14871_s26] sm:$0xff] %v8337_v44  ;;  %v8339_v32 = vmul.f32 %v8337_v44, %v14471_v46 }
 0x6f7   : > { %v8342_v11 = vmul.f32 %v8337_v44, %v14479_v4 }
 0x6f8   : > { %v8412_v34 = vsub.f32 %v8340_v41, %v8341_v51  ;;  %v8345_v36 = vmul.f32 %v8343_v42, %v14457_v20  ;;  %v8346_v5 = vmul.f32 %v8343_v42, %v14464_v30  ;;  %v8344_v0 = vmul.f32 %v8343_v42, %v14471_v46 }
 0x6f9   : > { %v8347_v22 = vmul.f32 %v8343_v42, %v14479_v4  ;;  %v8430_v1 = vsub.f32 %v8340_v41, %v8339_v32  ;;  %v8448_v50 = vsub.f32 %v8340_v41, %v8342_v11  ;;  %v8466_v13 = vsub.f32 %v8339_v32, %v8342_v11 }
 0x6fa   : > { %v8413_v2 = vadd.f32 1e-06, %v8412_v34  ;;  %v8366_v17 = vsub.f32 %v8346_v5, %v8345_v36  ;;  %v8348_v23 = vsub.f32 %v8344_v0, %v8345_v36 }
 0x6fb   : > { %v8384_v3 = vsub.f32 %v8344_v0, %v8347_v22  ;;  %v8431_v46 = vadd.f32 1e-06, %v8430_v1  ;;  %v8449_v45 = vadd.f32 1e-06, %v8448_v50  ;;  %v8467_v19 = vadd.f32 1e-06, %v8466_v13 }
 0x6fc   : > { %v8414_v54 = vand.u32 2147483647, %v8413_v2  ;;  %v8367_v28 = vadd.f32 1e-06, %v8366_v17  ;;  %v8349_v20 = vadd.f32 1e-06, %v8348_v23 }
 0x6fd   : > { %v8385_v38 = vadd.f32 1e-06, %v8384_v3  ;;  %v8432_v16 = vand.u32 2147483647, %v8431_v46  ;;  %v8450_v43 = vand.u32 2147483647, %v8449_v45 }
 0x6fe   : > { %v8415_v62 = vmul.f32 %v8414_v54, %v8414_v54  ;;  %v8368_v31 = vand.u32 2147483647, %v8367_v28  ;;  %v8350_v4 = vand.u32 2147483647, %v8349_v20  ;;  %v8468_v18 = vand.u32 2147483647, %v8467_v19 }
 0x6ff   : > { %v8386_v24 = vand.u32 2147483647, %v8385_v38  ;;  %v8433_v6 = vmul.f32 %v8432_v16, %v8432_v16  ;;  %v8451_v7 = vmul.f32 %v8450_v43, %v8450_v43 }
 0x700   : > { %8416 = vadd.xlane.f32.xlu0 %v8415_v62  ;;  %v8369_v30 = vmul.f32 %v8368_v31, %v8368_v31  ;;  %v8351_v14 = vmul.f32 %v8350_v4, %v8350_v4  ;;  %v8469_v35 = vmul.f32 %v8468_v18, %v8468_v18 }
 0x701   : > { %v8387_v25 = vmul.f32 %v8386_v24, %v8386_v24 }
 0x702   : > { %8370 = vadd.xlane.f32.xlu1 %v8369_v30 }
 0x703   : > { %8388 = vadd.xlane.f32.xlu2 %v8387_v25 }
 0x708   : > { %8352 = vadd.xlane.f32.xlu0 %v8351_v14 }
 0x70a   : > { %8434 = vadd.xlane.f32.xlu1 %v8433_v6 }
 0x70b   : > { %8452 = vadd.xlane.f32.xlu2 %v8451_v7 }
 0x710   : > { %8470 = vadd.xlane.f32.xlu0 %v8469_v35 }
 0x773   : > { %v14880_v40 = vpop.xlane.xlu0 %8416 }
 0x774   : > { %13582 = vrsqrt.f32 %v14880_v40  ;;  %v8428_v58 = vand.u32 2147483648, %v14880_v40  ;;  %vm8425_vm1 = vcmp.eq.f32.partialorder %v14880_v40, inf  ;;  %vm8427_vm5 = vcmp.eq.f32.partialorder %v14880_v40, 0.0 }
 0x775   : > { %v14883_v9 = vpop.xlane.xlu1 %8370 }
 0x776   : > { %13584 = vrsqrt.f32 %v14883_v9  ;;  %v14886_v63 = vpop.xlane.xlu2 %8388  ;;  %vm8379_vm0 = vcmp.eq.f32.partialorder %v14883_v9, inf  ;;  %vm8381_vm2 = vcmp.eq.f32.partialorder %v14883_v9, 0.0  ;;  %v8382_v34 = vand.u32 2147483648, %v14883_v9 }
 0x777   : > { %13586 = vrsqrt.f32 %v14886_v63  ;;  %vm8397_vm3 = vcmp.eq.f32.partialorder %v14886_v63, inf  ;;  %vm8399_vm4 = vcmp.eq.f32.partialorder %v14886_v63, 0.0  ;;  %v8400_v17 = vand.u32 2147483648, %v14886_v63 }
 0x77a   : > { %v13583_v37 = vpop.eup %13582 }
 0x77b   : > { %v8419_v26 = vmul.f32 %v13583_v37, %v14880_v40  ;;  %v14890_v27 = vpop.xlane.xlu0 %8352 }
 0x77c   : > { %v13585_v60 = vpop.eup %13584  ;;  %13588 = vrsqrt.f32 %v14890_v27  ;;  %vm8361_vm6 = vcmp.eq.f32.partialorder %v14890_v27, inf  ;;  %vm8363_vm7 = vcmp.eq.f32.partialorder %v14890_v27, 0.0  ;;  %v8364_v38 = vand.u32 2147483648, %v14890_v27 }
 0x77d   : > { %v13587_v52 = vpop.eup %13586  ;;  %v8373_v55 = vmul.f32 %v13585_v60, %v14883_v9  ;;  %v14894_v39 = vpop.xlane.xlu1 %8434  ;;  %v8420_v61 = vmul.f32 %v13583_v37, %v8419_v26 }
 0x77e   : > { %v8391_v33 = vmul.f32 %v13587_v52, %v14886_v63  ;;  %v14897_v53 = vpop.xlane.xlu2 %8452  ;;  %13590 = vrsqrt.f32 %v14894_v39  ;;  %vm8443_vm8 = vcmp.eq.f32.partialorder %v14894_v39, inf  ;;  %vm8445_vm9 = vcmp.eq.f32.partialorder %v14894_v39, 0.0 }
 0x77f   : > { %v8374_v47 = vmul.f32 %v13585_v60, %v8373_v55  ;;  %13592 = vrsqrt.f32 %v14897_v53  ;;  %v8421_v12 = vmul.f32 0.5, %v8420_v61  ;;  %vm8461_vm10 = vcmp.eq.f32.partialorder %v14897_v53, inf }
 0x780   : > { %v8392_v15 = vmul.f32 %v13587_v52, %v8391_v33  ;;  %vm8463_vm11 = vcmp.eq.f32.partialorder %v14897_v53, 0.0  ;;  %v8464_v35 = vand.u32 2147483648, %v14897_v53 }
 0x781   : > { %v8375_v56 = vmul.f32 0.5, %v8374_v47  ;;  %v8422_v29 = vsub.f32 1.5, %v8421_v12 }
 0x782   : > { %v13589_v10 = vpop.eup %13588  ;;  %v8393_v8 = vmul.f32 0.5, %v8392_v15 }
 0x783   : > { %v8355_v48 = vmul.f32 %v13589_v10, %v14890_v27  ;;  %v14902_v57 = vpop.xlane.xlu0 %8470  ;;  %v8376_v49 = vsub.f32 1.5, %v8375_v56  ;;  %v8423_v32 = vmul.f32 %v13583_v37, %v8422_v29  ;;  %v8446_v37 = vand.u32 2147483648, %v14894_v39 }
 0x784   : > { %v13591_v59 = vpop.eup %13590  ;;  %13594 = vrsqrt.f32 %v14902_v57  ;;  %v8394_v36 = vsub.f32 1.5, %v8393_v8  ;;  %vm8479_vm13 = vcmp.eq.f32.partialorder %v14902_v57, inf  ;;  %vm8481_vm14 = vcmp.eq.f32.partialorder %v14902_v57, 0.0 }
 0x785   : > { %v13593_v21 = vpop.eup %13592  ;;  %v8356_v44 = vmul.f32 %v13589_v10, %v8355_v48  ;;  %v8437_v41 = vmul.f32 %v13591_v59, %v14894_v39  ;;  %v8377_v51 = vmul.f32 %v13585_v60, %v8376_v49  ;;  %v8424_v28 = vmul.f32 %v8423_v32, %v14880_v40 }
 0x786   : > { %v8455_v42 = vmul.f32 %v13593_v21, %v14897_v53  ;;  %v8395_v2 = vmul.f32 %v13587_v52, %v8394_v36 }
 0x787   : > { %v8357_v5 = vmul.f32 0.5, %v8356_v44  ;;  %v8438_v0 = vmul.f32 %v13591_v59, %v8437_v41  ;;  %v8378_v22 = vmul.f32 %v8377_v51, %v14883_v9  ;;  %v8426_v13 = vsel %vm8425_vm1, %v14880_v40, %v8424_v28 }
 0x788   : > { %v8456_v11 = vmul.f32 %v13593_v21, %v8455_v42  ;;  %v8396_v50 = vmul.f32 %v8395_v2, %v14886_v63  ;;  %v8429_v55 = vsel %vm8427_vm5, %v8428_v58, %v8426_v13 }
 0x789   : > { %v8358_v23 = vsub.f32 1.5, %v8357_v5  ;;  %v8439_v3 = vmul.f32 0.5, %v8438_v0  ;;  %v8380_v24 = vsel %vm8379_vm0, %v14883_v9, %v8378_v22 }
 0x78a   : > { %v13595_v54 = vpop.eup %13594  ;;  %v8457_v1 = vmul.f32 0.5, %v8456_v11  ;;  %v8398_v46 = vsel %vm8397_vm3, %v14886_v63, %v8396_v50  ;;  %v8383_v43 = vsel %vm8381_vm2, %v8382_v34, %v8380_v24 }
 0x78b   : > { %v8473_v62 = vmul.f32 %v13595_v54, %v14902_v57  ;;  %v8440_v31 = vsub.f32 1.5, %v8439_v3  ;;  %v8359_v20 = vmul.f32 %v13589_v10, %v8358_v23  ;;  %v8401_v7 = vsel %vm8399_vm4, %v8400_v17, %v8398_v46 }
 0x78c   : > { %v8458_v30 = vsub.f32 1.5, %v8457_v1 }
 0x78d   : > { %v8441_v25 = vmul.f32 %v13591_v59, %v8440_v31  ;;  %v8474_v45 = vmul.f32 %v13595_v54, %v8473_v62  ;;  %v8360_v4 = vmul.f32 %v8359_v20, %v14890_v27 }
 0x78e   : > { %v8459_v16 = vmul.f32 %v13593_v21, %v8458_v30  ;;  %v8484_v21 = vadd.f32 1.0, %v8429_v55 }
 0x78f   : > { %v8442_v14 = vmul.f32 %v8441_v25, %v14894_v39  ;;  %v8475_v19 = vmul.f32 0.5, %v8474_v45  ;;  %v8362_v6 = vsel %vm8361_vm6, %v14890_v27, %v8360_v4  ;;  %v8407_v27 = vsub.f32 %v8401_v7, %v8383_v43 }
 0x790   : > { %v8460_v18 = vmul.f32 %v8459_v16, %v14897_v53  ;;  %v8365_v9 = vsel %vm8363_vm7, %v8364_v38, %v8362_v6 }
 0x791   : > { %v8444_v26 = vsel %vm8443_vm8, %v14894_v39, %v8442_v14  ;;  %v8476_v60 = vsub.f32 1.5, %v8475_v19  ;;  %v8402_v63 = vsub.f32 %v8365_v9, %v8383_v43  ;;  %v8404_v52 = vsub.f32 %v8365_v9, %v8401_v7 }
 0x792   : > { %v8462_v61 = vsel %vm8461_vm10, %v14897_v53, %v8460_v18  ;;  %v8447_v33 = vsel %vm8445_vm9, %v8446_v37, %v8444_v26  ;;  %v8482_v39 = vand.u32 2147483648, %v14902_v57  ;;  %v8408_v59 = vand.u32 2147483647, %v8407_v27 }
 0x793   : > { %v8465_v47 = vsel %vm8463_vm11, %v8464_v35, %v8462_v61  ;;  %v8497_v12 = vsub.f32 %v8429_v55, %v8447_v33  ;;  %v8477_v15 = vmul.f32 %v13595_v54, %v8476_v60  ;;  %v8403_v56 = vand.u32 2147483647, %v8402_v63 }
 0x794   : > { %v8510_v10 = vsub.f32 %v8429_v55, %v8465_v47  ;;  %v8405_v29 = vand.u32 2147483647, %v8404_v52 }
 0x795   : > { %v8498_v40 = vadd.f32 1.0, %v8497_v12  ;;  %v8478_v8 = vmul.f32 %v8477_v15, %v14902_v57 }
 0x796   : > { %v8511_v48 = vadd.f32 1.0, %v8510_v10  ;;  %v8406_v49 = vadd.f32 %v8405_v29, %v8403_v56 }
 0x797   : > { %v8499_v53 = vmax.f32 %v8498_v40, 0.0  ;;  %v8480_v58 = vsel %vm8479_vm13, %v14902_v57, %v8478_v8 }
 0x798   : > { %v8512_v44 = vmax.f32 %v8511_v48, 0.0  ;;  %v8483_v41 = vsel %vm8481_vm14, %v8482_v39, %v8480_v58  ;;  %v8409_v51 = vadd.f32 %v8408_v59, %v8406_v49 }
 0x799   : > { %v8500_v42 = vsel %vm8410_vm12, %v8499_v53, 0.0  ;;  %v8485_v32 = vsub.f32 %v8484_v21, %v8483_v41 }
 0x79a   : > { %v8513_v34 = vsel %vm8410_vm12, %v8512_v44, 0.0  ;;  %8501 = vadd.xlane.f32.xlu2 %v8500_v42  ;;  %8411 = vst.msk [vmem:[%s875_s1] sm:$0xff] %vm8410_vm12, %v8409_v51  ;;  %v8523_v5 = vsel %vm8410_vm12, %v8409_v51, 0.0 }
 0x79b   : > { %8514 = vadd.xlane.f32.xlu0 %v8513_v34  ;;  %v8486_v57 = vmax.f32 %v8485_v32, 0.0 }
 0x79d   : > { %v8487_v36 = vsel %vm8410_vm12, %v8486_v57, 0.0 }
 0x79e   : > { %8488 = vadd.xlane.f32.xlu1 %v8487_v36 }
 0x7a6   : > { %8524 = vadd.xlane.f32.xlu1 %v8523_v5 }
 0x7a7   : > { %14073 = shalt.err (!%p14070_p11)
}
 0x7a8   : > { %13428 = dma.vmem_to_hbm [thread:$0]  (%p14305_p6), %s8570_s16, 128, %s8572_s19, %s8549_s17   ;;  %v8533_v18 = vlaneseq }
 0x7a9   : > { %s15088_s4 = sshll.u32 %s14952_s6, 3  ;;  %s15089_s27 = sld [smem:[#allocation53_spill]] }
 0x7aa   : > { %v8534_v35 = vand.u32 127, %v8533_v18 }
 0x7ac   : > { %vm8538_vm15 = vcmp.eq.s32.totalorder %v8534_v35, 3  ;;  %vm8537_vm0 = vcmp.eq.s32.totalorder %v8534_v35, 2  ;;  %vm8536_vm1 = vcmp.eq.s32.totalorder %v8534_v35, 1  ;;  %vm8535_vm2 = vcmp.eq.s32.totalorder %v8534_v35, 0 }
 0x7af   : > { %s879_s21 = scalar_lea.vmem %s15089_s27, %s15088_s4 }
 0x80d   : > { %v8502_v0 = vpop.xlane.xlu2 %8501 }
 0x80e   : > { %v8515_v22 = vpop.xlane.xlu0 %8514  ;;  %v8503_v11 = vrot.slane %v8502_v0, 4 }
 0x80f   : > { %v8516_v2 = vrot.slane %v8515_v22, 4 }
 0x810   : > { %v8504_v17 = vadd.f32 %v8503_v11, %v8502_v0 }
 0x811   : > { %v8517_v23 = vadd.f32 %v8516_v2, %v8515_v22  ;;  %v8489_v3 = vpop.xlane.xlu1 %8488 }
 0x812   : > { %v8505_v54 = vrot.slane %v8504_v17, 2  ;;  %v8490_v28 = vrot.slane %v8489_v3, 4 }
 0x813   : > { %v8518_v1 = vrot.slane %v8517_v23, 2 }
 0x814   : > { %v8491_v38 = vadd.f32 %v8490_v28, %v8489_v3  ;;  %v8506_v50 = vadd.f32 %v8505_v54, %v8504_v17 }
 0x815   : > { %v8519_v62 = vadd.f32 %v8518_v1, %v8517_v23 }
 0x816   : > { %v8492_v31 = vrot.slane %v8491_v38, 2  ;;  %v8507_v30 = vrot.slane %v8506_v50, 1 }
 0x817   : > { %v8520_v45 = vrot.slane %v8519_v62, 1 }
 0x818   : > { %v8493_v20 = vadd.f32 %v8492_v31, %v8491_v38  ;;  %v8508_v16 = vadd.f32 %v8507_v30, %v8506_v50 }
 0x819   : > { %v8525_v24 = vpop.xlane.xlu1 %8524  ;;  %v8521_v14 = vadd.f32 %v8520_v45, %v8519_v62 }
 0x81a   : > { %v8526_v46 = vrot.slane %v8525_v24, 4  ;;  %v8494_v25 = vrot.slane %v8493_v20, 1 }
 0x81c   : > { %v8527_v4 = vadd.f32 %v8526_v46, %v8525_v24  ;;  %v8495_v13 = vadd.f32 %v8494_v25, %v8493_v20 }
 0x81e   : > { %v8528_v43 = vrot.slane %v8527_v4, 2  ;;  %13360 = vpush %v8495_v13 }
 0x81f   : > { %13362 = vpush %v8508_v16 }
 0x820   : > { %v8529_v19 = vadd.f32 %v8528_v43, %v8527_v4  ;;  %13364 = vpush %v8521_v14 }
 0x822   : > { %v8530_v6 = vrot.slane %v8529_v19, 1 }
 0x824   : > { %v8531_v7 = vadd.f32 %v8530_v6, %v8529_v19 }
 0x826   : > { %13366 = vpush %v8531_v7 }
 0x84f   : > { %s13361_s3 = spop %13360 }
 0x850   : > { %s13363_s24 = spop %13362  ;;  %v8545_v52 = vstv %s13361_s3 }
 0x851   : > { %s13365_s26 = spop %13364  ;;  %v8543_v60 = vstv %s13363_s24 }
 0x852   : > { %v8541_v9 = vstv %s13365_s26 }
 0x857   : > { %s13367_s22 = spop %13366 }
 0x858   : > { %v8539_v37 = vstv %s13367_s22 }
 0x859   : > { %v8540_v26 = vsel %vm8538_vm15, %v8539_v37, 0.0 }
 0x85a   : > { %v8542_v63 = vsel %vm8537_vm0, %v8541_v9, %v8540_v26 }
 0x85b   : > { %v8544_v55 = vsel %vm8536_vm1, %v8543_v60, %v8542_v63 }
 0x85c   : > { %v8546_v61 = vsel %vm8535_vm2, %v8545_v52, %v8544_v55 }
 0x85d   : > { %8547 = vst [vmem:[%s879_s21] sm:$0xff] %v8546_v61 }
 0x85e PF: > { %s15090_s16 = sld [smem:[#allocation37_spill]]  ;;  %p13477_p6 = pnand %p8853_p1, %p14311_p10 }
 0x860   : > { %p13478_p12 = pneg %p13477_p6 }
 0x864   : > { %s8589_s17 = sand.u32 1, %s15090_s16  }
 0x865   : > { %s8590_s25 = scalar_lea.sflag [#allocation5], %s8589_s17 }
 0x866   : > { %14123 = dma.done.wait (%p13478_p12), %s8590_s25, 128  }
 0x867   : > { %14125 = vsyncadd (%p13478_p12), %s8590_s25, 4294967168  ;;  %s15092_s30 = sld [smem:[#allocation40_spill]]  ;;  %s15095_s28 = smov %s14136_s29 }
 0x868   : > { %s15093_s27 = sld [smem:[#allocation38_spill]] }
 0x869   : > { %s15094_s6 = sld [smem:[#allocation41_spill]] }
 0x86d   : > { %p37_p13 = scmp.ge.s32.totalorder %s15092_s30, 4  }
 0x86f   : > { %s15096_s29 = smov %s15094_s6  ;;  %39 = sbr.rel (!%p37_p13) target bundleno = 21 (0x15), region = 255 }
 0x874   :  { %8610 = vsyncpa [#allocation4], 1 }
 0x875   :  { %8612 = vsyncpa [#allocation4 + $0x1], 1 }
 0x876   :  { %8613 = vsyncpa [#allocation7], 1 }
 0x877   :  { %8614 = vsyncpa [#allocation10], 1 }
 0x878   :  { %8615 = vsyncpa [#allocation13], 1 }
 0x879   :  { %8616 = vsyncpa [#allocation16], 1 }
 0x87a   :  { %8617 = vsyncpa [#allocation19], 1 }
 0x87b   :  { %8618 = vsyncpa [#allocation22], 1 }
 0x87c   :  { %8619 = vsyncpa [#allocation25], 1 }
 0x87d   :  { %8620 = vsyncpa [#allocation5], 1 }
 0x87e   :  { %8622 = vsyncpa [#allocation5 + $0x1], 1 }

</bundles_post_ra>
